<compile_context>
chip_gen: v7x
topology: tpu7x:2x2x1
jax: 0.10.0
libtpu: 0.0.40
codegen_flags: <defaults>
</compile_context>

<pallas_src>
import jax
import jax.numpy as jnp
from jax import lax
from jax.experimental import pallas as pl
from jax.experimental.pallas import tpu as pltpu

NUM_BITS = 128       # stands in for NumBits = 512
N_HIDDEN = 128       # stands in for n_hidden = 612 / 1024 (multiple of 128)
N_LAYERS = 2         # stands in for n_layers = 4
BATCH    = 32        # raised from 8 (recurrence matmul M-dim = 16 per program)
SEQ      = 8
N_BATCH_BLOCKS = 2   # "parallel" grid axis -> both TensorCores on v7x

WEIGHT_DTYPE = jnp.bfloat16   # bf16 weights & matmul operands, f32 accum/gates


# --------------------------- fused CharRNN kernel ----------------------------
def _make_char_rnn_kernel(n_layers, seq_len, batch_blk, in_dim, hidden, out_dim):
    T, Bs, D, H, M = seq_len, batch_blk, in_dim, hidden, out_dim

    def kernel(*refs):
        n_in = 3 + 3 * n_layers + 2
        x_ref, h0_ref, c0_ref = refs[0:3]                      # x: (T, Bs, D)
        layer_refs = [refs[3 + 3 * l: 3 + 3 * (l + 1)] for l in range(n_layers)]
        fcw_ref, fcb_ref = refs[3 + 3 * n_layers], refs[4 + 3 * n_layers]
        out_ref, hN_ref, cN_ref = refs[n_in: n_in + 3]
        gin_a, gin_b, fcbuf = refs[n_in + 3:]                  # VMEM scratch
        gin_bufs = [gin_a, gin_b]

        # ---- layer-0 input projection: one batched matmul, MXU M = T*Bs ----
        wih0_ref, _, b0_ref = layer_refs[0]
        gin_bufs[0][...] = (
            jnp.dot(x_ref[...].reshape(T * Bs, D), wih0_ref[...],
                    preferred_element_type=jnp.float32)
            + b0_ref[...]).reshape(T, Bs, 4 * H)               # f32, bias folded

        for l in range(n_layers):
            _, whh_ref, _ = layer_refs[l]
            whh = whh_ref[...]                                  # (H, 4H) bf16
            gin_cur = gin_bufs[l % 2]
            last = l == n_layers - 1
            if not last:
                # Next layer's projection is interleaved into this layer's
                # step loop (fills MXU bubbles left by the gate EUP/VPU math).
                wih_nxt_ref, _, b_nxt_ref = layer_refs[l + 1]
                wih_nxt = wih_nxt_ref[...]                      # (H, 4H) bf16
                b_nxt = jnp.broadcast_to(b_nxt_ref[...], (Bs, 4 * H))  # hoisted
                gin_nxt = gin_bufs[(l + 1) % 2]
            else:
                fcw = fcw_ref[...]                              # (H, M) bf16
                fcb = jnp.broadcast_to(fcb_ref[...], (Bs, M))   # hoisted

            def step(t, carry):
                h_prev, c_prev = carry                          # f32 (Bs, H)
                g = gin_cur[t] + jnp.dot(h_prev.astype(whh.dtype), whh,
                                         preferred_element_type=jnp.float32)
                # PyTorch gate order [i, f, g, o]; 128-lane-aligned slices.
                # f32 gate math (v5e has no bf16 VPU/EUP).
                i_g = jax.nn.sigmoid(g[:, 0 * H:1 * H])
                f_g = jax.nn.sigmoid(g[:, 1 * H:2 * H])
                g_g = jnp.tanh(g[:, 2 * H:3 * H])
                o_g = jax.nn.sigmoid(g[:, 3 * H:4 * H])
                c_new = f_g * c_prev + i_g * g_g
                h_new = o_g * jnp.tanh(c_new)
                h_bf = h_new.astype(whh.dtype)                  # bf16 operand
                if not last:
                    # Independent MXU work hidden under the recurrence chain.
                    gin_nxt[t] = jnp.dot(h_bf, wih_nxt,
                                         preferred_element_type=jnp.float32) + b_nxt
                else:
                    # Fused FC for timestep t (also hidden under recurrence).
                    fcbuf[t] = jnp.dot(h_bf, fcw,
                                       preferred_element_type=jnp.float32) + fcb
                return h_new, c_new

            # unroll=True is fine for T=8; use partial unroll (4..8) at real T.
            h_fin, c_fin = lax.fori_loop(0, T, step, (h0_ref[l], c0_ref[l]),
                                         unroll=True)
            hN_ref[l] = h_fin
            cN_ref[l] = c_fin
            # TODO(synk): nn.LSTM inter-layer dropout and self.dropout are
            # identity in eval mode; training-mode stochastic dropout is not
            # implemented.

        # ---- batch-major logits epilogue: row b*T + t, all-static writes ----
        # (matches PyTorch's batch_first .view(-1, n_hidden) row order, so the
        #  wrapper needs no HBM transpose; M is a multiple of 128 -> lane-dense
        #  unmasked stores).
        for b in range(Bs):
            out_ref[b * T:(b + 1) * T, :] = fcbuf[:, b, :].astype(out_ref.dtype)

    return kernel


# ------------------------------- model wrapper -------------------------------
def init_params(key):
    k = 1.0 / jnp.sqrt(jnp.float32(N_HIDDEN))
    keys = jax.random.split(key, 4 * N_LAYERS + 2)
    idx = 0
    lstm = []
    for layer in range(N_LAYERS):
        in_dim = NUM_BITS if layer == 0 else N_HIDDEN
        w_ih = jax.random.uniform(keys[idx], (4 * N_HIDDEN, in_dim),
                                  minval=-k, maxval=k, dtype=jnp.float32); idx += 1
        w_hh = jax.random.uniform(keys[idx], (4 * N_HIDDEN, N_HIDDEN),
                                  minval=-k, maxval=k, dtype=jnp.float32); idx += 1
        b_ih = jax.random.uniform(keys[idx], (4 * N_HIDDEN,),
                                  minval=-k, maxval=k, dtype=jnp.float32); idx += 1
        b_hh = jax.random.uniform(keys[idx], (4 * N_HIDDEN,),
                                  minval=-k, maxval=k, dtype=jnp.float32); idx += 1
        lstm.append(dict(
            w_ih_t=w_ih.T.astype(WEIGHT_DTYPE),                 # (in_dim, 4H)
            w_hh_t=w_hh.T.astype(WEIGHT_DTYPE),                 # (H, 4H)
            b=(b_ih + b_hh).reshape(1, 4 * N_HIDDEN)))          # f32, combined
    fc_w = jax.random.uniform(keys[idx], (NUM_BITS, N_HIDDEN),
                              minval=-k, maxval=k, dtype=jnp.float32); idx += 1
    fc_b = jax.random.uniform(keys[idx], (NUM_BITS,),
                              minval=-k, maxval=k, dtype=jnp.float32)
    return dict(lstm=lstm,
                fc_w_t=fc_w.T.astype(WEIGHT_DTYPE),             # (H, NUM_BITS)
                fc_b=fc_b.reshape(1, NUM_BITS))                 # f32


def char_rnn_forward(params, x, hidden):
    """x: (B, T, NUM_BITS) batch_first, hidden: (h0, c0) each (L, B, H).
    Returns (out (B*T, NUM_BITS), (h_n, c_n)) — PyTorch eval-mode semantics."""
    h0_all, c0_all = hidden
    B, T, D = x.shape
    L, _, H = h0_all.shape
    M = params["fc_w_t"].shape[-1]
    nb = N_BATCH_BLOCKS
    assert B % nb == 0 and (B // nb) % 8 == 0, "batch block must be a multiple of 8"
    Bs = B // nb

    # Time-major bf16 input (one cheap pre-kernel transpose; the *output* needs
    # no post-kernel transpose — the kernel writes batch-major rows directly).
    x_tm = jnp.transpose(x, (1, 0, 2)).astype(WEIGHT_DTYPE)     # (T, B, D)

    args = [x_tm, h0_all.astype(jnp.float32), c0_all.astype(jnp.float32)]
    in_specs = [
        pl.BlockSpec((T, Bs, D), lambda i: (0, i, 0)),          # x (batch block)
        pl.BlockSpec((L, Bs, H), lambda i: (0, i, 0)),          # h0
        pl.BlockSpec((L, Bs, H), lambda i: (0, i, 0)),          # c0
    ]
    for li, p in enumerate(params["lstm"]):
        d_in = D if li == 0 else H
        args += [p["w_ih_t"], p["w_hh_t"], p["b"]]
        in_specs += [
            pl.BlockSpec((d_in, 4 * H), lambda i: (0, 0)),      # weights: resident
            pl.BlockSpec((H, 4 * H), lambda i: (0, 0)),
            pl.BlockSpec((1, 4 * H), lambda i: (0, 0)),
        ]
    args += [params["fc_w_t"], params["fc_b"]]
    in_specs += [pl.BlockSpec((H, M), lambda i: (0, 0)),
                 pl.BlockSpec((1, M), lambda i: (0, 0))]

    out_specs = (
        pl.BlockSpec((Bs * T, M), lambda i: (i, 0)),            # logits (b-major)
        pl.BlockSpec((L, Bs, H), lambda i: (0, i, 0)),          # h_n
        pl.BlockSpec((L, Bs, H), lambda i: (0, i, 0)),          # c_n
    )

    # Advisory cost hint for XLA scheduling around the single fused call.
    flops = 2 * T * B * M * H                                   # FC
    transcendentals = 0
    for l in range(L):
        d_in = D if l == 0 else H
        flops += 2 * T * B * 4 * H * (d_in + H)                 # proj + recurrence
        transcendentals += 5 * T * B * H                        # 3 sigmoid + 2 tanh
    bytes_accessed = sum(int(a.size) * a.dtype.itemsize for a in args)
    bytes_accessed += (B * T * M + 2 * L * B * H) * 4

    out, h_n, c_n = pl.pallas_call(
        _make_char_rnn_kernel(L, T, Bs, D, H, M),
        out_shape=(
            jax.ShapeDtypeStruct((B * T, M), jnp.float32),      # logits, row b*T+t
            jax.ShapeDtypeStruct((L, B, H), jnp.float32),       # h_n
            jax.ShapeDtypeStruct((L, B, H), jnp.float32),       # c_n
        ),
        grid_spec=pltpu.PrefetchScalarGridSpec(
            num_scalar_prefetch=0,
            grid=(nb,),
            in_specs=in_specs,
            out_specs=out_specs,
            scratch_shapes=[
                pltpu.VMEM((T, Bs, 4 * H), jnp.float32),        # gin buffer A
                pltpu.VMEM((T, Bs, 4 * H), jnp.float32),        # gin buffer B
                pltpu.VMEM((T, Bs, M), jnp.float32),            # per-step FC rows
            ],
        ),
        compiler_params=pltpu.CompilerParams(
            dimension_semantics=("parallel",),                  # 2 TCs on v7x
            vmem_limit_bytes=32 * 1024 * 1024,                  # explicit scoped VMEM
        ),
        cost_estimate=pl.CostEstimate(flops=flops,
                                      transcendentals=transcendentals,
                                      bytes_accessed=bytes_accessed),
    )(*args)

    return out, (h_n, c_n)


if __name__ == "__main__":
    key = jax.random.PRNGKey(0)
    pkey, xkey = jax.random.split(key)
    params = init_params(pkey)

    x = jax.random.normal(xkey, (BATCH, SEQ, NUM_BITS), dtype=jnp.float32)
    h0 = jnp.zeros((N_LAYERS, BATCH, N_HIDDEN), jnp.float32)
    c0 = jnp.zeros((N_LAYERS, BATCH, N_HIDDEN), jnp.float32)

    fwd = jax.jit(char_rnn_forward)
    out, (h_n, c_n) = fwd(params, x, (h0, c0))
    jax.block_until_ready((out, h_n, c_n))

    assert out.shape == (BATCH * SEQ, NUM_BITS)
    assert h_n.shape == (N_LAYERS, BATCH, N_HIDDEN)
    assert c_n.shape == (N_LAYERS, BATCH, N_HIDDEN)
    assert bool(jnp.all(jnp.isfinite(out)))
    assert bool(jnp.all(jnp.isfinite(h_n))) and bool(jnp.all(jnp.isfinite(c_n)))
    print("KERNEL_OK")
</pallas_src>

<mosaic_0001>
module attributes {stable_mosaic.version = 11 : i64} {
  func.func @kernel(%arg0: i32, %arg1: memref<8x16x128xbf16, #tpu.memory_space<vmem>>, %arg2: memref<2x16x128xf32, #tpu.memory_space<vmem>>, %arg3: memref<2x16x128xf32, #tpu.memory_space<vmem>>, %arg4: memref<128x512xbf16, #tpu.memory_space<vmem>>, %arg5: memref<128x512xbf16, #tpu.memory_space<vmem>>, %arg6: memref<1x512xf32, #tpu.memory_space<vmem>>, %arg7: memref<128x512xbf16, #tpu.memory_space<vmem>>, %arg8: memref<128x512xbf16, #tpu.memory_space<vmem>>, %arg9: memref<1x512xf32, #tpu.memory_space<vmem>>, %arg10: memref<128x128xbf16, #tpu.memory_space<vmem>>, %arg11: memref<1x128xf32, #tpu.memory_space<vmem>>, %arg12: memref<128x128xf32, #tpu.memory_space<vmem>>, %arg13: memref<2x16x128xf32, #tpu.memory_space<vmem>>, %arg14: memref<2x16x128xf32, #tpu.memory_space<vmem>>, %arg15: memref<8x16x512xf32, #tpu.memory_space<vmem>>, %arg16: memref<8x16x512xf32, #tpu.memory_space<vmem>>, %arg17: memref<8x16x128xf32, #tpu.memory_space<vmem>>) attributes {dimension_semantics = [#tpu.dimension_semantics<parallel>], iteration_bounds = array<i64: 2>, scalar_prefetch = 0 : i64, scratch_operands = 3 : i64, tpu.core_type = #tpu.core_type<tc>, window_params = [{transform_indices = @transform_0, window_bounds = array<i64: 8, 16, 128>}, {transform_indices = @transform_1, window_bounds = array<i64: 2, 16, 128>}, {transform_indices = @transform_2, window_bounds = array<i64: 2, 16, 128>}, {pipeline_mode = #tpu.pipeline_mode<synchronous>, transform_indices = @transform_3, window_bounds = array<i64: 128, 512>}, {pipeline_mode = #tpu.pipeline_mode<synchronous>, transform_indices = @transform_4, window_bounds = array<i64: 128, 512>}, {pipeline_mode = #tpu.pipeline_mode<synchronous>, transform_indices = @transform_5, window_bounds = array<i64: 1, 512>}, {pipeline_mode = #tpu.pipeline_mode<synchronous>, transform_indices = @transform_6, window_bounds = array<i64: 128, 512>}, {pipeline_mode = #tpu.pipeline_mode<synchronous>, transform_indices = @transform_7, window_bounds = array<i64: 128, 512>}, {pipeline_mode = #tpu.pipeline_mode<synchronous>, transform_indices = @transform_8, window_bounds = array<i64: 1, 512>}, {pipeline_mode = #tpu.pipeline_mode<synchronous>, transform_indices = @transform_9, window_bounds = array<i64: 128, 128>}, {pipeline_mode = #tpu.pipeline_mode<synchronous>, transform_indices = @transform_10, window_bounds = array<i64: 1, 128>}, {transform_indices = @transform_11, window_bounds = array<i64: 128, 128>}, {transform_indices = @transform_12, window_bounds = array<i64: 2, 16, 128>}, {transform_indices = @transform_13, window_bounds = array<i64: 2, 16, 128>}]} {
    %c0 = arith.constant 0 : index
    %c0_0 = arith.constant 0 : index
    %c0_1 = arith.constant 0 : index
    %0 = vector.load %arg1[%c0, %c0_0, %c0_1] : memref<8x16x128xbf16, #tpu.memory_space<vmem>>, vector<8x16x128xbf16>
    %1 = vector.shape_cast %0 : vector<8x16x128xbf16> to vector<128x128xbf16>
    %c0_2 = arith.constant 0 : index
    %c0_3 = arith.constant 0 : index
    %2 = vector.load %arg4[%c0_2, %c0_3] : memref<128x512xbf16, #tpu.memory_space<vmem>>, vector<128x512xbf16>
    %cst = arith.constant dense<0.000000e+00> : vector<128x512xf32>
    %3 = tpu.matmul %1, %2, %cst {dimension_numbers = #tpu.dot_dimension_numbers<[1], [0], [0], [1], [0, 0, 1, 1], [], []>} : vector<128x128xbf16>, vector<128x512xbf16>, vector<128x512xf32> -> vector<128x512xf32>
    %c0_4 = arith.constant 0 : index
    %c0_5 = arith.constant 0 : index
    %4 = vector.load %arg6[%c0_4, %c0_5] : memref<1x512xf32, #tpu.memory_space<vmem>>, vector<1x512xf32>
    %5 = vector.broadcast %4 : vector<1x512xf32> to vector<128x512xf32>
    %6 = arith.addf %3, %5 : vector<128x512xf32>
    %7 = vector.shape_cast %6 : vector<128x512xf32> to vector<8x16x512xf32>
    %c0_6 = arith.constant 0 : index
    %c0_7 = arith.constant 0 : index
    %c0_8 = arith.constant 0 : index
    %8 = vector.load %arg15[%c0_6, %c0_7, %c0_8] : memref<8x16x512xf32, #tpu.memory_space<vmem>>, vector<8x16x512xf32>
    tpu.vector_store %arg15[%c0_6, %c0_7, %c0_8], %7 {strides = array<i32>} : memref<8x16x512xf32, #tpu.memory_space<vmem>>, vector<8x16x512xf32>,
    %c0_9 = arith.constant 0 : index
    %c0_10 = arith.constant 0 : index
    %9 = vector.load %arg5[%c0_9, %c0_10] : memref<128x512xbf16, #tpu.memory_space<vmem>>, vector<128x512xbf16>
    %c0_11 = arith.constant 0 : index
    %c0_12 = arith.constant 0 : index
    %10 = vector.load %arg7[%c0_11, %c0_12] : memref<128x512xbf16, #tpu.memory_space<vmem>>, vector<128x512xbf16>
    %c0_13 = arith.constant 0 : index
    %c0_14 = arith.constant 0 : index
    %11 = vector.load %arg9[%c0_13, %c0_14] : memref<1x512xf32, #tpu.memory_space<vmem>>, vector<1x512xf32>
    %12 = vector.shape_cast %11 : vector<1x512xf32> to vector<1x512xf32>
    %13 = vector.broadcast %12 : vector<1x512xf32> to vector<16x512xf32>
    %c0_15 = arith.constant 0 : index
    %c0_16 = arith.constant 0 : index
    %c0_17 = arith.constant 0 : index
    %14 = vector.load %arg2[%c0_15, %c0_16, %c0_17] : memref<2x16x128xf32, #tpu.memory_space<vmem>>, vector<1x16x128xf32>
    %15 = vector.shape_cast %14 : vector<1x16x128xf32> to vector<16x128xf32>
    %c0_18 = arith.constant 0 : index
    %c0_19 = arith.constant 0 : index
    %c0_20 = arith.constant 0 : index
    %16 = vector.load %arg3[%c0_18, %c0_19, %c0_20] : memref<2x16x128xf32, #tpu.memory_space<vmem>>, vector<1x16x128xf32>
    %17 = vector.shape_cast %16 : vector<1x16x128xf32> to vector<16x128xf32>
    %c0_i32 = arith.constant 0 : i32
    %18 = arith.index_cast %c0_i32 : i32 to index
    %c0_21 = arith.constant 0 : index
    %c0_22 = arith.constant 0 : index
    %19 = vector.load %arg15[%18, %c0_21, %c0_22] : memref<8x16x512xf32, #tpu.memory_space<vmem>>, vector<1x16x512xf32>
    %20 = vector.shape_cast %19 : vector<1x16x512xf32> to vector<16x512xf32>
    %21 = arith.truncf %15 : vector<16x128xf32> to vector<16x128xbf16>
    %cst_23 = arith.constant dense<0.000000e+00> : vector<16x512xf32>
    %22 = tpu.matmul %21, %9, %cst_23 {dimension_numbers = #tpu.dot_dimension_numbers<[1], [0], [0], [1], [0, 0, 1, 1], [], []>} : vector<16x128xbf16>, vector<128x512xbf16>, vector<16x512xf32> -> vector<16x512xf32>
    %23 = arith.addf %20, %22 : vector<16x512xf32>
    %24 = vector.extract_strided_slice %23 {offsets = [0, 0], sizes = [16, 128], strides = [1, 1]} : vector<16x512xf32> to vector<16x128xf32>
    %25 = arith.negf %24 : vector<16x128xf32>
    %26 = math.exp %25 : vector<16x128xf32>
    %cst_24 = arith.constant 1.000000e+00 : f32
    %27 = vector.broadcast %cst_24 : f32 to vector<16x128xf32>
    %28 = arith.addf %27, %26 : vector<16x128xf32>
    %29 = arith.divf %27, %28 : vector<16x128xf32>
    %30 = vector.extract_strided_slice %23 {offsets = [0, 128], sizes = [16, 128], strides = [1, 1]} : vector<16x512xf32> to vector<16x128xf32>
    %31 = arith.negf %30 : vector<16x128xf32>
    %32 = math.exp %31 : vector<16x128xf32>
    %cst_25 = arith.constant 1.000000e+00 : f32
    %33 = vector.broadcast %cst_25 : f32 to vector<16x128xf32>
    %34 = arith.addf %33, %32 : vector<16x128xf32>
    %35 = arith.divf %33, %34 : vector<16x128xf32>
    %36 = vector.extract_strided_slice %23 {offsets = [0, 256], sizes = [16, 128], strides = [1, 1]} : vector<16x512xf32> to vector<16x128xf32>
    %37 = math.tanh %36 : vector<16x128xf32>
    %38 = vector.extract_strided_slice %23 {offsets = [0, 384], sizes = [16, 128], strides = [1, 1]} : vector<16x512xf32> to vector<16x128xf32>
    %39 = arith.negf %38 : vector<16x128xf32>
    %40 = math.exp %39 : vector<16x128xf32>
    %cst_26 = arith.constant 1.000000e+00 : f32
    %41 = vector.broadcast %cst_26 : f32 to vector<16x128xf32>
    %42 = arith.addf %41, %40 : vector<16x128xf32>
    %43 = arith.divf %41, %42 : vector<16x128xf32>
    %44 = arith.mulf %35, %17 : vector<16x128xf32>
    %45 = arith.mulf %29, %37 : vector<16x128xf32>
    %46 = arith.addf %44, %45 : vector<16x128xf32>
    %47 = math.tanh %46 : vector<16x128xf32>
    %48 = arith.mulf %43, %47 : vector<16x128xf32>
    %49 = arith.truncf %48 : vector<16x128xf32> to vector<16x128xbf16>
    %cst_27 = arith.constant dense<0.000000e+00> : vector<16x512xf32>
    %50 = tpu.matmul %49, %10, %cst_27 {dimension_numbers = #tpu.dot_dimension_numbers<[1], [0], [0], [1], [0, 0, 1, 1], [], []>} : vector<16x128xbf16>, vector<128x512xbf16>, vector<16x512xf32> -> vector<16x512xf32>
    %51 = arith.addf %50, %13 : vector<16x512xf32>
    %52 = arith.index_cast %c0_i32 : i32 to index
    %c0_28 = arith.constant 0 : index
    %c0_29 = arith.constant 0 : index
    %53 = vector.load %arg16[%52, %c0_28, %c0_29] : memref<8x16x512xf32, #tpu.memory_space<vmem>>, vector<1x16x512xf32>
    %54 = vector.shape_cast %53 : vector<1x16x512xf32> to vector<16x512xf32>
    %55 = vector.shape_cast %51 : vector<16x512xf32> to vector<1x16x512xf32>
    tpu.vector_store %arg16[%52, %c0_28, %c0_29], %55 {strides = array<i32>} : memref<8x16x512xf32, #tpu.memory_space<vmem>>, vector<1x16x512xf32>,
    %c1_i32 = arith.constant 1 : i32
    %56 = arith.index_cast %c1_i32 : i32 to index
    %c0_30 = arith.constant 0 : index
    %c0_31 = arith.constant 0 : index
    %57 = vector.load %arg15[%56, %c0_30, %c0_31] : memref<8x16x512xf32, #tpu.memory_space<vmem>>, vector<1x16x512xf32>
    %58 = vector.shape_cast %57 : vector<1x16x512xf32> to vector<16x512xf32>
    %59 = arith.truncf %48 : vector<16x128xf32> to vector<16x128xbf16>
    %cst_32 = arith.constant dense<0.000000e+00> : vector<16x512xf32>
    %60 = tpu.matmul %59, %9, %cst_32 {dimension_numbers = #tpu.dot_dimension_numbers<[1], [0], [0], [1], [0, 0, 1, 1], [], []>} : vector<16x128xbf16>, vector<128x512xbf16>, vector<16x512xf32> -> vector<16x512xf32>
    %61 = arith.addf %58, %60 : vector<16x512xf32>
    %62 = vector.extract_strided_slice %61 {offsets = [0, 0], sizes = [16, 128], strides = [1, 1]} : vector<16x512xf32> to vector<16x128xf32>
    %63 = arith.negf %62 : vector<16x128xf32>
    %64 = math.exp %63 : vector<16x128xf32>
    %cst_33 = arith.constant 1.000000e+00 : f32
    %65 = vector.broadcast %cst_33 : f32 to vector<16x128xf32>
    %66 = arith.addf %65, %64 : vector<16x128xf32>
    %67 = arith.divf %65, %66 : vector<16x128xf32>
    %68 = vector.extract_strided_slice %61 {offsets = [0, 128], sizes = [16, 128], strides = [1, 1]} : vector<16x512xf32> to vector<16x128xf32>
    %69 = arith.negf %68 : vector<16x128xf32>
    %70 = math.exp %69 : vector<16x128xf32>
    %cst_34 = arith.constant 1.000000e+00 : f32
    %71 = vector.broadcast %cst_34 : f32 to vector<16x128xf32>
    %72 = arith.addf %71, %70 : vector<16x128xf32>
    %73 = arith.divf %71, %72 : vector<16x128xf32>
    %74 = vector.extract_strided_slice %61 {offsets = [0, 256], sizes = [16, 128], strides = [1, 1]} : vector<16x512xf32> to vector<16x128xf32>
    %75 = math.tanh %74 : vector<16x128xf32>
    %76 = vector.extract_strided_slice %61 {offsets = [0, 384], sizes = [16, 128], strides = [1, 1]} : vector<16x512xf32> to vector<16x128xf32>
    %77 = arith.negf %76 : vector<16x128xf32>
    %78 = math.exp %77 : vector<16x128xf32>
    %cst_35 = arith.constant 1.000000e+00 : f32
    %79 = vector.broadcast %cst_35 : f32 to vector<16x128xf32>
    %80 = arith.addf %79, %78 : vector<16x128xf32>
    %81 = arith.divf %79, %80 : vector<16x128xf32>
    %82 = arith.mulf %73, %46 : vector<16x128xf32>
    %83 = arith.mulf %67, %75 : vector<16x128xf32>
    %84 = arith.addf %82, %83 : vector<16x128xf32>
    %85 = math.tanh %84 : vector<16x128xf32>
    %86 = arith.mulf %81, %85 : vector<16x128xf32>
    %87 = arith.truncf %86 : vector<16x128xf32> to vector<16x128xbf16>
    %cst_36 = arith.constant dense<0.000000e+00> : vector<16x512xf32>
    %88 = tpu.matmul %87, %10, %cst_36 {dimension_numbers = #tpu.dot_dimension_numbers<[1], [0], [0], [1], [0, 0, 1, 1], [], []>} : vector<16x128xbf16>, vector<128x512xbf16>, vector<16x512xf32> -> vector<16x512xf32>
    %89 = arith.addf %88, %13 : vector<16x512xf32>
    %90 = arith.index_cast %c1_i32 : i32 to index
    %c0_37 = arith.constant 0 : index
    %c0_38 = arith.constant 0 : index
    %91 = vector.load %arg16[%90, %c0_37, %c0_38] : memref<8x16x512xf32, #tpu.memory_space<vmem>>, vector<1x16x512xf32>
    %92 = vector.shape_cast %91 : vector<1x16x512xf32> to vector<16x512xf32>
    %93 = vector.shape_cast %89 : vector<16x512xf32> to vector<1x16x512xf32>
    tpu.vector_store %arg16[%90, %c0_37, %c0_38], %93 {strides = array<i32>} : memref<8x16x512xf32, #tpu.memory_space<vmem>>, vector<1x16x512xf32>,
    %c2_i32 = arith.constant 2 : i32
    %94 = arith.index_cast %c2_i32 : i32 to index
    %c0_39 = arith.constant 0 : index
    %c0_40 = arith.constant 0 : index
    %95 = vector.load %arg15[%94, %c0_39, %c0_40] : memref<8x16x512xf32, #tpu.memory_space<vmem>>, vector<1x16x512xf32>
    %96 = vector.shape_cast %95 : vector<1x16x512xf32> to vector<16x512xf32>
    %97 = arith.truncf %86 : vector<16x128xf32> to vector<16x128xbf16>
    %cst_41 = arith.constant dense<0.000000e+00> : vector<16x512xf32>
    %98 = tpu.matmul %97, %9, %cst_41 {dimension_numbers = #tpu.dot_dimension_numbers<[1], [0], [0], [1], [0, 0, 1, 1], [], []>} : vector<16x128xbf16>, vector<128x512xbf16>, vector<16x512xf32> -> vector<16x512xf32>
    %99 = arith.addf %96, %98 : vector<16x512xf32>
    %100 = vector.extract_strided_slice %99 {offsets = [0, 0], sizes = [16, 128], strides = [1, 1]} : vector<16x512xf32> to vector<16x128xf32>
    %101 = arith.negf %100 : vector<16x128xf32>
    %102 = math.exp %101 : vector<16x128xf32>
    %cst_42 = arith.constant 1.000000e+00 : f32
    %103 = vector.broadcast %cst_42 : f32 to vector<16x128xf32>
    %104 = arith.addf %103, %102 : vector<16x128xf32>
    %105 = arith.divf %103, %104 : vector<16x128xf32>
    %106 = vector.extract_strided_slice %99 {offsets = [0, 128], sizes = [16, 128], strides = [1, 1]} : vector<16x512xf32> to vector<16x128xf32>
    %107 = arith.negf %106 : vector<16x128xf32>
    %108 = math.exp %107 : vector<16x128xf32>
    %cst_43 = arith.constant 1.000000e+00 : f32
    %109 = vector.broadcast %cst_43 : f32 to vector<16x128xf32>
    %110 = arith.addf %109, %108 : vector<16x128xf32>
    %111 = arith.divf %109, %110 : vector<16x128xf32>
    %112 = vector.extract_strided_slice %99 {offsets = [0, 256], sizes = [16, 128], strides = [1, 1]} : vector<16x512xf32> to vector<16x128xf32>
    %113 = math.tanh %112 : vector<16x128xf32>
    %114 = vector.extract_strided_slice %99 {offsets = [0, 384], sizes = [16, 128], strides = [1, 1]} : vector<16x512xf32> to vector<16x128xf32>
    %115 = arith.negf %114 : vector<16x128xf32>
    %116 = math.exp %115 : vector<16x128xf32>
    %cst_44 = arith.constant 1.000000e+00 : f32
    %117 = vector.broadcast %cst_44 : f32 to vector<16x128xf32>
    %118 = arith.addf %117, %116 : vector<16x128xf32>
    %119 = arith.divf %117, %118 : vector<16x128xf32>
    %120 = arith.mulf %111, %84 : vector<16x128xf32>
    %121 = arith.mulf %105, %113 : vector<16x128xf32>
    %122 = arith.addf %120, %121 : vector<16x128xf32>
    %123 = math.tanh %122 : vector<16x128xf32>
    %124 = arith.mulf %119, %123 : vector<16x128xf32>
    %125 = arith.truncf %124 : vector<16x128xf32> to vector<16x128xbf16>
    %cst_45 = arith.constant dense<0.000000e+00> : vector<16x512xf32>
    %126 = tpu.matmul %125, %10, %cst_45 {dimension_numbers = #tpu.dot_dimension_numbers<[1], [0], [0], [1], [0, 0, 1, 1], [], []>} : vector<16x128xbf16>, vector<128x512xbf16>, vector<16x512xf32> -> vector<16x512xf32>
    %127 = arith.addf %126, %13 : vector<16x512xf32>
    %128 = arith.index_cast %c2_i32 : i32 to index
    %c0_46 = arith.constant 0 : index
    %c0_47 = arith.constant 0 : index
    %129 = vector.load %arg16[%128, %c0_46, %c0_47] : memref<8x16x512xf32, #tpu.memory_space<vmem>>, vector<1x16x512xf32>
    %130 = vector.shape_cast %129 : vector<1x16x512xf32> to vector<16x512xf32>
    %131 = vector.shape_cast %127 : vector<16x512xf32> to vector<1x16x512xf32>
    tpu.vector_store %arg16[%128, %c0_46, %c0_47], %131 {strides = array<i32>} : memref<8x16x512xf32, #tpu.memory_space<vmem>>, vector<1x16x512xf32>,
    %c3_i32 = arith.constant 3 : i32
    %132 = arith.index_cast %c3_i32 : i32 to index
    %c0_48 = arith.constant 0 : index
    %c0_49 = arith.constant 0 : index
    %133 = vector.load %arg15[%132, %c0_48, %c0_49] : memref<8x16x512xf32, #tpu.memory_space<vmem>>, vector<1x16x512xf32>
    %134 = vector.shape_cast %133 : vector<1x16x512xf32> to vector<16x512xf32>
    %135 = arith.truncf %124 : vector<16x128xf32> to vector<16x128xbf16>
    %cst_50 = arith.constant dense<0.000000e+00> : vector<16x512xf32>
    %136 = tpu.matmul %135, %9, %cst_50 {dimension_numbers = #tpu.dot_dimension_numbers<[1], [0], [0], [1], [0, 0, 1, 1], [], []>} : vector<16x128xbf16>, vector<128x512xbf16>, vector<16x512xf32> -> vector<16x512xf32>
    %137 = arith.addf %134, %136 : vector<16x512xf32>
    %138 = vector.extract_strided_slice %137 {offsets = [0, 0], sizes = [16, 128], strides = [1, 1]} : vector<16x512xf32> to vector<16x128xf32>
    %139 = arith.negf %138 : vector<16x128xf32>
    %140 = math.exp %139 : vector<16x128xf32>
    %cst_51 = arith.constant 1.000000e+00 : f32
    %141 = vector.broadcast %cst_51 : f32 to vector<16x128xf32>
    %142 = arith.addf %141, %140 : vector<16x128xf32>
    %143 = arith.divf %141, %142 : vector<16x128xf32>
    %144 = vector.extract_strided_slice %137 {offsets = [0, 128], sizes = [16, 128], strides = [1, 1]} : vector<16x512xf32> to vector<16x128xf32>
    %145 = arith.negf %144 : vector<16x128xf32>
    %146 = math.exp %145 : vector<16x128xf32>
    %cst_52 = arith.constant 1.000000e+00 : f32
    %147 = vector.broadcast %cst_52 : f32 to vector<16x128xf32>
    %148 = arith.addf %147, %146 : vector<16x128xf32>
    %149 = arith.divf %147, %148 : vector<16x128xf32>
    %150 = vector.extract_strided_slice %137 {offsets = [0, 256], sizes = [16, 128], strides = [1, 1]} : vector<16x512xf32> to vector<16x128xf32>
    %151 = math.tanh %150 : vector<16x128xf32>
    %152 = vector.extract_strided_slice %137 {offsets = [0, 384], sizes = [16, 128], strides = [1, 1]} : vector<16x512xf32> to vector<16x128xf32>
    %153 = arith.negf %152 : vector<16x128xf32>
    %154 = math.exp %153 : vector<16x128xf32>
    %cst_53 = arith.constant 1.000000e+00 : f32
    %155 = vector.broadcast %cst_53 : f32 to vector<16x128xf32>
    %156 = arith.addf %155, %154 : vector<16x128xf32>
    %157 = arith.divf %155, %156 : vector<16x128xf32>
    %158 = arith.mulf %149, %122 : vector<16x128xf32>
    %159 = arith.mulf %143, %151 : vector<16x128xf32>
    %160 = arith.addf %158, %159 : vector<16x128xf32>
    %161 = math.tanh %160 : vector<16x128xf32>
    %162 = arith.mulf %157, %161 : vector<16x128xf32>
    %163 = arith.truncf %162 : vector<16x128xf32> to vector<16x128xbf16>
    %cst_54 = arith.constant dense<0.000000e+00> : vector<16x512xf32>
    %164 = tpu.matmul %163, %10, %cst_54 {dimension_numbers = #tpu.dot_dimension_numbers<[1], [0], [0], [1], [0, 0, 1, 1], [], []>} : vector<16x128xbf16>, vector<128x512xbf16>, vector<16x512xf32> -> vector<16x512xf32>
    %165 = arith.addf %164, %13 : vector<16x512xf32>
    %166 = arith.index_cast %c3_i32 : i32 to index
    %c0_55 = arith.constant 0 : index
    %c0_56 = arith.constant 0 : index
    %167 = vector.load %arg16[%166, %c0_55, %c0_56] : memref<8x16x512xf32, #tpu.memory_space<vmem>>, vector<1x16x512xf32>
    %168 = vector.shape_cast %167 : vector<1x16x512xf32> to vector<16x512xf32>
    %169 = vector.shape_cast %165 : vector<16x512xf32> to vector<1x16x512xf32>
    tpu.vector_store %arg16[%166, %c0_55, %c0_56], %169 {strides = array<i32>} : memref<8x16x512xf32, #tpu.memory_space<vmem>>, vector<1x16x512xf32>,
    %c4_i32 = arith.constant 4 : i32
    %170 = arith.index_cast %c4_i32 : i32 to index
    %c0_57 = arith.constant 0 : index
    %c0_58 = arith.constant 0 : index
    %171 = vector.load %arg15[%170, %c0_57, %c0_58] : memref<8x16x512xf32, #tpu.memory_space<vmem>>, vector<1x16x512xf32>
    %172 = vector.shape_cast %171 : vector<1x16x512xf32> to vector<16x512xf32>
    %173 = arith.truncf %162 : vector<16x128xf32> to vector<16x128xbf16>
    %cst_59 = arith.constant dense<0.000000e+00> : vector<16x512xf32>
    %174 = tpu.matmul %173, %9, %cst_59 {dimension_numbers = #tpu.dot_dimension_numbers<[1], [0], [0], [1], [0, 0, 1, 1], [], []>} : vector<16x128xbf16>, vector<128x512xbf16>, vector<16x512xf32> -> vector<16x512xf32>
    %175 = arith.addf %172, %174 : vector<16x512xf32>
    %176 = vector.extract_strided_slice %175 {offsets = [0, 0], sizes = [16, 128], strides = [1, 1]} : vector<16x512xf32> to vector<16x128xf32>
    %177 = arith.negf %176 : vector<16x128xf32>
    %178 = math.exp %177 : vector<16x128xf32>
    %cst_60 = arith.constant 1.000000e+00 : f32
    %179 = vector.broadcast %cst_60 : f32 to vector<16x128xf32>
    %180 = arith.addf %179, %178 : vector<16x128xf32>
    %181 = arith.divf %179, %180 : vector<16x128xf32>
    %182 = vector.extract_strided_slice %175 {offsets = [0, 128], sizes = [16, 128], strides = [1, 1]} : vector<16x512xf32> to vector<16x128xf32>
    %183 = arith.negf %182 : vector<16x128xf32>
    %184 = math.exp %183 : vector<16x128xf32>
    %cst_61 = arith.constant 1.000000e+00 : f32
    %185 = vector.broadcast %cst_61 : f32 to vector<16x128xf32>
    %186 = arith.addf %185, %184 : vector<16x128xf32>
    %187 = arith.divf %185, %186 : vector<16x128xf32>
    %188 = vector.extract_strided_slice %175 {offsets = [0, 256], sizes = [16, 128], strides = [1, 1]} : vector<16x512xf32> to vector<16x128xf32>
    %189 = math.tanh %188 : vector<16x128xf32>
    %190 = vector.extract_strided_slice %175 {offsets = [0, 384], sizes = [16, 128], strides = [1, 1]} : vector<16x512xf32> to vector<16x128xf32>
    %191 = arith.negf %190 : vector<16x128xf32>
    %192 = math.exp %191 : vector<16x128xf32>
    %cst_62 = arith.constant 1.000000e+00 : f32
    %193 = vector.broadcast %cst_62 : f32 to vector<16x128xf32>
    %194 = arith.addf %193, %192 : vector<16x128xf32>
    %195 = arith.divf %193, %194 : vector<16x128xf32>
    %196 = arith.mulf %187, %160 : vector<16x128xf32>
    %197 = arith.mulf %181, %189 : vector<16x128xf32>
    %198 = arith.addf %196, %197 : vector<16x128xf32>
    %199 = math.tanh %198 : vector<16x128xf32>
    %200 = arith.mulf %195, %199 : vector<16x128xf32>
    %201 = arith.truncf %200 : vector<16x128xf32> to vector<16x128xbf16>
    %cst_63 = arith.constant dense<0.000000e+00> : vector<16x512xf32>
    %202 = tpu.matmul %201, %10, %cst_63 {dimension_numbers = #tpu.dot_dimension_numbers<[1], [0], [0], [1], [0, 0, 1, 1], [], []>} : vector<16x128xbf16>, vector<128x512xbf16>, vector<16x512xf32> -> vector<16x512xf32>
    %203 = arith.addf %202, %13 : vector<16x512xf32>
    %204 = arith.index_cast %c4_i32 : i32 to index
    %c0_64 = arith.constant 0 : index
    %c0_65 = arith.constant 0 : index
    %205 = vector.load %arg16[%204, %c0_64, %c0_65] : memref<8x16x512xf32, #tpu.memory_space<vmem>>, vector<1x16x512xf32>
    %206 = vector.shape_cast %205 : vector<1x16x512xf32> to vector<16x512xf32>
    %207 = vector.shape_cast %203 : vector<16x512xf32> to vector<1x16x512xf32>
    tpu.vector_store %arg16[%204, %c0_64, %c0_65], %207 {strides = array<i32>} : memref<8x16x512xf32, #tpu.memory_space<vmem>>, vector<1x16x512xf32>,
    %c5_i32 = arith.constant 5 : i32
    %208 = arith.index_cast %c5_i32 : i32 to index
    %c0_66 = arith.constant 0 : index
    %c0_67 = arith.constant 0 : index
    %209 = vector.load %arg15[%208, %c0_66, %c0_67] : memref<8x16x512xf32, #tpu.memory_space<vmem>>, vector<1x16x512xf32>
    %210 = vector.shape_cast %209 : vector<1x16x512xf32> to vector<16x512xf32>
    %211 = arith.truncf %200 : vector<16x128xf32> to vector<16x128xbf16>
    %cst_68 = arith.constant dense<0.000000e+00> : vector<16x512xf32>
    %212 = tpu.matmul %211, %9, %cst_68 {dimension_numbers = #tpu.dot_dimension_numbers<[1], [0], [0], [1], [0, 0, 1, 1], [], []>} : vector<16x128xbf16>, vector<128x512xbf16>, vector<16x512xf32> -> vector<16x512xf32>
    %213 = arith.addf %210, %212 : vector<16x512xf32>
    %214 = vector.extract_strided_slice %213 {offsets = [0, 0], sizes = [16, 128], strides = [1, 1]} : vector<16x512xf32> to vector<16x128xf32>
    %215 = arith.negf %214 : vector<16x128xf32>
    %216 = math.exp %215 : vector<16x128xf32>
    %cst_69 = arith.constant 1.000000e+00 : f32
    %217 = vector.broadcast %cst_69 : f32 to vector<16x128xf32>
    %218 = arith.addf %217, %216 : vector<16x128xf32>
    %219 = arith.divf %217, %218 : vector<16x128xf32>
    %220 = vector.extract_strided_slice %213 {offsets = [0, 128], sizes = [16, 128], strides = [1, 1]} : vector<16x512xf32> to vector<16x128xf32>
    %221 = arith.negf %220 : vector<16x128xf32>
    %222 = math.exp %221 : vector<16x128xf32>
    %cst_70 = arith.constant 1.000000e+00 : f32
    %223 = vector.broadcast %cst_70 : f32 to vector<16x128xf32>
    %224 = arith.addf %223, %222 : vector<16x128xf32>
    %225 = arith.divf %223, %224 : vector<16x128xf32>
    %226 = vector.extract_strided_slice %213 {offsets = [0, 256], sizes = [16, 128], strides = [1, 1]} : vector<16x512xf32> to vector<16x128xf32>
    %227 = math.tanh %226 : vector<16x128xf32>
    %228 = vector.extract_strided_slice %213 {offsets = [0, 384], sizes = [16, 128], strides = [1, 1]} : vector<16x512xf32> to vector<16x128xf32>
    %229 = arith.negf %228 : vector<16x128xf32>
    %230 = math.exp %229 : vector<16x128xf32>
    %cst_71 = arith.constant 1.000000e+00 : f32
    %231 = vector.broadcast %cst_71 : f32 to vector<16x128xf32>
    %232 = arith.addf %231, %230 : vector<16x128xf32>
    %233 = arith.divf %231, %232 : vector<16x128xf32>
    %234 = arith.mulf %225, %198 : vector<16x128xf32>
    %235 = arith.mulf %219, %227 : vector<16x128xf32>
    %236 = arith.addf %234, %235 : vector<16x128xf32>
    %237 = math.tanh %236 : vector<16x128xf32>
    %238 = arith.mulf %233, %237 : vector<16x128xf32>
    %239 = arith.truncf %238 : vector<16x128xf32> to vector<16x128xbf16>
    %cst_72 = arith.constant dense<0.000000e+00> : vector<16x512xf32>
    %240 = tpu.matmul %239, %10, %cst_72 {dimension_numbers = #tpu.dot_dimension_numbers<[1], [0], [0], [1], [0, 0, 1, 1], [], []>} : vector<16x128xbf16>, vector<128x512xbf16>, vector<16x512xf32> -> vector<16x512xf32>
    %241 = arith.addf %240, %13 : vector<16x512xf32>
    %242 = arith.index_cast %c5_i32 : i32 to index
    %c0_73 = arith.constant 0 : index
    %c0_74 = arith.constant 0 : index
    %243 = vector.load %arg16[%242, %c0_73, %c0_74] : memref<8x16x512xf32, #tpu.memory_space<vmem>>, vector<1x16x512xf32>
    %244 = vector.shape_cast %243 : vector<1x16x512xf32> to vector<16x512xf32>
    %245 = vector.shape_cast %241 : vector<16x512xf32> to vector<1x16x512xf32>
    tpu.vector_store %arg16[%242, %c0_73, %c0_74], %245 {strides = array<i32>} : memref<8x16x512xf32, #tpu.memory_space<vmem>>, vector<1x16x512xf32>,
    %c6_i32 = arith.constant 6 : i32
    %246 = arith.index_cast %c6_i32 : i32 to index
    %c0_75 = arith.constant 0 : index
    %c0_76 = arith.constant 0 : index
    %247 = vector.load %arg15[%246, %c0_75, %c0_76] : memref<8x16x512xf32, #tpu.memory_space<vmem>>, vector<1x16x512xf32>
    %248 = vector.shape_cast %247 : vector<1x16x512xf32> to vector<16x512xf32>
    %249 = arith.truncf %238 : vector<16x128xf32> to vector<16x128xbf16>
    %cst_77 = arith.constant dense<0.000000e+00> : vector<16x512xf32>
    %250 = tpu.matmul %249, %9, %cst_77 {dimension_numbers = #tpu.dot_dimension_numbers<[1], [0], [0], [1], [0, 0, 1, 1], [], []>} : vector<16x128xbf16>, vector<128x512xbf16>, vector<16x512xf32> -> vector<16x512xf32>
    %251 = arith.addf %248, %250 : vector<16x512xf32>
    %252 = vector.extract_strided_slice %251 {offsets = [0, 0], sizes = [16, 128], strides = [1, 1]} : vector<16x512xf32> to vector<16x128xf32>
    %253 = arith.negf %252 : vector<16x128xf32>
    %254 = math.exp %253 : vector<16x128xf32>
    %cst_78 = arith.constant 1.000000e+00 : f32
    %255 = vector.broadcast %cst_78 : f32 to vector<16x128xf32>
    %256 = arith.addf %255, %254 : vector<16x128xf32>
    %257 = arith.divf %255, %256 : vector<16x128xf32>
    %258 = vector.extract_strided_slice %251 {offsets = [0, 128], sizes = [16, 128], strides = [1, 1]} : vector<16x512xf32> to vector<16x128xf32>
    %259 = arith.negf %258 : vector<16x128xf32>
    %260 = math.exp %259 : vector<16x128xf32>
    %cst_79 = arith.constant 1.000000e+00 : f32
    %261 = vector.broadcast %cst_79 : f32 to vector<16x128xf32>
    %262 = arith.addf %261, %260 : vector<16x128xf32>
    %263 = arith.divf %261, %262 : vector<16x128xf32>
    %264 = vector.extract_strided_slice %251 {offsets = [0, 256], sizes = [16, 128], strides = [1, 1]} : vector<16x512xf32> to vector<16x128xf32>
    %265 = math.tanh %264 : vector<16x128xf32>
    %266 = vector.extract_strided_slice %251 {offsets = [0, 384], sizes = [16, 128], strides = [1, 1]} : vector<16x512xf32> to vector<16x128xf32>
    %267 = arith.negf %266 : vector<16x128xf32>
    %268 = math.exp %267 : vector<16x128xf32>
    %cst_80 = arith.constant 1.000000e+00 : f32
    %269 = vector.broadcast %cst_80 : f32 to vector<16x128xf32>
    %270 = arith.addf %269, %268 : vector<16x128xf32>
    %271 = arith.divf %269, %270 : vector<16x128xf32>
    %272 = arith.mulf %263, %236 : vector<16x128xf32>
    %273 = arith.mulf %257, %265 : vector<16x128xf32>
    %274 = arith.addf %272, %273 : vector<16x128xf32>
    %275 = math.tanh %274 : vector<16x128xf32>
    %276 = arith.mulf %271, %275 : vector<16x128xf32>
    %277 = arith.truncf %276 : vector<16x128xf32> to vector<16x128xbf16>
    %cst_81 = arith.constant dense<0.000000e+00> : vector<16x512xf32>
    %278 = tpu.matmul %277, %10, %cst_81 {dimension_numbers = #tpu.dot_dimension_numbers<[1], [0], [0], [1], [0, 0, 1, 1], [], []>} : vector<16x128xbf16>, vector<128x512xbf16>, vector<16x512xf32> -> vector<16x512xf32>
    %279 = arith.addf %278, %13 : vector<16x512xf32>
    %280 = arith.index_cast %c6_i32 : i32 to index
    %c0_82 = arith.constant 0 : index
    %c0_83 = arith.constant 0 : index
    %281 = vector.load %arg16[%280, %c0_82, %c0_83] : memref<8x16x512xf32, #tpu.memory_space<vmem>>, vector<1x16x512xf32>
    %282 = vector.shape_cast %281 : vector<1x16x512xf32> to vector<16x512xf32>
    %283 = vector.shape_cast %279 : vector<16x512xf32> to vector<1x16x512xf32>
    tpu.vector_store %arg16[%280, %c0_82, %c0_83], %283 {strides = array<i32>} : memref<8x16x512xf32, #tpu.memory_space<vmem>>, vector<1x16x512xf32>,
    %c7_i32 = arith.constant 7 : i32
    %284 = arith.index_cast %c7_i32 : i32 to index
    %c0_84 = arith.constant 0 : index
    %c0_85 = arith.constant 0 : index
    %285 = vector.load %arg15[%284, %c0_84, %c0_85] : memref<8x16x512xf32, #tpu.memory_space<vmem>>, vector<1x16x512xf32>
    %286 = vector.shape_cast %285 : vector<1x16x512xf32> to vector<16x512xf32>
    %287 = arith.truncf %276 : vector<16x128xf32> to vector<16x128xbf16>
    %cst_86 = arith.constant dense<0.000000e+00> : vector<16x512xf32>
    %288 = tpu.matmul %287, %9, %cst_86 {dimension_numbers = #tpu.dot_dimension_numbers<[1], [0], [0], [1], [0, 0, 1, 1], [], []>} : vector<16x128xbf16>, vector<128x512xbf16>, vector<16x512xf32> -> vector<16x512xf32>
    %289 = arith.addf %286, %288 : vector<16x512xf32>
    %290 = vector.extract_strided_slice %289 {offsets = [0, 0], sizes = [16, 128], strides = [1, 1]} : vector<16x512xf32> to vector<16x128xf32>
    %291 = arith.negf %290 : vector<16x128xf32>
    %292 = math.exp %291 : vector<16x128xf32>
    %cst_87 = arith.constant 1.000000e+00 : f32
    %293 = vector.broadcast %cst_87 : f32 to vector<16x128xf32>
    %294 = arith.addf %293, %292 : vector<16x128xf32>
    %295 = arith.divf %293, %294 : vector<16x128xf32>
    %296 = vector.extract_strided_slice %289 {offsets = [0, 128], sizes = [16, 128], strides = [1, 1]} : vector<16x512xf32> to vector<16x128xf32>
    %297 = arith.negf %296 : vector<16x128xf32>
    %298 = math.exp %297 : vector<16x128xf32>
    %cst_88 = arith.constant 1.000000e+00 : f32
    %299 = vector.broadcast %cst_88 : f32 to vector<16x128xf32>
    %300 = arith.addf %299, %298 : vector<16x128xf32>
    %301 = arith.divf %299, %300 : vector<16x128xf32>
    %302 = vector.extract_strided_slice %289 {offsets = [0, 256], sizes = [16, 128], strides = [1, 1]} : vector<16x512xf32> to vector<16x128xf32>
    %303 = math.tanh %302 : vector<16x128xf32>
    %304 = vector.extract_strided_slice %289 {offsets = [0, 384], sizes = [16, 128], strides = [1, 1]} : vector<16x512xf32> to vector<16x128xf32>
    %305 = arith.negf %304 : vector<16x128xf32>
    %306 = math.exp %305 : vector<16x128xf32>
    %cst_89 = arith.constant 1.000000e+00 : f32
    %307 = vector.broadcast %cst_89 : f32 to vector<16x128xf32>
    %308 = arith.addf %307, %306 : vector<16x128xf32>
    %309 = arith.divf %307, %308 : vector<16x128xf32>
    %310 = arith.mulf %301, %274 : vector<16x128xf32>
    %311 = arith.mulf %295, %303 : vector<16x128xf32>
    %312 = arith.addf %310, %311 : vector<16x128xf32>
    %313 = math.tanh %312 : vector<16x128xf32>
    %314 = arith.mulf %309, %313 : vector<16x128xf32>
    %315 = arith.truncf %314 : vector<16x128xf32> to vector<16x128xbf16>
    %cst_90 = arith.constant dense<0.000000e+00> : vector<16x512xf32>
    %316 = tpu.matmul %315, %10, %cst_90 {dimension_numbers = #tpu.dot_dimension_numbers<[1], [0], [0], [1], [0, 0, 1, 1], [], []>} : vector<16x128xbf16>, vector<128x512xbf16>, vector<16x512xf32> -> vector<16x512xf32>
    %317 = arith.addf %316, %13 : vector<16x512xf32>
    %318 = arith.index_cast %c7_i32 : i32 to index
    %c0_91 = arith.constant 0 : index
    %c0_92 = arith.constant 0 : index
    %319 = vector.load %arg16[%318, %c0_91, %c0_92] : memref<8x16x512xf32, #tpu.memory_space<vmem>>, vector<1x16x512xf32>
    %320 = vector.shape_cast %319 : vector<1x16x512xf32> to vector<16x512xf32>
    %321 = vector.shape_cast %317 : vector<16x512xf32> to vector<1x16x512xf32>
    tpu.vector_store %arg16[%318, %c0_91, %c0_92], %321 {strides = array<i32>} : memref<8x16x512xf32, #tpu.memory_space<vmem>>, vector<1x16x512xf32>,
    %c8_i32 = arith.constant 8 : i32
    %c0_93 = arith.constant 0 : index
    %c0_94 = arith.constant 0 : index
    %c0_95 = arith.constant 0 : index
    %322 = vector.load %arg13[%c0_93, %c0_94, %c0_95] : memref<2x16x128xf32, #tpu.memory_space<vmem>>, vector<1x16x128xf32>
    %323 = vector.shape_cast %322 : vector<1x16x128xf32> to vector<16x128xf32>
    %324 = vector.shape_cast %314 : vector<16x128xf32> to vector<1x16x128xf32>
    tpu.vector_store %arg13[%c0_93, %c0_94, %c0_95], %324 {strides = array<i32>} : memref<2x16x128xf32, #tpu.memory_space<vmem>>, vector<1x16x128xf32>,
    %c0_96 = arith.constant 0 : index
    %c0_97 = arith.constant 0 : index
    %c0_98 = arith.constant 0 : index
    %325 = vector.load %arg14[%c0_96, %c0_97, %c0_98] : memref<2x16x128xf32, #tpu.memory_space<vmem>>, vector<1x16x128xf32>
    %326 = vector.shape_cast %325 : vector<1x16x128xf32> to vector<16x128xf32>
    %327 = vector.shape_cast %312 : vector<16x128xf32> to vector<1x16x128xf32>
    tpu.vector_store %arg14[%c0_96, %c0_97, %c0_98], %327 {strides = array<i32>} : memref<2x16x128xf32, #tpu.memory_space<vmem>>, vector<1x16x128xf32>,
    %c0_99 = arith.constant 0 : index
    %c0_100 = arith.constant 0 : index
    %328 = vector.load %arg8[%c0_99, %c0_100] : memref<128x512xbf16, #tpu.memory_space<vmem>>, vector<128x512xbf16>
    %c0_101 = arith.constant 0 : index
    %c0_102 = arith.constant 0 : index
    %329 = vector.load %arg10[%c0_101, %c0_102] : memref<128x128xbf16, #tpu.memory_space<vmem>>, vector<128x128xbf16>
    %c0_103 = arith.constant 0 : index
    %c0_104 = arith.constant 0 : index
    %330 = vector.load %arg11[%c0_103, %c0_104] : memref<1x128xf32, #tpu.memory_space<vmem>>, vector<1x128xf32>
    %331 = vector.shape_cast %330 : vector<1x128xf32> to vector<1x128xf32>
    %332 = vector.broadcast %331 : vector<1x128xf32> to vector<16x128xf32>
    %c1 = arith.constant 1 : index
    %c0_105 = arith.constant 0 : index
    %c0_106 = arith.constant 0 : index
    %333 = vector.load %arg2[%c1, %c0_105, %c0_106] : memref<2x16x128xf32, #tpu.memory_space<vmem>>, vector<1x16x128xf32>
    %334 = vector.shape_cast %333 : vector<1x16x128xf32> to vector<16x128xf32>
    %c1_107 = arith.constant 1 : index
    %c0_108 = arith.constant 0 : index
    %c0_109 = arith.constant 0 : index
    %335 = vector.load %arg3[%c1_107, %c0_108, %c0_109] : memref<2x16x128xf32, #tpu.memory_space<vmem>>, vector<1x16x128xf32>
    %336 = vector.shape_cast %335 : vector<1x16x128xf32> to vector<16x128xf32>
    %c0_i32_110 = arith.constant 0 : i32
    %337 = arith.index_cast %c0_i32_110 : i32 to index
    %c0_111 = arith.constant 0 : index
    %c0_112 = arith.constant 0 : index
    %338 = vector.load %arg16[%337, %c0_111, %c0_112] : memref<8x16x512xf32, #tpu.memory_space<vmem>>, vector<1x16x512xf32>
    %339 = vector.shape_cast %338 : vector<1x16x512xf32> to vector<16x512xf32>
    %340 = arith.truncf %334 : vector<16x128xf32> to vector<16x128xbf16>
    %cst_113 = arith.constant dense<0.000000e+00> : vector<16x512xf32>
    %341 = tpu.matmul %340, %328, %cst_113 {dimension_numbers = #tpu.dot_dimension_numbers<[1], [0], [0], [1], [0, 0, 1, 1], [], []>} : vector<16x128xbf16>, vector<128x512xbf16>, vector<16x512xf32> -> vector<16x512xf32>
    %342 = arith.addf %339, %341 : vector<16x512xf32>
    %343 = vector.extract_strided_slice %342 {offsets = [0, 0], sizes = [16, 128], strides = [1, 1]} : vector<16x512xf32> to vector<16x128xf32>
    %344 = arith.negf %343 : vector<16x128xf32>
    %345 = math.exp %344 : vector<16x128xf32>
    %cst_114 = arith.constant 1.000000e+00 : f32
    %346 = vector.broadcast %cst_114 : f32 to vector<16x128xf32>
    %347 = arith.addf %346, %345 : vector<16x128xf32>
    %348 = arith.divf %346, %347 : vector<16x128xf32>
    %349 = vector.extract_strided_slice %342 {offsets = [0, 128], sizes = [16, 128], strides = [1, 1]} : vector<16x512xf32> to vector<16x128xf32>
    %350 = arith.negf %349 : vector<16x128xf32>
    %351 = math.exp %350 : vector<16x128xf32>
    %cst_115 = arith.constant 1.000000e+00 : f32
    %352 = vector.broadcast %cst_115 : f32 to vector<16x128xf32>
    %353 = arith.addf %352, %351 : vector<16x128xf32>
    %354 = arith.divf %352, %353 : vector<16x128xf32>
    %355 = vector.extract_strided_slice %342 {offsets = [0, 256], sizes = [16, 128], strides = [1, 1]} : vector<16x512xf32> to vector<16x128xf32>
    %356 = math.tanh %355 : vector<16x128xf32>
    %357 = vector.extract_strided_slice %342 {offsets = [0, 384], sizes = [16, 128], strides = [1, 1]} : vector<16x512xf32> to vector<16x128xf32>
    %358 = arith.negf %357 : vector<16x128xf32>
    %359 = math.exp %358 : vector<16x128xf32>
    %cst_116 = arith.constant 1.000000e+00 : f32
    %360 = vector.broadcast %cst_116 : f32 to vector<16x128xf32>
    %361 = arith.addf %360, %359 : vector<16x128xf32>
    %362 = arith.divf %360, %361 : vector<16x128xf32>
    %363 = arith.mulf %354, %336 : vector<16x128xf32>
    %364 = arith.mulf %348, %356 : vector<16x128xf32>
    %365 = arith.addf %363, %364 : vector<16x128xf32>
    %366 = math.tanh %365 : vector<16x128xf32>
    %367 = arith.mulf %362, %366 : vector<16x128xf32>
    %368 = arith.truncf %367 : vector<16x128xf32> to vector<16x128xbf16>
    %cst_117 = arith.constant dense<0.000000e+00> : vector<16x128xf32>
    %369 = tpu.matmul %368, %329, %cst_117 {dimension_numbers = #tpu.dot_dimension_numbers<[1], [0], [0], [1], [0, 0, 1, 1], [], []>} : vector<16x128xbf16>, vector<128x128xbf16>, vector<16x128xf32> -> vector<16x128xf32>
    %370 = arith.addf %369, %332 : vector<16x128xf32>
    %371 = arith.index_cast %c0_i32_110 : i32 to index
    %c0_118 = arith.constant 0 : index
    %c0_119 = arith.constant 0 : index
    %372 = vector.load %arg17[%371, %c0_118, %c0_119] : memref<8x16x128xf32, #tpu.memory_space<vmem>>, vector<1x16x128xf32>
    %373 = vector.shape_cast %372 : vector<1x16x128xf32> to vector<16x128xf32>
    %374 = vector.shape_cast %370 : vector<16x128xf32> to vector<1x16x128xf32>
    tpu.vector_store %arg17[%371, %c0_118, %c0_119], %374 {strides = array<i32>} : memref<8x16x128xf32, #tpu.memory_space<vmem>>, vector<1x16x128xf32>,
    %c1_i32_120 = arith.constant 1 : i32
    %375 = arith.index_cast %c1_i32_120 : i32 to index
    %c0_121 = arith.constant 0 : index
    %c0_122 = arith.constant 0 : index
    %376 = vector.load %arg16[%375, %c0_121, %c0_122] : memref<8x16x512xf32, #tpu.memory_space<vmem>>, vector<1x16x512xf32>
    %377 = vector.shape_cast %376 : vector<1x16x512xf32> to vector<16x512xf32>
    %378 = arith.truncf %367 : vector<16x128xf32> to vector<16x128xbf16>
    %cst_123 = arith.constant dense<0.000000e+00> : vector<16x512xf32>
    %379 = tpu.matmul %378, %328, %cst_123 {dimension_numbers = #tpu.dot_dimension_numbers<[1], [0], [0], [1], [0, 0, 1, 1], [], []>} : vector<16x128xbf16>, vector<128x512xbf16>, vector<16x512xf32> -> vector<16x512xf32>
    %380 = arith.addf %377, %379 : vector<16x512xf32>
    %381 = vector.extract_strided_slice %380 {offsets = [0, 0], sizes = [16, 128], strides = [1, 1]} : vector<16x512xf32> to vector<16x128xf32>
    %382 = arith.negf %381 : vector<16x128xf32>
    %383 = math.exp %382 : vector<16x128xf32>
    %cst_124 = arith.constant 1.000000e+00 : f32
    %384 = vector.broadcast %cst_124 : f32 to vector<16x128xf32>
    %385 = arith.addf %384, %383 : vector<16x128xf32>
    %386 = arith.divf %384, %385 : vector<16x128xf32>
    %387 = vector.extract_strided_slice %380 {offsets = [0, 128], sizes = [16, 128], strides = [1, 1]} : vector<16x512xf32> to vector<16x128xf32>
    %388 = arith.negf %387 : vector<16x128xf32>
    %389 = math.exp %388 : vector<16x128xf32>
    %cst_125 = arith.constant 1.000000e+00 : f32
    %390 = vector.broadcast %cst_125 : f32 to vector<16x128xf32>
    %391 = arith.addf %390, %389 : vector<16x128xf32>
    %392 = arith.divf %390, %391 : vector<16x128xf32>
    %393 = vector.extract_strided_slice %380 {offsets = [0, 256], sizes = [16, 128], strides = [1, 1]} : vector<16x512xf32> to vector<16x128xf32>
    %394 = math.tanh %393 : vector<16x128xf32>
    %395 = vector.extract_strided_slice %380 {offsets = [0, 384], sizes = [16, 128], strides = [1, 1]} : vector<16x512xf32> to vector<16x128xf32>
    %396 = arith.negf %395 : vector<16x128xf32>
    %397 = math.exp %396 : vector<16x128xf32>
    %cst_126 = arith.constant 1.000000e+00 : f32
    %398 = vector.broadcast %cst_126 : f32 to vector<16x128xf32>
    %399 = arith.addf %398, %397 : vector<16x128xf32>
    %400 = arith.divf %398, %399 : vector<16x128xf32>
    %401 = arith.mulf %392, %365 : vector<16x128xf32>
    %402 = arith.mulf %386, %394 : vector<16x128xf32>
    %403 = arith.addf %401, %402 : vector<16x128xf32>
    %404 = math.tanh %403 : vector<16x128xf32>
    %405 = arith.mulf %400, %404 : vector<16x128xf32>
    %406 = arith.truncf %405 : vector<16x128xf32> to vector<16x128xbf16>
    %cst_127 = arith.constant dense<0.000000e+00> : vector<16x128xf32>
    %407 = tpu.matmul %406, %329, %cst_127 {dimension_numbers = #tpu.dot_dimension_numbers<[1], [0], [0], [1], [0, 0, 1, 1], [], []>} : vector<16x128xbf16>, vector<128x128xbf16>, vector<16x128xf32> -> vector<16x128xf32>
    %408 = arith.addf %407, %332 : vector<16x128xf32>
    %409 = arith.index_cast %c1_i32_120 : i32 to index
    %c0_128 = arith.constant 0 : index
    %c0_129 = arith.constant 0 : index
    %410 = vector.load %arg17[%409, %c0_128, %c0_129] : memref<8x16x128xf32, #tpu.memory_space<vmem>>, vector<1x16x128xf32>
    %411 = vector.shape_cast %410 : vector<1x16x128xf32> to vector<16x128xf32>
    %412 = vector.shape_cast %408 : vector<16x128xf32> to vector<1x16x128xf32>
    tpu.vector_store %arg17[%409, %c0_128, %c0_129], %412 {strides = array<i32>} : memref<8x16x128xf32, #tpu.memory_space<vmem>>, vector<1x16x128xf32>,
    %c2_i32_130 = arith.constant 2 : i32
    %413 = arith.index_cast %c2_i32_130 : i32 to index
    %c0_131 = arith.constant 0 : index
    %c0_132 = arith.constant 0 : index
    %414 = vector.load %arg16[%413, %c0_131, %c0_132] : memref<8x16x512xf32, #tpu.memory_space<vmem>>, vector<1x16x512xf32>
    %415 = vector.shape_cast %414 : vector<1x16x512xf32> to vector<16x512xf32>
    %416 = arith.truncf %405 : vector<16x128xf32> to vector<16x128xbf16>
    %cst_133 = arith.constant dense<0.000000e+00> : vector<16x512xf32>
    %417 = tpu.matmul %416, %328, %cst_133 {dimension_numbers = #tpu.dot_dimension_numbers<[1], [0], [0], [1], [0, 0, 1, 1], [], []>} : vector<16x128xbf16>, vector<128x512xbf16>, vector<16x512xf32> -> vector<16x512xf32>
    %418 = arith.addf %415, %417 : vector<16x512xf32>
    %419 = vector.extract_strided_slice %418 {offsets = [0, 0], sizes = [16, 128], strides = [1, 1]} : vector<16x512xf32> to vector<16x128xf32>
    %420 = arith.negf %419 : vector<16x128xf32>
    %421 = math.exp %420 : vector<16x128xf32>
    %cst_134 = arith.constant 1.000000e+00 : f32
    %422 = vector.broadcast %cst_134 : f32 to vector<16x128xf32>
    %423 = arith.addf %422, %421 : vector<16x128xf32>
    %424 = arith.divf %422, %423 : vector<16x128xf32>
    %425 = vector.extract_strided_slice %418 {offsets = [0, 128], sizes = [16, 128], strides = [1, 1]} : vector<16x512xf32> to vector<16x128xf32>
    %426 = arith.negf %425 : vector<16x128xf32>
    %427 = math.exp %426 : vector<16x128xf32>
    %cst_135 = arith.constant 1.000000e+00 : f32
    %428 = vector.broadcast %cst_135 : f32 to vector<16x128xf32>
    %429 = arith.addf %428, %427 : vector<16x128xf32>
    %430 = arith.divf %428, %429 : vector<16x128xf32>
    %431 = vector.extract_strided_slice %418 {offsets = [0, 256], sizes = [16, 128], strides = [1, 1]} : vector<16x512xf32> to vector<16x128xf32>
    %432 = math.tanh %431 : vector<16x128xf32>
    %433 = vector.extract_strided_slice %418 {offsets = [0, 384], sizes = [16, 128], strides = [1, 1]} : vector<16x512xf32> to vector<16x128xf32>
    %434 = arith.negf %433 : vector<16x128xf32>
    %435 = math.exp %434 : vector<16x128xf32>
    %cst_136 = arith.constant 1.000000e+00 : f32
    %436 = vector.broadcast %cst_136 : f32 to vector<16x128xf32>
    %437 = arith.addf %436, %435 : vector<16x128xf32>
    %438 = arith.divf %436, %437 : vector<16x128xf32>
    %439 = arith.mulf %430, %403 : vector<16x128xf32>
    %440 = arith.mulf %424, %432 : vector<16x128xf32>
    %441 = arith.addf %439, %440 : vector<16x128xf32>
    %442 = math.tanh %441 : vector<16x128xf32>
    %443 = arith.mulf %438, %442 : vector<16x128xf32>
    %444 = arith.truncf %443 : vector<16x128xf32> to vector<16x128xbf16>
    %cst_137 = arith.constant dense<0.000000e+00> : vector<16x128xf32>
    %445 = tpu.matmul %444, %329, %cst_137 {dimension_numbers = #tpu.dot_dimension_numbers<[1], [0], [0], [1], [0, 0, 1, 1], [], []>} : vector<16x128xbf16>, vector<128x128xbf16>, vector<16x128xf32> -> vector<16x128xf32>
    %446 = arith.addf %445, %332 : vector<16x128xf32>
    %447 = arith.index_cast %c2_i32_130 : i32 to index
    %c0_138 = arith.constant 0 : index
    %c0_139 = arith.constant 0 : index
    %448 = vector.load %arg17[%447, %c0_138, %c0_139] : memref<8x16x128xf32, #tpu.memory_space<vmem>>, vector<1x16x128xf32>
    %449 = vector.shape_cast %448 : vector<1x16x128xf32> to vector<16x128xf32>
    %450 = vector.shape_cast %446 : vector<16x128xf32> to vector<1x16x128xf32>
    tpu.vector_store %arg17[%447, %c0_138, %c0_139], %450 {strides = array<i32>} : memref<8x16x128xf32, #tpu.memory_space<vmem>>, vector<1x16x128xf32>,
    %c3_i32_140 = arith.constant 3 : i32
    %451 = arith.index_cast %c3_i32_140 : i32 to index
    %c0_141 = arith.constant 0 : index
    %c0_142 = arith.constant 0 : index
    %452 = vector.load %arg16[%451, %c0_141, %c0_142] : memref<8x16x512xf32, #tpu.memory_space<vmem>>, vector<1x16x512xf32>
    %453 = vector.shape_cast %452 : vector<1x16x512xf32> to vector<16x512xf32>
    %454 = arith.truncf %443 : vector<16x128xf32> to vector<16x128xbf16>
    %cst_143 = arith.constant dense<0.000000e+00> : vector<16x512xf32>
    %455 = tpu.matmul %454, %328, %cst_143 {dimension_numbers = #tpu.dot_dimension_numbers<[1], [0], [0], [1], [0, 0, 1, 1], [], []>} : vector<16x128xbf16>, vector<128x512xbf16>, vector<16x512xf32> -> vector<16x512xf32>
    %456 = arith.addf %453, %455 : vector<16x512xf32>
    %457 = vector.extract_strided_slice %456 {offsets = [0, 0], sizes = [16, 128], strides = [1, 1]} : vector<16x512xf32> to vector<16x128xf32>
    %458 = arith.negf %457 : vector<16x128xf32>
    %459 = math.exp %458 : vector<16x128xf32>
    %cst_144 = arith.constant 1.000000e+00 : f32
    %460 = vector.broadcast %cst_144 : f32 to vector<16x128xf32>
    %461 = arith.addf %460, %459 : vector<16x128xf32>
    %462 = arith.divf %460, %461 : vector<16x128xf32>
    %463 = vector.extract_strided_slice %456 {offsets = [0, 128], sizes = [16, 128], strides = [1, 1]} : vector<16x512xf32> to vector<16x128xf32>
    %464 = arith.negf %463 : vector<16x128xf32>
    %465 = math.exp %464 : vector<16x128xf32>
    %cst_145 = arith.constant 1.000000e+00 : f32
    %466 = vector.broadcast %cst_145 : f32 to vector<16x128xf32>
    %467 = arith.addf %466, %465 : vector<16x128xf32>
    %468 = arith.divf %466, %467 : vector<16x128xf32>
    %469 = vector.extract_strided_slice %456 {offsets = [0, 256], sizes = [16, 128], strides = [1, 1]} : vector<16x512xf32> to vector<16x128xf32>
    %470 = math.tanh %469 : vector<16x128xf32>
    %471 = vector.extract_strided_slice %456 {offsets = [0, 384], sizes = [16, 128], strides = [1, 1]} : vector<16x512xf32> to vector<16x128xf32>
    %472 = arith.negf %471 : vector<16x128xf32>
    %473 = math.exp %472 : vector<16x128xf32>
    %cst_146 = arith.constant 1.000000e+00 : f32
    %474 = vector.broadcast %cst_146 : f32 to vector<16x128xf32>
    %475 = arith.addf %474, %473 : vector<16x128xf32>
    %476 = arith.divf %474, %475 : vector<16x128xf32>
    %477 = arith.mulf %468, %441 : vector<16x128xf32>
    %478 = arith.mulf %462, %470 : vector<16x128xf32>
    %479 = arith.addf %477, %478 : vector<16x128xf32>
    %480 = math.tanh %479 : vector<16x128xf32>
    %481 = arith.mulf %476, %480 : vector<16x128xf32>
    %482 = arith.truncf %481 : vector<16x128xf32> to vector<16x128xbf16>
    %cst_147 = arith.constant dense<0.000000e+00> : vector<16x128xf32>
    %483 = tpu.matmul %482, %329, %cst_147 {dimension_numbers = #tpu.dot_dimension_numbers<[1], [0], [0], [1], [0, 0, 1, 1], [], []>} : vector<16x128xbf16>, vector<128x128xbf16>, vector<16x128xf32> -> vector<16x128xf32>
    %484 = arith.addf %483, %332 : vector<16x128xf32>
    %485 = arith.index_cast %c3_i32_140 : i32 to index
    %c0_148 = arith.constant 0 : index
    %c0_149 = arith.constant 0 : index
    %486 = vector.load %arg17[%485, %c0_148, %c0_149] : memref<8x16x128xf32, #tpu.memory_space<vmem>>, vector<1x16x128xf32>
    %487 = vector.shape_cast %486 : vector<1x16x128xf32> to vector<16x128xf32>
    %488 = vector.shape_cast %484 : vector<16x128xf32> to vector<1x16x128xf32>
    tpu.vector_store %arg17[%485, %c0_148, %c0_149], %488 {strides = array<i32>} : memref<8x16x128xf32, #tpu.memory_space<vmem>>, vector<1x16x128xf32>,
    %c4_i32_150 = arith.constant 4 : i32
    %489 = arith.index_cast %c4_i32_150 : i32 to index
    %c0_151 = arith.constant 0 : index
    %c0_152 = arith.constant 0 : index
    %490 = vector.load %arg16[%489, %c0_151, %c0_152] : memref<8x16x512xf32, #tpu.memory_space<vmem>>, vector<1x16x512xf32>
    %491 = vector.shape_cast %490 : vector<1x16x512xf32> to vector<16x512xf32>
    %492 = arith.truncf %481 : vector<16x128xf32> to vector<16x128xbf16>
    %cst_153 = arith.constant dense<0.000000e+00> : vector<16x512xf32>
    %493 = tpu.matmul %492, %328, %cst_153 {dimension_numbers = #tpu.dot_dimension_numbers<[1], [0], [0], [1], [0, 0, 1, 1], [], []>} : vector<16x128xbf16>, vector<128x512xbf16>, vector<16x512xf32> -> vector<16x512xf32>
    %494 = arith.addf %491, %493 : vector<16x512xf32>
    %495 = vector.extract_strided_slice %494 {offsets = [0, 0], sizes = [16, 128], strides = [1, 1]} : vector<16x512xf32> to vector<16x128xf32>
    %496 = arith.negf %495 : vector<16x128xf32>
    %497 = math.exp %496 : vector<16x128xf32>
    %cst_154 = arith.constant 1.000000e+00 : f32
    %498 = vector.broadcast %cst_154 : f32 to vector<16x128xf32>
    %499 = arith.addf %498, %497 : vector<16x128xf32>
    %500 = arith.divf %498, %499 : vector<16x128xf32>
    %501 = vector.extract_strided_slice %494 {offsets = [0, 128], sizes = [16, 128], strides = [1, 1]} : vector<16x512xf32> to vector<16x128xf32>
    %502 = arith.negf %501 : vector<16x128xf32>
    %503 = math.exp %502 : vector<16x128xf32>
    %cst_155 = arith.constant 1.000000e+00 : f32
    %504 = vector.broadcast %cst_155 : f32 to vector<16x128xf32>
    %505 = arith.addf %504, %503 : vector<16x128xf32>
    %506 = arith.divf %504, %505 : vector<16x128xf32>
    %507 = vector.extract_strided_slice %494 {offsets = [0, 256], sizes = [16, 128], strides = [1, 1]} : vector<16x512xf32> to vector<16x128xf32>
    %508 = math.tanh %507 : vector<16x128xf32>
    %509 = vector.extract_strided_slice %494 {offsets = [0, 384], sizes = [16, 128], strides = [1, 1]} : vector<16x512xf32> to vector<16x128xf32>
    %510 = arith.negf %509 : vector<16x128xf32>
    %511 = math.exp %510 : vector<16x128xf32>
    %cst_156 = arith.constant 1.000000e+00 : f32
    %512 = vector.broadcast %cst_156 : f32 to vector<16x128xf32>
    %513 = arith.addf %512, %511 : vector<16x128xf32>
    %514 = arith.divf %512, %513 : vector<16x128xf32>
    %515 = arith.mulf %506, %479 : vector<16x128xf32>
    %516 = arith.mulf %500, %508 : vector<16x128xf32>
    %517 = arith.addf %515, %516 : vector<16x128xf32>
    %518 = math.tanh %517 : vector<16x128xf32>
    %519 = arith.mulf %514, %518 : vector<16x128xf32>
    %520 = arith.truncf %519 : vector<16x128xf32> to vector<16x128xbf16>
    %cst_157 = arith.constant dense<0.000000e+00> : vector<16x128xf32>
    %521 = tpu.matmul %520, %329, %cst_157 {dimension_numbers = #tpu.dot_dimension_numbers<[1], [0], [0], [1], [0, 0, 1, 1], [], []>} : vector<16x128xbf16>, vector<128x128xbf16>, vector<16x128xf32> -> vector<16x128xf32>
    %522 = arith.addf %521, %332 : vector<16x128xf32>
    %523 = arith.index_cast %c4_i32_150 : i32 to index
    %c0_158 = arith.constant 0 : index
    %c0_159 = arith.constant 0 : index
    %524 = vector.load %arg17[%523, %c0_158, %c0_159] : memref<8x16x128xf32, #tpu.memory_space<vmem>>, vector<1x16x128xf32>
    %525 = vector.shape_cast %524 : vector<1x16x128xf32> to vector<16x128xf32>
    %526 = vector.shape_cast %522 : vector<16x128xf32> to vector<1x16x128xf32>
    tpu.vector_store %arg17[%523, %c0_158, %c0_159], %526 {strides = array<i32>} : memref<8x16x128xf32, #tpu.memory_space<vmem>>, vector<1x16x128xf32>,
    %c5_i32_160 = arith.constant 5 : i32
    %527 = arith.index_cast %c5_i32_160 : i32 to index
    %c0_161 = arith.constant 0 : index
    %c0_162 = arith.constant 0 : index
    %528 = vector.load %arg16[%527, %c0_161, %c0_162] : memref<8x16x512xf32, #tpu.memory_space<vmem>>, vector<1x16x512xf32>
    %529 = vector.shape_cast %528 : vector<1x16x512xf32> to vector<16x512xf32>
    %530 = arith.truncf %519 : vector<16x128xf32> to vector<16x128xbf16>
    %cst_163 = arith.constant dense<0.000000e+00> : vector<16x512xf32>
    %531 = tpu.matmul %530, %328, %cst_163 {dimension_numbers = #tpu.dot_dimension_numbers<[1], [0], [0], [1], [0, 0, 1, 1], [], []>} : vector<16x128xbf16>, vector<128x512xbf16>, vector<16x512xf32> -> vector<16x512xf32>
    %532 = arith.addf %529, %531 : vector<16x512xf32>
    %533 = vector.extract_strided_slice %532 {offsets = [0, 0], sizes = [16, 128], strides = [1, 1]} : vector<16x512xf32> to vector<16x128xf32>
    %534 = arith.negf %533 : vector<16x128xf32>
    %535 = math.exp %534 : vector<16x128xf32>
    %cst_164 = arith.constant 1.000000e+00 : f32
    %536 = vector.broadcast %cst_164 : f32 to vector<16x128xf32>
    %537 = arith.addf %536, %535 : vector<16x128xf32>
    %538 = arith.divf %536, %537 : vector<16x128xf32>
    %539 = vector.extract_strided_slice %532 {offsets = [0, 128], sizes = [16, 128], strides = [1, 1]} : vector<16x512xf32> to vector<16x128xf32>
    %540 = arith.negf %539 : vector<16x128xf32>
    %541 = math.exp %540 : vector<16x128xf32>
    %cst_165 = arith.constant 1.000000e+00 : f32
    %542 = vector.broadcast %cst_165 : f32 to vector<16x128xf32>
    %543 = arith.addf %542, %541 : vector<16x128xf32>
    %544 = arith.divf %542, %543 : vector<16x128xf32>
    %545 = vector.extract_strided_slice %532 {offsets = [0, 256], sizes = [16, 128], strides = [1, 1]} : vector<16x512xf32> to vector<16x128xf32>
    %546 = math.tanh %545 : vector<16x128xf32>
    %547 = vector.extract_strided_slice %532 {offsets = [0, 384], sizes = [16, 128], strides = [1, 1]} : vector<16x512xf32> to vector<16x128xf32>
    %548 = arith.negf %547 : vector<16x128xf32>
    %549 = math.exp %548 : vector<16x128xf32>
    %cst_166 = arith.constant 1.000000e+00 : f32
    %550 = vector.broadcast %cst_166 : f32 to vector<16x128xf32>
    %551 = arith.addf %550, %549 : vector<16x128xf32>
    %552 = arith.divf %550, %551 : vector<16x128xf32>
    %553 = arith.mulf %544, %517 : vector<16x128xf32>
    %554 = arith.mulf %538, %546 : vector<16x128xf32>
    %555 = arith.addf %553, %554 : vector<16x128xf32>
    %556 = math.tanh %555 : vector<16x128xf32>
    %557 = arith.mulf %552, %556 : vector<16x128xf32>
    %558 = arith.truncf %557 : vector<16x128xf32> to vector<16x128xbf16>
    %cst_167 = arith.constant dense<0.000000e+00> : vector<16x128xf32>
    %559 = tpu.matmul %558, %329, %cst_167 {dimension_numbers = #tpu.dot_dimension_numbers<[1], [0], [0], [1], [0, 0, 1, 1], [], []>} : vector<16x128xbf16>, vector<128x128xbf16>, vector<16x128xf32> -> vector<16x128xf32>
    %560 = arith.addf %559, %332 : vector<16x128xf32>
    %561 = arith.index_cast %c5_i32_160 : i32 to index
    %c0_168 = arith.constant 0 : index
    %c0_169 = arith.constant 0 : index
    %562 = vector.load %arg17[%561, %c0_168, %c0_169] : memref<8x16x128xf32, #tpu.memory_space<vmem>>, vector<1x16x128xf32>
    %563 = vector.shape_cast %562 : vector<1x16x128xf32> to vector<16x128xf32>
    %564 = vector.shape_cast %560 : vector<16x128xf32> to vector<1x16x128xf32>
    tpu.vector_store %arg17[%561, %c0_168, %c0_169], %564 {strides = array<i32>} : memref<8x16x128xf32, #tpu.memory_space<vmem>>, vector<1x16x128xf32>,
    %c6_i32_170 = arith.constant 6 : i32
    %565 = arith.index_cast %c6_i32_170 : i32 to index
    %c0_171 = arith.constant 0 : index
    %c0_172 = arith.constant 0 : index
    %566 = vector.load %arg16[%565, %c0_171, %c0_172] : memref<8x16x512xf32, #tpu.memory_space<vmem>>, vector<1x16x512xf32>
    %567 = vector.shape_cast %566 : vector<1x16x512xf32> to vector<16x512xf32>
    %568 = arith.truncf %557 : vector<16x128xf32> to vector<16x128xbf16>
    %cst_173 = arith.constant dense<0.000000e+00> : vector<16x512xf32>
    %569 = tpu.matmul %568, %328, %cst_173 {dimension_numbers = #tpu.dot_dimension_numbers<[1], [0], [0], [1], [0, 0, 1, 1], [], []>} : vector<16x128xbf16>, vector<128x512xbf16>, vector<16x512xf32> -> vector<16x512xf32>
    %570 = arith.addf %567, %569 : vector<16x512xf32>
    %571 = vector.extract_strided_slice %570 {offsets = [0, 0], sizes = [16, 128], strides = [1, 1]} : vector<16x512xf32> to vector<16x128xf32>
    %572 = arith.negf %571 : vector<16x128xf32>
    %573 = math.exp %572 : vector<16x128xf32>
    %cst_174 = arith.constant 1.000000e+00 : f32
    %574 = vector.broadcast %cst_174 : f32 to vector<16x128xf32>
    %575 = arith.addf %574, %573 : vector<16x128xf32>
    %576 = arith.divf %574, %575 : vector<16x128xf32>
    %577 = vector.extract_strided_slice %570 {offsets = [0, 128], sizes = [16, 128], strides = [1, 1]} : vector<16x512xf32> to vector<16x128xf32>
    %578 = arith.negf %577 : vector<16x128xf32>
    %579 = math.exp %578 : vector<16x128xf32>
    %cst_175 = arith.constant 1.000000e+00 : f32
    %580 = vector.broadcast %cst_175 : f32 to vector<16x128xf32>
    %581 = arith.addf %580, %579 : vector<16x128xf32>
    %582 = arith.divf %580, %581 : vector<16x128xf32>
    %583 = vector.extract_strided_slice %570 {offsets = [0, 256], sizes = [16, 128], strides = [1, 1]} : vector<16x512xf32> to vector<16x128xf32>
    %584 = math.tanh %583 : vector<16x128xf32>
    %585 = vector.extract_strided_slice %570 {offsets = [0, 384], sizes = [16, 128], strides = [1, 1]} : vector<16x512xf32> to vector<16x128xf32>
    %586 = arith.negf %585 : vector<16x128xf32>
    %587 = math.exp %586 : vector<16x128xf32>
    %cst_176 = arith.constant 1.000000e+00 : f32
    %588 = vector.broadcast %cst_176 : f32 to vector<16x128xf32>
    %589 = arith.addf %588, %587 : vector<16x128xf32>
    %590 = arith.divf %588, %589 : vector<16x128xf32>
    %591 = arith.mulf %582, %555 : vector<16x128xf32>
    %592 = arith.mulf %576, %584 : vector<16x128xf32>
    %593 = arith.addf %591, %592 : vector<16x128xf32>
    %594 = math.tanh %593 : vector<16x128xf32>
    %595 = arith.mulf %590, %594 : vector<16x128xf32>
    %596 = arith.truncf %595 : vector<16x128xf32> to vector<16x128xbf16>
    %cst_177 = arith.constant dense<0.000000e+00> : vector<16x128xf32>
    %597 = tpu.matmul %596, %329, %cst_177 {dimension_numbers = #tpu.dot_dimension_numbers<[1], [0], [0], [1], [0, 0, 1, 1], [], []>} : vector<16x128xbf16>, vector<128x128xbf16>, vector<16x128xf32> -> vector<16x128xf32>
    %598 = arith.addf %597, %332 : vector<16x128xf32>
    %599 = arith.index_cast %c6_i32_170 : i32 to index
    %c0_178 = arith.constant 0 : index
    %c0_179 = arith.constant 0 : index
    %600 = vector.load %arg17[%599, %c0_178, %c0_179] : memref<8x16x128xf32, #tpu.memory_space<vmem>>, vector<1x16x128xf32>
    %601 = vector.shape_cast %600 : vector<1x16x128xf32> to vector<16x128xf32>
    %602 = vector.shape_cast %598 : vector<16x128xf32> to vector<1x16x128xf32>
    tpu.vector_store %arg17[%599, %c0_178, %c0_179], %602 {strides = array<i32>} : memref<8x16x128xf32, #tpu.memory_space<vmem>>, vector<1x16x128xf32>,
    %c7_i32_180 = arith.constant 7 : i32
    %603 = arith.index_cast %c7_i32_180 : i32 to index
    %c0_181 = arith.constant 0 : index
    %c0_182 = arith.constant 0 : index
    %604 = vector.load %arg16[%603, %c0_181, %c0_182] : memref<8x16x512xf32, #tpu.memory_space<vmem>>, vector<1x16x512xf32>
    %605 = vector.shape_cast %604 : vector<1x16x512xf32> to vector<16x512xf32>
    %606 = arith.truncf %595 : vector<16x128xf32> to vector<16x128xbf16>
    %cst_183 = arith.constant dense<0.000000e+00> : vector<16x512xf32>
    %607 = tpu.matmul %606, %328, %cst_183 {dimension_numbers = #tpu.dot_dimension_numbers<[1], [0], [0], [1], [0, 0, 1, 1], [], []>} : vector<16x128xbf16>, vector<128x512xbf16>, vector<16x512xf32> -> vector<16x512xf32>
    %608 = arith.addf %605, %607 : vector<16x512xf32>
    %609 = vector.extract_strided_slice %608 {offsets = [0, 0], sizes = [16, 128], strides = [1, 1]} : vector<16x512xf32> to vector<16x128xf32>
    %610 = arith.negf %609 : vector<16x128xf32>
    %611 = math.exp %610 : vector<16x128xf32>
    %cst_184 = arith.constant 1.000000e+00 : f32
    %612 = vector.broadcast %cst_184 : f32 to vector<16x128xf32>
    %613 = arith.addf %612, %611 : vector<16x128xf32>
    %614 = arith.divf %612, %613 : vector<16x128xf32>
    %615 = vector.extract_strided_slice %608 {offsets = [0, 128], sizes = [16, 128], strides = [1, 1]} : vector<16x512xf32> to vector<16x128xf32>
    %616 = arith.negf %615 : vector<16x128xf32>
    %617 = math.exp %616 : vector<16x128xf32>
    %cst_185 = arith.constant 1.000000e+00 : f32
    %618 = vector.broadcast %cst_185 : f32 to vector<16x128xf32>
    %619 = arith.addf %618, %617 : vector<16x128xf32>
    %620 = arith.divf %618, %619 : vector<16x128xf32>
    %621 = vector.extract_strided_slice %608 {offsets = [0, 256], sizes = [16, 128], strides = [1, 1]} : vector<16x512xf32> to vector<16x128xf32>
    %622 = math.tanh %621 : vector<16x128xf32>
    %623 = vector.extract_strided_slice %608 {offsets = [0, 384], sizes = [16, 128], strides = [1, 1]} : vector<16x512xf32> to vector<16x128xf32>
    %624 = arith.negf %623 : vector<16x128xf32>
    %625 = math.exp %624 : vector<16x128xf32>
    %cst_186 = arith.constant 1.000000e+00 : f32
    %626 = vector.broadcast %cst_186 : f32 to vector<16x128xf32>
    %627 = arith.addf %626, %625 : vector<16x128xf32>
    %628 = arith.divf %626, %627 : vector<16x128xf32>
    %629 = arith.mulf %620, %593 : vector<16x128xf32>
    %630 = arith.mulf %614, %622 : vector<16x128xf32>
    %631 = arith.addf %629, %630 : vector<16x128xf32>
    %632 = math.tanh %631 : vector<16x128xf32>
    %633 = arith.mulf %628, %632 : vector<16x128xf32>
    %634 = arith.truncf %633 : vector<16x128xf32> to vector<16x128xbf16>
    %cst_187 = arith.constant dense<0.000000e+00> : vector<16x128xf32>
    %635 = tpu.matmul %634, %329, %cst_187 {dimension_numbers = #tpu.dot_dimension_numbers<[1], [0], [0], [1], [0, 0, 1, 1], [], []>} : vector<16x128xbf16>, vector<128x128xbf16>, vector<16x128xf32> -> vector<16x128xf32>
    %636 = arith.addf %635, %332 : vector<16x128xf32>
    %637 = arith.index_cast %c7_i32_180 : i32 to index
    %c0_188 = arith.constant 0 : index
    %c0_189 = arith.constant 0 : index
    %638 = vector.load %arg17[%637, %c0_188, %c0_189] : memref<8x16x128xf32, #tpu.memory_space<vmem>>, vector<1x16x128xf32>
    %639 = vector.shape_cast %638 : vector<1x16x128xf32> to vector<16x128xf32>
    %640 = vector.shape_cast %636 : vector<16x128xf32> to vector<1x16x128xf32>
    tpu.vector_store %arg17[%637, %c0_188, %c0_189], %640 {strides = array<i32>} : memref<8x16x128xf32, #tpu.memory_space<vmem>>, vector<1x16x128xf32>,
    %c8_i32_190 = arith.constant 8 : i32
    %c1_191 = arith.constant 1 : index
    %c0_192 = arith.constant 0 : index
    %c0_193 = arith.constant 0 : index
    %641 = vector.load %arg13[%c1_191, %c0_192, %c0_193] : memref<2x16x128xf32, #tpu.memory_space<vmem>>, vector<1x16x128xf32>
    %642 = vector.shape_cast %641 : vector<1x16x128xf32> to vector<16x128xf32>
    %643 = vector.shape_cast %633 : vector<16x128xf32> to vector<1x16x128xf32>
    tpu.vector_store %arg13[%c1_191, %c0_192, %c0_193], %643 {strides = array<i32>} : memref<2x16x128xf32, #tpu.memory_space<vmem>>, vector<1x16x128xf32>,
    %c1_194 = arith.constant 1 : index
    %c0_195 = arith.constant 0 : index
    %c0_196 = arith.constant 0 : index
    %644 = vector.load %arg14[%c1_194, %c0_195, %c0_196] : memref<2x16x128xf32, #tpu.memory_space<vmem>>, vector<1x16x128xf32>
    %645 = vector.shape_cast %644 : vector<1x16x128xf32> to vector<16x128xf32>
    %646 = vector.shape_cast %631 : vector<16x128xf32> to vector<1x16x128xf32>
    tpu.vector_store %arg14[%c1_194, %c0_195, %c0_196], %646 {strides = array<i32>} : memref<2x16x128xf32, #tpu.memory_space<vmem>>, vector<1x16x128xf32>,
    %c0_197 = arith.constant 0 : index
    %c0_198 = arith.constant 0 : index
    %c0_199 = arith.constant 0 : index
    %647 = vector.load %arg17[%c0_197, %c0_198, %c0_199] : memref<8x16x128xf32, #tpu.memory_space<vmem>>, vector<8x1x128xf32>
    %648 = vector.shape_cast %647 : vector<8x1x128xf32> to vector<8x128xf32>
    %c0_200 = arith.constant 0 : index
    %c0_201 = arith.constant 0 : index
    %649 = vector.load %arg12[%c0_200, %c0_201] : memref<128x128xf32, #tpu.memory_space<vmem>>, vector<8x128xf32>
    tpu.vector_store %arg12[%c0_200, %c0_201], %648 {strides = array<i32>} : memref<128x128xf32, #tpu.memory_space<vmem>>, vector<8x128xf32>,
    %c0_202 = arith.constant 0 : index
    %c1_203 = arith.constant 1 : index
    %c0_204 = arith.constant 0 : index
    %650 = vector.load %arg17[%c0_202, %c1_203, %c0_204] : memref<8x16x128xf32, #tpu.memory_space<vmem>>, vector<8x1x128xf32>
    %651 = vector.shape_cast %650 : vector<8x1x128xf32> to vector<8x128xf32>
    %c8 = arith.constant 8 : index
    %c0_205 = arith.constant 0 : index
    %652 = vector.load %arg12[%c8, %c0_205] : memref<128x128xf32, #tpu.memory_space<vmem>>, vector<8x128xf32>
    tpu.vector_store %arg12[%c8, %c0_205], %651 {strides = array<i32>} : memref<128x128xf32, #tpu.memory_space<vmem>>, vector<8x128xf32>,
    %c0_206 = arith.constant 0 : index
    %c2 = arith.constant 2 : index
    %c0_207 = arith.constant 0 : index
    %653 = vector.load %arg17[%c0_206, %c2, %c0_207] : memref<8x16x128xf32, #tpu.memory_space<vmem>>, vector<8x1x128xf32>
    %654 = vector.shape_cast %653 : vector<8x1x128xf32> to vector<8x128xf32>
    %c16 = arith.constant 16 : index
    %c0_208 = arith.constant 0 : index
    %655 = vector.load %arg12[%c16, %c0_208] : memref<128x128xf32, #tpu.memory_space<vmem>>, vector<8x128xf32>
    tpu.vector_store %arg12[%c16, %c0_208], %654 {strides = array<i32>} : memref<128x128xf32, #tpu.memory_space<vmem>>, vector<8x128xf32>,
    %c0_209 = arith.constant 0 : index
    %c3 = arith.constant 3 : index
    %c0_210 = arith.constant 0 : index
    %656 = vector.load %arg17[%c0_209, %c3, %c0_210] : memref<8x16x128xf32, #tpu.memory_space<vmem>>, vector<8x1x128xf32>
    %657 = vector.shape_cast %656 : vector<8x1x128xf32> to vector<8x128xf32>
    %c24 = arith.constant 24 : index
    %c0_211 = arith.constant 0 : index
    %658 = vector.load %arg12[%c24, %c0_211] : memref<128x128xf32, #tpu.memory_space<vmem>>, vector<8x128xf32>
    tpu.vector_store %arg12[%c24, %c0_211], %657 {strides = array<i32>} : memref<128x128xf32, #tpu.memory_space<vmem>>, vector<8x128xf32>,
    %c0_212 = arith.constant 0 : index
    %c4 = arith.constant 4 : index
    %c0_213 = arith.constant 0 : index
    %659 = vector.load %arg17[%c0_212, %c4, %c0_213] : memref<8x16x128xf32, #tpu.memory_space<vmem>>, vector<8x1x128xf32>
    %660 = vector.shape_cast %659 : vector<8x1x128xf32> to vector<8x128xf32>
    %c32 = arith.constant 32 : index
    %c0_214 = arith.constant 0 : index
    %661 = vector.load %arg12[%c32, %c0_214] : memref<128x128xf32, #tpu.memory_space<vmem>>, vector<8x128xf32>
    tpu.vector_store %arg12[%c32, %c0_214], %660 {strides = array<i32>} : memref<128x128xf32, #tpu.memory_space<vmem>>, vector<8x128xf32>,
    %c0_215 = arith.constant 0 : index
    %c5 = arith.constant 5 : index
    %c0_216 = arith.constant 0 : index
    %662 = vector.load %arg17[%c0_215, %c5, %c0_216] : memref<8x16x128xf32, #tpu.memory_space<vmem>>, vector<8x1x128xf32>
    %663 = vector.shape_cast %662 : vector<8x1x128xf32> to vector<8x128xf32>
    %c40 = arith.constant 40 : index
    %c0_217 = arith.constant 0 : index
    %664 = vector.load %arg12[%c40, %c0_217] : memref<128x128xf32, #tpu.memory_space<vmem>>, vector<8x128xf32>
    tpu.vector_store %arg12[%c40, %c0_217], %663 {strides = array<i32>} : memref<128x128xf32, #tpu.memory_space<vmem>>, vector<8x128xf32>,
    %c0_218 = arith.constant 0 : index
    %c6 = arith.constant 6 : index
    %c0_219 = arith.constant 0 : index
    %665 = vector.load %arg17[%c0_218, %c6, %c0_219] : memref<8x16x128xf32, #tpu.memory_space<vmem>>, vector<8x1x128xf32>
    %666 = vector.shape_cast %665 : vector<8x1x128xf32> to vector<8x128xf32>
    %c48 = arith.constant 48 : index
    %c0_220 = arith.constant 0 : index
    %667 = vector.load %arg12[%c48, %c0_220] : memref<128x128xf32, #tpu.memory_space<vmem>>, vector<8x128xf32>
    tpu.vector_store %arg12[%c48, %c0_220], %666 {strides = array<i32>} : memref<128x128xf32, #tpu.memory_space<vmem>>, vector<8x128xf32>,
    %c0_221 = arith.constant 0 : index
    %c7 = arith.constant 7 : index
    %c0_222 = arith.constant 0 : index
    %668 = vector.load %arg17[%c0_221, %c7, %c0_222] : memref<8x16x128xf32, #tpu.memory_space<vmem>>, vector<8x1x128xf32>
    %669 = vector.shape_cast %668 : vector<8x1x128xf32> to vector<8x128xf32>
    %c56 = arith.constant 56 : index
    %c0_223 = arith.constant 0 : index
    %670 = vector.load %arg12[%c56, %c0_223] : memref<128x128xf32, #tpu.memory_space<vmem>>, vector<8x128xf32>
    tpu.vector_store %arg12[%c56, %c0_223], %669 {strides = array<i32>} : memref<128x128xf32, #tpu.memory_space<vmem>>, vector<8x128xf32>,
    %c0_224 = arith.constant 0 : index
    %c8_225 = arith.constant 8 : index
    %c0_226 = arith.constant 0 : index
    %671 = vector.load %arg17[%c0_224, %c8_225, %c0_226] : memref<8x16x128xf32, #tpu.memory_space<vmem>>, vector<8x1x128xf32>
    %672 = vector.shape_cast %671 : vector<8x1x128xf32> to vector<8x128xf32>
    %c64 = arith.constant 64 : index
    %c0_227 = arith.constant 0 : index
    %673 = vector.load %arg12[%c64, %c0_227] : memref<128x128xf32, #tpu.memory_space<vmem>>, vector<8x128xf32>
    tpu.vector_store %arg12[%c64, %c0_227], %672 {strides = array<i32>} : memref<128x128xf32, #tpu.memory_space<vmem>>, vector<8x128xf32>,
    %c0_228 = arith.constant 0 : index
    %c9 = arith.constant 9 : index
    %c0_229 = arith.constant 0 : index
    %674 = vector.load %arg17[%c0_228, %c9, %c0_229] : memref<8x16x128xf32, #tpu.memory_space<vmem>>, vector<8x1x128xf32>
    %675 = vector.shape_cast %674 : vector<8x1x128xf32> to vector<8x128xf32>
    %c72 = arith.constant 72 : index
    %c0_230 = arith.constant 0 : index
    %676 = vector.load %arg12[%c72, %c0_230] : memref<128x128xf32, #tpu.memory_space<vmem>>, vector<8x128xf32>
    tpu.vector_store %arg12[%c72, %c0_230], %675 {strides = array<i32>} : memref<128x128xf32, #tpu.memory_space<vmem>>, vector<8x128xf32>,
    %c0_231 = arith.constant 0 : index
    %c10 = arith.constant 10 : index
    %c0_232 = arith.constant 0 : index
    %677 = vector.load %arg17[%c0_231, %c10, %c0_232] : memref<8x16x128xf32, #tpu.memory_space<vmem>>, vector<8x1x128xf32>
    %678 = vector.shape_cast %677 : vector<8x1x128xf32> to vector<8x128xf32>
    %c80 = arith.constant 80 : index
    %c0_233 = arith.constant 0 : index
    %679 = vector.load %arg12[%c80, %c0_233] : memref<128x128xf32, #tpu.memory_space<vmem>>, vector<8x128xf32>
    tpu.vector_store %arg12[%c80, %c0_233], %678 {strides = array<i32>} : memref<128x128xf32, #tpu.memory_space<vmem>>, vector<8x128xf32>,
    %c0_234 = arith.constant 0 : index
    %c11 = arith.constant 11 : index
    %c0_235 = arith.constant 0 : index
    %680 = vector.load %arg17[%c0_234, %c11, %c0_235] : memref<8x16x128xf32, #tpu.memory_space<vmem>>, vector<8x1x128xf32>
    %681 = vector.shape_cast %680 : vector<8x1x128xf32> to vector<8x128xf32>
    %c88 = arith.constant 88 : index
    %c0_236 = arith.constant 0 : index
    %682 = vector.load %arg12[%c88, %c0_236] : memref<128x128xf32, #tpu.memory_space<vmem>>, vector<8x128xf32>
    tpu.vector_store %arg12[%c88, %c0_236], %681 {strides = array<i32>} : memref<128x128xf32, #tpu.memory_space<vmem>>, vector<8x128xf32>,
    %c0_237 = arith.constant 0 : index
    %c12 = arith.constant 12 : index
    %c0_238 = arith.constant 0 : index
    %683 = vector.load %arg17[%c0_237, %c12, %c0_238] : memref<8x16x128xf32, #tpu.memory_space<vmem>>, vector<8x1x128xf32>
    %684 = vector.shape_cast %683 : vector<8x1x128xf32> to vector<8x128xf32>
    %c96 = arith.constant 96 : index
    %c0_239 = arith.constant 0 : index
    %685 = vector.load %arg12[%c96, %c0_239] : memref<128x128xf32, #tpu.memory_space<vmem>>, vector<8x128xf32>
    tpu.vector_store %arg12[%c96, %c0_239], %684 {strides = array<i32>} : memref<128x128xf32, #tpu.memory_space<vmem>>, vector<8x128xf32>,
    %c0_240 = arith.constant 0 : index
    %c13 = arith.constant 13 : index
    %c0_241 = arith.constant 0 : index
    %686 = vector.load %arg17[%c0_240, %c13, %c0_241] : memref<8x16x128xf32, #tpu.memory_space<vmem>>, vector<8x1x128xf32>
    %687 = vector.shape_cast %686 : vector<8x1x128xf32> to vector<8x128xf32>
    %c104 = arith.constant 104 : index
    %c0_242 = arith.constant 0 : index
    %688 = vector.load %arg12[%c104, %c0_242] : memref<128x128xf32, #tpu.memory_space<vmem>>, vector<8x128xf32>
    tpu.vector_store %arg12[%c104, %c0_242], %687 {strides = array<i32>} : memref<128x128xf32, #tpu.memory_space<vmem>>, vector<8x128xf32>,
    %c0_243 = arith.constant 0 : index
    %c14 = arith.constant 14 : index
    %c0_244 = arith.constant 0 : index
    %689 = vector.load %arg17[%c0_243, %c14, %c0_244] : memref<8x16x128xf32, #tpu.memory_space<vmem>>, vector<8x1x128xf32>
    %690 = vector.shape_cast %689 : vector<8x1x128xf32> to vector<8x128xf32>
    %c112 = arith.constant 112 : index
    %c0_245 = arith.constant 0 : index
    %691 = vector.load %arg12[%c112, %c0_245] : memref<128x128xf32, #tpu.memory_space<vmem>>, vector<8x128xf32>
    tpu.vector_store %arg12[%c112, %c0_245], %690 {strides = array<i32>} : memref<128x128xf32, #tpu.memory_space<vmem>>, vector<8x128xf32>,
    %c0_246 = arith.constant 0 : index
    %c15 = arith.constant 15 : index
    %c0_247 = arith.constant 0 : index
    %692 = vector.load %arg17[%c0_246, %c15, %c0_247] : memref<8x16x128xf32, #tpu.memory_space<vmem>>, vector<8x1x128xf32>
    %693 = vector.shape_cast %692 : vector<8x1x128xf32> to vector<8x128xf32>
    %c120 = arith.constant 120 : index
    %c0_248 = arith.constant 0 : index
    %694 = vector.load %arg12[%c120, %c0_248] : memref<128x128xf32, #tpu.memory_space<vmem>>, vector<8x128xf32>
    tpu.vector_store %arg12[%c120, %c0_248], %693 {strides = array<i32>} : memref<128x128xf32, #tpu.memory_space<vmem>>, vector<8x128xf32>,
    return
  }
  func.func @transform_0(%arg0: i32) -> (i32, i32, i32) {
    %c0_i32 = arith.constant 0 : i32
    %c0_i32_0 = arith.constant 0 : i32
    %c0_i32_1 = arith.constant 0 : i32
    return %c0_i32, %arg0, %c0_i32_0 : i32, i32, i32
  }
  func.func @transform_1(%arg0: i32) -> (i32, i32, i32) {
    %c0_i32 = arith.constant 0 : i32
    %c0_i32_0 = arith.constant 0 : i32
    %c0_i32_1 = arith.constant 0 : i32
    return %c0_i32, %arg0, %c0_i32_0 : i32, i32, i32
  }
  func.func @transform_2(%arg0: i32) -> (i32, i32, i32) {
    %c0_i32 = arith.constant 0 : i32
    %c0_i32_0 = arith.constant 0 : i32
    %c0_i32_1 = arith.constant 0 : i32
    return %c0_i32, %arg0, %c0_i32_0 : i32, i32, i32
  }
  func.func @transform_3(%arg0: i32) -> (i32, i32) {
    %c0_i32 = arith.constant 0 : i32
    %c0_i32_0 = arith.constant 0 : i32
    %c0_i32_1 = arith.constant 0 : i32
    return %c0_i32, %c0_i32_0 : i32, i32
  }
  func.func @transform_4(%arg0: i32) -> (i32, i32) {
    %c0_i32 = arith.constant 0 : i32
    %c0_i32_0 = arith.constant 0 : i32
    %c0_i32_1 = arith.constant 0 : i32
    return %c0_i32, %c0_i32_0 : i32, i32
  }
  func.func @transform_5(%arg0: i32) -> (i32, i32) {
    %c0_i32 = arith.constant 0 : i32
    %c0_i32_0 = arith.constant 0 : i32
    %c0_i32_1 = arith.constant 0 : i32
    return %c0_i32, %c0_i32_0 : i32, i32
  }
  func.func @transform_6(%arg0: i32) -> (i32, i32) {
    %c0_i32 = arith.constant 0 : i32
    %c0_i32_0 = arith.constant 0 : i32
    %c0_i32_1 = arith.constant 0 : i32
    return %c0_i32, %c0_i32_0 : i32, i32
  }
  func.func @transform_7(%arg0: i32) -> (i32, i32) {
    %c0_i32 = arith.constant 0 : i32
    %c0_i32_0 = arith.constant 0 : i32
    %c0_i32_1 = arith.constant 0 : i32
    return %c0_i32, %c0_i32_0 : i32, i32
  }
  func.func @transform_8(%arg0: i32) -> (i32, i32) {
    %c0_i32 = arith.constant 0 : i32
    %c0_i32_0 = arith.constant 0 : i32
    %c0_i32_1 = arith.constant 0 : i32
    return %c0_i32, %c0_i32_0 : i32, i32
  }
  func.func @transform_9(%arg0: i32) -> (i32, i32) {
    %c0_i32 = arith.constant 0 : i32
    %c0_i32_0 = arith.constant 0 : i32
    %c0_i32_1 = arith.constant 0 : i32
    return %c0_i32, %c0_i32_0 : i32, i32
  }
  func.func @transform_10(%arg0: i32) -> (i32, i32) {
    %c0_i32 = arith.constant 0 : i32
    %c0_i32_0 = arith.constant 0 : i32
    %c0_i32_1 = arith.constant 0 : i32
    return %c0_i32, %c0_i32_0 : i32, i32
  }
  func.func @transform_11(%arg0: i32) -> (i32, i32) {
    %c0_i32 = arith.constant 0 : i32
    %c0_i32_0 = arith.constant 0 : i32
    return %arg0, %c0_i32 : i32, i32
  }
  func.func @transform_12(%arg0: i32) -> (i32, i32, i32) {
    %c0_i32 = arith.constant 0 : i32
    %c0_i32_0 = arith.constant 0 : i32
    %c0_i32_1 = arith.constant 0 : i32
    return %c0_i32, %arg0, %c0_i32_0 : i32, i32, i32
  }
  func.func @transform_13(%arg0: i32) -> (i32, i32, i32) {
    %c0_i32 = arith.constant 0 : i32
    %c0_i32_0 = arith.constant 0 : i32
    %c0_i32_1 = arith.constant 0 : i32
    return %c0_i32, %arg0, %c0_i32_0 : i32, i32, i32
  }
}

</mosaic_0001>

<bundles_post_ra>
// kernel: char_rnn_forward.1
= control target key start
LH: loop header
LB: loop body
LE: loop exit
PB: predicated region body
PF: predicated region fallthrough
CT: control target
= control target key end

     0   :  { %s10815_s0 = inlined_call_operand.vmem [shape: bf16[8,32,128], index: 0, kind: input, shape index: {}]   ;;  %s10816_s1 = inlined_call_operand.vmem [shape: f32[2,32,128], index: 1, kind: input, shape index: {}]   ;;  %s10817_s2 = inlined_call_operand.vmem [shape: f32[2,32,128], index: 2, kind: input, shape index: {}]   ;;  %s10818_s3 = inlined_call_operand.vmem [shape: bf16[128,512], index: 3, kind: input, shape index: {}]   ;;  %s10819_s4 = inlined_call_operand.hbm [shape: bf16[128,512], index: 4, kind: input, shape index: {}]   ;;  %s10820_s5 = inlined_call_operand.vmem [shape: f32[1,512], index: 5, kind: input, shape index: {}]   ;;  %s10821_s6 = inlined_call_operand.hbm [shape: bf16[128,512], index: 6, kind: input, shape index: {}]   ;;  %s10822_s7 = inlined_call_operand.hbm [shape: bf16[128,512], index: 7, kind: input, shape index: {}]   ;;  %s10823_s8 = inlined_call_operand.vmem [shape: f32[1,512], index: 8, kind: input, shape index: {}]   ;;  %s10824_s9 = inlined_call_operand.hbm [shape: bf16[128,128], index: 9, kind: input, shape index: {}]   ;;  %s10825_s10 = inlined_call_operand.vmem [shape: f32[1,128], index: 10, kind: input, shape index: {}]   ;;  %s10826_s11 = inlined_call_operand.hbm [shape: f32[256,128], index: 11, kind: output, shape index: {0}]   ;;  %s10827_s12 = inlined_call_operand.hbm [shape: f32[2,32,128], index: 12, kind: output, shape index: {1}]   ;;  %s10828_s13 = inlined_call_operand.hbm [shape: f32[2,32,128], index: 13, kind: output, shape index: {2}]  }
   0x1   :  { %10980 = sst [smem:[#allocation61_spill]] %s10823_s8 }
   0x2   :  { %10981 = sst [smem:[#allocation62_spill]] %s10825_s10 }
   0x3   :  { %10982 = sst [smem:[#allocation63_spill]] %s10826_s11 }
   0x4   :  { %10983 = sst [smem:[#allocation64_spill]] %s10827_s12 }
   0x5   :  { %10984 = sst [smem:[#allocation65_spill]] %s10828_s13 }
   0x6   :  { %19 = vsyncpa [#allocation9], 0 }
   0x7   :  { %20 = vsyncpa [#allocation12], 0 }
   0x8   :  { %21 = vsyncpa [#allocation15], 0 }
   0x9   :  { %22 = vsyncpa [#allocation10], 0 }
   0xa   :  { %24 = vsyncpa [#allocation10 + $0x1], 0 }
   0xb   :  { %25 = vsyncpa [#allocation18], 0 }
   0xc   :  { %27 = vsyncpa [#allocation18 + $0x1], 0  ;;  %s8444_s25 = smov 0   ;;  %s8446_s26 = smov 0  }
   0xd   :  { %s8448_s27 = smov 0   ;;  %s8450_s28 = smov 0  }
   0xe LB: > { %10985 = sst [smem:[#allocation29_spill]] %s8332_s25  ;;  %s8465_s29 = sadd.s32 4294967295, %s8344_s28   ;;  %s8344_s28 = sphi %s8450_s28, %s11206_s28   ;;  %s8340_s27 = sphi %s8448_s27, %s11210_s27   ;;  %s8336_s26 = sphi %s8446_s26, %s11209_s26   ;;  %s8332_s25 = sphi %s8444_s25, %s11208_s25  }
   0xf   : > { %s10829_s30 = sadd.s32 4294967294, %s8344_s28   ;;  %s8469_s14 = sadd.s32 1, %s8344_s28  }
  0x10   : > { %10986 = sst [smem:[#allocation30_spill]] %s8469_s14  ;;  %s40_s15 = sadd.s32 1, %s8340_s27 }
  0x11   : > { %s37_s16 = ssub.s32 %s8344_s28, %s8469_s14  ;;  %p47_p0 = scmp.ne.s32.totalorder %s8340_s27, %s8336_s26 }
  0x12   : > { %p38_p1 = scmp.eq.s32.totalorder %s37_s16, 0  ;;  %p48_p2 = scmp.eq.s32.totalorder %s8344_s28, 0 }
  0x13   : > { %p297_p3 = scmp.eq.s32.totalorder %s8465_s29, 1  ;;  %p302_p4 = scmp.ne.s32.totalorder %s8336_s26, %s8332_s25 }
  0x14   : > { %s8481_s17 = scalar_select %p38_p1, %s8340_s27, %s40_s15  }
  0x15   : > { %p8483_p5 = por %p48_p2, %p47_p0  ;;  %p8487_p6 = por %p297_p3, %p47_p0 }
  0x16   : > { %10987 = sst [smem:[#allocation31_spill]] %s8481_s17  ;;  %p303_p7 = scmp.eq.s32.totalorder %s10829_s30, 1 }
  0x17   : > { %s10988_s18 = scalar_select %p8483_p5, 1, 0 }
  0x18   : > { %s10989_s19 = scalar_select %p8487_p6, 1, 0 }
  0x19   : > { %p6391_p8 = scmp.ge.s32.totalorder %s8344_s28, 1  ;;  %p362_p9 = scmp.lt.s32.totalorder %s8344_s28, 3 }
  0x1a   : > { %10990 = sst [smem:[#allocation32_spill]] %s10989_s19  ;;  %p8495_p10 = por %p303_p7, %p302_p4 }
  0x1b   : > { %p10834_p11 = scmp.eq.s32.totalorder %s8465_s29, 0  ;;  %p8500_p12 = pnand %p6391_p8, %p362_p9 }
  0x1c   : > { %s10991_s20 = scalar_select %p8495_p10, 1, 0 }
  0x1d   : > { %s10993_s21 = scalar_select %p8500_p12, 1, 0 }
  0x1e   : > { %10992 = sst [smem:[#allocation33_spill]] %s10991_s20  ;;  %p7205_p13 = pneg %p8500_p12 }
  0x1f   : > { %s8346_s22 = smov [#allocation11]   ;;  %s8347_s15 = smov [#allocation8]  }
  0x20   : > { %s393_s23 = sshll.u32 %s8346_s22, 4  ;;  %p8510_p0 = pnand %p10834_p11, %p7205_p13  ;;  %s8506_s23 = int_to_ptr.vmem [resolvable:$true] %s393_s23 }
  0x21   : > { %s377_s16 = sshll.u32 %s8347_s15, 4  ;;  %s8348_s30 = smov [#allocation13]   ;;  %s8514_s16 = int_to_ptr.vmem [resolvable:$true] %s377_s16 }
  0x22   : > { %s8516_s17 = sshll.u32 %s8348_s30, 4  ;;  %s8154_s25 = scalar_lea.hbm %s10821_s6, 4096  ;;  %s407_s17 = int_to_ptr.vmem [resolvable:$true] %s8516_s17 }
  0x23   : > { %p8155_p1 = scmp.ne.s32.totalorder %s10821_s6, %s8154_s25  ;;  %p8526_p2 = pneg %p8510_p0 }
  0x24   : > { %p8161_p7 = scmp.lt.u32.totalorder %s8154_s25, %s10821_s6 }
  0x25   : > { %p8157_p3 = pnand %p8526_p2, %p8155_p1 }
  0x27   : > { %p8158_p4 = pneg %p8157_p3 }
  0x29   : > { %p8163_p8 = pnand %p8161_p7, %p8158_p4 }
  0x2b   : > { %8166 = shalt.err (!%p8163_p8)
}
  0x2c   : > { %s8167_s13 = scalar_lea.vmem %s8506_s23, 4096  ;;  %p8175_p10 = scmp.lt.s32.totalorder %s8506_s23, %s8506_s23 }
  0x2d   : > { %p8168_p9 = scmp.ne.s32.totalorder %s8506_s23, %s8167_s13  ;;  %p8176_p6 = scmp.lt.s32.totalorder %s8167_s13, %s8167_s13 }
  0x2f   : > { %p8170_p13 = pnand %p8168_p9, %p8526_p2  ;;  %p8177_p1 = por %p8176_p6, %p8175_p10 }
  0x31   : > { %p8171_p11 = pneg %p8170_p13 }
  0x33   : > { %p8178_p3 = pnand %p8177_p1, %p8171_p11 }
  0x35   : > { %8181 = shalt.err (!%p8178_p3)
}
  0x36   : > { %s8349_s14 = smov 256   ;;  %s8350_s25 = smov 16  }
  0x37   : > { %7211 = dma.hbm_to_vmem [thread:$0]  (!%p8510_p0), %s10821_s6, 4096, %s8506_s23, [#allocation12], %s8349_s14, %s8349_s14, %s8350_s25  }
  0x38   : > { %s8182_s13 = scalar_lea.hbm %s10819_s4, 4096 }
  0x39   : > { %p8183_p6 = scmp.ne.s32.totalorder %s10819_s4, %s8182_s13  ;;  %p8189_p4 = scmp.lt.u32.totalorder %s8182_s13, %s10819_s4 }
  0x3b   : > { %p8185_p10 = pnand %p8183_p6, %p8526_p2 }
  0x3d   : > { %p8186_p11 = pneg %p8185_p10 }
  0x3f   : > { %p8191_p7 = pnand %p8189_p4, %p8186_p11 }
  0x41   : > { %8194 = shalt.err (!%p8191_p7)
}
  0x42   : > { %s8195_s23 = scalar_lea.vmem %s8514_s16, 4096  ;;  %p8203_p1 = scmp.lt.s32.totalorder %s8514_s16, %s8514_s16 }
  0x43   : > { %p8196_p8 = scmp.ne.s32.totalorder %s8514_s16, %s8195_s23  ;;  %p8204_p3 = scmp.lt.s32.totalorder %s8195_s23, %s8195_s23 }
  0x45   : > { %p8198_p9 = pnand %p8196_p8, %p8526_p2  ;;  %p8205_p6 = por %p8204_p3, %p8203_p1 }
  0x47   : > { %p8199_p13 = pneg %p8198_p9 }
  0x49   : > { %p8206_p10 = pnand %p8205_p6, %p8199_p13 }
  0x4b   : > { %8209 = shalt.err (!%p8206_p10)
}
  0x4c   : > { %7208 = dma.hbm_to_vmem [thread:$0]  (!%p8510_p0), %s10819_s4, 4096, %s8514_s16, [#allocation9], %s8349_s14, %s8349_s14, %s8350_s25  }
  0x4d   : > { %s8210_s20 = scalar_lea.hbm %s10822_s7, 4096 }
  0x4e   : > { %p8211_p11 = scmp.ne.s32.totalorder %s10822_s7, %s8210_s20  ;;  %p8217_p8 = scmp.lt.u32.totalorder %s8210_s20, %s10822_s7 }
  0x50   : > { %p8213_p4 = pnand %p8211_p11, %p8526_p2 }
  0x52   : > { %p8214_p7 = pneg %p8213_p4 }
  0x54   : > { %p8219_p9 = pnand %p8217_p8, %p8214_p7 }
  0x56   : > { %8222 = shalt.err (!%p8219_p9)
}
  0x57   : > { %s8223_s23 = scalar_lea.vmem %s407_s17, 4096  ;;  %p8231_p6 = scmp.lt.s32.totalorder %s407_s17, %s407_s17 }
  0x58   : > { %p8224_p13 = scmp.ne.s32.totalorder %s407_s17, %s8223_s23  ;;  %p8232_p10 = scmp.lt.s32.totalorder %s8223_s23, %s8223_s23 }
  0x5a   : > { %p8226_p1 = pnand %p8224_p13, %p8526_p2  ;;  %p8233_p12 = por %p8232_p10, %p8231_p6 }
  0x5c   : > { %p8227_p3 = pneg %p8226_p1 }
  0x5e   : > { %p8234_p5 = pnand %p8233_p12, %p8227_p3 }
  0x60   : > { %8237 = shalt.err (!%p8234_p5)
}
  0x61   : > { %7214 = dma.hbm_to_vmem [thread:$0]  (!%p8510_p0), %s10822_s7, 4096, %s407_s17, [#allocation12], %s8349_s14, %s8349_s14, %s8350_s25  }
  0x62   : > { %s8351_s10 = smov [#allocation14]   ;;  %s8238_s22 = scalar_lea.hbm %s10824_s9, 1024 }
  0x63   : > { %s422_s11 = sshll.u32 %s8351_s10, 4  ;;  %p8239_p5 = scmp.ne.s32.totalorder %s10824_s9, %s8238_s22  ;;  %s423_s11 = int_to_ptr.vmem [resolvable:$true] %s422_s11 }
  0x64   : > { %p8245_p4 = scmp.lt.u32.totalorder %s8238_s22, %s10824_s9 }
  0x65   : > { %p8241_p12 = pnand %p8239_p5, %p8526_p2 }
  0x67   : > { %p8242_p11 = pneg %p8241_p12 }
  0x69   : > { %p8247_p7 = pnand %p8245_p4, %p8242_p11 }
  0x6b   : > { %8250 = shalt.err (!%p8247_p7)
}
  0x6c   : > { %s8251_s17 = scalar_lea.vmem %s423_s11, 1024  ;;  %p8259_p1 = scmp.lt.s32.totalorder %s423_s11, %s423_s11 }
  0x6d   : > { %p8252_p8 = scmp.ne.s32.totalorder %s423_s11, %s8251_s17  ;;  %p8260_p3 = scmp.lt.s32.totalorder %s8251_s17, %s8251_s17 }
  0x6f   : > { %p8254_p9 = pnand %p8252_p8, %p8526_p2  ;;  %p8261_p6 = por %p8260_p3, %p8259_p1 }
  0x71   : > { %p8255_p13 = pneg %p8254_p9 }
  0x73   : > { %p8262_p10 = pnand %p8261_p6, %p8255_p13 }
  0x75   : > { %8265 = shalt.err (!%p8262_p10)
}
  0x76   : > { %s8352_s14 = smov 64   ;;  %s8353_s25 = smov 4  }
  0x77   : > { %7217 = dma.hbm_to_vmem [thread:$0]  (!%p8510_p0), %s10824_s9, 1024, %s423_s11, [#allocation15], %s8352_s14, %s8352_s14, %s8353_s25  }
  0x78   : > { %p6396_p5 = scmp.ge.s32.totalorder %s8344_s28, 2 }
  0x79   : > { %p10996_p2 = scmp.ne.s32.totalorder (!%p6396_p5), %s10988_s18, 0 }
  0x7a   : > { %435 = sbr.rel (%p6396_p5) target bundleno = 155 (0x9b), region = 48 }
  0x81   : > { %438 = sbr.rel (!%p10996_p2) target bundleno = 137 (0x89), region = 52  ;;  %s440_s12 = sand.u32 (%p10996_p2), 1, %s8340_s27  }
  0x82   : > { %s6677_s10 = sshll.u32 (%p10996_p2), %s8344_s28, 3  ;;  %s6397_s19 = sshll.u32 (%p10996_p2), %s440_s12, 6 }
  0x83   : > { %s445_s24 = scalar_lea.vmem (%p10996_p2), %s10815_s0, %s6677_s10  ;;  %s442_s11 = scalar_lea.vmem (%p10996_p2), [#allocation5], %s6397_s19 }
  0x84   : > { %v461_v0 = vld [vmem:[%s445_s24] sm:$0xff] (%p10996_p2)   ;;  %v465_v1 = vld [vmem:[%s445_s24 + $0x10] sm:$0xff] (%p10996_p2)  }
  0x85   : > { %v469_v2 = vld [vmem:[%s445_s24 + $0x20] sm:$0xff] (%p10996_p2)   ;;  %462 = vst [vmem:[%s442_s11] sm:$0xff] (%p10996_p2), %v461_v0   ;;  %466 = vst [vmem:[%s442_s11 + $0x8] sm:$0xff] (%p10996_p2), %v465_v1   ;;  %v473_v3 = vld [vmem:[%s445_s24 + $0x30] sm:$0xff] (%p10996_p2)  }
  0x86   : > { %470 = vst [vmem:[%s442_s11 + $0x10] sm:$0xff] (%p10996_p2), %v469_v2   ;;  %v477_v4 = vld [vmem:[%s445_s24 + $0x40] sm:$0xff] (%p10996_p2)   ;;  %v481_v5 = vld [vmem:[%s445_s24 + $0x50] sm:$0xff] (%p10996_p2)   ;;  %474 = vst [vmem:[%s442_s11 + $0x18] sm:$0xff] (%p10996_p2), %v473_v3  }
  0x87   : > { %478 = vst [vmem:[%s442_s11 + $0x20] sm:$0xff] (%p10996_p2), %v477_v4   ;;  %482 = vst [vmem:[%s442_s11 + $0x28] sm:$0xff] (%p10996_p2), %v481_v5   ;;  %v485_v6 = vld [vmem:[%s445_s24 + $0x60] sm:$0xff] (%p10996_p2)   ;;  %v489_v7 = vld [vmem:[%s445_s24 + $0x70] sm:$0xff] (%p10996_p2)  }
  0x88   : > { %486 = vst [vmem:[%s442_s11 + $0x30] sm:$0xff] %v485_v6   ;;  %490 = vst [vmem:[%s442_s11 + $0x38] sm:$0xff] %v489_v7  }
  0x89 PF: > { %p10997_p0 = scmp.ne.s32.totalorder %s10988_s18, 0 }
  0x8a   : > { %s549_s15 = sand.u32 (%p10997_p0), 1, %s8340_s27   ;;  %s6678_s30 = sshll.u32 (%p10997_p0), %s8344_s28, 4 }
  0x8b   : > { %547 = sbr.rel (!%p10997_p0) target bundleno = 146 (0x92), region = 93  ;;  %s6400_s13 = sshll.u32 (%p10997_p0), %s549_s15, 5 }
  0x8c   : > { %s554_s14 = scalar_lea.vmem (%p10997_p0), %s10816_s1, %s6678_s30  ;;  %s551_s25 = scalar_lea.vmem (%p10997_p0), [#allocation6], %s6400_s13 }
  0x8d   : > { %v588_v8 = vld [vmem:[%s554_s14] sm:$0xff] (%p10997_p0)  ;;  %v590_v9 = vld [vmem:[%s554_s14 + $0x8] sm:$0xff] (%p10997_p0) }
  0x8e   : > { %v592_v10 = vld [vmem:[%s554_s14 + $0x20] sm:$0xff] (%p10997_p0)  ;;  %589 = vst [vmem:[%s551_s25] sm:$0xff] (%p10997_p0), %v588_v8  ;;  %591 = vst [vmem:[%s551_s25 + $0x8] sm:$0xff] (%p10997_p0), %v590_v9  ;;  %v594_v11 = vld [vmem:[%s554_s14 + $0x28] sm:$0xff] (%p10997_p0) }
  0x8f   : > { %593 = vst [vmem:[%s551_s25 + $0x10] sm:$0xff] (%p10997_p0), %v592_v10  ;;  %595 = vst [vmem:[%s551_s25 + $0x18] sm:$0xff] (%p10997_p0), %v594_v11 }
  0x92 PF: > { %p10998_p12 = scmp.ne.s32.totalorder %s10988_s18, 0 }
  0x93   : > { %s603_s16 = sand.u32 (%p10998_p12), 1, %s8340_s27   ;;  %s6679_s8 = sshll.u32 (%p10998_p12), %s8344_s28, 4 }
  0x94   : > { %601 = sbr.rel (!%p10998_p12) target bundleno = 155 (0x9b), region = 131  ;;  %s6403_s12 = sshll.u32 (%p10998_p12), %s603_s16, 5 }
  0x95   : > { %s608_s20 = scalar_lea.vmem (%p10998_p12), %s10817_s2, %s6679_s8  ;;  %s605_s22 = scalar_lea.vmem (%p10998_p12), [#allocation7], %s6403_s12 }
  0x96   : > { %v642_v12 = vld [vmem:[%s608_s20] sm:$0xff] (%p10998_p12)  ;;  %v644_v13 = vld [vmem:[%s608_s20 + $0x8] sm:$0xff] (%p10998_p12) }
  0x97   : > { %v646_v14 = vld [vmem:[%s608_s20 + $0x20] sm:$0xff] (%p10998_p12)  ;;  %643 = vst [vmem:[%s605_s22] sm:$0xff] (%p10998_p12), %v642_v12  ;;  %645 = vst [vmem:[%s605_s22 + $0x8] sm:$0xff] (%p10998_p12), %v644_v13  ;;  %v648_v15 = vld [vmem:[%s608_s20 + $0x28] sm:$0xff] (%p10998_p12) }
  0x98   : > { %647 = vst [vmem:[%s605_s22 + $0x10] sm:$0xff] (%p10998_p12), %v646_v14  ;;  %649 = vst [vmem:[%s605_s22 + $0x18] sm:$0xff] (%p10998_p12), %v648_v15 }
  0x9b PF: > { %p10999_p11 = scmp.ne.s32.totalorder %s10993_s21, 0 }
  0x9d   : > { %658 = sbr.rel (%p10999_p11) target bundleno = 5178 (0x143a), region = 169 }
  0xa4   : > { %s8643_s18 = sand.u32 1, %s8336_s26   ;;  %p11000_p4 = scmp.eq.s32.totalorder %s8465_s29, 0 }
  0xa5   : > { %s6407_s24 = sshll.u32 %s8643_s18, 6  ;;  %s8647_s11 = sshll.u32 %s8643_s18, 5 }
  0xa6   : > { %s8649_s15 = scalar_lea.vmem [#allocation5], %s6407_s24  ;;  %s8652_s30 = scalar_lea.vmem [#allocation6], %s8647_s11 }
  0xa7   : > { %s8655_s13 = scalar_lea.vmem [#allocation7], %s8647_s11 }
  0xa8   : > { %8311 = dma.done.wait (%p11000_p4), [#allocation9], 4096   ;;  %p11001_p7 = pmov %p11000_p4 }
  0xa9   : > { %p11002_p8 = pmov %p11000_p4 }
  0xaa   : > { %8313 = vsyncadd (%p11001_p7), [#allocation9], 4294963200 }
  0xab   : > { %8315 = dma.done.wait (%p11002_p8), [#allocation12], 8192   ;;  %p11003_p9 = pmov %p11000_p4 }
  0xac   : > { %p11004_p13 = pmov %p11000_p4 }
  0xad   : > { %8317 = vsyncadd (%p11003_p9), [#allocation12], 4294959104 }
  0xae   : > { %8319 = dma.done.wait (%p11004_p13), [#allocation15], 1024   ;;  %p11005_p1 = pmov %p11000_p4 }
  0xaf   : > { %v10841_v16 = vmov 0   ;;  %v7296_v17 = vld [vmem:[%s10818_s3 + $0x4] ss:$16 sps:$4 sm:$0xff]   ;;  %v7298_v18 = vld [vmem:[%s10818_s3 + $0xc] ss:$16 sps:$4 sm:$0xff]   ;;  %s9724_s21 = scalar_lea.vmem [#allocation19], %s8647_s11 }
  0xb0   : > { %8321 = vsyncadd (%p11005_p1), [#allocation15], 4294966272  ;;  %1069 = vmatprep.mubr.bf16.mxu0 %v10841_v16  ;;  %1182 = vmatprep.mubr.bf16.mxu1 %v10841_v16  ;;  %v7300_v19 = vld [vmem:[%s10818_s3] ss:$16 sps:$4 sm:$0xff]   ;;  %v7301_v20 = vld [vmem:[%s10818_s3 + $0x8] ss:$16 sps:$4 sm:$0xff]  }
  0xb1   : > { %1037 = vmatprep.subr.bf16.mxu0 %v7296_v17  ;;  %1150 = vmatprep.subr.bf16.mxu1 %v7298_v18  ;;  %v7302_v21 = vld [vmem:[%s10818_s3 + $0x24] ss:$16 sps:$4 sm:$0xff]   ;;  %v7304_v22 = vld [vmem:[%s10818_s3 + $0x2c] ss:$16 sps:$4 sm:$0xff]   ;;  %v7306_v23 = vld [vmem:[%s10818_s3 + $0x20] ss:$16 sps:$4 sm:$0xff]  }
  0xb2   : > { %1038 = vmatpush1.bf16.msra.mxu0 %v7300_v19  ;;  %1151 = vmatpush1.bf16.msra.mxu1 %v7301_v20  ;;  %v7307_v24 = vld [vmem:[%s10818_s3 + $0x28] ss:$16 sps:$4 sm:$0xff]   ;;  %v7308_v25 = vld [vmem:[%s10818_s3 + $0x44] ss:$16 sps:$4 sm:$0xff]   ;;  %v7310_v26 = vld [vmem:[%s10818_s3 + $0x4c] ss:$16 sps:$4 sm:$0xff]  }
  0xb3   : > { %1039 = vmatprep.subr.bf16.mxu0 %v7302_v21  ;;  %1152 = vmatprep.subr.bf16.mxu1 %v7304_v22  ;;  %v7312_v27 = vld [vmem:[%s10818_s3 + $0x40] ss:$16 sps:$4 sm:$0xff]   ;;  %v7313_v28 = vld [vmem:[%s10818_s3 + $0x48] ss:$16 sps:$4 sm:$0xff]   ;;  %v7314_v29 = vld [vmem:[%s10818_s3 + $0x64] ss:$16 sps:$4 sm:$0xff]  }
  0xb4   : > { %v7316_v30 = vld [vmem:[%s10818_s3 + $0x6c] ss:$16 sps:$4 sm:$0xff]   ;;  %v7318_v31 = vld [vmem:[%s10818_s3 + $0x60] ss:$16 sps:$4 sm:$0xff]   ;;  %v7319_v32 = vld [vmem:[%s10818_s3 + $0x68] ss:$16 sps:$4 sm:$0xff]  }
  0xb5   : > { %v7320_v33 = vld [vmem:[%s10818_s3 + $0x84] ss:$16 sps:$4 sm:$0xff]   ;;  %v7322_v34 = vld [vmem:[%s10818_s3 + $0x8c] ss:$16 sps:$4 sm:$0xff]   ;;  %v7324_v35 = vld [vmem:[%s10818_s3 + $0x80] ss:$16 sps:$4 sm:$0xff]  }
  0xb6   : > { %1040 = vmatpush1.bf16.msra.mxu0 %v7306_v23  ;;  %1153 = vmatpush1.bf16.msra.mxu1 %v7307_v24  ;;  %v7325_v36 = vld [vmem:[%s10818_s3 + $0x88] ss:$16 sps:$4 sm:$0xff]   ;;  %v7326_v37 = vld [vmem:[%s10818_s3 + $0xa4] ss:$16 sps:$4 sm:$0xff]   ;;  %v7328_v38 = vld [vmem:[%s10818_s3 + $0xac] ss:$16 sps:$4 sm:$0xff]  }
  0xb7   : > { %1041 = vmatprep.subr.bf16.mxu0 %v7308_v25  ;;  %1154 = vmatprep.subr.bf16.mxu1 %v7310_v26  ;;  %v7330_v39 = vld [vmem:[%s10818_s3 + $0xa0] ss:$16 sps:$4 sm:$0xff]   ;;  %v7331_v40 = vld [vmem:[%s10818_s3 + $0xa8] ss:$16 sps:$4 sm:$0xff]   ;;  %v7332_v41 = vld [vmem:[%s10818_s3 + $0xc4] ss:$16 sps:$4 sm:$0xff]  }
  0xb8   : > { %v7334_v42 = vld [vmem:[%s10818_s3 + $0xcc] ss:$16 sps:$4 sm:$0xff]   ;;  %v7336_v43 = vld [vmem:[%s10818_s3 + $0xc0] ss:$16 sps:$4 sm:$0xff]   ;;  %v7337_v44 = vld [vmem:[%s10818_s3 + $0xc8] ss:$16 sps:$4 sm:$0xff]  }
  0xb9   : > { %v7338_v45 = vld [vmem:[%s10818_s3 + $0xe4] ss:$16 sps:$4 sm:$0xff]   ;;  %v7340_v46 = vld [vmem:[%s10818_s3 + $0xec] ss:$16 sps:$4 sm:$0xff]   ;;  %v7342_v47 = vld [vmem:[%s10818_s3 + $0xe0] ss:$16 sps:$4 sm:$0xff]  }
  0xba   : > { %1042 = vmatpush1.bf16.msra.mxu0 %v7312_v27  ;;  %1155 = vmatpush1.bf16.msra.mxu1 %v7313_v28  ;;  %v7343_v48 = vld [vmem:[%s10818_s3 + $0xe8] ss:$16 sps:$4 sm:$0xff]   ;;  %v8767_v49 = vld [vmem:[#allocation8 + $0x4] ss:$16 sps:$4 sm:$0xff]   ;;  %v8769_v50 = vld [vmem:[#allocation8 + $0xc] ss:$16 sps:$4 sm:$0xff]  }
  0xbb   : > { %1043 = vmatprep.subr.bf16.mxu0 %v7314_v29  ;;  %1156 = vmatprep.subr.bf16.mxu1 %v7316_v30  ;;  %11006 = vst [vmem:[#allocation34_spill] sm:$0xff] %v8767_v49  ;;  %11007 = vst [vmem:[#allocation35_spill] sm:$0xff] %v8769_v50  ;;  %v7344_v51 = vld [vmem:[%s8649_s15] sm:$0xff]   ;;  %v8778_v54 = vld [vmem:[#allocation8 + $0x8] ss:$16 sps:$4 sm:$0xff]   ;;  %s9730_s23 = scalar_lea.vmem [#allocation17], %s8647_s11 }
  0xbc   : > { %v8772_v52 = vld [vmem:[#allocation8] ss:$16 sps:$4 sm:$0xff]   ;;  %v8775_v53 = vld [vmem:[#allocation8 + $0x24] ss:$16 sps:$4 sm:$0xff]   ;;  %v8780_v55 = vld [vmem:[#allocation8 + $0x2c] ss:$16 sps:$4 sm:$0xff]  }
  0xbd   : > { %v8784_v56 = vld [vmem:[#allocation8 + $0x20] ss:$16 sps:$4 sm:$0xff]   ;;  %v8788_v57 = vld [vmem:[#allocation8 + $0x44] ss:$16 sps:$4 sm:$0xff]   ;;  %v8791_v58 = vld [vmem:[#allocation8 + $0x28] ss:$16 sps:$4 sm:$0xff]  }
  0xbe   : > { %1044 = vmatpush1.bf16.msra.mxu0 %v7318_v31  ;;  %1157 = vmatpush1.bf16.msra.mxu1 %v7319_v32  ;;  %v7348_v59 = vld [vmem:[%s8649_s15 + $0x8] sm:$0xff]   ;;  %v8796_v60 = vld [vmem:[#allocation8 + $0x40] ss:$16 sps:$4 sm:$0xff]   ;;  %v8798_v61 = vld [vmem:[#allocation8 + $0x64] ss:$16 sps:$4 sm:$0xff]   ;;  %vm8356_vm0 = vmmov 0  }
  0xbf   : > { %1045 = vmatprep.subr.bf16.mxu0 %v7320_v33  ;;  %1158 = vmatprep.subr.bf16.mxu1 %v7322_v34  ;;  %v8801_v62 = vld [vmem:[#allocation8 + $0x4c] ss:$16 sps:$4 sm:$0xff]   ;;  %v8804_v63 = vld [vmem:[#allocation8 + $0x48] ss:$16 sps:$4 sm:$0xff]   ;;  %v8811_v1 = vld [vmem:[#allocation8 + $0x60] ss:$16 sps:$4 sm:$0xff]  }
  0xc0   : > { %v8806_v0 = vld [vmem:[#allocation8 + $0x6c] ss:$16 sps:$4 sm:$0xff]   ;;  %v8814_v2 = vld [vmem:[#allocation8 + $0x84] ss:$16 sps:$4 sm:$0xff]   ;;  %v8818_v3 = vld [vmem:[#allocation8 + $0x68] ss:$16 sps:$4 sm:$0xff]  }
  0xc1   : > { %v7354_v4 = vld [vmem:[%s8649_s15 + $0x10] sm:$0xff]   ;;  %v8825_v6 = vld [vmem:[#allocation8 + $0x8c] ss:$16 sps:$4 sm:$0xff]   ;;  %v8831_v8 = vld [vmem:[#allocation8 + $0x88] ss:$16 sps:$4 sm:$0xff]   ;;  %s11176_s17 = sld [smem:[#allocation61_spill]] }
  0xc2   : > { %1046 = vmatpush1.bf16.msra.mxu0 %v7324_v35  ;;  %1159 = vmatpush1.bf16.msra.mxu1 %v7325_v36  ;;  %v8822_v5 = vld [vmem:[#allocation8 + $0x80] ss:$16 sps:$4 sm:$0xff]   ;;  %v8828_v7 = vld [vmem:[#allocation8 + $0xa4] ss:$16 sps:$4 sm:$0xff]   ;;  %v8835_v10 = vld [vmem:[#allocation8 + $0xac] ss:$16 sps:$4 sm:$0xff]  }
  0xc3   : > { %1047 = vmatprep.subr.bf16.mxu0 %v7326_v37  ;;  %1160 = vmatprep.subr.bf16.mxu1 %v7328_v38  ;;  %v8833_v9 = vld [vmem:[#allocation8 + $0xa0] ss:$16 sps:$4 sm:$0xff]   ;;  %v8839_v11 = vld [vmem:[#allocation8 + $0xc4] ss:$16 sps:$4 sm:$0xff]   ;;  %v8841_v12 = vld [vmem:[#allocation8 + $0xa8] ss:$16 sps:$4 sm:$0xff]  }
  0xc4   : > { %v7361_v13 = vld [vmem:[%s8649_s15 + $0x18] sm:$0xff]   ;;  %v8848_v14 = vld [vmem:[#allocation8 + $0xc0] ss:$16 sps:$4 sm:$0xff]   ;;  %v8853_v17 = vld [vmem:[#allocation8 + $0xe4] ss:$16 sps:$4 sm:$0xff]   ;;  %s11183_s25 = sld [smem:[#allocation62_spill]] }
  0xc5   : > { %v8851_v15 = vld [vmem:[#allocation8 + $0xcc] ss:$16 sps:$4 sm:$0xff]   ;;  %v8855_v18 = vld [vmem:[#allocation8 + $0xc8] ss:$16 sps:$4 sm:$0xff]   ;;  %v8862_v20 = vld [vmem:[#allocation8 + $0xe0] ss:$16 sps:$4 sm:$0xff]  }
  0xc6   : > { %1048 = vmatpush1.bf16.msra.mxu0 %v7330_v39  ;;  %1161 = vmatpush1.bf16.msra.mxu1 %v7331_v40  ;;  %v8858_v19 = vld [vmem:[#allocation8 + $0xec] ss:$16 sps:$4 sm:$0xff]   ;;  %v8866_v21 = vld [vmem:[#allocation8 + $0xe8] ss:$16 sps:$4 sm:$0xff]   ;;  %v7368_v22 = vld [vmem:[%s8649_s15 + $0x20] sm:$0xff]   ;;  %s6075_s10 = sand.u32 1, %s8465_s29  }
  0xc7   : > { %1049 = vmatprep.subr.bf16.mxu0 %v7332_v41  ;;  %1162 = vmatprep.subr.bf16.mxu1 %v7334_v42  ;;  %v7375_v23 = vld [vmem:[%s8649_s15 + $0x28] sm:$0xff]   ;;  %v7382_v24 = vld [vmem:[%s8649_s15 + $0x30] sm:$0xff]   ;;  %v7390_v25 = vld [vmem:[%s8649_s15 + $0x38] sm:$0xff]   ;;  %vm5568_vm1 = vcmask 1041409   ;;  %vm5571_vm2 = vcmask 1042434   ;;  %vm5574_vm3 = vcmask 1043459  }
  0xc8   : > { %v1413_v26 = vld [vmem:[%s8652_s30] sm:$0xff]  ;;  %v1414_v27 = vld [vmem:[%s8652_s30 + $0x8] sm:$0xff]  ;;  %vm5577_vm4 = vcmask 1044484   ;;  %vm5580_vm5 = vcmask 1045509   ;;  %vm5583_vm6 = vcmask 1046534   ;;  %s6414_s22 = sshll.u32 %s8643_s18, 7 }
  0xc9   : > { %v1425_v28 = vpack.c.bf16 %v1414_v27, %v1413_v26  ;;  %v8891_v29 = vld [vmem:[#allocation11 + $0x4] ss:$16 sps:$4 sm:$0xff]   ;;  %v8893_v30 = vld [vmem:[#allocation11 + $0xc] ss:$16 sps:$4 sm:$0xff]   ;;  %v8895_v31 = vld [vmem:[#allocation11] ss:$16 sps:$4 sm:$0xff]  }
  0xca   : > { %1050 = vmatpush1.bf16.msra.mxu0 %v7336_v43  ;;  %1163 = vmatpush1.bf16.msra.mxu1 %v7337_v44  ;;  %v8897_v32 = vld [vmem:[#allocation11 + $0x8] ss:$16 sps:$4 sm:$0xff]   ;;  %v8903_v33 = vld [vmem:[#allocation11 + $0x24] ss:$16 sps:$4 sm:$0xff]   ;;  %v8905_v34 = vld [vmem:[#allocation11 + $0x2c] ss:$16 sps:$4 sm:$0xff]   ;;  %s11184_s16 = smov %s11183_s25 }
  0xcb   : > { %1051 = vmatprep.subr.bf16.mxu0 %v7338_v45  ;;  %1164 = vmatprep.subr.bf16.mxu1 %v7340_v46  ;;  %v8907_v35 = vld [vmem:[#allocation11 + $0x20] ss:$16 sps:$4 sm:$0xff]   ;;  %v8909_v36 = vld [vmem:[#allocation11 + $0x28] ss:$16 sps:$4 sm:$0xff]   ;;  %v8915_v37 = vld [vmem:[#allocation11 + $0x44] ss:$16 sps:$4 sm:$0xff]  }
  0xcc   : > { %v8917_v38 = vld [vmem:[#allocation11 + $0x4c] ss:$16 sps:$4 sm:$0xff]   ;;  %v8919_v39 = vld [vmem:[#allocation11 + $0x40] ss:$16 sps:$4 sm:$0xff]   ;;  %v8921_v40 = vld [vmem:[#allocation11 + $0x48] ss:$16 sps:$4 sm:$0xff]  }
  0xcd   : > { %11008 = vst [vmem:[#allocation36_spill] sm:$0xff] %v8917_v38  ;;  %11009 = vst [vmem:[#allocation37_spill] sm:$0xff] %v8919_v39  ;;  %v8927_v41 = vld [vmem:[#allocation11 + $0x64] ss:$16 sps:$4 sm:$0xff]   ;;  %v8929_v42 = vld [vmem:[#allocation11 + $0x6c] ss:$16 sps:$4 sm:$0xff]  }
  0xce   : > { %1052 = vmatpush1.bf16.msra.mxu0 %v7342_v47  ;;  %1165 = vmatpush1.bf16.msra.mxu1 %v7343_v48  ;;  %11010 = vst [vmem:[#allocation38_spill] sm:$0xff] %v8921_v40  ;;  %11011 = vst [vmem:[#allocation39_spill] sm:$0xff] %v8927_v41  ;;  %v8931_v43 = vld [vmem:[#allocation11 + $0x60] ss:$16 sps:$4 sm:$0xff]   ;;  %v8933_v44 = vld [vmem:[#allocation11 + $0x68] ss:$16 sps:$4 sm:$0xff]  }
  0xcf   : > { %1586 = vmatprep.subr.bf16.mxu0 %v8767_v49  ;;  %1629 = vmatprep.subr.bf16.mxu1 %v8769_v50  ;;  %11012 = vst [vmem:[#allocation40_spill] sm:$0xff] %v8929_v42  ;;  %11013 = vst [vmem:[#allocation41_spill] sm:$0xff] %v8931_v43  ;;  %v8939_v45 = vld [vmem:[#allocation11 + $0x84] ss:$16 sps:$4 sm:$0xff]   ;;  %v8941_v46 = vld [vmem:[#allocation11 + $0x8c] ss:$16 sps:$4 sm:$0xff]  }
  0xd0   : > { %11014 = vst [vmem:[#allocation42_spill] sm:$0xff] %v8933_v44  ;;  %11015 = vst [vmem:[#allocation43_spill] sm:$0xff] %v8939_v45  ;;  %v8943_v47 = vld [vmem:[#allocation11 + $0x80] ss:$16 sps:$4 sm:$0xff]   ;;  %v8945_v48 = vld [vmem:[#allocation11 + $0x88] ss:$16 sps:$4 sm:$0xff]  }
  0xd1   : > { %1070 = vmatmul.mubr.bf16.vlgmr.msra.gmra.mrb[0].mxu0 %v7344_v51  ;;  %1183 = vmatmul.mubr.bf16.vlgmr.msra.gmra.mrb[0].mxu1 %v7344_v51  ;;  %11016 = vst [vmem:[#allocation44_spill] sm:$0xff] %v8941_v46  ;;  %11017 = vst [vmem:[#allocation45_spill] sm:$0xff] %v8943_v47  ;;  %v8949_v51 = vld [vmem:[#allocation11 + $0xa4] ss:$16 sps:$4 sm:$0xff]   ;;  %v8975_v27 = vld [vmem:[#allocation11 + $0xec] ss:$16 sps:$4 sm:$0xff]  }
  0xd2   : > { %1587 = vmatpush1.bf16.msra.mxu0 %v8772_v52  ;;  %1079 = vmatprep.mubr.bf16.mxu0 %v10841_v16  ;;  %11018 = vst [vmem:[#allocation46_spill] sm:$0xff] %v8945_v48  ;;  %11019 = vst [vmem:[#allocation47_spill] sm:$0xff] %v8949_v51  ;;  %v8973_v26 = vld [vmem:[#allocation11 + $0xe4] ss:$16 sps:$4 sm:$0xff]   ;;  %vm5586_vm7 = vcmask 1047559   ;;  %s10673_s15 = scalar_lea.vmem [#allocation16], %s6414_s22 }
  0xd3   : > { %1192 = vmatprep.mubr.bf16.mxu1 %v10841_v16  ;;  %1588 = vmatprep.subr.bf16.mxu0 %v8775_v53  ;;  %11027 = vst [vmem:[#allocation55_spill] sm:$0xff] %v8973_v26  ;;  %11028 = vst [vmem:[#allocation56_spill] sm:$0xff] %v8975_v27  ;;  %s6680_s24 = sshll.u32 %s8465_s29, 11  ;;  %s6094_s11 = sshll.u32 %s10673_s15, 4  ;;  %s10720_s11 = int_to_ptr.vmem [resolvable:$true] %s6094_s11 }
  0xd4   : > { %1630 = vmatpush1.bf16.msra.mxu1 %v8778_v54  ;;  %s11198_s14 = sld [smem:[#allocation63_spill]]  ;;  %s6071_s8 = scalar_lea.sflag [#allocation10], %s8643_s18 }
  0xd5   : > { %1631 = vmatprep.subr.bf16.mxu1 %v8780_v55  ;;  %s8266_s12 = scalar_lea.vmem %s10720_s11, 2048  ;;  %s8357_s19 = smov [#allocation16]  }
  0xd6   : > { %1589 = vmatpush1.bf16.msra.mxu0 %v8784_v56  ;;  %p8267_p3 = scmp.ne.s32.totalorder %s10720_s11, %s8266_s12  ;;  %s8270_s20 = sshll.u32 %s8357_s19, 4  ;;  %s8271_s20 = int_to_ptr.vmem [resolvable:$false] %s8270_s20 }
  0xd7   : > { %1590 = vmatprep.subr.bf16.mxu0 %v8788_v57  ;;  %s8272_s22 = scalar_lea.vmem %s8271_s20, 4096  ;;  %p8273_p0 = scmp.lt.s32.totalorder %s10720_s11, %s8271_s20 }
  0xd8   : > { %1632 = vmatpush1.bf16.msra.mxu1 %v8791_v58  ;;  %p8274_p12 = scmp.lt.s32.totalorder %s8272_s22, %s8266_s12 }
  0xd9   : > { %1080 = vmatmul.mubr.bf16.gmra.mrb[4].mxu0 %v7348_v59  ;;  %1193 = vmatmul.mubr.bf16.gmra.mrb[4].mxu1 %v7348_v59  ;;  %v8951_v59 = vld [vmem:[#allocation11 + $0xac] ss:$16 sps:$4 sm:$0xff]  }
  0xda   : > { %1089 = vmatprep.mubr.bf16.mxu0 %v10841_v16  ;;  %1202 = vmatprep.mubr.bf16.mxu1 %v10841_v16  ;;  %11020 = vst [vmem:[#allocation48_spill] sm:$0xff] %v8951_v59  ;;  %p8275_p11 = por %p8274_p12, %p8273_p0 }
  0xdb   : > { %1591 = vmatpush1.bf16.msra.mxu0 %v8796_v60  ;;  %1633 = vmatprep.subr.bf16.mxu1 %v8801_v62 }
  0xdc   : > { %1592 = vmatprep.subr.bf16.mxu0 %v8798_v61  ;;  %1634 = vmatpush1.bf16.msra.mxu1 %v8804_v63 }
  0xdd   : > { %1635 = vmatprep.subr.bf16.mxu1 %v8806_v0 }
  0xdf   : > { %1593 = vmatpush1.bf16.msra.mxu0 %v8811_v1 }
  0xe0   : > { %1594 = vmatprep.subr.bf16.mxu0 %v8814_v2  ;;  %1636 = vmatpush1.bf16.msra.mxu1 %v8818_v3 }
  0xe1   : > { %1090 = vmatmul.mubr.bf16.gmra.mrb[8].mxu0 %v7354_v4  ;;  %1203 = vmatmul.mubr.bf16.gmra.mrb[8].mxu1 %v7354_v4  ;;  %v8955_v4 = vld [vmem:[#allocation11 + $0xa0] ss:$16 sps:$4 sm:$0xff]  }
  0xe2   : > { %1099 = vmatprep.mubr.bf16.mxu0 %v10841_v16  ;;  %1212 = vmatprep.mubr.bf16.mxu1 %v10841_v16  ;;  %11021 = vst [vmem:[#allocation49_spill] sm:$0xff] %v8955_v4 }
  0xe3   : > { %1595 = vmatpush1.bf16.msra.mxu0 %v8822_v5  ;;  %1637 = vmatprep.subr.bf16.mxu1 %v8825_v6 }
  0xe4   : > { %1596 = vmatprep.subr.bf16.mxu0 %v8828_v7  ;;  %1638 = vmatpush1.bf16.msra.mxu1 %v8831_v8 }
  0xe5   : > { %1639 = vmatprep.subr.bf16.mxu1 %v8835_v10 }
  0xe7   : > { %1597 = vmatpush1.bf16.msra.mxu0 %v8833_v9 }
  0xe8   : > { %1598 = vmatprep.subr.bf16.mxu0 %v8839_v11  ;;  %1640 = vmatpush1.bf16.msra.mxu1 %v8841_v12 }
  0xe9   : > { %1100 = vmatmul.mubr.bf16.gmra.mrb[12].mxu0 %v7361_v13  ;;  %1213 = vmatmul.mubr.bf16.gmra.mrb[12].mxu1 %v7361_v13  ;;  %v8957_v13 = vld [vmem:[#allocation11 + $0xa8] ss:$16 sps:$4 sm:$0xff]  }
  0xea   : > { %1109 = vmatprep.mubr.bf16.mxu0 %v10841_v16  ;;  %1222 = vmatprep.mubr.bf16.mxu1 %v10841_v16  ;;  %11022 = vst [vmem:[#allocation50_spill] sm:$0xff] %v8957_v13 }
  0xeb   : > { %1599 = vmatpush1.bf16.msra.mxu0 %v8848_v14  ;;  %1641 = vmatprep.subr.bf16.mxu1 %v8851_v15 }
  0xec   : > { %1600 = vmatprep.subr.bf16.mxu0 %v8853_v17  ;;  %1642 = vmatpush1.bf16.msra.mxu1 %v8855_v18 }
  0xed   : > { %1643 = vmatprep.subr.bf16.mxu1 %v8858_v19 }
  0xef   : > { %1601 = vmatpush1.bf16.msra.mxu0 %v8862_v20 }
  0xf0   : > { %1644 = vmatpush1.bf16.msra.mxu1 %v8866_v21  ;;  %1889 = vmatprep.subr.bf16.mxu0 %v8891_v29 }
  0xf1   : > { %1110 = vmatmul.mubr.bf16.gmra.mrb[16].mxu0 %v7368_v22  ;;  %1223 = vmatmul.mubr.bf16.gmra.mrb[16].mxu1 %v7368_v22  ;;  %v8961_v22 = vld [vmem:[#allocation11 + $0xc4] ss:$16 sps:$4 sm:$0xff]  }
  0xf2   : > { %1119 = vmatprep.mubr.bf16.mxu0 %v10841_v16  ;;  %1232 = vmatprep.mubr.bf16.mxu1 %v10841_v16  ;;  %11023 = vst [vmem:[#allocation51_spill] sm:$0xff] %v8961_v22 }
  0xf3   : > { %1932 = vmatprep.subr.bf16.mxu1 %v8893_v30 }
  0xf9   : > { %1120 = vmatmul.mubr.bf16.gmra.mrb[20].mxu0 %v7375_v23  ;;  %1233 = vmatmul.mubr.bf16.gmra.mrb[20].mxu1 %v7375_v23  ;;  %v8963_v23 = vld [vmem:[#allocation11 + $0xcc] ss:$16 sps:$4 sm:$0xff]  }
  0xfa   : > { %1129 = vmatprep.mubr.bf16.mxu0 %v10841_v16  ;;  %1242 = vmatprep.mubr.bf16.mxu1 %v10841_v16  ;;  %11024 = vst [vmem:[#allocation52_spill] sm:$0xff] %v8963_v23 }
 0x101   : > { %1130 = vmatmul.mubr.bf16.gmra.mrb[24].mxu0 %v7382_v24  ;;  %1243 = vmatmul.mubr.bf16.gmra.mrb[24].mxu1 %v7382_v24  ;;  %v8967_v24 = vld [vmem:[#allocation11 + $0xc0] ss:$16 sps:$4 sm:$0xff]  }
 0x102   : > { %1139 = vmatprep.mubr.bf16.mxu0 %v10841_v16  ;;  %1252 = vmatprep.mubr.bf16.mxu1 %v10841_v16  ;;  %11025 = vst [vmem:[#allocation53_spill] sm:$0xff] %v8967_v24 }
 0x109   : > { %1140 = vmatmul.mubr.bf16.gmra.mrb[28].mxu0 %v7390_v25  ;;  %1253 = vmatmul.mubr.bf16.gmra.mrb[28].mxu1 %v7390_v25  ;;  %v8969_v25 = vld [vmem:[#allocation11 + $0xc8] ss:$16 sps:$4 sm:$0xff]  }
 0x10a   : > { %1618 = vmatprep.mubr.bf16.mxu0 %v10841_v16  ;;  %1661 = vmatprep.mubr.bf16.mxu1 %v10841_v16  ;;  %11026 = vst [vmem:[#allocation54_spill] sm:$0xff] %v8969_v25 }
 0x111   : > { %1619 = vmatmul.mubr.bf16.vlgmr.msra.gmra.mrb[0].mxu0 %v1425_v28  ;;  %1662 = vmatmul.mubr.bf16.vlgmr.msra.gmra.mrb[0].mxu1 %v1425_v28  ;;  %v8979_v28 = vld [vmem:[#allocation11 + $0xe0] ss:$16 sps:$4 sm:$0xff]  }
 0x112   : > { %1921 = vmatprep.mubr.bf16.mxu0 %v10841_v16  ;;  %1964 = vmatprep.mubr.bf16.mxu1 %v10841_v16  ;;  %11029 = vst [vmem:[#allocation57_spill] sm:$0xff] %v8979_v28  ;;  %v8981_v16 = vld [vmem:[#allocation11 + $0xe8] ss:$16 sps:$4 sm:$0xff]  }
 0x113   : > { %1890 = vmatpush1.bf16.msra.mxu0 %v8895_v31  ;;  %1933 = vmatpush1.bf16.msra.mxu1 %v8897_v32  ;;  %11030 = vst [vmem:[#allocation58_spill] sm:$0xff] %v8981_v16 }
 0x114   : > { %1891 = vmatprep.subr.bf16.mxu0 %v8903_v33  ;;  %1934 = vmatprep.subr.bf16.mxu1 %v8905_v34 }
 0x117   : > { %1892 = vmatpush1.bf16.msra.mxu0 %v8907_v35  ;;  %1935 = vmatpush1.bf16.msra.mxu1 %v8909_v36 }
 0x118   : > { %1893 = vmatprep.subr.bf16.mxu0 %v8915_v37  ;;  %1936 = vmatprep.subr.bf16.mxu1 %v8917_v38 }
 0x11b   : > { %1894 = vmatpush1.bf16.msra.mxu0 %v8919_v39  ;;  %1937 = vmatpush1.bf16.msra.mxu1 %v8921_v40 }
 0x11c   : > { %1895 = vmatprep.subr.bf16.mxu0 %v8927_v41  ;;  %1938 = vmatprep.subr.bf16.mxu1 %v8929_v42 }
 0x11f   : > { %1896 = vmatpush1.bf16.msra.mxu0 %v8931_v43  ;;  %1939 = vmatpush1.bf16.msra.mxu1 %v8933_v44 }
 0x120   : > { %1897 = vmatprep.subr.bf16.mxu0 %v8939_v45  ;;  %1940 = vmatprep.subr.bf16.mxu1 %v8941_v46 }
 0x123   : > { %1898 = vmatpush1.bf16.msra.mxu0 %v8943_v47  ;;  %1941 = vmatpush1.bf16.msra.mxu1 %v8945_v48 }
 0x124   : > { %1899 = vmatprep.subr.bf16.mxu0 %v8949_v51  ;;  %1942 = vmatprep.subr.bf16.mxu1 %v8951_v59 }
 0x127   : > { %1900 = vmatpush1.bf16.msra.mxu0 %v8955_v4  ;;  %1943 = vmatpush1.bf16.msra.mxu1 %v8957_v13 }
 0x128   : > { %1901 = vmatprep.subr.bf16.mxu0 %v8961_v22  ;;  %1944 = vmatprep.subr.bf16.mxu1 %v8963_v23  ;;  %v809_v23 = vlaneseq  ;;  %v807_v22 = vld [vmem:[%s10820_s5] sm:$0xf] }
 0x12b   : > { %1902 = vmatpush1.bf16.msra.mxu0 %v8967_v24  ;;  %1945 = vmatpush1.bf16.msra.mxu1 %v8969_v25  ;;  %v8989_v24 = vshrl.u32 %v809_v23, 7 }
 0x12c   : > { %1903 = vmatprep.subr.bf16.mxu0 %v8973_v26  ;;  %1946 = vmatprep.subr.bf16.mxu1 %v8975_v27 }
 0x12d   : > { %11031 = vst [vmem:[#allocation59_spill] sm:$0xff] %v8989_v24  ;;  %v10873_v25 = vsub.s32 0, %v8989_v24  ;;  %v10878_v26 = vsub.s32 1, %v8989_v24  ;;  %v10887_v23 = vsub.s32 3, %v8989_v24 }
 0x12f   : > { %1904 = vmatpush1.bf16.msra.mxu0 %v8979_v28  ;;  %1947 = vmatpush1.bf16.msra.mxu1 %v8981_v16  ;;  %v8998_v28 = vrot.slane %v807_v22, %v10873_v25  ;;  %v10890_v25 = vsub.s32 2, %v8989_v24  ;;  %v9011_v43 = vrot.slane %v807_v22, %v10887_v23 }
 0x130   : > { %1992 = vmatprep.subr.bf16.mxu0 %v8767_v49  ;;  %2035 = vmatprep.subr.bf16.mxu1 %v8769_v50  ;;  %v9002_v49 = vrot.slane %v807_v22, %v10878_v26 }
 0x131   : > { %11032 = vst [vmem:[#allocation60_spill] sm:$0xff] %v8998_v28 }
 0x1e4   : > { %v1620_v50 = vpop.f32.mrb[0].mxu0  ;;  %v1663_v16 = vpop.f32.mrb[0].mxu1 }
 0x1e5   : > { %v6915_v27 = vadd.f32 %v1620_v50, %v8998_v28  ;;  %v1622_v13 = vpop.f32.mrb[1].mxu0  ;;  %v1665_v4 = vpop.f32.mrb[1].mxu1 }
 0x1e6   : > { %v6916_v59 = vadd.f32 %v1622_v13, %v9002_v49  ;;  %v1624_v51 = vpop.f32.mrb[2].mxu0  ;;  %v1667_v48 = vpop.f32.mrb[2].mxu1  ;;  %v6948_v41 = vadd.f32 %v1665_v4, %v9011_v43 }
 0x1e7   : > { %v6489_v47 = vmul.f32 -1.442695, %v6915_v27  ;;  %v6917_v46 = vadd.f32 %v1624_v51, %v8998_v28  ;;  %v1626_v45 = vpop.f32.mrb[3].mxu0  ;;  %v1669_v26 = vpop.f32.mrb[3].mxu1  ;;  %v9016_v27 = vrot.slane %v807_v22, %v10890_v25 }
 0x1e8   : > { %v6491_v44 = vmul.f32 -1.442695, %v6916_v59  ;;  %v6918_v50 = vadd.f32 %v1626_v45, %v9002_v49  ;;  %v6493_v59 = vmul.f32 -1.442695, %v6948_v41  ;;  %v6950_v23 = vadd.f32 %v1669_v26, %v9011_v43 }
 0x1e9   : > { %7504 = vpow2.f32 %v6489_v47  ;;  %v6490_v42 = vmul.f32 -1.442695, %v6917_v46  ;;  %v6947_v51 = vadd.f32 %v1663_v16, %v9016_v27  ;;  %v6949_v28 = vadd.f32 %v1667_v48, %v9016_v27 }
 0x1ea   : > { %7506 = vpow2.f32 %v6491_v44  ;;  %v6492_v13 = vmul.f32 -1.442695, %v6918_v50  ;;  %v6494_v47 = vmul.f32 -1.442695, %v6950_v23 }
 0x1eb   : > { %7508 = vpow2.f32 %v6490_v42 }
 0x1ec   : > { %7510 = vpow2.f32 %v6492_v13  ;;  %v1415_v13 = vld [vmem:[%s8655_s13] sm:$0xff] }
 0x1ed   : > { %7512 = vtanh.f32 %v6947_v51 }
 0x1ee   : > { %7514 = vpow2.f32 %v6493_v59 }
 0x1ef   : > { %7516 = vtanh.f32 %v6949_v28 }
 0x1f3   : > { %v7505_v45 = vpop.eup %7504 }
 0x1f4   : > { %v7507_v46 = vpop.eup %7506  ;;  %v1686_v44 = vadd.f32 1.0, %v7505_v45 }
 0x1f5   : > { %v1698_v22 = vadd.f32 1.0, %v7507_v46  ;;  %v7509_v50 = vpop.eup %7508 }
 0x1f6   : > { %7518 = vrcp.f32 %v1686_v44  ;;  %v1687_v42 = vadd.f32 1.0, %v7509_v50  ;;  %v7511_v4 = vpop.eup %7510  ;;  %v1416_v44 = vld [vmem:[%s8655_s13 + $0x8] sm:$0xff] }
 0x1f7   : > { %7520 = vrcp.f32 %v1698_v22  ;;  %v1699_v16 = vadd.f32 1.0, %v7511_v4  ;;  %v7513_v41 = vpop.eup %7512 }
 0x1f8   : > { %7522 = vpow2.f32 %v6494_v47  ;;  %v7515_v48 = vpop.eup %7514 }
 0x1f9   : > { %7524 = vrcp.f32 %v1687_v42  ;;  %v7517_v26 = vpop.eup %7516  ;;  %v1712_v25 = vadd.f32 1.0, %v7515_v48 }
 0x1fa   : > { %7526 = vrcp.f32 %v1699_v16 }
 0x1fb   : > { %7528 = vrcp.f32 %v1712_v25  ;;  %v11034_v25 = vld [vmem:[#allocation39_spill] sm:$0xff] }
 0x200   : > { %v7519_v51 = vpop.eup %7518 }
 0x201   : > { %v7521_v59 = vpop.eup %7520  ;;  %v1720_v45 = vmul.f32 %v7519_v51, %v7513_v41 }
 0x202   : > { %v7523_v23 = vpop.eup %7522  ;;  %v1718_v46 = vmul.f32 %v7521_v59, %v1415_v13 }
 0x203   : > { %v7525_v28 = vpop.eup %7524  ;;  %v1713_v47 = vadd.f32 1.0, %v7523_v23  ;;  %v11036_v23 = vld [vmem:[#allocation41_spill] sm:$0xff] }
 0x204   : > { %v9024_v22 = vadd.f32 %v1720_v45, %v1718_v46  ;;  %v1721_v50 = vmul.f32 %v7525_v28, %v7517_v26  ;;  %v7527_v24 = vpop.eup %7526  ;;  %v11035_v26 = vld [vmem:[#allocation40_spill] sm:$0xff]  ;;  %v11037_v46 = vld [vmem:[#allocation42_spill] sm:$0xff]  ;;  %v11038_v28 = vld [vmem:[#allocation43_spill] sm:$0xff] }
 0x205   : > { %v1719_v42 = vmul.f32 %v7527_v24, %v1416_v44  ;;  %v7529_v16 = vpop.eup %7528  ;;  %v11033_v24 = vmov 0   ;;  %v11039_v44 = vld [vmem:[#allocation44_spill] sm:$0xff] }
 0x206   : > { %7530 = vtanh.f32 %v9024_v22 }
 0x207   : > { %v9027_v4 = vadd.f32 %v1721_v50, %v1719_v42  ;;  %7532 = vrcp.f32 %v1713_v47  ;;  %v11040_v50 = vld [vmem:[#allocation45_spill] sm:$0xff]  ;;  %v11041_v47 = vld [vmem:[#allocation46_spill] sm:$0xff]  ;;  %v11042_v42 = vld [vmem:[#allocation47_spill] sm:$0xff] }
 0x209   : > { %7534 = vtanh.f32 %v9027_v4 }
 0x210   : > { %v7531_v41 = vpop.eup %7530 }
 0x211   : > { %v7533_v13 = vpop.eup %7532  ;;  %v1726_v48 = vmul.f32 %v7531_v41, %v7529_v16  ;;  %v11043_v16 = vld [vmem:[#allocation48_spill] sm:$0xff]  ;;  %v11044_v41 = vld [vmem:[#allocation49_spill] sm:$0xff] }
 0x213   : > { %v7535_v51 = vpop.eup %7534 }
 0x214   : > { %v1727_v59 = vmul.f32 %v7535_v51, %v7533_v13  ;;  %v11045_v13 = vld [vmem:[#allocation50_spill] sm:$0xff]  ;;  %v11046_v51 = vld [vmem:[#allocation51_spill] sm:$0xff] }
 0x216   : > { %v1728_v45 = vpack.c.bf16 %v1727_v59, %v1726_v48  ;;  %v11047_v48 = vld [vmem:[#allocation52_spill] sm:$0xff]  ;;  %v11048_v59 = vld [vmem:[#allocation53_spill] sm:$0xff] }
 0x218   : > { %1922 = vmatmul.mubr.bf16.vlgmr.msra.gmra.mrb[32].mxu0 %v1728_v45  ;;  %1965 = vmatmul.mubr.bf16.vlgmr.msra.gmra.mrb[32].mxu1 %v1728_v45 }
 0x219   : > { %1993 = vmatpush1.bf16.msra.mxu0 %v8772_v52  ;;  %2036 = vmatpush1.bf16.msra.mxu1 %v8778_v54 }
 0x21a   : > { %1994 = vmatprep.subr.bf16.mxu0 %v8775_v53  ;;  %2037 = vmatprep.subr.bf16.mxu1 %v8780_v55 }
 0x21b   : > { %2024 = vmatprep.mubr.bf16.mxu0 %v11033_v24  ;;  %2067 = vmatprep.mubr.bf16.mxu1 %v11033_v24 }
 0x21d   : > { %1995 = vmatpush1.bf16.msra.mxu0 %v8784_v56  ;;  %2038 = vmatpush1.bf16.msra.mxu1 %v8791_v58 }
 0x21e   : > { %1996 = vmatprep.subr.bf16.mxu0 %v8788_v57  ;;  %2039 = vmatprep.subr.bf16.mxu1 %v8801_v62 }
 0x221   : > { %1997 = vmatpush1.bf16.msra.mxu0 %v8796_v60  ;;  %2040 = vmatpush1.bf16.msra.mxu1 %v8804_v63 }
 0x222   : > { %1998 = vmatprep.subr.bf16.mxu0 %v8798_v61  ;;  %2041 = vmatprep.subr.bf16.mxu1 %v8806_v0 }
 0x225   : > { %1999 = vmatpush1.bf16.msra.mxu0 %v8811_v1  ;;  %2042 = vmatpush1.bf16.msra.mxu1 %v8818_v3 }
 0x226   : > { %2000 = vmatprep.subr.bf16.mxu0 %v8814_v2  ;;  %2043 = vmatprep.subr.bf16.mxu1 %v8825_v6 }
 0x229   : > { %2001 = vmatpush1.bf16.msra.mxu0 %v8822_v5  ;;  %2044 = vmatpush1.bf16.msra.mxu1 %v8831_v8 }
 0x22a   : > { %2002 = vmatprep.subr.bf16.mxu0 %v8828_v7  ;;  %2045 = vmatprep.subr.bf16.mxu1 %v8835_v10 }
 0x22d   : > { %2003 = vmatpush1.bf16.msra.mxu0 %v8833_v9  ;;  %2046 = vmatpush1.bf16.msra.mxu1 %v8841_v12 }
 0x22e   : > { %2004 = vmatprep.subr.bf16.mxu0 %v8839_v11  ;;  %2047 = vmatprep.subr.bf16.mxu1 %v8851_v15 }
 0x231   : > { %2005 = vmatpush1.bf16.msra.mxu0 %v8848_v14  ;;  %2048 = vmatpush1.bf16.msra.mxu1 %v8855_v18 }
 0x232   : > { %2006 = vmatprep.subr.bf16.mxu0 %v8853_v17  ;;  %2049 = vmatprep.subr.bf16.mxu1 %v8858_v19 }
 0x235   : > { %2007 = vmatpush1.bf16.msra.mxu0 %v8862_v20  ;;  %2050 = vmatpush1.bf16.msra.mxu1 %v8866_v21 }
 0x236   : > { %2135 = vmatprep.subr.bf16.mxu0 %v8891_v29  ;;  %2178 = vmatprep.subr.bf16.mxu1 %v8893_v30 }
 0x238   : > { %2025 = vmatmul.mubr.bf16.vlgmr.msra.gmra.mrb[4].mxu0 %v1728_v45  ;;  %2068 = vmatmul.mubr.bf16.vlgmr.msra.gmra.mrb[4].mxu1 %v1728_v45  ;;  %v11049_v45 = vld [vmem:[#allocation54_spill] sm:$0xff] }
 0x239   : > { %2136 = vmatpush1.bf16.msra.mxu0 %v8895_v31  ;;  %2179 = vmatpush1.bf16.msra.mxu1 %v8897_v32 }
 0x23a   : > { %2137 = vmatprep.subr.bf16.mxu0 %v8903_v33  ;;  %2180 = vmatprep.subr.bf16.mxu1 %v8905_v34 }
 0x23b   : > { %2167 = vmatprep.mubr.bf16.mxu0 %v11033_v24  ;;  %2210 = vmatprep.mubr.bf16.mxu1 %v11033_v24 }
 0x23d   : > { %2138 = vmatpush1.bf16.msra.mxu0 %v8907_v35  ;;  %2181 = vmatpush1.bf16.msra.mxu1 %v8909_v36 }
 0x23e   : > { %2139 = vmatprep.subr.bf16.mxu0 %v8915_v37  ;;  %2182 = vmatprep.subr.bf16.mxu1 %v8917_v38 }
 0x241   : > { %2140 = vmatpush1.bf16.msra.mxu0 %v8919_v39  ;;  %2183 = vmatpush1.bf16.msra.mxu1 %v8921_v40 }
 0x242   : > { %2141 = vmatprep.subr.bf16.mxu0 %v11034_v25  ;;  %2184 = vmatprep.subr.bf16.mxu1 %v11035_v26 }
 0x245   : > { %2142 = vmatpush1.bf16.msra.mxu0 %v11036_v23  ;;  %2185 = vmatpush1.bf16.msra.mxu1 %v11037_v46 }
 0x246   : > { %2143 = vmatprep.subr.bf16.mxu0 %v11038_v28  ;;  %2186 = vmatprep.subr.bf16.mxu1 %v11039_v44  ;;  %v11050_v44 = vld [vmem:[#allocation55_spill] sm:$0xff]  ;;  %v11056_v28 = vld [vmem:[#allocation60_spill] sm:$0xff] }
 0x249   : > { %2144 = vmatpush1.bf16.msra.mxu0 %v11040_v50  ;;  %2187 = vmatpush1.bf16.msra.mxu1 %v11041_v47  ;;  %v11051_v50 = vld [vmem:[#allocation56_spill] sm:$0xff]  ;;  %v11052_v47 = vld [vmem:[#allocation57_spill] sm:$0xff] }
 0x24a   : > { %2145 = vmatprep.subr.bf16.mxu0 %v11042_v42  ;;  %2188 = vmatprep.subr.bf16.mxu1 %v11043_v16  ;;  %v11053_v42 = vld [vmem:[#allocation58_spill] sm:$0xff] }
 0x24b   : > { %v11054_v16 = vld [vmem:[#allocation34_spill] sm:$0xff] }
 0x24d   : > { %2146 = vmatpush1.bf16.msra.mxu0 %v11044_v41  ;;  %2189 = vmatpush1.bf16.msra.mxu1 %v11045_v13  ;;  %v11055_v41 = vld [vmem:[#allocation35_spill] sm:$0xff] }
 0x24e   : > { %2147 = vmatprep.subr.bf16.mxu0 %v11046_v51  ;;  %2190 = vmatprep.subr.bf16.mxu1 %v11047_v48 }
 0x251   : > { %2148 = vmatpush1.bf16.msra.mxu0 %v11048_v59  ;;  %2191 = vmatpush1.bf16.msra.mxu1 %v11049_v45 }
 0x252   : > { %2149 = vmatprep.subr.bf16.mxu0 %v11050_v44  ;;  %2192 = vmatprep.subr.bf16.mxu1 %v11051_v50 }
 0x255   : > { %2150 = vmatpush1.bf16.msra.mxu0 %v11052_v47  ;;  %2193 = vmatpush1.bf16.msra.mxu1 %v11053_v42 }
 0x256   : > { %2239 = vmatprep.subr.bf16.mxu0 %v11054_v16  ;;  %2282 = vmatprep.subr.bf16.mxu1 %v11055_v41 }
 0x30b   : > { %v2026_v13 = vpop.f32.mrb[4].mxu0  ;;  %v2069_v51 = vpop.f32.mrb[4].mxu1 }
 0x30c   : > { %v6919_v48 = vadd.f32 %v2026_v13, %v11056_v28  ;;  %v2028_v46 = vpop.f32.mrb[5].mxu0  ;;  %v2071_v59 = vpop.f32.mrb[5].mxu1 }
 0x30d   : > { %v6920_v45 = vadd.f32 %v2028_v46, %v9002_v49  ;;  %v2030_v23 = vpop.f32.mrb[6].mxu0  ;;  %v2073_v44 = vpop.f32.mrb[6].mxu1  ;;  %v6952_v13 = vadd.f32 %v2071_v59, %v9011_v43  ;;  %v6951_v46 = vadd.f32 %v2069_v51, %v9016_v27 }
 0x30e   : > { %v6527_v26 = vmul.f32 -1.442695, %v6919_v48  ;;  %v6921_v50 = vadd.f32 %v2030_v23, %v11056_v28  ;;  %v2032_v47 = vpop.f32.mrb[7].mxu0  ;;  %v2075_v25 = vpop.f32.mrb[7].mxu1  ;;  %v6953_v23 = vadd.f32 %v2073_v44, %v9016_v27 }
 0x30f   : > { %v6529_v42 = vmul.f32 -1.442695, %v6920_v45  ;;  %v6922_v16 = vadd.f32 %v2032_v47, %v9002_v49  ;;  %v6531_v39 = vmul.f32 -1.442695, %v6952_v13  ;;  %v6954_v48 = vadd.f32 %v2075_v25, %v9011_v43 }
 0x310   : > { %7536 = vpow2.f32 %v6527_v26  ;;  %v6528_v41 = vmul.f32 -1.442695, %v6921_v50 }
 0x311   : > { %7538 = vpow2.f32 %v6529_v42  ;;  %v6530_v40 = vmul.f32 -1.442695, %v6922_v16  ;;  %v6532_v26 = vmul.f32 -1.442695, %v6954_v48 }
 0x312   : > { %7540 = vpow2.f32 %v6528_v41 }
 0x313   : > { %7542 = vpow2.f32 %v6530_v40 }
 0x314   : > { %7544 = vtanh.f32 %v6951_v46 }
 0x315   : > { %7546 = vpow2.f32 %v6531_v39 }
 0x316   : > { %7548 = vtanh.f32 %v6953_v23 }
 0x31a   : > { %v7537_v28 = vpop.eup %7536 }
 0x31b   : > { %v7539_v45 = vpop.eup %7538  ;;  %v2092_v38 = vadd.f32 1.0, %v7537_v28 }
 0x31c   : > { %v2104_v50 = vadd.f32 1.0, %v7539_v45  ;;  %v7541_v47 = vpop.eup %7540 }
 0x31d   : > { %7550 = vrcp.f32 %v2092_v38  ;;  %v2093_v42 = vadd.f32 1.0, %v7541_v47  ;;  %v7543_v40 = vpop.eup %7542 }
 0x31e   : > { %7552 = vrcp.f32 %v2104_v50  ;;  %v2105_v51 = vadd.f32 1.0, %v7543_v40  ;;  %v7545_v25 = vpop.eup %7544 }
 0x31f   : > { %7554 = vpow2.f32 %v6532_v26  ;;  %v7547_v59 = vpop.eup %7546 }
 0x320   : > { %7556 = vrcp.f32 %v2093_v42  ;;  %v7549_v44 = vpop.eup %7548  ;;  %v2118_v48 = vadd.f32 1.0, %v7547_v59 }
 0x321   : > { %7558 = vrcp.f32 %v2105_v51 }
 0x322   : > { %7560 = vrcp.f32 %v2118_v48 }
 0x327   : > { %v7551_v16 = vpop.eup %7550 }
 0x328   : > { %v7553_v41 = vpop.eup %7552  ;;  %v2126_v13 = vmul.f32 %v7551_v16, %v7545_v25 }
 0x329   : > { %v7555_v28 = vpop.eup %7554  ;;  %v2124_v39 = vmul.f32 %v7553_v41, %v9024_v22 }
 0x32a   : > { %v7557_v46 = vpop.eup %7556  ;;  %v2119_v50 = vadd.f32 1.0, %v7555_v28 }
 0x32b   : > { %v9107_v23 = vadd.f32 %v2126_v13, %v2124_v39  ;;  %v2127_v38 = vmul.f32 %v7557_v46, %v7549_v44  ;;  %v7559_v45 = vpop.eup %7558 }
 0x32c   : > { %v2125_v26 = vmul.f32 %v7559_v45, %v9027_v4  ;;  %v7561_v42 = vpop.eup %7560 }
 0x32d   : > { %7562 = vtanh.f32 %v9107_v23 }
 0x32e   : > { %v9111_v47 = vadd.f32 %v2127_v38, %v2125_v26  ;;  %7564 = vrcp.f32 %v2119_v50 }
 0x330   : > { %7566 = vtanh.f32 %v9111_v47 }
 0x337   : > { %v7563_v40 = vpop.eup %7562 }
 0x338   : > { %v7565_v22 = vpop.eup %7564  ;;  %v2132_v25 = vmul.f32 %v7563_v40, %v7561_v42 }
 0x33a   : > { %v7567_v51 = vpop.eup %7566 }
 0x33b   : > { %v2133_v59 = vmul.f32 %v7567_v51, %v7565_v22 }
 0x33d   : > { %v2134_v16 = vpack.c.bf16 %v2133_v59, %v2132_v25 }
 0x33f   : > { %2168 = vmatmul.mubr.bf16.vlgmr.msra.gmra.mrb[36].mxu0 %v2134_v16  ;;  %2211 = vmatmul.mubr.bf16.vlgmr.msra.gmra.mrb[36].mxu1 %v2134_v16 }
 0x340   : > { %2240 = vmatpush1.bf16.msra.mxu0 %v8772_v52  ;;  %2283 = vmatpush1.bf16.msra.mxu1 %v8778_v54  ;;  %v11057_v52 = vld [vmem:[#allocation36_spill] sm:$0xff]  ;;  %v11059_v54 = vld [vmem:[#allocation38_spill] sm:$0xff] }
 0x341   : > { %2241 = vmatprep.subr.bf16.mxu0 %v8775_v53  ;;  %2284 = vmatprep.subr.bf16.mxu1 %v8780_v55  ;;  %v11058_v53 = vld [vmem:[#allocation37_spill] sm:$0xff]  ;;  %v11060_v55 = vld [vmem:[#allocation39_spill] sm:$0xff] }
 0x342   : > { %2271 = vmatprep.mubr.bf16.mxu0 %v11033_v24  ;;  %2314 = vmatprep.mubr.bf16.mxu1 %v11033_v24 }
 0x344   : > { %2242 = vmatpush1.bf16.msra.mxu0 %v8784_v56  ;;  %2285 = vmatpush1.bf16.msra.mxu1 %v8791_v58  ;;  %v11061_v56 = vld [vmem:[#allocation40_spill] sm:$0xff]  ;;  %v11063_v58 = vld [vmem:[#allocation42_spill] sm:$0xff] }
 0x345   : > { %2243 = vmatprep.subr.bf16.mxu0 %v8788_v57  ;;  %2286 = vmatprep.subr.bf16.mxu1 %v8801_v62  ;;  %v11062_v57 = vld [vmem:[#allocation41_spill] sm:$0xff] }
 0x346   : > { %v11066_v62 = vld [vmem:[#allocation45_spill] sm:$0xff] }
 0x348   : > { %2244 = vmatpush1.bf16.msra.mxu0 %v8796_v60  ;;  %2287 = vmatpush1.bf16.msra.mxu1 %v8804_v63  ;;  %v11064_v60 = vld [vmem:[#allocation43_spill] sm:$0xff]  ;;  %v11067_v63 = vld [vmem:[#allocation46_spill] sm:$0xff] }
 0x349   : > { %2245 = vmatprep.subr.bf16.mxu0 %v8798_v61  ;;  %2288 = vmatprep.subr.bf16.mxu1 %v8806_v0  ;;  %v11065_v61 = vld [vmem:[#allocation44_spill] sm:$0xff]  ;;  %v11068_v0 = vld [vmem:[#allocation47_spill] sm:$0xff] }
 0x34c   : > { %2246 = vmatpush1.bf16.msra.mxu0 %v8811_v1  ;;  %2289 = vmatpush1.bf16.msra.mxu1 %v8818_v3  ;;  %v11069_v1 = vld [vmem:[#allocation48_spill] sm:$0xff]  ;;  %v11071_v3 = vld [vmem:[#allocation50_spill] sm:$0xff] }
 0x34d   : > { %2247 = vmatprep.subr.bf16.mxu0 %v8814_v2  ;;  %2290 = vmatprep.subr.bf16.mxu1 %v8825_v6  ;;  %v11070_v2 = vld [vmem:[#allocation49_spill] sm:$0xff]  ;;  %v11073_v6 = vld [vmem:[#allocation52_spill] sm:$0xff] }
 0x350   : > { %2248 = vmatpush1.bf16.msra.mxu0 %v8822_v5  ;;  %2291 = vmatpush1.bf16.msra.mxu1 %v8831_v8  ;;  %v11072_v5 = vld [vmem:[#allocation51_spill] sm:$0xff]  ;;  %v11075_v8 = vld [vmem:[#allocation54_spill] sm:$0xff] }
 0x351   : > { %2249 = vmatprep.subr.bf16.mxu0 %v8828_v7  ;;  %2292 = vmatprep.subr.bf16.mxu1 %v8835_v10  ;;  %v11074_v7 = vld [vmem:[#allocation53_spill] sm:$0xff]  ;;  %v11077_v10 = vld [vmem:[#allocation56_spill] sm:$0xff] }
 0x354   : > { %2250 = vmatpush1.bf16.msra.mxu0 %v8833_v9  ;;  %2293 = vmatpush1.bf16.msra.mxu1 %v8841_v12  ;;  %v11076_v9 = vld [vmem:[#allocation55_spill] sm:$0xff]  ;;  %v11079_v12 = vld [vmem:[#allocation58_spill] sm:$0xff] }
 0x355   : > { %2251 = vmatprep.subr.bf16.mxu0 %v8839_v11  ;;  %2294 = vmatprep.subr.bf16.mxu1 %v8851_v15  ;;  %v11078_v11 = vld [vmem:[#allocation57_spill] sm:$0xff] }
 0x356   : > { %v9183_v15 = vld [vmem:[#allocation8 + $0xc] ss:$16 sps:$4 sm:$0xff]  }
 0x357   : > { %11081 = vst [vmem:[#allocation35_spill] sm:$0xff] %v9183_v15 }
 0x358   : > { %2252 = vmatpush1.bf16.msra.mxu0 %v8848_v14  ;;  %2295 = vmatpush1.bf16.msra.mxu1 %v8855_v18  ;;  %v9180_v14 = vld [vmem:[#allocation8 + $0x4] ss:$16 sps:$4 sm:$0xff]  }
 0x359   : > { %2253 = vmatprep.subr.bf16.mxu0 %v8853_v17  ;;  %2296 = vmatprep.subr.bf16.mxu1 %v8858_v19  ;;  %11080 = vst [vmem:[#allocation34_spill] sm:$0xff] %v9180_v14  ;;  %v11082_v19 = vld [vmem:[#allocation60_spill] sm:$0xff] }
 0x35c   : > { %2254 = vmatpush1.bf16.msra.mxu0 %v8862_v20  ;;  %2297 = vmatpush1.bf16.msra.mxu1 %v8866_v21 }
 0x35d   : > { %2382 = vmatprep.subr.bf16.mxu0 %v8891_v29  ;;  %2425 = vmatprep.subr.bf16.mxu1 %v8893_v30 }
 0x35f   : > { %2272 = vmatmul.mubr.bf16.vlgmr.msra.gmra.mrb[8].mxu0 %v2134_v16  ;;  %2315 = vmatmul.mubr.bf16.vlgmr.msra.gmra.mrb[8].mxu1 %v2134_v16 }
 0x360   : > { %2383 = vmatpush1.bf16.msra.mxu0 %v8895_v31  ;;  %2426 = vmatpush1.bf16.msra.mxu1 %v8897_v32 }
 0x361   : > { %2384 = vmatprep.subr.bf16.mxu0 %v8903_v33  ;;  %2427 = vmatprep.subr.bf16.mxu1 %v8905_v34 }
 0x362   : > { %2414 = vmatprep.mubr.bf16.mxu0 %v11033_v24  ;;  %2457 = vmatprep.mubr.bf16.mxu1 %v11033_v24 }
 0x364   : > { %2385 = vmatpush1.bf16.msra.mxu0 %v8907_v35  ;;  %2428 = vmatpush1.bf16.msra.mxu1 %v8909_v36 }
 0x365   : > { %2386 = vmatprep.subr.bf16.mxu0 %v8915_v37  ;;  %2429 = vmatprep.subr.bf16.mxu1 %v11057_v52 }
 0x368   : > { %2387 = vmatpush1.bf16.msra.mxu0 %v11058_v53  ;;  %2430 = vmatpush1.bf16.msra.mxu1 %v11059_v54 }
 0x369   : > { %2388 = vmatprep.subr.bf16.mxu0 %v11060_v55  ;;  %2431 = vmatprep.subr.bf16.mxu1 %v11061_v56 }
 0x36c   : > { %2389 = vmatpush1.bf16.msra.mxu0 %v11062_v57  ;;  %2432 = vmatpush1.bf16.msra.mxu1 %v11063_v58 }
 0x36d   : > { %2390 = vmatprep.subr.bf16.mxu0 %v11064_v60  ;;  %2433 = vmatprep.subr.bf16.mxu1 %v11065_v61 }
 0x370   : > { %2391 = vmatpush1.bf16.msra.mxu0 %v11066_v62  ;;  %2434 = vmatpush1.bf16.msra.mxu1 %v11067_v63 }
 0x371   : > { %2392 = vmatprep.subr.bf16.mxu0 %v11068_v0  ;;  %2435 = vmatprep.subr.bf16.mxu1 %v11069_v1 }
 0x374   : > { %2393 = vmatpush1.bf16.msra.mxu0 %v11070_v2  ;;  %2436 = vmatpush1.bf16.msra.mxu1 %v11071_v3 }
 0x375   : > { %2394 = vmatprep.subr.bf16.mxu0 %v11072_v5  ;;  %2437 = vmatprep.subr.bf16.mxu1 %v11073_v6 }
 0x378   : > { %2395 = vmatpush1.bf16.msra.mxu0 %v11074_v7  ;;  %2438 = vmatpush1.bf16.msra.mxu1 %v11075_v8 }
 0x379   : > { %2396 = vmatprep.subr.bf16.mxu0 %v11076_v9  ;;  %2439 = vmatprep.subr.bf16.mxu1 %v11077_v10 }
 0x37c   : > { %2397 = vmatpush1.bf16.msra.mxu0 %v11078_v11  ;;  %2440 = vmatpush1.bf16.msra.mxu1 %v11079_v12 }
 0x37d   : > { %2486 = vmatprep.subr.bf16.mxu0 %v9180_v14  ;;  %2529 = vmatprep.subr.bf16.mxu1 %v9183_v15 }
 0x432   : > { %v2273_v17 = vpop.f32.mrb[8].mxu0  ;;  %v2316_v18 = vpop.f32.mrb[8].mxu1 }
 0x433   : > { %v6923_v20 = vadd.f32 %v2273_v17, %v11082_v19  ;;  %v2275_v21 = vpop.f32.mrb[9].mxu0  ;;  %v2318_v4 = vpop.f32.mrb[9].mxu1  ;;  %v6955_v40 = vadd.f32 %v2316_v18, %v9016_v27 }
 0x434   : > { %v6924_v44 = vadd.f32 %v2275_v21, %v9002_v49  ;;  %v2277_v41 = vpop.f32.mrb[10].mxu0  ;;  %v2320_v13 = vpop.f32.mrb[10].mxu1  ;;  %v6956_v42 = vadd.f32 %v2318_v4, %v9011_v43 }
 0x435   : > { %v6533_v28 = vmul.f32 -1.442695, %v6923_v20  ;;  %v6925_v39 = vadd.f32 %v2277_v41, %v11082_v19  ;;  %v2279_v46 = vpop.f32.mrb[11].mxu0  ;;  %v2322_v48 = vpop.f32.mrb[11].mxu1  ;;  %v6957_v25 = vadd.f32 %v2320_v13, %v9016_v27 }
 0x436   : > { %v6535_v38 = vmul.f32 -1.442695, %v6924_v44  ;;  %v6926_v45 = vadd.f32 %v2279_v46, %v9002_v49  ;;  %v6537_v22 = vmul.f32 -1.442695, %v6956_v42  ;;  %v6958_v51 = vadd.f32 %v2322_v48, %v9011_v43 }
 0x437   : > { %7568 = vpow2.f32 %v6533_v28  ;;  %v6534_v50 = vmul.f32 -1.442695, %v6925_v39 }
 0x438   : > { %7570 = vpow2.f32 %v6535_v38  ;;  %v6536_v26 = vmul.f32 -1.442695, %v6926_v45  ;;  %v6538_v20 = vmul.f32 -1.442695, %v6958_v51 }
 0x439   : > { %7572 = vpow2.f32 %v6534_v50 }
 0x43a   : > { %7574 = vpow2.f32 %v6536_v26 }
 0x43b   : > { %7576 = vtanh.f32 %v6955_v40 }
 0x43c   : > { %7578 = vpow2.f32 %v6537_v22 }
 0x43d   : > { %7580 = vtanh.f32 %v6957_v25 }
 0x441   : > { %v7569_v59 = vpop.eup %7568 }
 0x442   : > { %v7571_v16 = vpop.eup %7570  ;;  %v2339_v17 = vadd.f32 1.0, %v7569_v59 }
 0x443   : > { %v2351_v21 = vadd.f32 1.0, %v7571_v16  ;;  %v7573_v44 = vpop.eup %7572 }
 0x444   : > { %7582 = vrcp.f32 %v2339_v17  ;;  %v2340_v4 = vadd.f32 1.0, %v7573_v44  ;;  %v7575_v41 = vpop.eup %7574 }
 0x445   : > { %7584 = vrcp.f32 %v2351_v21  ;;  %v2352_v18 = vadd.f32 1.0, %v7575_v41  ;;  %v7577_v28 = vpop.eup %7576 }
 0x446   : > { %7586 = vpow2.f32 %v6538_v20  ;;  %v7579_v39 = vpop.eup %7578 }
 0x447   : > { %7588 = vrcp.f32 %v2340_v4  ;;  %v7581_v13 = vpop.eup %7580  ;;  %v2365_v42 = vadd.f32 1.0, %v7579_v39  ;;  %v9215_v39 = vld [vmem:[#allocation8 + $0x2c] ss:$16 sps:$4 sm:$0xff]  }
 0x448   : > { %7590 = vrcp.f32 %v2352_v18  ;;  %v9209_v18 = vld [vmem:[#allocation8 + $0x8] ss:$16 sps:$4 sm:$0xff]  }
 0x449   : > { %7592 = vrcp.f32 %v2365_v42  ;;  %v9241_v42 = vld [vmem:[#allocation8 + $0x6c] ss:$16 sps:$4 sm:$0xff]  }
 0x44e   : > { %v7583_v46 = vpop.eup %7582 }
 0x44f   : > { %v7585_v48 = vpop.eup %7584  ;;  %v2373_v38 = vmul.f32 %v7583_v46, %v7577_v28  ;;  %v9212_v28 = vld [vmem:[#allocation8 + $0x24] ss:$16 sps:$4 sm:$0xff]   ;;  %v9223_v46 = vld [vmem:[#allocation8 + $0x28] ss:$16 sps:$4 sm:$0xff]  }
 0x450   : > { %v7587_v45 = vpop.eup %7586  ;;  %v2371_v50 = vmul.f32 %v7585_v48, %v9107_v23  ;;  %v9226_v48 = vld [vmem:[#allocation8 + $0x44] ss:$16 sps:$4 sm:$0xff]  }
 0x451   : > { %v7589_v26 = vpop.eup %7588  ;;  %v2366_v25 = vadd.f32 1.0, %v7587_v45  ;;  %v9232_v45 = vld [vmem:[#allocation8 + $0x40] ss:$16 sps:$4 sm:$0xff]  }
 0x452   : > { %v9195_v40 = vadd.f32 %v2373_v38, %v2371_v50  ;;  %v2374_v22 = vmul.f32 %v7589_v26, %v7581_v13  ;;  %v7591_v51 = vpop.eup %7590  ;;  %v9220_v13 = vld [vmem:[#allocation8 + $0x20] ss:$16 sps:$4 sm:$0xff]   ;;  %v9229_v38 = vld [vmem:[#allocation8 + $0x4c] ss:$16 sps:$4 sm:$0xff]   ;;  %v9235_v50 = vld [vmem:[#allocation8 + $0x48] ss:$16 sps:$4 sm:$0xff]  }
 0x453   : > { %v2372_v59 = vmul.f32 %v7591_v51, %v9111_v47  ;;  %v7593_v17 = vpop.eup %7592  ;;  %v9206_v47 = vld [vmem:[#allocation8] ss:$16 sps:$4 sm:$0xff]   ;;  %v9238_v26 = vld [vmem:[#allocation8 + $0x64] ss:$16 sps:$4 sm:$0xff]   ;;  %v9247_v51 = vld [vmem:[#allocation8 + $0x68] ss:$16 sps:$4 sm:$0xff]  }
 0x454   : > { %7594 = vtanh.f32 %v9195_v40 }
 0x455   : > { %v9199_v16 = vadd.f32 %v2374_v22, %v2372_v59  ;;  %7596 = vrcp.f32 %v2366_v25  ;;  %v9244_v22 = vld [vmem:[#allocation8 + $0x60] ss:$16 sps:$4 sm:$0xff]   ;;  %v9250_v25 = vld [vmem:[#allocation8 + $0x84] ss:$16 sps:$4 sm:$0xff]   ;;  %v9253_v59 = vld [vmem:[#allocation8 + $0x8c] ss:$16 sps:$4 sm:$0xff]  }
 0x457   : > { %7598 = vtanh.f32 %v9199_v16 }
 0x45e   : > { %v7595_v20 = vpop.eup %7594 }
 0x45f   : > { %v7597_v23 = vpop.eup %7596  ;;  %v2379_v44 = vmul.f32 %v7595_v20, %v7593_v17  ;;  %v9256_v17 = vld [vmem:[#allocation8 + $0x80] ss:$16 sps:$4 sm:$0xff]   ;;  %v9259_v20 = vld [vmem:[#allocation8 + $0x88] ss:$16 sps:$4 sm:$0xff]  }
 0x460   : > { %11083 = vst [vmem:[#allocation36_spill] sm:$0xff] %v9256_v17  ;;  %11084 = vst [vmem:[#allocation37_spill] sm:$0xff] %v9259_v20 }
 0x461   : > { %v7599_v21 = vpop.eup %7598 }
 0x462   : > { %v2380_v4 = vmul.f32 %v7599_v21, %v7597_v23  ;;  %v9262_v23 = vld [vmem:[#allocation8 + $0xa4] ss:$16 sps:$4 sm:$0xff]   ;;  %v9265_v21 = vld [vmem:[#allocation8 + $0xac] ss:$16 sps:$4 sm:$0xff]  }
 0x463   : > { %11085 = vst [vmem:[#allocation38_spill] sm:$0xff] %v9262_v23  ;;  %11086 = vst [vmem:[#allocation39_spill] sm:$0xff] %v9265_v21 }
 0x464   : > { %v9202_v41 = vpack.c.bf16 %v2380_v4, %v2379_v44  ;;  %v9268_v44 = vld [vmem:[#allocation8 + $0xa0] ss:$16 sps:$4 sm:$0xff]   ;;  %v9271_v4 = vld [vmem:[#allocation8 + $0xa8] ss:$16 sps:$4 sm:$0xff]  }
 0x465   : > { %11087 = vst [vmem:[#allocation40_spill] sm:$0xff] %v9268_v44  ;;  %11088 = vst [vmem:[#allocation41_spill] sm:$0xff] %v9271_v4 }
 0x466   : > { %2415 = vmatmul.mubr.bf16.vlgmr.msra.gmra.mrb[40].mxu0 %v9202_v41  ;;  %2458 = vmatmul.mubr.bf16.vlgmr.msra.gmra.mrb[40].mxu1 %v9202_v41 }
 0x467   : > { %2487 = vmatpush1.bf16.msra.mxu0 %v9206_v47  ;;  %2530 = vmatpush1.bf16.msra.mxu1 %v9209_v18 }
 0x468   : > { %2488 = vmatprep.subr.bf16.mxu0 %v9212_v28  ;;  %2531 = vmatprep.subr.bf16.mxu1 %v9215_v39 }
 0x469   : > { %2518 = vmatprep.mubr.bf16.mxu0 %v11033_v24  ;;  %2561 = vmatprep.mubr.bf16.mxu1 %v11033_v24 }
 0x46b   : > { %2489 = vmatpush1.bf16.msra.mxu0 %v9220_v13  ;;  %2532 = vmatpush1.bf16.msra.mxu1 %v9223_v46 }
 0x46c   : > { %2490 = vmatprep.subr.bf16.mxu0 %v9226_v48  ;;  %2533 = vmatprep.subr.bf16.mxu1 %v9229_v38 }
 0x46f   : > { %2491 = vmatpush1.bf16.msra.mxu0 %v9232_v45  ;;  %2534 = vmatpush1.bf16.msra.mxu1 %v9235_v50 }
 0x470   : > { %2492 = vmatprep.subr.bf16.mxu0 %v9238_v26  ;;  %2535 = vmatprep.subr.bf16.mxu1 %v9241_v42 }
 0x473   : > { %2493 = vmatpush1.bf16.msra.mxu0 %v9244_v22  ;;  %2536 = vmatpush1.bf16.msra.mxu1 %v9247_v51 }
 0x474   : > { %2494 = vmatprep.subr.bf16.mxu0 %v9250_v25  ;;  %2537 = vmatprep.subr.bf16.mxu1 %v9253_v59 }
 0x477   : > { %2495 = vmatpush1.bf16.msra.mxu0 %v9256_v17  ;;  %2538 = vmatpush1.bf16.msra.mxu1 %v9259_v20  ;;  %v9274_v17 = vld [vmem:[#allocation8 + $0xc4] ss:$16 sps:$4 sm:$0xff]   ;;  %v9277_v20 = vld [vmem:[#allocation8 + $0xcc] ss:$16 sps:$4 sm:$0xff]  }
 0x478   : > { %2496 = vmatprep.subr.bf16.mxu0 %v9262_v23  ;;  %2539 = vmatprep.subr.bf16.mxu1 %v9265_v21  ;;  %11089 = vst [vmem:[#allocation42_spill] sm:$0xff] %v9274_v17  ;;  %11090 = vst [vmem:[#allocation43_spill] sm:$0xff] %v9277_v20  ;;  %v9280_v23 = vld [vmem:[#allocation8 + $0xc0] ss:$16 sps:$4 sm:$0xff]   ;;  %v9283_v21 = vld [vmem:[#allocation8 + $0xc8] ss:$16 sps:$4 sm:$0xff]  }
 0x47b   : > { %2497 = vmatpush1.bf16.msra.mxu0 %v9268_v44  ;;  %2540 = vmatpush1.bf16.msra.mxu1 %v9271_v4  ;;  %v9286_v44 = vld [vmem:[#allocation8 + $0xe4] ss:$16 sps:$4 sm:$0xff]   ;;  %v9289_v4 = vld [vmem:[#allocation8 + $0xec] ss:$16 sps:$4 sm:$0xff]  }
 0x47c   : > { %2498 = vmatprep.subr.bf16.mxu0 %v9274_v17  ;;  %2541 = vmatprep.subr.bf16.mxu1 %v9277_v20  ;;  %v9292_v17 = vld [vmem:[#allocation8 + $0xe0] ss:$16 sps:$4 sm:$0xff]   ;;  %v9295_v20 = vld [vmem:[#allocation8 + $0xe8] ss:$16 sps:$4 sm:$0xff]  }
 0x47f   : > { %2499 = vmatpush1.bf16.msra.mxu0 %v9280_v23  ;;  %2542 = vmatpush1.bf16.msra.mxu1 %v9283_v21 }
 0x480   : > { %2500 = vmatprep.subr.bf16.mxu0 %v9286_v44  ;;  %2543 = vmatprep.subr.bf16.mxu1 %v9289_v4 }
 0x483   : > { %2501 = vmatpush1.bf16.msra.mxu0 %v9292_v17  ;;  %2544 = vmatpush1.bf16.msra.mxu1 %v9295_v20 }
 0x484   : > { %2629 = vmatprep.subr.bf16.mxu0 %v8891_v29  ;;  %2672 = vmatprep.subr.bf16.mxu1 %v8893_v30 }
 0x486   : > { %2519 = vmatmul.mubr.bf16.vlgmr.msra.gmra.mrb[12].mxu0 %v9202_v41  ;;  %2562 = vmatmul.mubr.bf16.vlgmr.msra.gmra.mrb[12].mxu1 %v9202_v41 }
 0x487   : > { %2630 = vmatpush1.bf16.msra.mxu0 %v8895_v31  ;;  %2673 = vmatpush1.bf16.msra.mxu1 %v8897_v32 }
 0x488   : > { %2631 = vmatprep.subr.bf16.mxu0 %v8903_v33  ;;  %2674 = vmatprep.subr.bf16.mxu1 %v8905_v34 }
 0x489   : > { %2661 = vmatprep.mubr.bf16.mxu0 %v11033_v24  ;;  %2704 = vmatprep.mubr.bf16.mxu1 %v11033_v24 }
 0x48b   : > { %2632 = vmatpush1.bf16.msra.mxu0 %v8907_v35  ;;  %2675 = vmatpush1.bf16.msra.mxu1 %v8909_v36 }
 0x48c   : > { %2633 = vmatprep.subr.bf16.mxu0 %v8915_v37  ;;  %2676 = vmatprep.subr.bf16.mxu1 %v11057_v52 }
 0x48f   : > { %2634 = vmatpush1.bf16.msra.mxu0 %v11058_v53  ;;  %2677 = vmatpush1.bf16.msra.mxu1 %v11059_v54 }
 0x490   : > { %2635 = vmatprep.subr.bf16.mxu0 %v11060_v55  ;;  %2678 = vmatprep.subr.bf16.mxu1 %v11061_v56 }
 0x493   : > { %2636 = vmatpush1.bf16.msra.mxu0 %v11062_v57  ;;  %2679 = vmatpush1.bf16.msra.mxu1 %v11063_v58 }
 0x494   : > { %2637 = vmatprep.subr.bf16.mxu0 %v11064_v60  ;;  %2680 = vmatprep.subr.bf16.mxu1 %v11065_v61 }
 0x497   : > { %2638 = vmatpush1.bf16.msra.mxu0 %v11066_v62  ;;  %2681 = vmatpush1.bf16.msra.mxu1 %v11067_v63 }
 0x498   : > { %2639 = vmatprep.subr.bf16.mxu0 %v11068_v0  ;;  %2682 = vmatprep.subr.bf16.mxu1 %v11069_v1 }
 0x49b   : > { %2640 = vmatpush1.bf16.msra.mxu0 %v11070_v2  ;;  %2683 = vmatpush1.bf16.msra.mxu1 %v11071_v3 }
 0x49c   : > { %2641 = vmatprep.subr.bf16.mxu0 %v11072_v5  ;;  %2684 = vmatprep.subr.bf16.mxu1 %v11073_v6 }
 0x49f   : > { %2642 = vmatpush1.bf16.msra.mxu0 %v11074_v7  ;;  %2685 = vmatpush1.bf16.msra.mxu1 %v11075_v8 }
 0x4a0   : > { %2643 = vmatprep.subr.bf16.mxu0 %v11076_v9  ;;  %2686 = vmatprep.subr.bf16.mxu1 %v11077_v10 }
 0x4a3   : > { %2644 = vmatpush1.bf16.msra.mxu0 %v11078_v11  ;;  %2687 = vmatpush1.bf16.msra.mxu1 %v11079_v12 }
 0x4a4   : > { %2733 = vmatprep.subr.bf16.mxu0 %v9180_v14  ;;  %2776 = vmatprep.subr.bf16.mxu1 %v9183_v15 }
 0x559   : > { %v2520_v29 = vpop.f32.mrb[12].mxu0  ;;  %v2563_v30 = vpop.f32.mrb[12].mxu1 }
 0x55a   : > { %v6927_v31 = vadd.f32 %v2520_v29, %v11082_v19  ;;  %v2522_v32 = vpop.f32.mrb[13].mxu0  ;;  %v2565_v33 = vpop.f32.mrb[13].mxu1  ;;  %v6959_v61 = vadd.f32 %v2563_v30, %v9016_v27 }
 0x55b   : > { %v6928_v34 = vadd.f32 %v2522_v32, %v9002_v49  ;;  %v2524_v35 = vpop.f32.mrb[14].mxu0  ;;  %v2567_v36 = vpop.f32.mrb[14].mxu1  ;;  %v6960_v60 = vadd.f32 %v2565_v33, %v9011_v43 }
 0x55c   : > { %v6539_v37 = vmul.f32 -1.442695, %v6927_v31  ;;  %v6929_v52 = vadd.f32 %v2524_v35, %v11082_v19  ;;  %v2526_v53 = vpop.f32.mrb[15].mxu0  ;;  %v2569_v54 = vpop.f32.mrb[15].mxu1  ;;  %v6961_v0 = vadd.f32 %v2567_v36, %v9016_v27 }
 0x55d   : > { %v6541_v55 = vmul.f32 -1.442695, %v6928_v34  ;;  %v6930_v56 = vadd.f32 %v2526_v53, %v9002_v49  ;;  %v6543_v62 = vmul.f32 -1.442695, %v6960_v60  ;;  %v6962_v63 = vadd.f32 %v2569_v54, %v9011_v43 }
 0x55e   : > { %7600 = vpow2.f32 %v6539_v37  ;;  %v6540_v57 = vmul.f32 -1.442695, %v6929_v52 }
 0x55f   : > { %7602 = vpow2.f32 %v6541_v55  ;;  %v6542_v58 = vmul.f32 -1.442695, %v6930_v56  ;;  %v6544_v5 = vmul.f32 -1.442695, %v6962_v63  ;;  %v11092_v63 = vld [vmem:[#allocation37_spill] sm:$0xff] }
 0x560   : > { %7604 = vpow2.f32 %v6540_v57 }
 0x561   : > { %7606 = vpow2.f32 %v6542_v58 }
 0x562   : > { %7608 = vtanh.f32 %v6959_v61 }
 0x563   : > { %7610 = vpow2.f32 %v6543_v62 }
 0x564   : > { %7612 = vtanh.f32 %v6961_v0  ;;  %v11093_v0 = vld [vmem:[#allocation38_spill] sm:$0xff] }
 0x568   : > { %v7601_v1 = vpop.eup %7600 }
 0x569   : > { %v7603_v2 = vpop.eup %7602  ;;  %v2586_v3 = vadd.f32 1.0, %v7601_v1  ;;  %v11094_v1 = vld [vmem:[#allocation39_spill] sm:$0xff] }
 0x56a   : > { %v2598_v6 = vadd.f32 1.0, %v7603_v2  ;;  %v7605_v7 = vpop.eup %7604  ;;  %v11095_v2 = vld [vmem:[#allocation40_spill] sm:$0xff] }
 0x56b   : > { %7614 = vrcp.f32 %v2586_v3  ;;  %v2587_v8 = vadd.f32 1.0, %v7605_v7  ;;  %v7607_v9 = vpop.eup %7606  ;;  %v11096_v3 = vld [vmem:[#allocation41_spill] sm:$0xff]  ;;  %v9384_v7 = vld [vmem:[#allocation11 + $0x4] ss:$16 sps:$4 sm:$0xff]  }
 0x56c   : > { %7616 = vrcp.f32 %v2598_v6  ;;  %v2599_v10 = vadd.f32 1.0, %v7607_v9  ;;  %v7609_v11 = vpop.eup %7608  ;;  %v11098_v6 = vld [vmem:[#allocation43_spill] sm:$0xff]  ;;  %v9390_v9 = vld [vmem:[#allocation11] ss:$16 sps:$4 sm:$0xff]  }
 0x56d   : > { %7618 = vpow2.f32 %v6544_v5  ;;  %v7611_v12 = vpop.eup %7610  ;;  %v11097_v5 = vld [vmem:[#allocation42_spill] sm:$0xff] }
 0x56e   : > { %7620 = vrcp.f32 %v2587_v8  ;;  %v7613_v41 = vpop.eup %7612  ;;  %v2612_v35 = vadd.f32 1.0, %v7611_v12  ;;  %v9387_v8 = vld [vmem:[#allocation11 + $0xc] ss:$16 sps:$4 sm:$0xff]  }
 0x56f   : > { %7622 = vrcp.f32 %v2599_v10  ;;  %v9393_v10 = vld [vmem:[#allocation11 + $0x8] ss:$16 sps:$4 sm:$0xff]   ;;  %v9399_v12 = vld [vmem:[#allocation11 + $0x2c] ss:$16 sps:$4 sm:$0xff]  }
 0x570   : > { %7624 = vrcp.f32 %v2612_v35  ;;  %v9425_v35 = vld [vmem:[#allocation11 + $0x6c] ss:$16 sps:$4 sm:$0xff]  }
 0x571   : > { %11103 = vst [vmem:[#allocation48_spill] sm:$0xff] %v9425_v35 }
 0x575   : > { %v7615_v29 = vpop.eup %7614 }
 0x576   : > { %v7617_v30 = vpop.eup %7616  ;;  %v2620_v31 = vmul.f32 %v7615_v29, %v7609_v11  ;;  %v9396_v11 = vld [vmem:[#allocation11 + $0x24] ss:$16 sps:$4 sm:$0xff]   ;;  %v9407_v29 = vld [vmem:[#allocation11 + $0x28] ss:$16 sps:$4 sm:$0xff]  }
 0x577   : > { %v7619_v32 = vpop.eup %7618  ;;  %v2618_v33 = vmul.f32 %v7617_v30, %v9195_v40  ;;  %v9410_v30 = vld [vmem:[#allocation11 + $0x44] ss:$16 sps:$4 sm:$0xff]  }
 0x578   : > { %v7621_v34 = vpop.eup %7620  ;;  %v2613_v53 = vadd.f32 1.0, %v7619_v32  ;;  %v9416_v32 = vld [vmem:[#allocation11 + $0x40] ss:$16 sps:$4 sm:$0xff]  }
 0x579   : > { %v9345_v36 = vadd.f32 %v2620_v31, %v2618_v33  ;;  %v2621_v37 = vmul.f32 %v7621_v34, %v7613_v41  ;;  %v7623_v52 = vpop.eup %7622  ;;  %v9404_v41 = vld [vmem:[#allocation11 + $0x20] ss:$16 sps:$4 sm:$0xff]   ;;  %v9413_v31 = vld [vmem:[#allocation11 + $0x4c] ss:$16 sps:$4 sm:$0xff]   ;;  %11100 = vst [vmem:[#allocation45_spill] sm:$0xff] %v9416_v32 }
 0x57a   : > { %v2619_v54 = vmul.f32 %v7623_v52, %v9199_v16  ;;  %v7625_v56 = vpop.eup %7624  ;;  %v11091_v16 = vld [vmem:[#allocation36_spill] sm:$0xff]  ;;  %11099 = vst [vmem:[#allocation44_spill] sm:$0xff] %v9413_v31  ;;  %v9419_v33 = vld [vmem:[#allocation11 + $0x48] ss:$16 sps:$4 sm:$0xff]  }
 0x57b   : > { %7626 = vtanh.f32 %v9345_v36  ;;  %11101 = vst [vmem:[#allocation46_spill] sm:$0xff] %v9419_v33  ;;  %v9422_v34 = vld [vmem:[#allocation11 + $0x64] ss:$16 sps:$4 sm:$0xff]   ;;  %v9431_v52 = vld [vmem:[#allocation11 + $0x68] ss:$16 sps:$4 sm:$0xff]  }
 0x57c   : > { %v9349_v55 = vadd.f32 %v2621_v37, %v2619_v54  ;;  %7628 = vrcp.f32 %v2613_v53  ;;  %11102 = vst [vmem:[#allocation47_spill] sm:$0xff] %v9422_v34  ;;  %v9428_v37 = vld [vmem:[#allocation11 + $0x60] ss:$16 sps:$4 sm:$0xff]   ;;  %11105 = vst [vmem:[#allocation50_spill] sm:$0xff] %v9431_v52  ;;  %v9434_v53 = vld [vmem:[#allocation11 + $0x84] ss:$16 sps:$4 sm:$0xff]  }
 0x57d   : > { %11104 = vst [vmem:[#allocation49_spill] sm:$0xff] %v9428_v37  ;;  %11106 = vst [vmem:[#allocation51_spill] sm:$0xff] %v9434_v53  ;;  %v9437_v54 = vld [vmem:[#allocation11 + $0x8c] ss:$16 sps:$4 sm:$0xff]  }
 0x57e   : > { %7630 = vtanh.f32 %v9349_v55  ;;  %11107 = vst [vmem:[#allocation52_spill] sm:$0xff] %v9437_v54 }
 0x585   : > { %v7627_v57 = vpop.eup %7626 }
 0x586   : > { %v7629_v40 = vpop.eup %7628  ;;  %v2626_v60 = vmul.f32 %v7627_v57, %v7625_v56  ;;  %v9440_v56 = vld [vmem:[#allocation11 + $0x80] ss:$16 sps:$4 sm:$0xff]   ;;  %v9443_v57 = vld [vmem:[#allocation11 + $0x88] ss:$16 sps:$4 sm:$0xff]  }
 0x587   : > { %11108 = vst [vmem:[#allocation53_spill] sm:$0xff] %v9440_v56  ;;  %11109 = vst [vmem:[#allocation54_spill] sm:$0xff] %v9443_v57 }
 0x588   : > { %v7631_v58 = vpop.eup %7630 }
 0x589   : > { %v2627_v61 = vmul.f32 %v7631_v58, %v7629_v40  ;;  %v9446_v40 = vld [vmem:[#allocation11 + $0xa4] ss:$16 sps:$4 sm:$0xff]   ;;  %v9449_v58 = vld [vmem:[#allocation11 + $0xac] ss:$16 sps:$4 sm:$0xff]  }
 0x58a   : > { %11110 = vst [vmem:[#allocation55_spill] sm:$0xff] %v9446_v40  ;;  %11111 = vst [vmem:[#allocation56_spill] sm:$0xff] %v9449_v58 }
 0x58b   : > { %v2628_v62 = vpack.c.bf16 %v2627_v61, %v2626_v60  ;;  %v9452_v60 = vld [vmem:[#allocation11 + $0xa0] ss:$16 sps:$4 sm:$0xff]   ;;  %v9455_v61 = vld [vmem:[#allocation11 + $0xa8] ss:$16 sps:$4 sm:$0xff]  }
 0x58c   : > { %11112 = vst [vmem:[#allocation57_spill] sm:$0xff] %v9452_v60  ;;  %11113 = vst [vmem:[#allocation58_spill] sm:$0xff] %v9455_v61 }
 0x58d   : > { %2662 = vmatmul.mubr.bf16.vlgmr.msra.gmra.mrb[44].mxu0 %v2628_v62  ;;  %2705 = vmatmul.mubr.bf16.vlgmr.msra.gmra.mrb[44].mxu1 %v2628_v62 }
 0x58e   : > { %2734 = vmatpush1.bf16.msra.mxu0 %v9206_v47  ;;  %2777 = vmatpush1.bf16.msra.mxu1 %v9209_v18 }
 0x58f   : > { %2735 = vmatprep.subr.bf16.mxu0 %v9212_v28  ;;  %2778 = vmatprep.subr.bf16.mxu1 %v9215_v39 }
 0x590   : > { %2765 = vmatprep.mubr.bf16.mxu0 %v11033_v24  ;;  %2808 = vmatprep.mubr.bf16.mxu1 %v11033_v24 }
 0x592   : > { %2736 = vmatpush1.bf16.msra.mxu0 %v9220_v13  ;;  %2779 = vmatpush1.bf16.msra.mxu1 %v9223_v46 }
 0x593   : > { %2737 = vmatprep.subr.bf16.mxu0 %v9226_v48  ;;  %2780 = vmatprep.subr.bf16.mxu1 %v9229_v38 }
 0x596   : > { %2738 = vmatpush1.bf16.msra.mxu0 %v9232_v45  ;;  %2781 = vmatpush1.bf16.msra.mxu1 %v9235_v50 }
 0x597   : > { %2739 = vmatprep.subr.bf16.mxu0 %v9238_v26  ;;  %2782 = vmatprep.subr.bf16.mxu1 %v9241_v42 }
 0x59a   : > { %2740 = vmatpush1.bf16.msra.mxu0 %v9244_v22  ;;  %2783 = vmatpush1.bf16.msra.mxu1 %v9247_v51 }
 0x59b   : > { %2741 = vmatprep.subr.bf16.mxu0 %v9250_v25  ;;  %2784 = vmatprep.subr.bf16.mxu1 %v9253_v59 }
 0x59e   : > { %2742 = vmatpush1.bf16.msra.mxu0 %v11091_v16  ;;  %2785 = vmatpush1.bf16.msra.mxu1 %v11092_v63 }
 0x59f   : > { %2743 = vmatprep.subr.bf16.mxu0 %v11093_v0  ;;  %2786 = vmatprep.subr.bf16.mxu1 %v11094_v1 }
 0x5a2   : > { %2744 = vmatpush1.bf16.msra.mxu0 %v11095_v2  ;;  %2787 = vmatpush1.bf16.msra.mxu1 %v11096_v3 }
 0x5a3   : > { %2745 = vmatprep.subr.bf16.mxu0 %v11097_v5  ;;  %2788 = vmatprep.subr.bf16.mxu1 %v11098_v6 }
 0x5a6   : > { %2746 = vmatpush1.bf16.msra.mxu0 %v9280_v23  ;;  %2789 = vmatpush1.bf16.msra.mxu1 %v9283_v21 }
 0x5a7   : > { %2747 = vmatprep.subr.bf16.mxu0 %v9286_v44  ;;  %2790 = vmatprep.subr.bf16.mxu1 %v9289_v4 }
 0x5aa   : > { %2748 = vmatpush1.bf16.msra.mxu0 %v9292_v17  ;;  %2791 = vmatpush1.bf16.msra.mxu1 %v9295_v20 }
 0x5ab   : > { %2876 = vmatprep.subr.bf16.mxu0 %v9384_v7  ;;  %2919 = vmatprep.subr.bf16.mxu1 %v9387_v8 }
 0x5ad   : > { %2766 = vmatmul.mubr.bf16.vlgmr.msra.gmra.mrb[16].mxu0 %v2628_v62  ;;  %2809 = vmatmul.mubr.bf16.vlgmr.msra.gmra.mrb[16].mxu1 %v2628_v62  ;;  %v9458_v62 = vld [vmem:[#allocation11 + $0xc4] ss:$16 sps:$4 sm:$0xff]  }
 0x5ae   : > { %2877 = vmatpush1.bf16.msra.mxu0 %v9390_v9  ;;  %2920 = vmatpush1.bf16.msra.mxu1 %v9393_v10  ;;  %11114 = vst [vmem:[#allocation36_spill] sm:$0xff] %v9458_v62 }
 0x5af   : > { %2878 = vmatprep.subr.bf16.mxu0 %v9396_v11  ;;  %2921 = vmatprep.subr.bf16.mxu1 %v9399_v12 }
 0x5b0   : > { %2908 = vmatprep.mubr.bf16.mxu0 %v11033_v24  ;;  %2951 = vmatprep.mubr.bf16.mxu1 %v11033_v24 }
 0x5b2   : > { %2879 = vmatpush1.bf16.msra.mxu0 %v9404_v41  ;;  %2922 = vmatpush1.bf16.msra.mxu1 %v9407_v29 }
 0x5b3   : > { %2880 = vmatprep.subr.bf16.mxu0 %v9410_v30  ;;  %2923 = vmatprep.subr.bf16.mxu1 %v9413_v31 }
 0x5b6   : > { %2881 = vmatpush1.bf16.msra.mxu0 %v9416_v32  ;;  %2924 = vmatpush1.bf16.msra.mxu1 %v9419_v33 }
 0x5b7   : > { %2882 = vmatprep.subr.bf16.mxu0 %v9422_v34  ;;  %2925 = vmatprep.subr.bf16.mxu1 %v9425_v35 }
 0x5ba   : > { %2883 = vmatpush1.bf16.msra.mxu0 %v9428_v37  ;;  %2926 = vmatpush1.bf16.msra.mxu1 %v9431_v52 }
 0x5bb   : > { %2884 = vmatprep.subr.bf16.mxu0 %v9434_v53  ;;  %2927 = vmatprep.subr.bf16.mxu1 %v9437_v54 }
 0x5be   : > { %2885 = vmatpush1.bf16.msra.mxu0 %v9440_v56  ;;  %2928 = vmatpush1.bf16.msra.mxu1 %v9443_v57  ;;  %v9461_v57 = vld [vmem:[#allocation11 + $0xcc] ss:$16 sps:$4 sm:$0xff]  }
 0x5bf   : > { %2886 = vmatprep.subr.bf16.mxu0 %v9446_v40  ;;  %2929 = vmatprep.subr.bf16.mxu1 %v9449_v58  ;;  %11115 = vst [vmem:[#allocation37_spill] sm:$0xff] %v9461_v57  ;;  %v9464_v40 = vld [vmem:[#allocation11 + $0xc0] ss:$16 sps:$4 sm:$0xff]   ;;  %v9467_v58 = vld [vmem:[#allocation11 + $0xc8] ss:$16 sps:$4 sm:$0xff]  }
 0x5c0   : > { %11116 = vst [vmem:[#allocation38_spill] sm:$0xff] %v9464_v40  ;;  %11117 = vst [vmem:[#allocation39_spill] sm:$0xff] %v9467_v58 }
 0x5c2   : > { %2887 = vmatpush1.bf16.msra.mxu0 %v9452_v60  ;;  %2930 = vmatpush1.bf16.msra.mxu1 %v9455_v61  ;;  %v9470_v60 = vld [vmem:[#allocation11 + $0xe4] ss:$16 sps:$4 sm:$0xff]   ;;  %v9473_v61 = vld [vmem:[#allocation11 + $0xec] ss:$16 sps:$4 sm:$0xff]  }
 0x5c3   : > { %2888 = vmatprep.subr.bf16.mxu0 %v9458_v62  ;;  %2931 = vmatprep.subr.bf16.mxu1 %v9461_v57  ;;  %11118 = vst [vmem:[#allocation40_spill] sm:$0xff] %v9470_v60  ;;  %11119 = vst [vmem:[#allocation41_spill] sm:$0xff] %v9473_v61  ;;  %v9476_v62 = vld [vmem:[#allocation11 + $0xe0] ss:$16 sps:$4 sm:$0xff]   ;;  %v9479_v57 = vld [vmem:[#allocation11 + $0xe8] ss:$16 sps:$4 sm:$0xff]  }
 0x5c4   : > { %11120 = vst [vmem:[#allocation42_spill] sm:$0xff] %v9476_v62  ;;  %11121 = vst [vmem:[#allocation43_spill] sm:$0xff] %v9479_v57 }
 0x5c6   : > { %2889 = vmatpush1.bf16.msra.mxu0 %v9464_v40  ;;  %2932 = vmatpush1.bf16.msra.mxu1 %v9467_v58 }
 0x5c7   : > { %2890 = vmatprep.subr.bf16.mxu0 %v9470_v60  ;;  %2933 = vmatprep.subr.bf16.mxu1 %v9473_v61 }
 0x5ca   : > { %2891 = vmatpush1.bf16.msra.mxu0 %v9476_v62  ;;  %2934 = vmatpush1.bf16.msra.mxu1 %v9479_v57 }
 0x5cb   : > { %2980 = vmatprep.subr.bf16.mxu0 %v9180_v14  ;;  %3023 = vmatprep.subr.bf16.mxu1 %v9183_v15 }
 0x680   : > { %v2767_v58 = vpop.f32.mrb[16].mxu0  ;;  %v2810_v40 = vpop.f32.mrb[16].mxu1 }
 0x681   : > { %v6931_v60 = vadd.f32 %v2767_v58, %v11082_v19  ;;  %v2769_v56 = vpop.f32.mrb[17].mxu0  ;;  %v2812_v54 = vpop.f32.mrb[17].mxu1 }
 0x682   : > { %v6932_v61 = vadd.f32 %v2769_v56, %v9002_v49  ;;  %v2771_v53 = vpop.f32.mrb[18].mxu0  ;;  %v2814_v52 = vpop.f32.mrb[18].mxu1  ;;  %v6964_v58 = vadd.f32 %v2812_v54, %v9011_v43  ;;  %v6963_v56 = vadd.f32 %v2810_v40, %v9016_v27 }
 0x683   : > { %v6545_v37 = vmul.f32 -1.442695, %v6931_v60  ;;  %v6933_v62 = vadd.f32 %v2771_v53, %v11082_v19  ;;  %v2773_v35 = vpop.f32.mrb[19].mxu0  ;;  %v2816_v34 = vpop.f32.mrb[19].mxu1  ;;  %v6965_v53 = vadd.f32 %v2814_v52, %v9016_v27 }
 0x684   : > { %v6547_v57 = vmul.f32 -1.442695, %v6932_v61  ;;  %v6934_v14 = vadd.f32 %v2773_v35, %v9002_v49  ;;  %v6549_v32 = vmul.f32 -1.442695, %v6964_v58  ;;  %v6966_v60 = vadd.f32 %v2816_v34, %v9011_v43 }
 0x685   : > { %7632 = vpow2.f32 %v6545_v37  ;;  %v6546_v15 = vmul.f32 -1.442695, %v6933_v62 }
 0x686   : > { %7634 = vpow2.f32 %v6547_v57  ;;  %v6548_v33 = vmul.f32 -1.442695, %v6934_v14  ;;  %v6550_v35 = vmul.f32 -1.442695, %v6966_v60 }
 0x687   : > { %7636 = vpow2.f32 %v6546_v15 }
 0x688   : > { %7638 = vpow2.f32 %v6548_v33 }
 0x689   : > { %7640 = vtanh.f32 %v6963_v56 }
 0x68a   : > { %7642 = vpow2.f32 %v6549_v32 }
 0x68b   : > { %7644 = vtanh.f32 %v6965_v53 }
 0x68f   : > { %v7633_v19 = vpop.eup %7632 }
 0x690   : > { %v7635_v61 = vpop.eup %7634  ;;  %v2833_v31 = vadd.f32 1.0, %v7633_v19 }
 0x691   : > { %v2845_v37 = vadd.f32 1.0, %v7635_v61  ;;  %v7637_v14 = vpop.eup %7636 }
 0x692   : > { %7646 = vrcp.f32 %v2833_v31  ;;  %v2834_v15 = vadd.f32 1.0, %v7637_v14  ;;  %v7639_v33 = vpop.eup %7638 }
 0x693   : > { %7648 = vrcp.f32 %v2845_v37  ;;  %v2846_v54 = vadd.f32 1.0, %v7639_v33  ;;  %v7641_v34 = vpop.eup %7640 }
 0x694   : > { %7650 = vpow2.f32 %v6550_v35  ;;  %v7643_v57 = vpop.eup %7642 }
 0x695   : > { %7652 = vrcp.f32 %v2834_v15  ;;  %v7645_v52 = vpop.eup %7644  ;;  %v2859_v60 = vadd.f32 1.0, %v7643_v57 }
 0x696   : > { %7654 = vrcp.f32 %v2846_v54 }
 0x697   : > { %7656 = vrcp.f32 %v2859_v60  ;;  %v11129_v60 = vld [vmem:[#allocation51_spill] sm:$0xff] }
 0x69c   : > { %v7647_v40 = vpop.eup %7646 }
 0x69d   : > { %v7649_v62 = vpop.eup %7648  ;;  %v2867_v58 = vmul.f32 %v7647_v40, %v7641_v34 }
 0x69e   : > { %v7651_v19 = vpop.eup %7650  ;;  %v2865_v32 = vmul.f32 %v7649_v62, %v9345_v36  ;;  %v11124_v62 = vld [vmem:[#allocation46_spill] sm:$0xff] }
 0x69f   : > { %v7653_v56 = vpop.eup %7652  ;;  %v2860_v37 = vadd.f32 1.0, %v7651_v19  ;;  %v11126_v19 = vld [vmem:[#allocation48_spill] sm:$0xff] }
 0x6a0   : > { %v9493_v53 = vadd.f32 %v2867_v58, %v2865_v32  ;;  %v2868_v31 = vmul.f32 %v7653_v56, %v7645_v52  ;;  %v7655_v61 = vpop.eup %7654  ;;  %v11123_v52 = vld [vmem:[#allocation45_spill] sm:$0xff]  ;;  %v11125_v58 = vld [vmem:[#allocation47_spill] sm:$0xff]  ;;  %v11128_v56 = vld [vmem:[#allocation50_spill] sm:$0xff] }
 0x6a1   : > { %v2866_v35 = vmul.f32 %v7655_v61, %v9349_v55  ;;  %v7657_v15 = vpop.eup %7656  ;;  %v11122_v55 = vld [vmem:[#allocation44_spill] sm:$0xff]  ;;  %v11127_v32 = vld [vmem:[#allocation49_spill] sm:$0xff] }
 0x6a2   : > { %7658 = vtanh.f32 %v9493_v53  ;;  %v11131_v61 = vld [vmem:[#allocation53_spill] sm:$0xff] }
 0x6a3   : > { %v9497_v14 = vadd.f32 %v2868_v31, %v2866_v35  ;;  %7660 = vrcp.f32 %v2860_v37  ;;  %v11130_v31 = vld [vmem:[#allocation52_spill] sm:$0xff]  ;;  %v11132_v37 = vld [vmem:[#allocation54_spill] sm:$0xff]  ;;  %v11133_v35 = vld [vmem:[#allocation55_spill] sm:$0xff] }
 0x6a5   : > { %7662 = vtanh.f32 %v9497_v14 }
 0x6ac   : > { %v7659_v33 = vpop.eup %7658 }
 0x6ad   : > { %v7661_v36 = vpop.eup %7660  ;;  %v2873_v34 = vmul.f32 %v7659_v33, %v7657_v15  ;;  %v11134_v15 = vld [vmem:[#allocation56_spill] sm:$0xff]  ;;  %v11135_v33 = vld [vmem:[#allocation57_spill] sm:$0xff] }
 0x6af   : > { %v7663_v54 = vpop.eup %7662 }
 0x6b0   : > { %v2874_v57 = vmul.f32 %v7663_v54, %v7661_v36  ;;  %v11136_v36 = vld [vmem:[#allocation58_spill] sm:$0xff]  ;;  %v11137_v54 = vld [vmem:[#allocation36_spill] sm:$0xff] }
 0x6b2   : > { %v2875_v40 = vpack.c.bf16 %v2874_v57, %v2873_v34  ;;  %v11138_v34 = vld [vmem:[#allocation37_spill] sm:$0xff]  ;;  %v11139_v57 = vld [vmem:[#allocation38_spill] sm:$0xff] }
 0x6b4   : > { %2909 = vmatmul.mubr.bf16.vlgmr.msra.gmra.mrb[48].mxu0 %v2875_v40  ;;  %2952 = vmatmul.mubr.bf16.vlgmr.msra.gmra.mrb[48].mxu1 %v2875_v40 }
 0x6b5   : > { %2981 = vmatpush1.bf16.msra.mxu0 %v9206_v47  ;;  %3024 = vmatpush1.bf16.msra.mxu1 %v9209_v18 }
 0x6b6   : > { %2982 = vmatprep.subr.bf16.mxu0 %v9212_v28  ;;  %3025 = vmatprep.subr.bf16.mxu1 %v9215_v39 }
 0x6b7   : > { %3012 = vmatprep.mubr.bf16.mxu0 %v11033_v24  ;;  %3055 = vmatprep.mubr.bf16.mxu1 %v11033_v24 }
 0x6b9   : > { %2983 = vmatpush1.bf16.msra.mxu0 %v9220_v13  ;;  %3026 = vmatpush1.bf16.msra.mxu1 %v9223_v46 }
 0x6ba   : > { %2984 = vmatprep.subr.bf16.mxu0 %v9226_v48  ;;  %3027 = vmatprep.subr.bf16.mxu1 %v9229_v38 }
 0x6bd   : > { %2985 = vmatpush1.bf16.msra.mxu0 %v9232_v45  ;;  %3028 = vmatpush1.bf16.msra.mxu1 %v9235_v50 }
 0x6be   : > { %2986 = vmatprep.subr.bf16.mxu0 %v9238_v26  ;;  %3029 = vmatprep.subr.bf16.mxu1 %v9241_v42 }
 0x6c1   : > { %2987 = vmatpush1.bf16.msra.mxu0 %v9244_v22  ;;  %3030 = vmatpush1.bf16.msra.mxu1 %v9247_v51 }
 0x6c2   : > { %2988 = vmatprep.subr.bf16.mxu0 %v9250_v25  ;;  %3031 = vmatprep.subr.bf16.mxu1 %v9253_v59 }
 0x6c5   : > { %2989 = vmatpush1.bf16.msra.mxu0 %v11091_v16  ;;  %3032 = vmatpush1.bf16.msra.mxu1 %v11092_v63 }
 0x6c6   : > { %2990 = vmatprep.subr.bf16.mxu0 %v11093_v0  ;;  %3033 = vmatprep.subr.bf16.mxu1 %v11094_v1 }
 0x6c9   : > { %2991 = vmatpush1.bf16.msra.mxu0 %v11095_v2  ;;  %3034 = vmatpush1.bf16.msra.mxu1 %v11096_v3 }
 0x6ca   : > { %2992 = vmatprep.subr.bf16.mxu0 %v11097_v5  ;;  %3035 = vmatprep.subr.bf16.mxu1 %v11098_v6 }
 0x6cd   : > { %2993 = vmatpush1.bf16.msra.mxu0 %v9280_v23  ;;  %3036 = vmatpush1.bf16.msra.mxu1 %v9283_v21 }
 0x6ce   : > { %2994 = vmatprep.subr.bf16.mxu0 %v9286_v44  ;;  %3037 = vmatprep.subr.bf16.mxu1 %v9289_v4 }
 0x6d1   : > { %2995 = vmatpush1.bf16.msra.mxu0 %v9292_v17  ;;  %3038 = vmatpush1.bf16.msra.mxu1 %v9295_v20 }
 0x6d2   : > { %3123 = vmatprep.subr.bf16.mxu0 %v9384_v7  ;;  %3166 = vmatprep.subr.bf16.mxu1 %v9387_v8 }
 0x6d4   : > { %3013 = vmatmul.mubr.bf16.vlgmr.msra.gmra.mrb[20].mxu0 %v2875_v40  ;;  %3056 = vmatmul.mubr.bf16.vlgmr.msra.gmra.mrb[20].mxu1 %v2875_v40  ;;  %v11140_v40 = vld [vmem:[#allocation39_spill] sm:$0xff] }
 0x6d5   : > { %3124 = vmatpush1.bf16.msra.mxu0 %v9390_v9  ;;  %3167 = vmatpush1.bf16.msra.mxu1 %v9393_v10 }
 0x6d6   : > { %3125 = vmatprep.subr.bf16.mxu0 %v9396_v11  ;;  %3168 = vmatprep.subr.bf16.mxu1 %v9399_v12 }
 0x6d7   : > { %3155 = vmatprep.mubr.bf16.mxu0 %v11033_v24  ;;  %3198 = vmatprep.mubr.bf16.mxu1 %v11033_v24 }
 0x6d9   : > { %3126 = vmatpush1.bf16.msra.mxu0 %v9404_v41  ;;  %3169 = vmatpush1.bf16.msra.mxu1 %v9407_v29 }
 0x6da   : > { %3127 = vmatprep.subr.bf16.mxu0 %v9410_v30  ;;  %3170 = vmatprep.subr.bf16.mxu1 %v11122_v55 }
 0x6dd   : > { %3128 = vmatpush1.bf16.msra.mxu0 %v11123_v52  ;;  %3171 = vmatpush1.bf16.msra.mxu1 %v11124_v62 }
 0x6de   : > { %3129 = vmatprep.subr.bf16.mxu0 %v11125_v58  ;;  %3172 = vmatprep.subr.bf16.mxu1 %v11126_v19 }
 0x6e1   : > { %3130 = vmatpush1.bf16.msra.mxu0 %v11127_v32  ;;  %3173 = vmatpush1.bf16.msra.mxu1 %v11128_v56 }
 0x6e2   : > { %3131 = vmatprep.subr.bf16.mxu0 %v11129_v60  ;;  %3174 = vmatprep.subr.bf16.mxu1 %v11130_v31  ;;  %v11141_v31 = vld [vmem:[#allocation40_spill] sm:$0xff] }
 0x6e3   : > { %v11147_v60 = vld [vmem:[#allocation60_spill] sm:$0xff] }
 0x6e5   : > { %3132 = vmatpush1.bf16.msra.mxu0 %v11131_v61  ;;  %3175 = vmatpush1.bf16.msra.mxu1 %v11132_v37  ;;  %v11142_v61 = vld [vmem:[#allocation41_spill] sm:$0xff]  ;;  %v11143_v37 = vld [vmem:[#allocation42_spill] sm:$0xff] }
 0x6e6   : > { %3133 = vmatprep.subr.bf16.mxu0 %v11133_v35  ;;  %3176 = vmatprep.subr.bf16.mxu1 %v11134_v15  ;;  %v11144_v35 = vld [vmem:[#allocation43_spill] sm:$0xff]  ;;  %v11145_v15 = vld [vmem:[#allocation34_spill] sm:$0xff] }
 0x6e9   : > { %3134 = vmatpush1.bf16.msra.mxu0 %v11135_v33  ;;  %3177 = vmatpush1.bf16.msra.mxu1 %v11136_v36  ;;  %v11146_v33 = vld [vmem:[#allocation35_spill] sm:$0xff] }
 0x6ea   : > { %3135 = vmatprep.subr.bf16.mxu0 %v11137_v54  ;;  %3178 = vmatprep.subr.bf16.mxu1 %v11138_v34 }
 0x6ed   : > { %3136 = vmatpush1.bf16.msra.mxu0 %v11139_v57  ;;  %3179 = vmatpush1.bf16.msra.mxu1 %v11140_v40 }
 0x6ee   : > { %3137 = vmatprep.subr.bf16.mxu0 %v11141_v31  ;;  %3180 = vmatprep.subr.bf16.mxu1 %v11142_v61 }
 0x6f1   : > { %3138 = vmatpush1.bf16.msra.mxu0 %v11143_v37  ;;  %3181 = vmatpush1.bf16.msra.mxu1 %v11144_v35 }
 0x6f2   : > { %3227 = vmatprep.subr.bf16.mxu0 %v11145_v15  ;;  %3270 = vmatprep.subr.bf16.mxu1 %v11146_v33 }
 0x7a7   : > { %v3014_v36 = vpop.f32.mrb[20].mxu0  ;;  %v3057_v54 = vpop.f32.mrb[20].mxu1 }
 0x7a8   : > { %v6935_v34 = vadd.f32 %v3014_v36, %v11147_v60  ;;  %v3016_v56 = vpop.f32.mrb[21].mxu0  ;;  %v3059_v57 = vpop.f32.mrb[21].mxu1 }
 0x7a9   : > { %v6936_v40 = vadd.f32 %v3016_v56, %v9002_v49  ;;  %v3018_v32 = vpop.f32.mrb[22].mxu0  ;;  %v3061_v31 = vpop.f32.mrb[22].mxu1  ;;  %v6968_v36 = vadd.f32 %v3059_v57, %v9011_v43  ;;  %v6967_v56 = vadd.f32 %v3057_v54, %v9016_v27 }
 0x7aa   : > { %v6551_v19 = vmul.f32 -1.442695, %v6935_v34  ;;  %v6937_v61 = vadd.f32 %v3018_v32, %v11147_v60  ;;  %v3020_v37 = vpop.f32.mrb[23].mxu0  ;;  %v3063_v58 = vpop.f32.mrb[23].mxu1  ;;  %v6969_v32 = vadd.f32 %v3061_v31, %v9016_v27 }
 0x7ab   : > { %v6553_v35 = vmul.f32 -1.442695, %v6936_v40  ;;  %v6938_v15 = vadd.f32 %v3020_v37, %v9002_v49  ;;  %v6555_v52 = vmul.f32 -1.442695, %v6968_v36  ;;  %v6970_v34 = vadd.f32 %v3063_v58, %v9011_v43 }
 0x7ac   : > { %7664 = vpow2.f32 %v6551_v19  ;;  %v6552_v33 = vmul.f32 -1.442695, %v6937_v61 }
 0x7ad   : > { %7666 = vpow2.f32 %v6553_v35  ;;  %v6554_v62 = vmul.f32 -1.442695, %v6938_v15  ;;  %v6556_v19 = vmul.f32 -1.442695, %v6970_v34 }
 0x7ae   : > { %7668 = vpow2.f32 %v6552_v33 }
 0x7af   : > { %7670 = vpow2.f32 %v6554_v62 }
 0x7b0   : > { %7672 = vtanh.f32 %v6967_v56 }
 0x7b1   : > { %7674 = vpow2.f32 %v6555_v52 }
 0x7b2   : > { %7676 = vtanh.f32 %v6969_v32 }
 0x7b6   : > { %v7665_v60 = vpop.eup %7664 }
 0x7b7   : > { %v7667_v40 = vpop.eup %7666  ;;  %v3080_v55 = vadd.f32 1.0, %v7665_v60 }
 0x7b8   : > { %v3092_v61 = vadd.f32 1.0, %v7667_v40  ;;  %v7669_v37 = vpop.eup %7668 }
 0x7b9   : > { %7678 = vrcp.f32 %v3080_v55  ;;  %v3081_v35 = vadd.f32 1.0, %v7669_v37  ;;  %v7671_v62 = vpop.eup %7670 }
 0x7ba   : > { %7680 = vrcp.f32 %v3092_v61  ;;  %v3093_v54 = vadd.f32 1.0, %v7671_v62  ;;  %v7673_v58 = vpop.eup %7672 }
 0x7bb   : > { %7682 = vpow2.f32 %v6556_v19  ;;  %v7675_v57 = vpop.eup %7674 }
 0x7bc   : > { %7684 = vrcp.f32 %v3081_v35  ;;  %v7677_v31 = vpop.eup %7676  ;;  %v3106_v34 = vadd.f32 1.0, %v7675_v57 }
 0x7bd   : > { %7686 = vrcp.f32 %v3093_v54 }
 0x7be   : > { %7688 = vrcp.f32 %v3106_v34 }
 0x7c3   : > { %v7679_v15 = vpop.eup %7678 }
 0x7c4   : > { %v7681_v33 = vpop.eup %7680  ;;  %v3114_v36 = vmul.f32 %v7679_v15, %v7673_v58 }
 0x7c5   : > { %v7683_v60 = vpop.eup %7682  ;;  %v3112_v52 = vmul.f32 %v7681_v33, %v9493_v53 }
 0x7c6   : > { %v7685_v56 = vpop.eup %7684  ;;  %v3107_v61 = vadd.f32 1.0, %v7683_v60 }
 0x7c7   : > { %v9577_v32 = vadd.f32 %v3114_v36, %v3112_v52  ;;  %v3115_v55 = vmul.f32 %v7685_v56, %v7677_v31  ;;  %v7687_v40 = vpop.eup %7686 }
 0x7c8   : > { %v3113_v19 = vmul.f32 %v7687_v40, %v9497_v14  ;;  %v7689_v35 = vpop.eup %7688 }
 0x7c9   : > { %7690 = vtanh.f32 %v9577_v32 }
 0x7ca   : > { %v9581_v37 = vadd.f32 %v3115_v55, %v3113_v19  ;;  %7692 = vrcp.f32 %v3107_v61 }
 0x7cc   : > { %7694 = vtanh.f32 %v9581_v37 }
 0x7d3   : > { %v7691_v62 = vpop.eup %7690 }
 0x7d4   : > { %v7693_v53 = vpop.eup %7692  ;;  %v3120_v58 = vmul.f32 %v7691_v62, %v7689_v35 }
 0x7d6   : > { %v7695_v54 = vpop.eup %7694 }
 0x7d7   : > { %v3121_v57 = vmul.f32 %v7695_v54, %v7693_v53 }
 0x7d9   : > { %v3122_v15 = vpack.c.bf16 %v3121_v57, %v3120_v58 }
 0x7db   : > { %3156 = vmatmul.mubr.bf16.vlgmr.msra.gmra.mrb[52].mxu0 %v3122_v15  ;;  %3199 = vmatmul.mubr.bf16.vlgmr.msra.gmra.mrb[52].mxu1 %v3122_v15 }
 0x7dc   : > { %3228 = vmatpush1.bf16.msra.mxu0 %v9206_v47  ;;  %3271 = vmatpush1.bf16.msra.mxu1 %v9209_v18  ;;  %v11148_v47 = vld [vmem:[#allocation44_spill] sm:$0xff]  ;;  %v11149_v18 = vld [vmem:[#allocation45_spill] sm:$0xff] }
 0x7dd   : > { %3229 = vmatprep.subr.bf16.mxu0 %v9212_v28  ;;  %3272 = vmatprep.subr.bf16.mxu1 %v9215_v39  ;;  %v11150_v28 = vld [vmem:[#allocation46_spill] sm:$0xff]  ;;  %v11151_v39 = vld [vmem:[#allocation47_spill] sm:$0xff] }
 0x7de   : > { %3259 = vmatprep.mubr.bf16.mxu0 %v11033_v24  ;;  %3302 = vmatprep.mubr.bf16.mxu1 %v11033_v24 }
 0x7e0   : > { %3230 = vmatpush1.bf16.msra.mxu0 %v9220_v13  ;;  %3273 = vmatpush1.bf16.msra.mxu1 %v9223_v46  ;;  %v11152_v13 = vld [vmem:[#allocation48_spill] sm:$0xff]  ;;  %v11153_v46 = vld [vmem:[#allocation49_spill] sm:$0xff] }
 0x7e1   : > { %3231 = vmatprep.subr.bf16.mxu0 %v9226_v48  ;;  %3274 = vmatprep.subr.bf16.mxu1 %v9229_v38  ;;  %v11154_v48 = vld [vmem:[#allocation50_spill] sm:$0xff]  ;;  %v11155_v38 = vld [vmem:[#allocation51_spill] sm:$0xff] }
 0x7e4   : > { %3232 = vmatpush1.bf16.msra.mxu0 %v9232_v45  ;;  %3275 = vmatpush1.bf16.msra.mxu1 %v9235_v50  ;;  %v11156_v45 = vld [vmem:[#allocation52_spill] sm:$0xff]  ;;  %v11157_v50 = vld [vmem:[#allocation53_spill] sm:$0xff] }
 0x7e5   : > { %3233 = vmatprep.subr.bf16.mxu0 %v9238_v26  ;;  %3276 = vmatprep.subr.bf16.mxu1 %v9241_v42  ;;  %v11158_v26 = vld [vmem:[#allocation54_spill] sm:$0xff]  ;;  %v11159_v42 = vld [vmem:[#allocation55_spill] sm:$0xff] }
 0x7e8   : > { %3234 = vmatpush1.bf16.msra.mxu0 %v9244_v22  ;;  %3277 = vmatpush1.bf16.msra.mxu1 %v9247_v51  ;;  %v11160_v22 = vld [vmem:[#allocation56_spill] sm:$0xff]  ;;  %v11161_v51 = vld [vmem:[#allocation57_spill] sm:$0xff] }
 0x7e9   : > { %3235 = vmatprep.subr.bf16.mxu0 %v9250_v25  ;;  %3278 = vmatprep.subr.bf16.mxu1 %v9253_v59  ;;  %v11162_v25 = vld [vmem:[#allocation58_spill] sm:$0xff]  ;;  %v11163_v59 = vld [vmem:[#allocation36_spill] sm:$0xff] }
 0x7ec   : > { %3236 = vmatpush1.bf16.msra.mxu0 %v11091_v16  ;;  %3279 = vmatpush1.bf16.msra.mxu1 %v11092_v63  ;;  %v11170_v16 = vld [vmem:[#allocation43_spill] sm:$0xff]  ;;  %v8080_v63 = vld [vmem:[#allocation8 + $0x4] ss:$16 sps:$4 sm:$0xff]  }
 0x7ed   : > { %3237 = vmatprep.subr.bf16.mxu0 %v11093_v0  ;;  %3280 = vmatprep.subr.bf16.mxu1 %v11094_v1  ;;  %v8081_v0 = vld [vmem:[#allocation8 + $0xc] ss:$16 sps:$4 sm:$0xff]  }
 0x7f0   : > { %3238 = vmatpush1.bf16.msra.mxu0 %v11095_v2  ;;  %3281 = vmatpush1.bf16.msra.mxu1 %v11096_v3  ;;  %v11171_v3 = vld [vmem:[#allocation60_spill] sm:$0xff] }
 0x7f1   : > { %3239 = vmatprep.subr.bf16.mxu0 %v11097_v5  ;;  %3282 = vmatprep.subr.bf16.mxu1 %v11098_v6 }
 0x7f4   : > { %3240 = vmatpush1.bf16.msra.mxu0 %v9280_v23  ;;  %3283 = vmatpush1.bf16.msra.mxu1 %v9283_v21  ;;  %v11166_v23 = vld [vmem:[#allocation39_spill] sm:$0xff]  ;;  %v11167_v21 = vld [vmem:[#allocation40_spill] sm:$0xff] }
 0x7f5   : > { %3241 = vmatprep.subr.bf16.mxu0 %v9286_v44  ;;  %3284 = vmatprep.subr.bf16.mxu1 %v9289_v4  ;;  %v11168_v44 = vld [vmem:[#allocation41_spill] sm:$0xff]  ;;  %v11169_v4 = vld [vmem:[#allocation42_spill] sm:$0xff] }
 0x7f8   : > { %3242 = vmatpush1.bf16.msra.mxu0 %v9292_v17  ;;  %3285 = vmatpush1.bf16.msra.mxu1 %v9295_v20  ;;  %v11164_v17 = vld [vmem:[#allocation37_spill] sm:$0xff]  ;;  %v11165_v20 = vld [vmem:[#allocation38_spill] sm:$0xff] }
 0x7f9   : > { %3370 = vmatprep.subr.bf16.mxu0 %v9384_v7  ;;  %3413 = vmatprep.subr.bf16.mxu1 %v9387_v8 }
 0x7fb   : > { %3260 = vmatmul.mubr.bf16.vlgmr.msra.gmra.mrb[24].mxu0 %v3122_v15  ;;  %3303 = vmatmul.mubr.bf16.vlgmr.msra.gmra.mrb[24].mxu1 %v3122_v15 }
 0x7fc   : > { %3371 = vmatpush1.bf16.msra.mxu0 %v9390_v9  ;;  %3414 = vmatpush1.bf16.msra.mxu1 %v9393_v10 }
 0x7fd   : > { %3372 = vmatprep.subr.bf16.mxu0 %v9396_v11  ;;  %3415 = vmatprep.subr.bf16.mxu1 %v9399_v12 }
 0x7fe   : > { %3402 = vmatprep.mubr.bf16.mxu0 %v11033_v24  ;;  %3445 = vmatprep.mubr.bf16.mxu1 %v11033_v24 }
 0x800   : > { %3373 = vmatpush1.bf16.msra.mxu0 %v9404_v41  ;;  %3416 = vmatpush1.bf16.msra.mxu1 %v9407_v29 }
 0x801   : > { %3374 = vmatprep.subr.bf16.mxu0 %v9410_v30  ;;  %3417 = vmatprep.subr.bf16.mxu1 %v11148_v47 }
 0x804   : > { %3375 = vmatpush1.bf16.msra.mxu0 %v11149_v18  ;;  %3418 = vmatpush1.bf16.msra.mxu1 %v11150_v28 }
 0x805   : > { %3376 = vmatprep.subr.bf16.mxu0 %v11151_v39  ;;  %3419 = vmatprep.subr.bf16.mxu1 %v11152_v13 }
 0x808   : > { %3377 = vmatpush1.bf16.msra.mxu0 %v11153_v46  ;;  %3420 = vmatpush1.bf16.msra.mxu1 %v11154_v48 }
 0x809   : > { %3378 = vmatprep.subr.bf16.mxu0 %v11155_v38  ;;  %3421 = vmatprep.subr.bf16.mxu1 %v11156_v45 }
 0x80c   : > { %3379 = vmatpush1.bf16.msra.mxu0 %v11157_v50  ;;  %3422 = vmatpush1.bf16.msra.mxu1 %v11158_v26 }
 0x80d   : > { %3380 = vmatprep.subr.bf16.mxu0 %v11159_v42  ;;  %3423 = vmatprep.subr.bf16.mxu1 %v11160_v22 }
 0x810   : > { %3381 = vmatpush1.bf16.msra.mxu0 %v11161_v51  ;;  %3424 = vmatpush1.bf16.msra.mxu1 %v11162_v25 }
 0x811   : > { %3382 = vmatprep.subr.bf16.mxu0 %v11163_v59  ;;  %3425 = vmatprep.subr.bf16.mxu1 %v11164_v17 }
 0x814   : > { %3383 = vmatpush1.bf16.msra.mxu0 %v11165_v20  ;;  %3426 = vmatpush1.bf16.msra.mxu1 %v11166_v23 }
 0x815   : > { %3384 = vmatprep.subr.bf16.mxu0 %v11167_v21  ;;  %3427 = vmatprep.subr.bf16.mxu1 %v11168_v44 }
 0x818   : > { %3385 = vmatpush1.bf16.msra.mxu0 %v11169_v4  ;;  %3428 = vmatpush1.bf16.msra.mxu1 %v11170_v16 }
 0x819   : > { %3474 = vmatprep.subr.bf16.mxu0 %v8080_v63  ;;  %3517 = vmatprep.subr.bf16.mxu1 %v8081_v0 }
 0x8ce   : > { %v3261_v1 = vpop.f32.mrb[24].mxu0  ;;  %v3304_v2 = vpop.f32.mrb[24].mxu1 }
 0x8cf   : > { %v6939_v5 = vadd.f32 %v3261_v1, %v11171_v3  ;;  %v3263_v6 = vpop.f32.mrb[25].mxu0  ;;  %v3306_v14 = vpop.f32.mrb[25].mxu1  ;;  %v6971_v62 = vadd.f32 %v3304_v2, %v9016_v27 }
 0x8d0   : > { %v6940_v31 = vadd.f32 %v3263_v6, %v9002_v49  ;;  %v3265_v33 = vpop.f32.mrb[26].mxu0  ;;  %v3308_v36 = vpop.f32.mrb[26].mxu1  ;;  %v6972_v35 = vadd.f32 %v3306_v14, %v9011_v43 }
 0x8d1   : > { %v6557_v60 = vmul.f32 -1.442695, %v6939_v5  ;;  %v6941_v52 = vadd.f32 %v3265_v33, %v11171_v3  ;;  %v3267_v56 = vpop.f32.mrb[27].mxu0  ;;  %v3310_v34 = vpop.f32.mrb[27].mxu1  ;;  %v6973_v58 = vadd.f32 %v3308_v36, %v9016_v27 }
 0x8d2   : > { %v6559_v55 = vmul.f32 -1.442695, %v6940_v31  ;;  %v6942_v40 = vadd.f32 %v3267_v56, %v9002_v49  ;;  %v6561_v53 = vmul.f32 -1.442695, %v6972_v35  ;;  %v6974_v54 = vadd.f32 %v3310_v34, %v9011_v43 }
 0x8d3   : > { %7696 = vpow2.f32 %v6557_v60  ;;  %v6558_v61 = vmul.f32 -1.442695, %v6941_v52 }
 0x8d4   : > { %7698 = vpow2.f32 %v6559_v55  ;;  %v6560_v19 = vmul.f32 -1.442695, %v6942_v40  ;;  %v6562_v0 = vmul.f32 -1.442695, %v6974_v54 }
 0x8d5   : > { %7700 = vpow2.f32 %v6558_v61 }
 0x8d6   : > { %7702 = vpow2.f32 %v6560_v19 }
 0x8d7   : > { %7704 = vtanh.f32 %v6971_v62 }
 0x8d8   : > { %7706 = vpow2.f32 %v6561_v53 }
 0x8d9   : > { %7708 = vtanh.f32 %v6973_v58 }
 0x8dd   : > { %v7697_v57 = vpop.eup %7696 }
 0x8de   : > { %v7699_v15 = vpop.eup %7698  ;;  %v3327_v63 = vadd.f32 1.0, %v7697_v57 }
 0x8df   : > { %v3339_v1 = vadd.f32 1.0, %v7699_v15  ;;  %v7701_v5 = vpop.eup %7700 }
 0x8e0   : > { %7710 = vrcp.f32 %v3327_v63  ;;  %v3328_v6 = vadd.f32 1.0, %v7701_v5  ;;  %v7703_v14 = vpop.eup %7702 }
 0x8e1   : > { %7712 = vrcp.f32 %v3339_v1  ;;  %v3340_v2 = vadd.f32 1.0, %v7703_v14  ;;  %v7705_v31 = vpop.eup %7704  ;;  %v8084_v14 = vld [vmem:[#allocation8 + $0x24] ss:$16 sps:$4 sm:$0xff]  }
 0x8e2   : > { %7714 = vpow2.f32 %v6562_v0  ;;  %v7707_v33 = vpop.eup %7706 }
 0x8e3   : > { %7716 = vrcp.f32 %v3328_v6  ;;  %v7709_v36 = vpop.eup %7708  ;;  %v3353_v61 = vadd.f32 1.0, %v7707_v33  ;;  %v8083_v6 = vld [vmem:[#allocation8 + $0x8] ss:$16 sps:$4 sm:$0xff]  }
 0x8e4   : > { %7718 = vrcp.f32 %v3340_v2  ;;  %v8085_v2 = vld [vmem:[#allocation8 + $0x2c] ss:$16 sps:$4 sm:$0xff]   ;;  %v8087_v33 = vld [vmem:[#allocation8 + $0x28] ss:$16 sps:$4 sm:$0xff]  }
 0x8e5   : > { %7720 = vrcp.f32 %v3353_v61  ;;  %v8095_v61 = vld [vmem:[#allocation8 + $0x68] ss:$16 sps:$4 sm:$0xff]  }
 0x8ea   : > { %v7711_v60 = vpop.eup %7710 }
 0x8eb   : > { %v7713_v52 = vpop.eup %7712  ;;  %v3361_v56 = vmul.f32 %v7711_v60, %v7705_v31  ;;  %v8086_v31 = vld [vmem:[#allocation8 + $0x20] ss:$16 sps:$4 sm:$0xff]   ;;  %v8089_v60 = vld [vmem:[#allocation8 + $0x4c] ss:$16 sps:$4 sm:$0xff]  }
 0x8ec   : > { %v7715_v34 = vpop.eup %7714  ;;  %v3359_v55 = vmul.f32 %v7713_v52, %v9577_v32  ;;  %v8090_v52 = vld [vmem:[#allocation8 + $0x40] ss:$16 sps:$4 sm:$0xff]  }
 0x8ed   : > { %v7717_v40 = vpop.eup %7716  ;;  %v3354_v53 = vadd.f32 1.0, %v7715_v34  ;;  %v8092_v34 = vld [vmem:[#allocation8 + $0x64] ss:$16 sps:$4 sm:$0xff]  }
 0x8ee   : > { %v9659_v19 = vadd.f32 %v3361_v56, %v3359_v55  ;;  %v3362_v35 = vmul.f32 %v7717_v40, %v7709_v36  ;;  %v7719_v62 = vpop.eup %7718  ;;  %v8088_v36 = vld [vmem:[#allocation8 + $0x44] ss:$16 sps:$4 sm:$0xff]   ;;  %v8091_v56 = vld [vmem:[#allocation8 + $0x48] ss:$16 sps:$4 sm:$0xff]   ;;  %v8093_v55 = vld [vmem:[#allocation8 + $0x6c] ss:$16 sps:$4 sm:$0xff]  }
 0x8ef   : > { %v3360_v54 = vmul.f32 %v7719_v62, %v9581_v37  ;;  %v7721_v57 = vpop.eup %7720  ;;  %v8082_v37 = vld [vmem:[#allocation8] ss:$16 sps:$4 sm:$0xff]   ;;  %v8097_v62 = vld [vmem:[#allocation8 + $0x8c] ss:$16 sps:$4 sm:$0xff]  }
 0x8f0   : > { %7722 = vtanh.f32 %v9659_v19  ;;  %v8094_v40 = vld [vmem:[#allocation8 + $0x60] ss:$16 sps:$4 sm:$0xff]  }
 0x8f1   : > { %v9663_v58 = vadd.f32 %v3362_v35, %v3360_v54  ;;  %7724 = vrcp.f32 %v3354_v53  ;;  %v8096_v35 = vld [vmem:[#allocation8 + $0x84] ss:$16 sps:$4 sm:$0xff]   ;;  %v8098_v53 = vld [vmem:[#allocation8 + $0x80] ss:$16 sps:$4 sm:$0xff]   ;;  %v8099_v54 = vld [vmem:[#allocation8 + $0x88] ss:$16 sps:$4 sm:$0xff]  }
 0x8f3   : > { %7726 = vtanh.f32 %v9663_v58 }
 0x8fa   : > { %v7723_v15 = vpop.eup %7722 }
 0x8fb   : > { %v7725_v32 = vpop.eup %7724  ;;  %v3367_v0 = vmul.f32 %v7723_v15, %v7721_v57  ;;  %v8100_v57 = vld [vmem:[#allocation8 + $0xa4] ss:$16 sps:$4 sm:$0xff]   ;;  %v8101_v15 = vld [vmem:[#allocation8 + $0xac] ss:$16 sps:$4 sm:$0xff]  }
 0x8fd   : > { %v7727_v63 = vpop.eup %7726 }
 0x8fe   : > { %v3368_v1 = vmul.f32 %v7727_v63, %v7725_v32  ;;  %v8102_v32 = vld [vmem:[#allocation8 + $0xa0] ss:$16 sps:$4 sm:$0xff]   ;;  %v8103_v63 = vld [vmem:[#allocation8 + $0xa8] ss:$16 sps:$4 sm:$0xff]  }
 0x900   : > { %v9666_v5 = vpack.c.bf16 %v3368_v1, %v3367_v0  ;;  %v8104_v0 = vld [vmem:[#allocation8 + $0xc4] ss:$16 sps:$4 sm:$0xff]   ;;  %v8105_v1 = vld [vmem:[#allocation8 + $0xcc] ss:$16 sps:$4 sm:$0xff]  }
 0x902   : > { %3403 = vmatmul.mubr.bf16.vlgmr.msra.gmra.mrb[56].mxu0 %v9666_v5  ;;  %3446 = vmatmul.mubr.bf16.vlgmr.msra.gmra.mrb[56].mxu1 %v9666_v5 }
 0x903   : > { %3475 = vmatpush1.bf16.msra.mxu0 %v8082_v37  ;;  %3518 = vmatpush1.bf16.msra.mxu1 %v8083_v6  ;;  %v8106_v37 = vld [vmem:[#allocation8 + $0xc0] ss:$16 sps:$4 sm:$0xff]   ;;  %v8107_v6 = vld [vmem:[#allocation8 + $0xc8] ss:$16 sps:$4 sm:$0xff]  }
 0x904   : > { %3476 = vmatprep.subr.bf16.mxu0 %v8084_v14  ;;  %3519 = vmatprep.subr.bf16.mxu1 %v8085_v2  ;;  %v8108_v14 = vld [vmem:[#allocation8 + $0xe4] ss:$16 sps:$4 sm:$0xff]   ;;  %v8109_v2 = vld [vmem:[#allocation8 + $0xec] ss:$16 sps:$4 sm:$0xff]  }
 0x905   : > { %3506 = vmatprep.mubr.bf16.mxu0 %v11033_v24  ;;  %3549 = vmatprep.mubr.bf16.mxu1 %v11033_v24 }
 0x907   : > { %3477 = vmatpush1.bf16.msra.mxu0 %v8086_v31  ;;  %3520 = vmatpush1.bf16.msra.mxu1 %v8087_v33  ;;  %v8110_v31 = vld [vmem:[#allocation8 + $0xe0] ss:$16 sps:$4 sm:$0xff]   ;;  %v8111_v33 = vld [vmem:[#allocation8 + $0xe8] ss:$16 sps:$4 sm:$0xff]  }
 0x908   : > { %3478 = vmatprep.subr.bf16.mxu0 %v8088_v36  ;;  %3521 = vmatprep.subr.bf16.mxu1 %v8089_v60 }
 0x90b   : > { %3479 = vmatpush1.bf16.msra.mxu0 %v8090_v52  ;;  %3522 = vmatpush1.bf16.msra.mxu1 %v8091_v56 }
 0x90c   : > { %3480 = vmatprep.subr.bf16.mxu0 %v8092_v34  ;;  %3523 = vmatprep.subr.bf16.mxu1 %v8093_v55 }
 0x90f   : > { %3481 = vmatpush1.bf16.msra.mxu0 %v8094_v40  ;;  %3524 = vmatpush1.bf16.msra.mxu1 %v8095_v61 }
 0x910   : > { %3482 = vmatprep.subr.bf16.mxu0 %v8096_v35  ;;  %3525 = vmatprep.subr.bf16.mxu1 %v8097_v62 }
 0x913   : > { %3483 = vmatpush1.bf16.msra.mxu0 %v8098_v53  ;;  %3526 = vmatpush1.bf16.msra.mxu1 %v8099_v54 }
 0x914   : > { %3484 = vmatprep.subr.bf16.mxu0 %v8100_v57  ;;  %3527 = vmatprep.subr.bf16.mxu1 %v8101_v15 }
 0x917   : > { %3485 = vmatpush1.bf16.msra.mxu0 %v8102_v32  ;;  %3528 = vmatpush1.bf16.msra.mxu1 %v8103_v63 }
 0x918   : > { %3486 = vmatprep.subr.bf16.mxu0 %v8104_v0  ;;  %3529 = vmatprep.subr.bf16.mxu1 %v8105_v1  ;;  %v9733_v0 = vld [vmem:[#allocation13] ss:$16 sps:$4 sm:$0xff]   ;;  %v9735_v1 = vld [vmem:[#allocation13 + $0x8] ss:$16 sps:$4 sm:$0xff]  }
 0x91b   : > { %3487 = vmatpush1.bf16.msra.mxu0 %v8106_v37  ;;  %3530 = vmatpush1.bf16.msra.mxu1 %v8107_v6  ;;  %v9738_v37 = vld [vmem:[#allocation13 + $0x24] ss:$16 sps:$4 sm:$0xff]   ;;  %v9740_v6 = vld [vmem:[#allocation13 + $0x2c] ss:$16 sps:$4 sm:$0xff]  }
 0x91c   : > { %3488 = vmatprep.subr.bf16.mxu0 %v8108_v14  ;;  %3531 = vmatprep.subr.bf16.mxu1 %v8109_v2  ;;  %v9744_v14 = vld [vmem:[#allocation13 + $0x20] ss:$16 sps:$4 sm:$0xff]   ;;  %v9746_v2 = vld [vmem:[#allocation13 + $0x28] ss:$16 sps:$4 sm:$0xff]  }
 0x91f   : > { %3489 = vmatpush1.bf16.msra.mxu0 %v8110_v31  ;;  %3532 = vmatpush1.bf16.msra.mxu1 %v8111_v33  ;;  %v9750_v31 = vld [vmem:[#allocation13 + $0x44] ss:$16 sps:$4 sm:$0xff]   ;;  %v9752_v33 = vld [vmem:[#allocation13 + $0x4c] ss:$16 sps:$4 sm:$0xff]  }
 0x920   : > { %3617 = vmatprep.subr.bf16.mxu0 %v9384_v7  ;;  %3660 = vmatprep.subr.bf16.mxu1 %v9387_v8  ;;  %v9708_v7 = vld [vmem:[#allocation13 + $0x4] ss:$16 sps:$4 sm:$0xff]   ;;  %v9710_v8 = vld [vmem:[#allocation13 + $0xc] ss:$16 sps:$4 sm:$0xff]  }
 0x922   : > { %3507 = vmatmul.mubr.bf16.vlgmr.msra.gmra.mrb[28].mxu0 %v9666_v5  ;;  %3550 = vmatmul.mubr.bf16.vlgmr.msra.gmra.mrb[28].mxu1 %v9666_v5 }
 0x923   : > { %3618 = vmatpush1.bf16.msra.mxu0 %v9390_v9  ;;  %3661 = vmatpush1.bf16.msra.mxu1 %v9393_v10 }
 0x924   : > { %3619 = vmatprep.subr.bf16.mxu0 %v9396_v11  ;;  %3662 = vmatprep.subr.bf16.mxu1 %v9399_v12 }
 0x925   : > { %3649 = vmatprep.mubr.bf16.mxu0 %v11033_v24  ;;  %3692 = vmatprep.mubr.bf16.mxu1 %v11033_v24 }
 0x927   : > { %3620 = vmatpush1.bf16.msra.mxu0 %v9404_v41  ;;  %3663 = vmatpush1.bf16.msra.mxu1 %v9407_v29 }
 0x928   : > { %3621 = vmatprep.subr.bf16.mxu0 %v9410_v30  ;;  %3664 = vmatprep.subr.bf16.mxu1 %v11148_v47 }
 0x92b   : > { %3622 = vmatpush1.bf16.msra.mxu0 %v11149_v18  ;;  %3665 = vmatpush1.bf16.msra.mxu1 %v11150_v28 }
 0x92c   : > { %3623 = vmatprep.subr.bf16.mxu0 %v11151_v39  ;;  %3666 = vmatprep.subr.bf16.mxu1 %v11152_v13 }
 0x92f   : > { %3624 = vmatpush1.bf16.msra.mxu0 %v11153_v46  ;;  %3667 = vmatpush1.bf16.msra.mxu1 %v11154_v48 }
 0x930   : > { %3625 = vmatprep.subr.bf16.mxu0 %v11155_v38  ;;  %3668 = vmatprep.subr.bf16.mxu1 %v11156_v45 }
 0x933   : > { %3626 = vmatpush1.bf16.msra.mxu0 %v11157_v50  ;;  %3669 = vmatpush1.bf16.msra.mxu1 %v11158_v26 }
 0x934   : > { %3627 = vmatprep.subr.bf16.mxu0 %v11159_v42  ;;  %3670 = vmatprep.subr.bf16.mxu1 %v11160_v22 }
 0x937   : > { %3628 = vmatpush1.bf16.msra.mxu0 %v11161_v51  ;;  %3671 = vmatpush1.bf16.msra.mxu1 %v11162_v25 }
 0x938   : > { %3629 = vmatprep.subr.bf16.mxu0 %v11163_v59  ;;  %3672 = vmatprep.subr.bf16.mxu1 %v11164_v17 }
 0x93b   : > { %3630 = vmatpush1.bf16.msra.mxu0 %v11165_v20  ;;  %3673 = vmatpush1.bf16.msra.mxu1 %v11166_v23 }
 0x93c   : > { %3631 = vmatprep.subr.bf16.mxu0 %v11167_v21  ;;  %3674 = vmatprep.subr.bf16.mxu1 %v11168_v44 }
 0x93f   : > { %3632 = vmatpush1.bf16.msra.mxu0 %v11169_v4  ;;  %3675 = vmatpush1.bf16.msra.mxu1 %v11170_v16 }
 0x940   : > { %3946 = vmatprep.subr.bf16.mxu0 %v9708_v7  ;;  %3989 = vmatprep.subr.bf16.mxu1 %v9710_v8 }
 0x9f5   : > { %v3508_v9 = vpop.f32.mrb[28].mxu0  ;;  %v3551_v10 = vpop.f32.mrb[28].mxu1 }
 0x9f6   : > { %v6943_v11 = vadd.f32 %v3508_v9, %v11171_v3  ;;  %v3510_v12 = vpop.f32.mrb[29].mxu0  ;;  %v3553_v41 = vpop.f32.mrb[29].mxu1  ;;  %v6975_v26 = vadd.f32 %v3551_v10, %v9016_v27  ;;  %v9758_v9 = vld [vmem:[#allocation13 + $0x40] ss:$16 sps:$4 sm:$0xff]   ;;  %v9760_v10 = vld [vmem:[#allocation13 + $0x48] ss:$16 sps:$4 sm:$0xff]  }
 0x9f7   : > { %v6944_v29 = vadd.f32 %v3510_v12, %v9002_v49  ;;  %v3512_v30 = vpop.f32.mrb[30].mxu0  ;;  %v3555_v47 = vpop.f32.mrb[30].mxu1  ;;  %v6976_v50 = vadd.f32 %v3553_v41, %v9011_v43  ;;  %v9766_v12 = vld [vmem:[#allocation13 + $0x6c] ss:$16 sps:$4 sm:$0xff]   ;;  %v9770_v41 = vld [vmem:[#allocation13 + $0x60] ss:$16 sps:$4 sm:$0xff]  }
 0x9f8   : > { %v6563_v18 = vmul.f32 -1.442695, %v6943_v11  ;;  %v6945_v28 = vadd.f32 %v3512_v30, %v11171_v3  ;;  %v3514_v39 = vpop.f32.mrb[31].mxu0  ;;  %v3557_v13 = vpop.f32.mrb[31].mxu1  ;;  %v6977_v51 = vadd.f32 %v3555_v47, %v9016_v27  ;;  %v9764_v11 = vld [vmem:[#allocation13 + $0x64] ss:$16 sps:$4 sm:$0xff]  }
 0x9f9   : > { %v6565_v46 = vmul.f32 -1.442695, %v6944_v29  ;;  %v6946_v48 = vadd.f32 %v3514_v39, %v9002_v49  ;;  %v6567_v42 = vmul.f32 -1.442695, %v6976_v50  ;;  %v6978_v22 = vadd.f32 %v3557_v13, %v9011_v43  ;;  %v9772_v29 = vld [vmem:[#allocation13 + $0x68] ss:$16 sps:$4 sm:$0xff]  }
 0x9fa   : > { %7728 = vpow2.f32 %v6563_v18  ;;  %v6564_v38 = vmul.f32 -1.442695, %v6945_v28  ;;  %v9776_v30 = vld [vmem:[#allocation13 + $0x84] ss:$16 sps:$4 sm:$0xff]   ;;  %v9778_v47 = vld [vmem:[#allocation13 + $0x8c] ss:$16 sps:$4 sm:$0xff]  }
 0x9fb   : > { %7730 = vpow2.f32 %v6565_v46  ;;  %v6566_v45 = vmul.f32 -1.442695, %v6946_v48  ;;  %v6568_v49 = vmul.f32 -1.442695, %v6978_v22  ;;  %v9782_v18 = vld [vmem:[#allocation13 + $0x80] ss:$16 sps:$4 sm:$0xff]  }
 0x9fc   : > { %7732 = vpow2.f32 %v6564_v38  ;;  %v9784_v28 = vld [vmem:[#allocation13 + $0x88] ss:$16 sps:$4 sm:$0xff]   ;;  %v9788_v39 = vld [vmem:[#allocation13 + $0xa4] ss:$16 sps:$4 sm:$0xff]   ;;  %v9790_v13 = vld [vmem:[#allocation13 + $0xac] ss:$16 sps:$4 sm:$0xff]  }
 0x9fd   : > { %7734 = vpow2.f32 %v6566_v45  ;;  %v9794_v46 = vld [vmem:[#allocation13 + $0xa0] ss:$16 sps:$4 sm:$0xff]   ;;  %v9796_v48 = vld [vmem:[#allocation13 + $0xa8] ss:$16 sps:$4 sm:$0xff]   ;;  %v9800_v38 = vld [vmem:[#allocation13 + $0xc4] ss:$16 sps:$4 sm:$0xff]  }
 0x9fe   : > { %7736 = vtanh.f32 %v6975_v26  ;;  %11172 = vst [vmem:[#allocation34_spill] sm:$0xff] %v9800_v38  ;;  %v9802_v45 = vld [vmem:[#allocation13 + $0xcc] ss:$16 sps:$4 sm:$0xff]   ;;  %v9806_v50 = vld [vmem:[#allocation13 + $0xc0] ss:$16 sps:$4 sm:$0xff]  }
 0x9ff   : > { %7738 = vpow2.f32 %v6567_v42  ;;  %11173 = vst [vmem:[#allocation35_spill] sm:$0xff] %v9806_v50  ;;  %v9808_v26 = vld [vmem:[#allocation13 + $0xc8] ss:$16 sps:$4 sm:$0xff]   ;;  %v9812_v42 = vld [vmem:[#allocation13 + $0xe4] ss:$16 sps:$4 sm:$0xff]  }
 0xa00   : > { %7740 = vtanh.f32 %v6977_v51  ;;  %11174 = vst [vmem:[#allocation44_spill] sm:$0xff] %v9812_v42  ;;  %v9814_v22 = vld [vmem:[#allocation13 + $0xec] ss:$16 sps:$4 sm:$0xff]   ;;  %v9816_v51 = vld [vmem:[#allocation13 + $0xe0] ss:$16 sps:$4 sm:$0xff]  }
 0xa01   : > { %11175 = vst [vmem:[#allocation45_spill] sm:$0xff] %v9816_v51 }
 0xa04   : > { %v7729_v25 = vpop.eup %7728 }
 0xa05   : > { %v7731_v59 = vpop.eup %7730  ;;  %v3574_v17 = vadd.f32 1.0, %v7729_v25  ;;  %v9820_v25 = vld [vmem:[#allocation13 + $0xe8] ss:$16 sps:$4 sm:$0xff]  }
 0xa06   : > { %v3586_v20 = vadd.f32 1.0, %v7731_v59  ;;  %v7733_v23 = vpop.eup %7732  ;;  %v6570_v59 = vld [vmem:[%s8652_s30 + $0x10] sm:$0xff] }
 0xa07   : > { %7742 = vrcp.f32 %v3574_v17  ;;  %v3575_v21 = vadd.f32 1.0, %v7733_v23  ;;  %v7735_v44 = vpop.eup %7734  ;;  %v6571_v17 = vld [vmem:[%s8652_s30 + $0x18] sm:$0xff]  ;;  %v10966_v23 = vmov 0.0   ;;  %s11197_s30 = sld [smem:[#allocation32_spill]] }
 0xa08   : > { %7744 = vrcp.f32 %v3586_v20  ;;  %v3587_v4 = vadd.f32 1.0, %v7735_v44  ;;  %v7737_v43 = vpop.eup %7736  ;;  %v9845_v20 = vld [vmem:[#allocation14] sm:$0xff]   ;;  %v9855_v44 = vld [vmem:[#allocation14 + $0x10] sm:$0xff]  }
 0xa09   : > { %7746 = vpow2.f32 %v6568_v49  ;;  %v7739_v27 = vpop.eup %7738  ;;  %v3785_v49 = vpack.c.bf16 %v6571_v17, %v6570_v59 }
 0xa0a   : > { %7748 = vrcp.f32 %v3575_v21  ;;  %v7741_v16 = vpop.eup %7740  ;;  %v3600_v60 = vadd.f32 1.0, %v7739_v27  ;;  %v9851_v21 = vld [vmem:[#allocation14 + $0x8] sm:$0xff]  }
 0xa0b   : > { %7750 = vrcp.f32 %v3587_v4  ;;  %v9859_v4 = vld [vmem:[#allocation14 + $0x18] sm:$0xff]   ;;  %v9866_v27 = vld [vmem:[#allocation14 + $0x28] sm:$0xff]  }
 0xa0c   : > { %7752 = vrcp.f32 %v3600_v60 }
 0xa0d   : > { %p11199_p6 = scmp.ne.s32.totalorder %s11197_s30, 0 }
 0xa0f   : > { %p8268_p10 = pnand %p8267_p3, %p11199_p6 }
 0xa11   : > { %v7743_v3 = vpop.eup %7742  ;;  %p8269_p2 = pneg %p8268_p10 }
 0xa12   : > { %v7745_v5 = vpop.eup %7744  ;;  %v3608_v36 = vmul.f32 %v7743_v3, %v7737_v43  ;;  %v9863_v43 = vld [vmem:[#allocation14 + $0x20] sm:$0xff]   ;;  %v9876_v3 = vld [vmem:[#allocation14 + $0x38] sm:$0xff]  }
 0xa13   : > { %v7747_v52 = vpop.eup %7746  ;;  %v3606_v56 = vmul.f32 %v7745_v5, %v9659_v19  ;;  %v1391_v5 = vld [vmem:[%s11176_s17] sm:$0xf]  ;;  %p8276_p4 = pnand %p8275_p11, %p8269_p2 }
 0xa14   : > { %v7749_v34 = vpop.eup %7748  ;;  %v3601_v35 = vadd.f32 1.0, %v7747_v52 }
 0xa15   : > { %v3610_v55 = vadd.f32 %v3608_v36, %v3606_v56  ;;  %v3609_v40 = vmul.f32 %v7749_v34, %v7741_v16  ;;  %v7751_v61 = vpop.eup %7750  ;;  %v9872_v16 = vld [vmem:[#allocation14 + $0x30] sm:$0xff]   ;;  %v11177_v36 = vld [vmem:[#allocation59_spill] sm:$0xff] }
 0xa16   : > { %v3607_v62 = vmul.f32 %v7751_v61, %v9663_v58  ;;  %v7753_v19 = vpop.eup %7752  ;;  %v11178_v60 = vsub.s32 0, %v11177_v36  ;;  %v11179_v56 = vsub.s32 1, %v11177_v36  ;;  %v11180_v59 = vsub.s32 3, %v11177_v36 }
 0xa17   : > { %7754 = vtanh.f32 %v3610_v55  ;;  %3714 = vst [vmem:[%s9724_s21] sm:$0xff] %v3610_v55 }
 0xa18   : > { %v3611_v53 = vadd.f32 %v3609_v40, %v3607_v62  ;;  %7756 = vrcp.f32 %v3601_v35  ;;  %v9886_v52 = vrot.slane %v1391_v5, %v11178_v60  ;;  %v9890_v34 = vrot.slane %v1391_v5, %v11179_v56 }
 0xa19   : > { %v9897_v17 = vrot.slane %v1391_v5, %v11180_v59 }
 0xa1a   : > { %7758 = vtanh.f32 %v3611_v53  ;;  %3715 = vst [vmem:[%s9724_s21 + $0x8] sm:$0xff] %v3611_v53 }
 0xa21   : > { %v7755_v54 = vpop.eup %7754 }
 0xa22   : > { %v3614_v57 = vmul.f32 %v7755_v54, %v7753_v19  ;;  %v7757_v15 = vpop.eup %7756 }
 0xa24   : > { %3712 = vst [vmem:[%s9730_s23] sm:$0xff] %v3614_v57  ;;  %v7759_v32 = vpop.eup %7758 }
 0xa25   : > { %v3615_v63 = vmul.f32 %v7759_v32, %v7757_v15 }
 0xa27   : > { %v3616_v58 = vpack.c.bf16 %v3615_v63, %v3614_v57  ;;  %3713 = vst [vmem:[%s9730_s23 + $0x8] sm:$0xff] %v3615_v63 }
 0xa29   : > { %3650 = vmatmul.mubr.bf16.vlgmr.msra.gmra.mrb[60].mxu0 %v3616_v58  ;;  %3693 = vmatmul.mubr.bf16.vlgmr.msra.gmra.mrb[60].mxu1 %v3616_v58 }
 0xa2a   : > { %3947 = vmatpush1.bf16.msra.mxu0 %v9733_v0  ;;  %3990 = vmatpush1.bf16.msra.mxu1 %v9735_v1 }
 0xa2b   : > { %3948 = vmatprep.subr.bf16.mxu0 %v9738_v37  ;;  %3991 = vmatprep.subr.bf16.mxu1 %v9740_v6 }
 0xa2c   : > { %3978 = vmatprep.mubr.bf16.mxu0 %v11033_v24  ;;  %4021 = vmatprep.mubr.bf16.mxu1 %v11033_v24 }
 0xa2e   : > { %3949 = vmatpush1.bf16.msra.mxu0 %v9744_v14  ;;  %3992 = vmatpush1.bf16.msra.mxu1 %v9746_v2 }
 0xa2f   : > { %3950 = vmatprep.subr.bf16.mxu0 %v9750_v31  ;;  %3993 = vmatprep.subr.bf16.mxu1 %v9752_v33 }
 0xa32   : > { %3951 = vmatpush1.bf16.msra.mxu0 %v9758_v9  ;;  %3994 = vmatpush1.bf16.msra.mxu1 %v9760_v10 }
 0xa33   : > { %3952 = vmatprep.subr.bf16.mxu0 %v9764_v11  ;;  %3995 = vmatprep.subr.bf16.mxu1 %v9766_v12 }
 0xa36   : > { %3953 = vmatpush1.bf16.msra.mxu0 %v9770_v41  ;;  %3996 = vmatpush1.bf16.msra.mxu1 %v9772_v29 }
 0xa37   : > { %3954 = vmatprep.subr.bf16.mxu0 %v9776_v30  ;;  %3997 = vmatprep.subr.bf16.mxu1 %v9778_v47 }
 0xa3a   : > { %3955 = vmatpush1.bf16.msra.mxu0 %v9782_v18  ;;  %3998 = vmatpush1.bf16.msra.mxu1 %v9784_v28 }
 0xa3b   : > { %3956 = vmatprep.subr.bf16.mxu0 %v9788_v39  ;;  %3999 = vmatprep.subr.bf16.mxu1 %v9790_v13 }
 0xa3e   : > { %3957 = vmatpush1.bf16.msra.mxu0 %v9794_v46  ;;  %4000 = vmatpush1.bf16.msra.mxu1 %v9796_v48 }
 0xa3f   : > { %3958 = vmatprep.subr.bf16.mxu0 %v9800_v38  ;;  %4001 = vmatprep.subr.bf16.mxu1 %v9802_v45 }
 0xa42   : > { %3959 = vmatpush1.bf16.msra.mxu0 %v9806_v50  ;;  %4002 = vmatpush1.bf16.msra.mxu1 %v9808_v26 }
 0xa43   : > { %3960 = vmatprep.subr.bf16.mxu0 %v9812_v42  ;;  %4003 = vmatprep.subr.bf16.mxu1 %v9814_v22 }
 0xa46   : > { %3961 = vmatpush1.bf16.msra.mxu0 %v9816_v51  ;;  %4004 = vmatpush1.bf16.msra.mxu1 %v9820_v25 }
 0xa47   : > { %4231 = vmatprep.subr.bf16.mxu1 %v9710_v8  ;;  %6755 = vmatprep.subr.bf16.mxu0 %v10966_v23 }
 0xa49   : > { %3979 = vmatmul.mubr.bf16.vlgmr.msra.gmra.mrb[32].mxu0 %v3785_v49  ;;  %4022 = vmatmul.mubr.bf16.vlgmr.msra.gmra.mrb[32].mxu1 %v3785_v49 }
 0xa4a   : > { %4232 = vmatpush1.bf16.msra.mxu1 %v9735_v1  ;;  %4263 = vmatprep.mubr.bf16.mxu1 %v11033_v24 }
 0xa4b   : > { %4233 = vmatprep.subr.bf16.mxu1 %v9740_v6  ;;  %6756 = vmatpush3.bf16.msra.mxu0 %v9845_v20 }
 0xa4c   : > { %6757 = vmatprep.subr.bf16.mxu0 %v10966_v23  ;;  %6771 = vmatprep.mubr.msk.bf16.mxu0 %vm8356_vm0, %v10966_v23 }
 0xa4e   : > { %4234 = vmatpush1.bf16.msra.mxu1 %v9746_v2 }
 0xa4f   : > { %4235 = vmatprep.subr.bf16.mxu1 %v9752_v33  ;;  %6758 = vmatpush3.bf16.msra.mxu0 %v9851_v21 }
 0xa50   : > { %6759 = vmatprep.subr.bf16.mxu0 %v10966_v23 }
 0xa52   : > { %4236 = vmatpush1.bf16.msra.mxu1 %v9760_v10 }
 0xa53   : > { %4237 = vmatprep.subr.bf16.mxu1 %v9766_v12  ;;  %6760 = vmatpush3.bf16.msra.mxu0 %v9855_v44 }
 0xa54   : > { %6761 = vmatprep.subr.bf16.mxu0 %v10966_v23 }
 0xa56   : > { %4238 = vmatpush1.bf16.msra.mxu1 %v9772_v29 }
 0xa57   : > { %4239 = vmatprep.subr.bf16.mxu1 %v9778_v47  ;;  %6762 = vmatpush3.bf16.msra.mxu0 %v9859_v4 }
 0xa58   : > { %6763 = vmatprep.subr.bf16.mxu0 %v10966_v23 }
 0xa5a   : > { %4240 = vmatpush1.bf16.msra.mxu1 %v9784_v28 }
 0xa5b   : > { %4241 = vmatprep.subr.bf16.mxu1 %v9790_v13  ;;  %6764 = vmatpush3.bf16.msra.mxu0 %v9863_v43 }
 0xa5c   : > { %6765 = vmatprep.subr.bf16.mxu0 %v10966_v23 }
 0xa5e   : > { %4242 = vmatpush1.bf16.msra.mxu1 %v9796_v48 }
 0xa5f   : > { %4243 = vmatprep.subr.bf16.mxu1 %v9802_v45  ;;  %6766 = vmatpush3.bf16.msra.mxu0 %v9866_v27 }
 0xa60   : > { %6767 = vmatprep.subr.bf16.mxu0 %v10966_v23 }
 0xa62   : > { %4244 = vmatpush1.bf16.msra.mxu1 %v9808_v26 }
 0xa63   : > { %4245 = vmatprep.subr.bf16.mxu1 %v9814_v22  ;;  %6768 = vmatpush3.bf16.msra.mxu0 %v9872_v16 }
 0xa64   : > { %6769 = vmatprep.subr.bf16.mxu0 %v10966_v23 }
 0xa66   : > { %4246 = vmatpush1.bf16.msra.mxu1 %v9820_v25 }
 0xa67   : > { %6775 = vmatprep.subr.bf16.mxu1 %v10966_v23  ;;  %6770 = vmatpush3.bf16.msra.mxu0 %v9876_v3 }
 0xa68   : > { %4188 = vmatprep.subr.bf16.mxu0 %v9708_v7 }
 0xb1c   : > { %v3980_v55 = vpop.f32.mrb[32].mxu0  ;;  %v4023_v40 = vpop.f32.mrb[32].mxu1 }
 0xb1d   : > { %v6979_v61 = vadd.f32 %v3980_v55, %v9886_v52  ;;  %v3982_v35 = vpop.f32.mrb[33].mxu0  ;;  %v4025_v62 = vpop.f32.mrb[33].mxu1  ;;  %v11181_v55 = vsub.s32 2, %v11177_v36 }
 0xb1e   : > { %v6980_v53 = vadd.f32 %v3982_v35, %v9890_v34  ;;  %v3984_v19 = vpop.f32.mrb[34].mxu0  ;;  %v4027_v54 = vpop.f32.mrb[34].mxu1 }
 0xb1f   : > { %v6606_v57 = vmul.f32 -1.442695, %v6979_v61  ;;  %v6981_v15 = vadd.f32 %v3984_v19, %v9886_v52  ;;  %v3986_v32 = vpop.f32.mrb[35].mxu0  ;;  %v4029_v63 = vpop.f32.mrb[35].mxu1  ;;  %v9902_v35 = vrot.slane %v1391_v5, %v11181_v55  ;;  %v6984_v61 = vadd.f32 %v4025_v62, %v9897_v17 }
 0xb20   : > { %v6608_v58 = vmul.f32 -1.442695, %v6980_v53  ;;  %v6982_v49 = vadd.f32 %v3986_v32, %v9890_v34  ;;  %v6986_v59 = vadd.f32 %v4029_v63, %v9897_v17 }
 0xb21   : > { %7760 = vpow2.f32 %v6606_v57  ;;  %v6607_v60 = vmul.f32 -1.442695, %v6981_v15  ;;  %v6983_v53 = vadd.f32 %v4023_v40, %v9902_v35  ;;  %v6610_v19 = vmul.f32 -1.442695, %v6984_v61 }
 0xb22   : > { %7762 = vpow2.f32 %v6608_v58  ;;  %v6609_v56 = vmul.f32 -1.442695, %v6982_v49  ;;  %v6985_v23 = vadd.f32 %v4027_v54, %v9902_v35  ;;  %v6611_v36 = vmul.f32 -1.442695, %v6986_v59 }
 0xb23   : > { %7764 = vpow2.f32 %v6607_v60 }
 0xb24   : > { %7766 = vpow2.f32 %v6609_v56  ;;  %v6572_v56 = vld [vmem:[%s8655_s13 + $0x10] sm:$0xff] }
 0xb25   : > { %7768 = vtanh.f32 %v6983_v53 }
 0xb26   : > { %7770 = vpow2.f32 %v6610_v19 }
 0xb27   : > { %7772 = vtanh.f32 %v6985_v23 }
 0xb2b   : > { %v7761_v32 = vpop.eup %7760 }
 0xb2c   : > { %v7763_v57 = vpop.eup %7762  ;;  %v4046_v15 = vadd.f32 1.0, %v7761_v32 }
 0xb2d   : > { %v4058_v5 = vadd.f32 1.0, %v7763_v57  ;;  %v7765_v58 = vpop.eup %7764  ;;  %v6573_v57 = vld [vmem:[%s8655_s13 + $0x18] sm:$0xff] }
 0xb2e   : > { %7774 = vrcp.f32 %v4046_v15  ;;  %v4047_v62 = vadd.f32 1.0, %v7765_v58  ;;  %v7767_v49 = vpop.eup %7766 }
 0xb2f   : > { %7776 = vrcp.f32 %v4058_v5  ;;  %v4059_v40 = vadd.f32 1.0, %v7767_v49  ;;  %v7769_v54 = vpop.eup %7768 }
 0xb30   : > { %7778 = vpow2.f32 %v6611_v36  ;;  %v7771_v63 = vpop.eup %7770 }
 0xb31   : > { %7780 = vrcp.f32 %v4047_v62  ;;  %v7773_v60 = vpop.eup %7772  ;;  %v4072_v32 = vadd.f32 1.0, %v7771_v63 }
 0xb32   : > { %7782 = vrcp.f32 %v4059_v40 }
 0xb33   : > { %7784 = vrcp.f32 %v4072_v32 }
 0xb38   : > { %v7775_v55 = vpop.eup %7774 }
 0xb39   : > { %v7777_v61 = vpop.eup %7776  ;;  %v4080_v53 = vmul.f32 %v7775_v55, %v7769_v54 }
 0xb3a   : > { %v7779_v19 = vpop.eup %7778  ;;  %v4078_v59 = vmul.f32 %v7777_v61, %v6572_v56 }
 0xb3b   : > { %v7781_v23 = vpop.eup %7780  ;;  %v4073_v36 = vadd.f32 1.0, %v7779_v19  ;;  %v9971_v19 = vld [vmem:[%s11183_s25] ss:$0 sm:$0xff]  ;;  %s10718_s25 = scalar_lea.hbm %s11198_s14, %s6680_s24 }
 0xb3c   : > { %v9910_v15 = vadd.f32 %v4080_v53, %v4078_v59  ;;  %v4081_v5 = vmul.f32 %v7781_v23, %v7773_v60  ;;  %v7783_v58 = vpop.eup %7782  ;;  %v11182_v60 = vmov 0.0  }
 0xb3d   : > { %v4079_v62 = vmul.f32 %v7783_v58, %v6573_v57  ;;  %v7785_v40 = vpop.eup %7784 }
 0xb3e   : > { %7786 = vtanh.f32 %v9910_v15 }
 0xb3f   : > { %v9913_v49 = vadd.f32 %v4081_v5, %v4079_v62  ;;  %7788 = vrcp.f32 %v4073_v36 }
 0xb41   : > { %7790 = vtanh.f32 %v9913_v49 }
 0xb48   : > { %v7787_v54 = vpop.eup %7786 }
 0xb49   : > { %v7789_v56 = vpop.eup %7788  ;;  %v4086_v63 = vmul.f32 %v7787_v54, %v7785_v40 }
 0xb4b   : > { %v7791_v55 = vpop.eup %7790 }
 0xb4c   : > { %v4087_v61 = vmul.f32 %v7791_v55, %v7789_v56 }
 0xb4e   : > { %v4088_v53 = vpack.c.bf16 %v4087_v61, %v4086_v63 }
 0xb50   : > { %6772 = vmatmul.mubr.bf16.vlgmr.msra.gmra.mrb[64].mxu0 %v4088_v53  ;;  %4264 = vmatmul.mubr.bf16.vlgmr.msra.gmra.mrb[36].mxu1 %v4088_v53 }
 0xb51   : > { %4189 = vmatpush1.bf16.msra.mxu0 %v9733_v0  ;;  %4220 = vmatprep.mubr.bf16.mxu0 %v11033_v24 }
 0xb52   : > { %4190 = vmatprep.subr.bf16.mxu0 %v9738_v37  ;;  %6776 = vmatpush3.bf16.msra.mxu1 %v9845_v20 }
 0xb53   : > { %6777 = vmatprep.subr.bf16.mxu1 %v11182_v60  ;;  %6791 = vmatprep.mubr.msk.bf16.mxu1 %vm8356_vm0, %v11182_v60 }
 0xb55   : > { %4191 = vmatpush1.bf16.msra.mxu0 %v9744_v14 }
 0xb56   : > { %4192 = vmatprep.subr.bf16.mxu0 %v9750_v31  ;;  %6778 = vmatpush3.bf16.msra.mxu1 %v9851_v21 }
 0xb57   : > { %6779 = vmatprep.subr.bf16.mxu1 %v11182_v60 }
 0xb59   : > { %4193 = vmatpush1.bf16.msra.mxu0 %v9758_v9 }
 0xb5a   : > { %4194 = vmatprep.subr.bf16.mxu0 %v9764_v11  ;;  %6780 = vmatpush3.bf16.msra.mxu1 %v9855_v44 }
 0xb5b   : > { %6781 = vmatprep.subr.bf16.mxu1 %v11182_v60 }
 0xb5d   : > { %4195 = vmatpush1.bf16.msra.mxu0 %v9770_v41 }
 0xb5e   : > { %4196 = vmatprep.subr.bf16.mxu0 %v9776_v30  ;;  %6782 = vmatpush3.bf16.msra.mxu1 %v9859_v4 }
 0xb5f   : > { %6783 = vmatprep.subr.bf16.mxu1 %v11182_v60 }
 0xb61   : > { %4197 = vmatpush1.bf16.msra.mxu0 %v9782_v18 }
 0xb62   : > { %4198 = vmatprep.subr.bf16.mxu0 %v9788_v39  ;;  %6784 = vmatpush3.bf16.msra.mxu1 %v9863_v43 }
 0xb63   : > { %6785 = vmatprep.subr.bf16.mxu1 %v11182_v60 }
 0xb65   : > { %4199 = vmatpush1.bf16.msra.mxu0 %v9794_v46 }
 0xb66   : > { %4200 = vmatprep.subr.bf16.mxu0 %v9800_v38  ;;  %6786 = vmatpush3.bf16.msra.mxu1 %v9866_v27 }
 0xb67   : > { %6787 = vmatprep.subr.bf16.mxu1 %v11182_v60 }
 0xb69   : > { %4201 = vmatpush1.bf16.msra.mxu0 %v9806_v50 }
 0xb6a   : > { %4202 = vmatprep.subr.bf16.mxu0 %v9812_v42  ;;  %6788 = vmatpush3.bf16.msra.mxu1 %v9872_v16 }
 0xb6b   : > { %6789 = vmatprep.subr.bf16.mxu1 %v11182_v60 }
 0xb6d   : > { %4203 = vmatpush1.bf16.msra.mxu0 %v9816_v51 }
 0xb6e   : > { %4383 = vmatprep.subr.bf16.mxu0 %v9708_v7  ;;  %6790 = vmatpush3.bf16.msra.mxu1 %v9876_v3 }
 0xb6f   : > { %4426 = vmatprep.subr.bf16.mxu1 %v9710_v8 }
 0xb70   : > { %4221 = vmatmul.mubr.bf16.vlgmr.msra.gmra.mrb[36].mxu0 %v4088_v53 }
 0xb71   : > { %4384 = vmatpush1.bf16.msra.mxu0 %v9733_v0  ;;  %4415 = vmatprep.mubr.bf16.mxu0 %v11033_v24 }
 0xb72   : > { %4385 = vmatprep.subr.bf16.mxu0 %v9738_v37 }
 0xb75   : > { %4386 = vmatpush1.bf16.msra.mxu0 %v9744_v14 }
 0xb76   : > { %4387 = vmatprep.subr.bf16.mxu0 %v9750_v31 }
 0xb79   : > { %4388 = vmatpush1.bf16.msra.mxu0 %v9758_v9 }
 0xb7a   : > { %4389 = vmatprep.subr.bf16.mxu0 %v9764_v11 }
 0xb7d   : > { %4390 = vmatpush1.bf16.msra.mxu0 %v9770_v41 }
 0xb7e   : > { %4391 = vmatprep.subr.bf16.mxu0 %v9776_v30 }
 0xb81   : > { %4392 = vmatpush1.bf16.msra.mxu0 %v9782_v18 }
 0xb82   : > { %4393 = vmatprep.subr.bf16.mxu0 %v9788_v39 }
 0xb85   : > { %4394 = vmatpush1.bf16.msra.mxu0 %v9794_v46 }
 0xb86   : > { %4395 = vmatprep.subr.bf16.mxu0 %v9800_v38 }
 0xb89   : > { %4396 = vmatpush1.bf16.msra.mxu0 %v9806_v50 }
 0xb8a   : > { %4397 = vmatprep.subr.bf16.mxu0 %v9812_v42 }
 0xb8d   : > { %4398 = vmatpush1.bf16.msra.mxu0 %v9816_v51 }
 0xb8e   : > { %6795 = vmatprep.subr.bf16.mxu0 %v11182_v60 }
 0xc23   : > { %v4171_v59 = vpop.f32.mrb[64].mxu0  ;;  %v4265_v23 = vpop.f32.mrb[36].mxu1 }
 0xc24   : > { %v4172_v32 = vadd.f32 %v9971_v19, %v4171_v59  ;;  %v6773_v57 = vpop.f32.mrb[65].mxu0  ;;  %v4267_v5 = vpop.f32.mrb[37].mxu1 }
 0xc25   : > { %v4174_v58 = vpop.f32.mrb[66].mxu0  ;;  %v4269_v36 = vpop.f32.mrb[38].mxu1 }
 0xc26   : > { %4178 = vst [vmem:[#allocation4] sm:$0xff] %v4172_v32  ;;  %v4175_v62 = vadd.f32 %v9971_v19, %v4174_v58  ;;  %v6774_v40 = vpop.f32.mrb[67].mxu0  ;;  %v4271_v54 = vpop.f32.mrb[39].mxu1 }
 0xc27   : > { %v6994_v40 = vadd.f32 %v4271_v54, %v9897_v17 }
 0xc28   : > { %4179 = vst [vmem:[#allocation4 + $0x8] sm:$0xff] %v4175_v62  ;;  %v6992_v62 = vadd.f32 %v4267_v5, %v9897_v17 }
 0xc43   : > { %v4222_v56 = vpop.f32.mrb[36].mxu0 }
 0xc44   : > { %v6987_v55 = vadd.f32 %v4222_v56, %v9886_v52  ;;  %v4224_v63 = vpop.f32.mrb[37].mxu0  ;;  %v6991_v56 = vadd.f32 %v4265_v23, %v9902_v35 }
 0xc45   : > { %v6988_v61 = vadd.f32 %v4224_v63, %v9890_v34  ;;  %v4226_v53 = vpop.f32.mrb[38].mxu0  ;;  %v6624_v63 = vmul.f32 -1.442695, %v6992_v62 }
 0xc46   : > { %v6620_v51 = vmul.f32 -1.442695, %v6987_v55  ;;  %v6989_v59 = vadd.f32 %v4226_v53, %v9886_v52  ;;  %v4228_v57 = vpop.f32.mrb[39].mxu0  ;;  %v6993_v55 = vadd.f32 %v4269_v36, %v9902_v35  ;;  %v6625_v53 = vmul.f32 -1.442695, %v6994_v40 }
 0xc47   : > { %v6622_v42 = vmul.f32 -1.442695, %v6988_v61  ;;  %v6990_v50 = vadd.f32 %v4228_v57, %v9890_v34 }
 0xc48   : > { %7792 = vpow2.f32 %v6620_v51  ;;  %v6621_v32 = vmul.f32 -1.442695, %v6989_v59 }
 0xc49   : > { %7794 = vpow2.f32 %v6622_v42  ;;  %v6623_v58 = vmul.f32 -1.442695, %v6990_v50 }
 0xc4a   : > { %7796 = vpow2.f32 %v6621_v32 }
 0xc4b   : > { %7798 = vpow2.f32 %v6623_v58 }
 0xc4c   : > { %7800 = vtanh.f32 %v6991_v56 }
 0xc4d   : > { %7802 = vtanh.f32 %v6993_v55 }
 0xc4e   : > { %7804 = vpow2.f32 %v6624_v63 }
 0xc4f   : > { %7806 = vpow2.f32 %v6625_v53 }
 0xc52   : > { %v7793_v61 = vpop.eup %7792 }
 0xc53   : > { %v7795_v57 = vpop.eup %7794  ;;  %v4288_v51 = vadd.f32 1.0, %v7793_v61 }
 0xc54   : > { %v7797_v42 = vpop.eup %7796  ;;  %v4300_v50 = vadd.f32 1.0, %v7795_v57 }
 0xc55   : > { %v7799_v59 = vpop.eup %7798  ;;  %7808 = vrcp.f32 %v4288_v51  ;;  %v4289_v5 = vadd.f32 1.0, %v7797_v42 }
 0xc56   : > { %7810 = vrcp.f32 %v4300_v50  ;;  %v4301_v54 = vadd.f32 1.0, %v7799_v59  ;;  %v7801_v23 = vpop.eup %7800 }
 0xc57   : > { %7812 = vrcp.f32 %v4289_v5  ;;  %v7803_v36 = vpop.eup %7802 }
 0xc58   : > { %7814 = vrcp.f32 %v4301_v54  ;;  %v7805_v32 = vpop.eup %7804 }
 0xc59   : > { %v7807_v58 = vpop.eup %7806  ;;  %v4314_v56 = vadd.f32 1.0, %v7805_v32 }
 0xc5a   : > { %v4315_v57 = vadd.f32 1.0, %v7807_v58 }
 0xc5b   : > { %7816 = vrcp.f32 %v4314_v56 }
 0xc5f   : > { %v7809_v62 = vpop.eup %7808 }
 0xc60   : > { %v7811_v40 = vpop.eup %7810  ;;  %v4322_v55 = vmul.f32 %v7809_v62, %v7801_v23 }
 0xc61   : > { %v7813_v63 = vpop.eup %7812  ;;  %v4320_v61 = vmul.f32 %v7811_v40, %v9910_v15 }
 0xc62   : > { %v7815_v53 = vpop.eup %7814  ;;  %v4323_v38 = vmul.f32 %v7813_v63, %v7803_v36 }
 0xc63   : > { %v9984_v51 = vadd.f32 %v4322_v55, %v4320_v61  ;;  %v4321_v42 = vmul.f32 %v7815_v53, %v9913_v49 }
 0xc65   : > { %7818 = vtanh.f32 %v9984_v51  ;;  %v9988_v50 = vadd.f32 %v4323_v38, %v4321_v42  ;;  %v7817_v59 = vpop.eup %7816 }
 0xc66   : > { %7820 = vrcp.f32 %v4315_v57 }
 0xc67   : > { %7822 = vtanh.f32 %v9988_v50 }
 0xc6f   : > { %v7819_v5 = vpop.eup %7818 }
 0xc70   : > { %v7821_v54 = vpop.eup %7820  ;;  %v4328_v15 = vmul.f32 %v7819_v5, %v7817_v59 }
 0xc71   : > { %v7823_v23 = vpop.eup %7822 }
 0xc72   : > { %v4329_v32 = vmul.f32 %v7823_v23, %v7821_v54 }
 0xc74   : > { %v4330_v58 = vpack.c.bf16 %v4329_v32, %v4328_v15 }
 0xc76   : > { %6792 = vmatmul.mubr.bf16.vlgmr.msra.gmra.mrb[64].mxu1 %v4330_v58  ;;  %4416 = vmatmul.mubr.bf16.vlgmr.msra.gmra.mrb[40].mxu0 %v4330_v58 }
 0xc77   : > { %4427 = vmatpush1.bf16.msra.mxu1 %v9735_v1  ;;  %4458 = vmatprep.mubr.bf16.mxu1 %v11033_v24 }
 0xc78   : > { %4428 = vmatprep.subr.bf16.mxu1 %v9740_v6  ;;  %6796 = vmatpush3.bf16.msra.mxu0 %v9845_v20 }
 0xc79   : > { %6797 = vmatprep.subr.bf16.mxu0 %v11182_v60  ;;  %6811 = vmatprep.mubr.msk.bf16.mxu0 %vm8356_vm0, %v11182_v60 }
 0xc7b   : > { %4429 = vmatpush1.bf16.msra.mxu1 %v9746_v2 }
 0xc7c   : > { %4430 = vmatprep.subr.bf16.mxu1 %v9752_v33  ;;  %6798 = vmatpush3.bf16.msra.mxu0 %v9851_v21 }
 0xc7d   : > { %6799 = vmatprep.subr.bf16.mxu0 %v11182_v60 }
 0xc7f   : > { %4431 = vmatpush1.bf16.msra.mxu1 %v9760_v10 }
 0xc80   : > { %4432 = vmatprep.subr.bf16.mxu1 %v9766_v12  ;;  %6800 = vmatpush3.bf16.msra.mxu0 %v9855_v44 }
 0xc81   : > { %6801 = vmatprep.subr.bf16.mxu0 %v11182_v60 }
 0xc83   : > { %4433 = vmatpush1.bf16.msra.mxu1 %v9772_v29 }
 0xc84   : > { %4434 = vmatprep.subr.bf16.mxu1 %v9778_v47  ;;  %6802 = vmatpush3.bf16.msra.mxu0 %v9859_v4 }
 0xc85   : > { %6803 = vmatprep.subr.bf16.mxu0 %v11182_v60 }
 0xc87   : > { %4435 = vmatpush1.bf16.msra.mxu1 %v9784_v28 }
 0xc88   : > { %4436 = vmatprep.subr.bf16.mxu1 %v9790_v13  ;;  %6804 = vmatpush3.bf16.msra.mxu0 %v9863_v43 }
 0xc89   : > { %6805 = vmatprep.subr.bf16.mxu0 %v11182_v60 }
 0xc8b   : > { %4437 = vmatpush1.bf16.msra.mxu1 %v9796_v48 }
 0xc8c   : > { %4438 = vmatprep.subr.bf16.mxu1 %v9802_v45  ;;  %6806 = vmatpush3.bf16.msra.mxu0 %v9866_v27 }
 0xc8d   : > { %6807 = vmatprep.subr.bf16.mxu0 %v11182_v60 }
 0xc8f   : > { %4439 = vmatpush1.bf16.msra.mxu1 %v9808_v26 }
 0xc90   : > { %4440 = vmatprep.subr.bf16.mxu1 %v9814_v22  ;;  %6808 = vmatpush3.bf16.msra.mxu0 %v9872_v16 }
 0xc91   : > { %6809 = vmatprep.subr.bf16.mxu0 %v11182_v60 }
 0xc93   : > { %4441 = vmatpush1.bf16.msra.mxu1 %v9820_v25 }
 0xc94   : > { %4621 = vmatprep.subr.bf16.mxu1 %v9710_v8  ;;  %6810 = vmatpush3.bf16.msra.mxu0 %v9876_v3 }
 0xc95   : > { %4578 = vmatprep.subr.bf16.mxu0 %v9708_v7 }
 0xc96   : > { %4459 = vmatmul.mubr.bf16.vlgmr.msra.gmra.mrb[40].mxu1 %v4330_v58 }
 0xc97   : > { %4622 = vmatpush1.bf16.msra.mxu1 %v9735_v1  ;;  %4653 = vmatprep.mubr.bf16.mxu1 %v11033_v24 }
 0xc98   : > { %4623 = vmatprep.subr.bf16.mxu1 %v9740_v6 }
 0xc9b   : > { %4624 = vmatpush1.bf16.msra.mxu1 %v9746_v2 }
 0xc9c   : > { %4625 = vmatprep.subr.bf16.mxu1 %v9752_v33 }
 0xc9f   : > { %4626 = vmatpush1.bf16.msra.mxu1 %v9760_v10 }
 0xca0   : > { %4627 = vmatprep.subr.bf16.mxu1 %v9766_v12 }
 0xca3   : > { %4628 = vmatpush1.bf16.msra.mxu1 %v9772_v29 }
 0xca4   : > { %4629 = vmatprep.subr.bf16.mxu1 %v9778_v47 }
 0xca7   : > { %4630 = vmatpush1.bf16.msra.mxu1 %v9784_v28 }
 0xca8   : > { %4631 = vmatprep.subr.bf16.mxu1 %v9790_v13 }
 0xcab   : > { %4632 = vmatpush1.bf16.msra.mxu1 %v9796_v48 }
 0xcac   : > { %4633 = vmatprep.subr.bf16.mxu1 %v9802_v45 }
 0xcaf   : > { %4634 = vmatpush1.bf16.msra.mxu1 %v9808_v26 }
 0xcb0   : > { %4635 = vmatprep.subr.bf16.mxu1 %v9814_v22 }
 0xcb3   : > { %4636 = vmatpush1.bf16.msra.mxu1 %v9820_v25 }
 0xcb4   : > { %6815 = vmatprep.subr.bf16.mxu1 %v11182_v60 }
 0xd49   : > { %v4365_v7 = vpop.f32.mrb[64].mxu1  ;;  %v4417_v8 = vpop.f32.mrb[40].mxu0 }
 0xd4a   : > { %v4366_v1 = vadd.f32 %v9971_v19, %v4365_v7  ;;  %v6793_v6 = vpop.f32.mrb[65].mxu1  ;;  %v4419_v2 = vpop.f32.mrb[41].mxu0  ;;  %v6995_v28 = vadd.f32 %v4417_v8, %v9886_v52 }
 0xd4b   : > { %v4368_v33 = vpop.f32.mrb[66].mxu1  ;;  %v4421_v10 = vpop.f32.mrb[42].mxu0  ;;  %v6996_v13 = vadd.f32 %v4419_v2, %v9890_v34 }
 0xd4c   : > { %4373 = vst [vmem:[#allocation4 + $0x10] sm:$0xff] %v4366_v1  ;;  %v4369_v12 = vadd.f32 %v9971_v19, %v4368_v33  ;;  %v6794_v29 = vpop.f32.mrb[67].mxu1  ;;  %v4423_v47 = vpop.f32.mrb[43].mxu0  ;;  %v6626_v38 = vmul.f32 -1.442695, %v6995_v28  ;;  %v6997_v45 = vadd.f32 %v4421_v10, %v9886_v52 }
 0xd4d   : > { %v6998_v48 = vadd.f32 %v4423_v47, %v9890_v34  ;;  %v6628_v26 = vmul.f32 -1.442695, %v6996_v13 }
 0xd4e   : > { %4374 = vst [vmem:[#allocation4 + $0x18] sm:$0xff] %v4369_v12  ;;  %7824 = vpow2.f32 %v6626_v38  ;;  %v6627_v25 = vmul.f32 -1.442695, %v6997_v45 }
 0xd4f   : > { %v6629_v22 = vmul.f32 -1.442695, %v6998_v48  ;;  %7826 = vpow2.f32 %v6628_v26 }
 0xd51   : > { %7828 = vpow2.f32 %v6629_v22 }
 0xd52   : > { %7830 = vpow2.f32 %v6627_v25 }
 0xd58   : > { %v7825_v49 = vpop.eup %7824 }
 0xd59   : > { %v7827_v36 = vpop.eup %7826  ;;  %v4483_v40 = vadd.f32 1.0, %v7825_v49 }
 0xd5a   : > { %v4495_v55 = vadd.f32 1.0, %v7827_v36 }
 0xd5b   : > { %v7829_v62 = vpop.eup %7828  ;;  %7832 = vrcp.f32 %v4483_v40  ;;  %v11185_v40 = vld [vmem:[#allocation34_spill] sm:$0xff] }
 0xd5c   : > { %v7831_v56 = vpop.eup %7830  ;;  %v4496_v63 = vadd.f32 1.0, %v7829_v62  ;;  %7834 = vrcp.f32 %v4495_v55  ;;  %v11187_v55 = vld [vmem:[#allocation44_spill] sm:$0xff] }
 0xd5d   : > { %v4484_v61 = vadd.f32 1.0, %v7831_v56  ;;  %v11186_v56 = vld [vmem:[#allocation35_spill] sm:$0xff] }
 0xd5e   : > { %7836 = vrcp.f32 %v4496_v63  ;;  %v11188_v63 = vld [vmem:[#allocation45_spill] sm:$0xff] }
 0xd65   : > { %v7833_v7 = vpop.eup %7832 }
 0xd66   : > { %v7835_v8 = vpop.eup %7834 }
 0xd67   : > { %v4515_v33 = vmul.f32 %v7835_v8, %v9984_v51 }
 0xd68   : > { %v7837_v1 = vpop.eup %7836 }
 0xd69   : > { %v4460_v53 = vpop.f32.mrb[40].mxu1  ;;  %v4516_v47 = vmul.f32 %v7837_v1, %v9988_v50 }
 0xd6a   : > { %v6999_v57 = vadd.f32 %v4460_v53, %v9902_v35  ;;  %v4462_v42 = vpop.f32.mrb[41].mxu1  ;;  %v10097_v53 = vld [vmem:[#allocation13 + $0xc] ss:$16 sps:$4 sm:$0xff]  }
 0xd6b   : > { %v7000_v59 = vadd.f32 %v4462_v42, %v9897_v17  ;;  %v4464_v5 = vpop.f32.mrb[42].mxu1 }
 0xd6c   : > { %7838 = vtanh.f32 %v6999_v57  ;;  %v7001_v54 = vadd.f32 %v4464_v5, %v9902_v35  ;;  %v4466_v23 = vpop.f32.mrb[43].mxu1 }
 0xd6d   : > { %7840 = vrcp.f32 %v4484_v61  ;;  %v6630_v15 = vmul.f32 -1.442695, %v7000_v59  ;;  %v7002_v32 = vadd.f32 %v4466_v23, %v9897_v17  ;;  %v10093_v61 = vld [vmem:[#allocation13 + $0x4] ss:$16 sps:$4 sm:$0xff]  }
 0xd6e   : > { %7842 = vtanh.f32 %v7001_v54 }
 0xd6f   : > { %7844 = vpow2.f32 %v6630_v15  ;;  %v6631_v58 = vmul.f32 -1.442695, %v7002_v32 }
 0xd71   : > { %7846 = vpow2.f32 %v6631_v58 }
 0xd76   : > { %v7839_v6 = vpop.eup %7838 }
 0xd77   : > { %v7841_v2 = vpop.eup %7840  ;;  %v4517_v10 = vmul.f32 %v7839_v6, %v7833_v7 }
 0xd78   : > { %v7843_v12 = vpop.eup %7842 }
 0xd79   : > { %v7845_v29 = vpop.eup %7844  ;;  %v10055_v28 = vadd.f32 %v4517_v10, %v4515_v33  ;;  %v4518_v13 = vmul.f32 %v7843_v12, %v7841_v2 }
 0xd7a   : > { %v4509_v48 = vadd.f32 1.0, %v7845_v29 }
 0xd7b   : > { %v7847_v38 = vpop.eup %7846  ;;  %7848 = vtanh.f32 %v10055_v28  ;;  %v10058_v45 = vadd.f32 %v4518_v13, %v4516_v47 }
 0xd7c   : > { %7850 = vrcp.f32 %v4509_v48  ;;  %v4510_v26 = vadd.f32 1.0, %v7847_v38 }
 0xd7d   : > { %7852 = vtanh.f32 %v10058_v45 }
 0xd7e   : > { %7854 = vrcp.f32 %v4510_v26 }
 0xd85   : > { %v7849_v51 = vpop.eup %7848 }
 0xd86   : > { %v7851_v22 = vpop.eup %7850 }
 0xd87   : > { %v7853_v25 = vpop.eup %7852  ;;  %v4523_v36 = vmul.f32 %v7851_v22, %v7849_v51 }
 0xd88   : > { %v7855_v49 = vpop.eup %7854 }
 0xd89   : > { %v4524_v50 = vmul.f32 %v7855_v49, %v7853_v25 }
 0xd8b   : > { %v4525_v62 = vpack.c.bf16 %v4524_v50, %v4523_v36 }
 0xd8d   : > { %6812 = vmatmul.mubr.bf16.vlgmr.msra.gmra.mrb[68].mxu0 %v4525_v62  ;;  %4654 = vmatmul.mubr.bf16.vlgmr.msra.gmra.mrb[44].mxu1 %v4525_v62 }
 0xd8e   : > { %4579 = vmatpush1.bf16.msra.mxu0 %v9733_v0  ;;  %4610 = vmatprep.mubr.bf16.mxu0 %v11033_v24 }
 0xd8f   : > { %4580 = vmatprep.subr.bf16.mxu0 %v9738_v37  ;;  %6816 = vmatpush3.bf16.msra.mxu1 %v9845_v20 }
 0xd90   : > { %6817 = vmatprep.subr.bf16.mxu1 %v11182_v60  ;;  %6831 = vmatprep.mubr.msk.bf16.mxu1 %vm8356_vm0, %v11182_v60 }
 0xd92   : > { %4581 = vmatpush1.bf16.msra.mxu0 %v9744_v14 }
 0xd93   : > { %4582 = vmatprep.subr.bf16.mxu0 %v9750_v31  ;;  %6818 = vmatpush3.bf16.msra.mxu1 %v9851_v21 }
 0xd94   : > { %6819 = vmatprep.subr.bf16.mxu1 %v11182_v60 }
 0xd96   : > { %4583 = vmatpush1.bf16.msra.mxu0 %v9758_v9 }
 0xd97   : > { %4584 = vmatprep.subr.bf16.mxu0 %v9764_v11  ;;  %6820 = vmatpush3.bf16.msra.mxu1 %v9855_v44 }
 0xd98   : > { %6821 = vmatprep.subr.bf16.mxu1 %v11182_v60 }
 0xd9a   : > { %4585 = vmatpush1.bf16.msra.mxu0 %v9770_v41 }
 0xd9b   : > { %4586 = vmatprep.subr.bf16.mxu0 %v9776_v30  ;;  %6822 = vmatpush3.bf16.msra.mxu1 %v9859_v4 }
 0xd9c   : > { %6823 = vmatprep.subr.bf16.mxu1 %v11182_v60 }
 0xd9e   : > { %4587 = vmatpush1.bf16.msra.mxu0 %v9782_v18 }
 0xd9f   : > { %4588 = vmatprep.subr.bf16.mxu0 %v9788_v39  ;;  %6824 = vmatpush3.bf16.msra.mxu1 %v9863_v43 }
 0xda0   : > { %6825 = vmatprep.subr.bf16.mxu1 %v11182_v60 }
 0xda2   : > { %4589 = vmatpush1.bf16.msra.mxu0 %v9794_v46 }
 0xda3   : > { %4590 = vmatprep.subr.bf16.mxu0 %v11185_v40  ;;  %6826 = vmatpush3.bf16.msra.mxu1 %v9866_v27 }
 0xda4   : > { %6827 = vmatprep.subr.bf16.mxu1 %v11182_v60 }
 0xda6   : > { %4591 = vmatpush1.bf16.msra.mxu0 %v11186_v56 }
 0xda7   : > { %4592 = vmatprep.subr.bf16.mxu0 %v11187_v55  ;;  %6828 = vmatpush3.bf16.msra.mxu1 %v9872_v16 }
 0xda8   : > { %6829 = vmatprep.subr.bf16.mxu1 %v11182_v60 }
 0xdaa   : > { %4593 = vmatpush1.bf16.msra.mxu0 %v11188_v63 }
 0xdab   : > { %4773 = vmatprep.subr.bf16.mxu0 %v10093_v61  ;;  %6830 = vmatpush3.bf16.msra.mxu1 %v9876_v3 }
 0xdac   : > { %4816 = vmatprep.subr.bf16.mxu1 %v10097_v53 }
 0xdad   : > { %4611 = vmatmul.mubr.bf16.vlgmr.msra.gmra.mrb[44].mxu0 %v4525_v62 }
 0xdae   : > { %4774 = vmatpush1.bf16.msra.mxu0 %v9733_v0  ;;  %4805 = vmatprep.mubr.bf16.mxu0 %v11033_v24 }
 0xdaf   : > { %4775 = vmatprep.subr.bf16.mxu0 %v9738_v37 }
 0xdb2   : > { %4776 = vmatpush1.bf16.msra.mxu0 %v9744_v14 }
 0xdb3   : > { %4777 = vmatprep.subr.bf16.mxu0 %v9750_v31 }
 0xdb6   : > { %4778 = vmatpush1.bf16.msra.mxu0 %v9758_v9 }
 0xdb7   : > { %4779 = vmatprep.subr.bf16.mxu0 %v9764_v11 }
 0xdba   : > { %4780 = vmatpush1.bf16.msra.mxu0 %v9770_v41 }
 0xdbb   : > { %4781 = vmatprep.subr.bf16.mxu0 %v9776_v30 }
 0xdbe   : > { %4782 = vmatpush1.bf16.msra.mxu0 %v9782_v18 }
 0xdbf   : > { %4783 = vmatprep.subr.bf16.mxu0 %v9788_v39 }
 0xdc2   : > { %4784 = vmatpush1.bf16.msra.mxu0 %v9794_v46 }
 0xdc3   : > { %4785 = vmatprep.subr.bf16.mxu0 %v11185_v40 }
 0xdc6   : > { %4786 = vmatpush1.bf16.msra.mxu0 %v11186_v56 }
 0xdc7   : > { %4787 = vmatprep.subr.bf16.mxu0 %v11187_v55 }
 0xdca   : > { %4788 = vmatpush1.bf16.msra.mxu0 %v11188_v63 }
 0xdcb   : > { %6835 = vmatprep.subr.bf16.mxu0 %v11182_v60 }
 0xe60   : > { %v4560_v0 = vpop.f32.mrb[68].mxu0  ;;  %v4655_v37 = vpop.f32.mrb[44].mxu1 }
 0xe61   : > { %v4561_v14 = vadd.f32 %v9971_v19, %v4560_v0  ;;  %v6813_v31 = vpop.f32.mrb[69].mxu0  ;;  %v4657_v9 = vpop.f32.mrb[45].mxu1  ;;  %v7007_v2 = vadd.f32 %v4655_v37, %v9902_v35 }
 0xe62   : > { %v4563_v11 = vpop.f32.mrb[70].mxu0  ;;  %v4659_v41 = vpop.f32.mrb[46].mxu1  ;;  %v7008_v1 = vadd.f32 %v4657_v9, %v9897_v17 }
 0xe63   : > { %4568 = vst [vmem:[#allocation4 + $0x20] sm:$0xff] %v4561_v14  ;;  %v4564_v30 = vadd.f32 %v9971_v19, %v4563_v11  ;;  %v6814_v18 = vpop.f32.mrb[71].mxu0  ;;  %v4661_v39 = vpop.f32.mrb[47].mxu1  ;;  %v7009_v33 = vadd.f32 %v4659_v41, %v9902_v35 }
 0xe64   : > { %v7010_v6 = vadd.f32 %v4661_v39, %v9897_v17  ;;  %v6636_v10 = vmul.f32 -1.442695, %v7008_v1 }
 0xe65   : > { %4569 = vst [vmem:[#allocation4 + $0x28] sm:$0xff] %v4564_v30 }
 0xe66   : > { %v6637_v12 = vmul.f32 -1.442695, %v7010_v6 }
 0xe80   : > { %v4612_v46 = vpop.f32.mrb[44].mxu0 }
 0xe81   : > { %v7003_v57 = vadd.f32 %v4612_v46, %v9886_v52  ;;  %v4614_v42 = vpop.f32.mrb[45].mxu0 }
 0xe82   : > { %v7004_v59 = vadd.f32 %v4614_v42, %v9890_v34  ;;  %v4616_v5 = vpop.f32.mrb[46].mxu0 }
 0xe83   : > { %v6632_v54 = vmul.f32 -1.442695, %v7003_v57  ;;  %v7005_v23 = vadd.f32 %v4616_v5, %v9886_v52  ;;  %v4618_v15 = vpop.f32.mrb[47].mxu0  ;;  %v10146_v5 = vld [vmem:[#allocation13 + $0x28] ss:$16 sps:$4 sm:$0xff]  }
 0xe84   : > { %v6634_v32 = vmul.f32 -1.442695, %v7004_v59  ;;  %v7006_v58 = vadd.f32 %v4618_v15, %v9890_v34  ;;  %v10135_v59 = vld [vmem:[#allocation13 + $0x8] ss:$16 sps:$4 sm:$0xff]  }
 0xe85   : > { %7856 = vpow2.f32 %v6632_v54  ;;  %v6633_v7 = vmul.f32 -1.442695, %v7005_v23  ;;  %v10149_v54 = vld [vmem:[#allocation13 + $0x4c] ss:$16 sps:$4 sm:$0xff]   ;;  %v10154_v23 = vld [vmem:[#allocation13 + $0x48] ss:$16 sps:$4 sm:$0xff]  }
 0xe86   : > { %7858 = vpow2.f32 %v6634_v32  ;;  %v6635_v8 = vmul.f32 -1.442695, %v7006_v58  ;;  %v10162_v15 = vld [vmem:[#allocation13 + $0x68] ss:$16 sps:$4 sm:$0xff]   ;;  %v10165_v32 = vld [vmem:[#allocation13 + $0x8c] ss:$16 sps:$4 sm:$0xff]  }
 0xe87   : > { %7860 = vpow2.f32 %v6633_v7  ;;  %v10173_v58 = vld [vmem:[#allocation13 + $0xac] ss:$16 sps:$4 sm:$0xff]  }
 0xe88   : > { %7862 = vpow2.f32 %v6635_v8  ;;  %v10181_v7 = vld [vmem:[#allocation13 + $0xcc] ss:$16 sps:$4 sm:$0xff]  }
 0xe89   : > { %7864 = vtanh.f32 %v7007_v2  ;;  %v10189_v8 = vld [vmem:[#allocation13 + $0xec] ss:$16 sps:$4 sm:$0xff]  }
 0xe8a   : > { %7866 = vtanh.f32 %v7009_v33 }
 0xe8b   : > { %7868 = vpow2.f32 %v6636_v10 }
 0xe8c   : > { %7870 = vpow2.f32 %v6637_v12 }
 0xe8f   : > { %v7857_v29 = vpop.eup %7856 }
 0xe90   : > { %v7859_v47 = vpop.eup %7858  ;;  %v4678_v13 = vadd.f32 1.0, %v7857_v29 }
 0xe91   : > { %v7861_v48 = vpop.eup %7860  ;;  %v4690_v38 = vadd.f32 1.0, %v7859_v47 }
 0xe92   : > { %v7863_v26 = vpop.eup %7862  ;;  %7872 = vrcp.f32 %v4678_v13  ;;  %v4679_v51 = vadd.f32 1.0, %v7861_v48 }
 0xe93   : > { %7874 = vrcp.f32 %v4690_v38  ;;  %v4691_v22 = vadd.f32 1.0, %v7863_v26  ;;  %v7865_v25 = vpop.eup %7864 }
 0xe94   : > { %7876 = vrcp.f32 %v4679_v51  ;;  %v7867_v49 = vpop.eup %7866 }
 0xe95   : > { %7878 = vrcp.f32 %v4691_v22  ;;  %v7869_v36 = vpop.eup %7868 }
 0xe96   : > { %v7871_v50 = vpop.eup %7870  ;;  %v4704_v56 = vadd.f32 1.0, %v7869_v36 }
 0xe97   : > { %v4705_v14 = vadd.f32 1.0, %v7871_v50 }
 0xe98   : > { %7880 = vrcp.f32 %v4704_v56 }
 0xe9c   : > { %v7873_v62 = vpop.eup %7872 }
 0xe9d   : > { %v7875_v40 = vpop.eup %7874  ;;  %v4712_v55 = vmul.f32 %v7873_v62, %v7865_v25 }
 0xe9e   : > { %v7877_v63 = vpop.eup %7876  ;;  %v4710_v0 = vmul.f32 %v7875_v40, %v10055_v28 }
 0xe9f   : > { %v7879_v37 = vpop.eup %7878  ;;  %v4713_v31 = vmul.f32 %v7877_v63, %v7867_v49 }
 0xea0   : > { %v10128_v9 = vadd.f32 %v4712_v55, %v4710_v0  ;;  %v4711_v11 = vmul.f32 %v7879_v37, %v10058_v45  ;;  %v10139_v45 = vld [vmem:[#allocation13 + $0x2c] ss:$16 sps:$4 sm:$0xff]  }
 0xea2   : > { %7882 = vtanh.f32 %v10128_v9  ;;  %v10132_v41 = vadd.f32 %v4713_v31, %v4711_v11  ;;  %v7881_v30 = vpop.eup %7880 }
 0xea3   : > { %7884 = vrcp.f32 %v4705_v14 }
 0xea4   : > { %7886 = vtanh.f32 %v10132_v41 }
 0xeac   : > { %v7883_v18 = vpop.eup %7882 }
 0xead   : > { %v7885_v39 = vpop.eup %7884  ;;  %v4718_v28 = vmul.f32 %v7883_v18, %v7881_v30 }
 0xeae   : > { %v7887_v46 = vpop.eup %7886 }
 0xeaf   : > { %v4719_v57 = vmul.f32 %v7887_v46, %v7885_v39 }
 0xeb1   : > { %v4720_v42 = vpack.c.bf16 %v4719_v57, %v4718_v28 }
 0xeb3   : > { %6832 = vmatmul.mubr.bf16.vlgmr.msra.gmra.mrb[68].mxu1 %v4720_v42  ;;  %4806 = vmatmul.mubr.bf16.vlgmr.msra.gmra.mrb[48].mxu0 %v4720_v42 }
 0xeb4   : > { %4817 = vmatpush1.bf16.msra.mxu1 %v10135_v59  ;;  %4848 = vmatprep.mubr.bf16.mxu1 %v11033_v24 }
 0xeb5   : > { %4818 = vmatprep.subr.bf16.mxu1 %v10139_v45  ;;  %6836 = vmatpush3.bf16.msra.mxu0 %v9845_v20  ;;  %v10157_v20 = vld [vmem:[#allocation13 + $0x6c] ss:$16 sps:$4 sm:$0xff]  }
 0xeb6   : > { %6837 = vmatprep.subr.bf16.mxu0 %v11182_v60  ;;  %6851 = vmatprep.mubr.msk.bf16.mxu0 %vm8356_vm0, %v11182_v60 }
 0xeb8   : > { %4819 = vmatpush1.bf16.msra.mxu1 %v10146_v5 }
 0xeb9   : > { %4820 = vmatprep.subr.bf16.mxu1 %v10149_v54  ;;  %6838 = vmatpush3.bf16.msra.mxu0 %v9851_v21  ;;  %v10170_v21 = vld [vmem:[#allocation13 + $0x88] ss:$16 sps:$4 sm:$0xff]  }
 0xeba   : > { %6839 = vmatprep.subr.bf16.mxu0 %v11182_v60 }
 0xebc   : > { %4821 = vmatpush1.bf16.msra.mxu1 %v10154_v23 }
 0xebd   : > { %4822 = vmatprep.subr.bf16.mxu1 %v10157_v20  ;;  %6840 = vmatpush3.bf16.msra.mxu0 %v9855_v44  ;;  %v10178_v44 = vld [vmem:[#allocation13 + $0xa8] ss:$16 sps:$4 sm:$0xff]  }
 0xebe   : > { %6841 = vmatprep.subr.bf16.mxu0 %v11182_v60 }
 0xec0   : > { %4823 = vmatpush1.bf16.msra.mxu1 %v10162_v15 }
 0xec1   : > { %4824 = vmatprep.subr.bf16.mxu1 %v10165_v32  ;;  %6842 = vmatpush3.bf16.msra.mxu0 %v9859_v4  ;;  %v10186_v4 = vld [vmem:[#allocation13 + $0xc8] ss:$16 sps:$4 sm:$0xff]  }
 0xec2   : > { %6843 = vmatprep.subr.bf16.mxu0 %v11182_v60 }
 0xec4   : > { %4825 = vmatpush1.bf16.msra.mxu1 %v10170_v21 }
 0xec5   : > { %4826 = vmatprep.subr.bf16.mxu1 %v10173_v58  ;;  %6844 = vmatpush3.bf16.msra.mxu0 %v9863_v43  ;;  %v10194_v43 = vld [vmem:[#allocation13 + $0xe8] ss:$16 sps:$4 sm:$0xff]  }
 0xec6   : > { %6845 = vmatprep.subr.bf16.mxu0 %v11182_v60 }
 0xec8   : > { %4827 = vmatpush1.bf16.msra.mxu1 %v10178_v44 }
 0xec9   : > { %4828 = vmatprep.subr.bf16.mxu1 %v10181_v7  ;;  %6846 = vmatpush3.bf16.msra.mxu0 %v9866_v27 }
 0xeca   : > { %6847 = vmatprep.subr.bf16.mxu0 %v11182_v60 }
 0xecc   : > { %4829 = vmatpush1.bf16.msra.mxu1 %v10186_v4 }
 0xecd   : > { %4830 = vmatprep.subr.bf16.mxu1 %v10189_v8  ;;  %6848 = vmatpush3.bf16.msra.mxu0 %v9872_v16 }
 0xece   : > { %6849 = vmatprep.subr.bf16.mxu0 %v11182_v60 }
 0xed0   : > { %4831 = vmatpush1.bf16.msra.mxu1 %v10194_v43 }
 0xed1   : > { %5011 = vmatprep.subr.bf16.mxu1 %v10097_v53  ;;  %6850 = vmatpush3.bf16.msra.mxu0 %v9876_v3 }
 0xed2   : > { %4968 = vmatprep.subr.bf16.mxu0 %v10093_v61 }
 0xed3   : > { %4849 = vmatmul.mubr.bf16.vlgmr.msra.gmra.mrb[48].mxu1 %v4720_v42 }
 0xed4   : > { %5012 = vmatpush1.bf16.msra.mxu1 %v10135_v59  ;;  %5043 = vmatprep.mubr.bf16.mxu1 %v11033_v24 }
 0xed5   : > { %5013 = vmatprep.subr.bf16.mxu1 %v10139_v45 }
 0xed8   : > { %5014 = vmatpush1.bf16.msra.mxu1 %v10146_v5 }
 0xed9   : > { %5015 = vmatprep.subr.bf16.mxu1 %v10149_v54 }
 0xedc   : > { %5016 = vmatpush1.bf16.msra.mxu1 %v10154_v23 }
 0xedd   : > { %5017 = vmatprep.subr.bf16.mxu1 %v10157_v20 }
 0xee0   : > { %5018 = vmatpush1.bf16.msra.mxu1 %v10162_v15 }
 0xee1   : > { %5019 = vmatprep.subr.bf16.mxu1 %v10165_v32 }
 0xee4   : > { %5020 = vmatpush1.bf16.msra.mxu1 %v10170_v21 }
 0xee5   : > { %5021 = vmatprep.subr.bf16.mxu1 %v10173_v58 }
 0xee8   : > { %5022 = vmatpush1.bf16.msra.mxu1 %v10178_v44 }
 0xee9   : > { %5023 = vmatprep.subr.bf16.mxu1 %v10181_v7 }
 0xeec   : > { %5024 = vmatpush1.bf16.msra.mxu1 %v10186_v4 }
 0xeed   : > { %5025 = vmatprep.subr.bf16.mxu1 %v10189_v8 }
 0xef0   : > { %5026 = vmatpush1.bf16.msra.mxu1 %v10194_v43 }
 0xef1   : > { %6855 = vmatprep.subr.bf16.mxu1 %v11182_v60 }
 0xf86   : > { %v4755_v27 = vpop.f32.mrb[68].mxu1  ;;  %v4807_v16 = vpop.f32.mrb[48].mxu0 }
 0xf87   : > { %v4756_v3 = vadd.f32 %v9971_v19, %v4755_v27  ;;  %v6833_v1 = vpop.f32.mrb[69].mxu1  ;;  %v4809_v6 = vpop.f32.mrb[49].mxu0  ;;  %v7011_v47 = vadd.f32 %v4807_v16, %v9886_v52 }
 0xf88   : > { %v4758_v2 = vpop.f32.mrb[70].mxu1  ;;  %v4811_v33 = vpop.f32.mrb[50].mxu0  ;;  %v7012_v13 = vadd.f32 %v4809_v6, %v9890_v34 }
 0xf89   : > { %4763 = vst [vmem:[#allocation4 + $0x30] sm:$0xff] %v4756_v3  ;;  %v4759_v10 = vadd.f32 %v9971_v19, %v4758_v2  ;;  %v6834_v12 = vpop.f32.mrb[71].mxu1  ;;  %v4813_v29 = vpop.f32.mrb[51].mxu0  ;;  %v6638_v38 = vmul.f32 -1.442695, %v7011_v47  ;;  %v7013_v26 = vadd.f32 %v4811_v33, %v9886_v52 }
 0xf8a   : > { %v7014_v48 = vadd.f32 %v4813_v29, %v9890_v34  ;;  %v6640_v51 = vmul.f32 -1.442695, %v7012_v13 }
 0xf8b   : > { %4764 = vst [vmem:[#allocation4 + $0x38] sm:$0xff] %v4759_v10  ;;  %7888 = vpow2.f32 %v6638_v38  ;;  %v6639_v25 = vmul.f32 -1.442695, %v7013_v26 }
 0xf8c   : > { %v6641_v22 = vmul.f32 -1.442695, %v7014_v48  ;;  %7890 = vpow2.f32 %v6640_v51 }
 0xf8e   : > { %7892 = vpow2.f32 %v6641_v22 }
 0xf8f   : > { %7894 = vpow2.f32 %v6639_v25 }
 0xf95   : > { %v7889_v19 = vpop.eup %7888 }
 0xf96   : > { %v7891_v49 = vpop.eup %7890  ;;  %v4873_v50 = vadd.f32 1.0, %v7889_v19  ;;  %v10235_v19 = vld [vmem:[#allocation13] ss:$16 sps:$4 sm:$0xff]  }
 0xf97   : > { %v4885_v40 = vadd.f32 1.0, %v7891_v49  ;;  %v10239_v49 = vld [vmem:[#allocation13 + $0x24] ss:$16 sps:$4 sm:$0xff]  }
 0xf98   : > { %v7893_v36 = vpop.eup %7892  ;;  %7896 = vrcp.f32 %v4873_v50  ;;  %v10248_v50 = vld [vmem:[#allocation13 + $0x20] ss:$16 sps:$4 sm:$0xff]  }
 0xf99   : > { %v7895_v62 = vpop.eup %7894  ;;  %v4886_v56 = vadd.f32 1.0, %v7893_v36  ;;  %7898 = vrcp.f32 %v4885_v40  ;;  %v10242_v36 = vld [vmem:[#allocation14] sm:$0xff]   ;;  %v10254_v40 = vld [vmem:[#allocation14 + $0x8] sm:$0xff]  }
 0xf9a   : > { %v4874_v55 = vadd.f32 1.0, %v7895_v62  ;;  %v10251_v62 = vld [vmem:[#allocation13 + $0x44] ss:$16 sps:$4 sm:$0xff]  }
 0xf9b   : > { %7900 = vrcp.f32 %v4886_v56  ;;  %v10258_v56 = vld [vmem:[#allocation13 + $0x40] ss:$16 sps:$4 sm:$0xff]  }
 0xfa2   : > { %v7897_v28 = vpop.eup %7896 }
 0xfa3   : > { %v7899_v57 = vpop.eup %7898 }
 0xfa4   : > { %v4905_v3 = vmul.f32 %v7899_v57, %v10128_v9  ;;  %v10301_v57 = vld [vmem:[#allocation13 + $0xe4] ss:$16 sps:$4 sm:$0xff]  }
 0xfa5   : > { %v7901_v42 = vpop.eup %7900  ;;  %11191 = vst [vmem:[#allocation48_spill] sm:$0xff] %v10301_v57 }
 0xfa6   : > { %v4850_v63 = vpop.f32.mrb[48].mxu1  ;;  %v4906_v33 = vmul.f32 %v7901_v42, %v10132_v41  ;;  %v10304_v42 = vld [vmem:[#allocation14 + $0x30] sm:$0xff]  }
 0xfa7   : > { %v7015_v0 = vadd.f32 %v4850_v63, %v9902_v35  ;;  %v4852_v37 = vpop.f32.mrb[49].mxu1  ;;  %v10264_v63 = vld [vmem:[#allocation14 + $0x10] sm:$0xff]  }
 0xfa8   : > { %v7016_v14 = vadd.f32 %v4852_v37, %v9897_v17  ;;  %v4854_v31 = vpop.f32.mrb[50].mxu1  ;;  %v10271_v37 = vld [vmem:[#allocation13 + $0x84] ss:$16 sps:$4 sm:$0xff]  }
 0xfa9   : > { %7902 = vtanh.f32 %v7015_v0  ;;  %v7017_v11 = vadd.f32 %v4854_v31, %v9902_v35  ;;  %v4856_v30 = vpop.f32.mrb[51].mxu1  ;;  %v10268_v0 = vld [vmem:[#allocation13 + $0x60] ss:$16 sps:$4 sm:$0xff]  }
 0xfaa   : > { %7904 = vrcp.f32 %v4874_v55  ;;  %v6642_v18 = vmul.f32 -1.442695, %v7016_v14  ;;  %v7018_v39 = vadd.f32 %v4856_v30, %v9897_v17  ;;  %v10261_v55 = vld [vmem:[#allocation13 + $0x64] ss:$16 sps:$4 sm:$0xff]   ;;  %v10274_v14 = vld [vmem:[#allocation14 + $0x18] sm:$0xff]  }
 0xfab   : > { %7906 = vtanh.f32 %v7017_v11  ;;  %v10278_v31 = vld [vmem:[#allocation13 + $0x80] ss:$16 sps:$4 sm:$0xff]   ;;  %v10281_v11 = vld [vmem:[#allocation13 + $0xa4] ss:$16 sps:$4 sm:$0xff]  }
 0xfac   : > { %7908 = vpow2.f32 %v6642_v18  ;;  %v6643_v46 = vmul.f32 -1.442695, %v7018_v39  ;;  %v10284_v30 = vld [vmem:[#allocation14 + $0x20] sm:$0xff]  }
 0xfad   : > { %v10288_v18 = vld [vmem:[#allocation13 + $0xa0] ss:$16 sps:$4 sm:$0xff]   ;;  %v10291_v39 = vld [vmem:[#allocation13 + $0xc4] ss:$16 sps:$4 sm:$0xff]  }
 0xfae   : > { %7910 = vpow2.f32 %v6643_v46  ;;  %11189 = vst [vmem:[#allocation46_spill] sm:$0xff] %v10291_v39  ;;  %v10294_v46 = vld [vmem:[#allocation14 + $0x28] sm:$0xff]  }
 0xfb3   : > { %v7903_v27 = vpop.eup %7902 }
 0xfb4   : > { %v7905_v16 = vpop.eup %7904  ;;  %v4907_v1 = vmul.f32 %v7903_v27, %v7897_v28  ;;  %v10298_v28 = vld [vmem:[#allocation13 + $0xc0] ss:$16 sps:$4 sm:$0xff]  }
 0xfb5   : > { %v7907_v6 = vpop.eup %7906  ;;  %11190 = vst [vmem:[#allocation47_spill] sm:$0xff] %v10298_v28  ;;  %v10308_v27 = vld [vmem:[#allocation13 + $0xe0] ss:$16 sps:$4 sm:$0xff]  }
 0xfb6   : > { %v7909_v2 = vpop.eup %7908  ;;  %v10229_v10 = vadd.f32 %v4907_v1, %v4905_v3  ;;  %v4908_v12 = vmul.f32 %v7907_v6, %v7905_v16  ;;  %11192 = vst [vmem:[#allocation49_spill] sm:$0xff] %v10308_v27  ;;  %v10312_v16 = vld [vmem:[#allocation14 + $0x38] sm:$0xff]   ;;  %v10336_v6 = vld [vmem:[%s11184_s16] ss:$0 sm:$0xff] }
 0xfb7   : > { %v4899_v29 = vadd.f32 1.0, %v7909_v2 }
 0xfb8   : > { %v7911_v47 = vpop.eup %7910  ;;  %7912 = vtanh.f32 %v10229_v10  ;;  %v10232_v13 = vadd.f32 %v4908_v12, %v4906_v33 }
 0xfb9   : > { %7914 = vrcp.f32 %v4899_v29  ;;  %v4900_v48 = vadd.f32 1.0, %v7911_v47 }
 0xfba   : > { %7916 = vtanh.f32 %v10232_v13 }
 0xfbb   : > { %7918 = vrcp.f32 %v4900_v48 }
 0xfc2   : > { %v7913_v9 = vpop.eup %7912 }
 0xfc3   : > { %v7915_v38 = vpop.eup %7914 }
 0xfc4   : > { %v7917_v26 = vpop.eup %7916  ;;  %v4913_v22 = vmul.f32 %v7915_v38, %v7913_v9 }
 0xfc5   : > { %v7919_v51 = vpop.eup %7918 }
 0xfc6   : > { %v4914_v41 = vmul.f32 %v7919_v51, %v7917_v26 }
 0xfc8   : > { %v4915_v25 = vpack.c.bf16 %v4914_v41, %v4913_v22 }
 0xfca   : > { %6852 = vmatmul.mubr.bf16.vlgmr.msra.gmra.mrb[72].mxu0 %v4915_v25  ;;  %5044 = vmatmul.mubr.bf16.vlgmr.msra.gmra.mrb[52].mxu1 %v4915_v25 }
 0xfcb   : > { %4969 = vmatpush1.bf16.msra.mxu0 %v10235_v19  ;;  %5000 = vmatprep.mubr.bf16.mxu0 %v11033_v24 }
 0xfcc   : > { %4970 = vmatprep.subr.bf16.mxu0 %v10239_v49  ;;  %6856 = vmatpush3.bf16.msra.mxu1 %v10242_v36 }
 0xfcd   : > { %6857 = vmatprep.subr.bf16.mxu1 %v11182_v60  ;;  %6871 = vmatprep.mubr.msk.bf16.mxu1 %vm8356_vm0, %v11182_v60 }
 0xfcf   : > { %4971 = vmatpush1.bf16.msra.mxu0 %v10248_v50 }
 0xfd0   : > { %4972 = vmatprep.subr.bf16.mxu0 %v10251_v62  ;;  %6858 = vmatpush3.bf16.msra.mxu1 %v10254_v40 }
 0xfd1   : > { %6859 = vmatprep.subr.bf16.mxu1 %v11182_v60 }
 0xfd3   : > { %4973 = vmatpush1.bf16.msra.mxu0 %v10258_v56 }
 0xfd4   : > { %4974 = vmatprep.subr.bf16.mxu0 %v10261_v55  ;;  %6860 = vmatpush3.bf16.msra.mxu1 %v10264_v63 }
 0xfd5   : > { %6861 = vmatprep.subr.bf16.mxu1 %v11182_v60 }
 0xfd7   : > { %4975 = vmatpush1.bf16.msra.mxu0 %v10268_v0 }
 0xfd8   : > { %4976 = vmatprep.subr.bf16.mxu0 %v10271_v37  ;;  %6862 = vmatpush3.bf16.msra.mxu1 %v10274_v14 }
 0xfd9   : > { %6863 = vmatprep.subr.bf16.mxu1 %v11182_v60 }
 0xfdb   : > { %4977 = vmatpush1.bf16.msra.mxu0 %v10278_v31 }
 0xfdc   : > { %4978 = vmatprep.subr.bf16.mxu0 %v10281_v11  ;;  %6864 = vmatpush3.bf16.msra.mxu1 %v10284_v30 }
 0xfdd   : > { %6865 = vmatprep.subr.bf16.mxu1 %v11182_v60 }
 0xfdf   : > { %4979 = vmatpush1.bf16.msra.mxu0 %v10288_v18 }
 0xfe0   : > { %4980 = vmatprep.subr.bf16.mxu0 %v10291_v39  ;;  %6866 = vmatpush3.bf16.msra.mxu1 %v10294_v46 }
 0xfe1   : > { %6867 = vmatprep.subr.bf16.mxu1 %v11182_v60 }
 0xfe3   : > { %4981 = vmatpush1.bf16.msra.mxu0 %v10298_v28 }
 0xfe4   : > { %4982 = vmatprep.subr.bf16.mxu0 %v10301_v57  ;;  %6868 = vmatpush3.bf16.msra.mxu1 %v10304_v42 }
 0xfe5   : > { %6869 = vmatprep.subr.bf16.mxu1 %v11182_v60 }
 0xfe7   : > { %4983 = vmatpush1.bf16.msra.mxu0 %v10308_v27 }
 0xfe8   : > { %5163 = vmatprep.subr.bf16.mxu0 %v10093_v61  ;;  %6870 = vmatpush3.bf16.msra.mxu1 %v10312_v16 }
 0xfe9   : > { %5206 = vmatprep.subr.bf16.mxu1 %v10097_v53 }
 0xfea   : > { %5001 = vmatmul.mubr.bf16.vlgmr.msra.gmra.mrb[52].mxu0 %v4915_v25 }
 0xfeb   : > { %5164 = vmatpush1.bf16.msra.mxu0 %v10235_v19  ;;  %5195 = vmatprep.mubr.bf16.mxu0 %v11033_v24 }
 0xfec   : > { %5165 = vmatprep.subr.bf16.mxu0 %v10239_v49 }
 0xfef   : > { %5166 = vmatpush1.bf16.msra.mxu0 %v10248_v50 }
 0xff0   : > { %5167 = vmatprep.subr.bf16.mxu0 %v10251_v62 }
 0xff3   : > { %5168 = vmatpush1.bf16.msra.mxu0 %v10258_v56 }
 0xff4   : > { %5169 = vmatprep.subr.bf16.mxu0 %v10261_v55 }
 0xff7   : > { %5170 = vmatpush1.bf16.msra.mxu0 %v10268_v0 }
 0xff8   : > { %5171 = vmatprep.subr.bf16.mxu0 %v10271_v37 }
 0xffb   : > { %5172 = vmatpush1.bf16.msra.mxu0 %v10278_v31 }
 0xffc   : > { %5173 = vmatprep.subr.bf16.mxu0 %v10281_v11 }
 0xfff   : > { %5174 = vmatpush1.bf16.msra.mxu0 %v10288_v18 }
0x1000   : > { %5175 = vmatprep.subr.bf16.mxu0 %v10291_v39 }
0x1003   : > { %5176 = vmatpush1.bf16.msra.mxu0 %v10298_v28 }
0x1004   : > { %5177 = vmatprep.subr.bf16.mxu0 %v10301_v57 }
0x1007   : > { %5178 = vmatpush1.bf16.msra.mxu0 %v10308_v27 }
0x1008   : > { %6875 = vmatprep.subr.bf16.mxu0 %v11182_v60 }
0x109d   : > { %v4950_v3 = vpop.f32.mrb[72].mxu0  ;;  %v5045_v1 = vpop.f32.mrb[52].mxu1 }
0x109e   : > { %v4951_v2 = vadd.f32 %v10336_v6, %v4950_v3  ;;  %v6853_v33 = vpop.f32.mrb[73].mxu0  ;;  %v5047_v12 = vpop.f32.mrb[53].mxu1 }
0x109f   : > { %v4953_v29 = vpop.f32.mrb[74].mxu0  ;;  %v5049_v47 = vpop.f32.mrb[54].mxu1 }
0x10a0   : > { %4958 = vst [vmem:[#allocation4 + $0x40] sm:$0xff] %v4951_v2  ;;  %v4954_v48 = vadd.f32 %v10336_v6, %v4953_v29  ;;  %v6854_v9 = vpop.f32.mrb[75].mxu0  ;;  %v5051_v38 = vpop.f32.mrb[55].mxu1 }
0x10a1   : > { %v7026_v9 = vadd.f32 %v5051_v38, %v9897_v17 }
0x10a2   : > { %4959 = vst [vmem:[#allocation4 + $0x48] sm:$0xff] %v4954_v48  ;;  %v7024_v48 = vadd.f32 %v5047_v12, %v9897_v17 }
0x10bd   : > { %v5002_v26 = vpop.f32.mrb[52].mxu0 }
0x10be   : > { %v7019_v51 = vadd.f32 %v5002_v26, %v9886_v52  ;;  %v5004_v22 = vpop.f32.mrb[53].mxu0  ;;  %v7023_v26 = vadd.f32 %v5045_v1, %v9902_v35 }
0x10bf   : > { %v7020_v41 = vadd.f32 %v5004_v22, %v9890_v34  ;;  %v5006_v25 = vpop.f32.mrb[54].mxu0  ;;  %v6648_v22 = vmul.f32 -1.442695, %v7024_v48 }
0x10c0   : > { %v6644_v27 = vmul.f32 -1.442695, %v7019_v51  ;;  %v7021_v3 = vadd.f32 %v5006_v25, %v9886_v52  ;;  %v5008_v33 = vpop.f32.mrb[55].mxu0  ;;  %v7025_v51 = vadd.f32 %v5049_v47, %v9902_v35  ;;  %v6649_v25 = vmul.f32 -1.442695, %v7026_v9 }
0x10c1   : > { %v6646_v57 = vmul.f32 -1.442695, %v7020_v41  ;;  %v7022_v28 = vadd.f32 %v5008_v33, %v9890_v34 }
0x10c2   : > { %7920 = vpow2.f32 %v6644_v27  ;;  %v6645_v2 = vmul.f32 -1.442695, %v7021_v3 }
0x10c3   : > { %7922 = vpow2.f32 %v6646_v57  ;;  %v6647_v29 = vmul.f32 -1.442695, %v7022_v28 }
0x10c4   : > { %7924 = vpow2.f32 %v6645_v2 }
0x10c5   : > { %7926 = vpow2.f32 %v6647_v29 }
0x10c6   : > { %7928 = vtanh.f32 %v7023_v26 }
0x10c7   : > { %7930 = vtanh.f32 %v7025_v51 }
0x10c8   : > { %7932 = vpow2.f32 %v6648_v22 }
0x10c9   : > { %7934 = vpow2.f32 %v6649_v25 }
0x10cc   : > { %v7921_v41 = vpop.eup %7920 }
0x10cd   : > { %v7923_v33 = vpop.eup %7922  ;;  %v5068_v27 = vadd.f32 1.0, %v7921_v41 }
0x10ce   : > { %v7925_v57 = vpop.eup %7924  ;;  %v5080_v28 = vadd.f32 1.0, %v7923_v33 }
0x10cf   : > { %v7927_v3 = vpop.eup %7926  ;;  %7936 = vrcp.f32 %v5068_v27  ;;  %v5069_v12 = vadd.f32 1.0, %v7925_v57 }
0x10d0   : > { %7938 = vrcp.f32 %v5080_v28  ;;  %v5081_v38 = vadd.f32 1.0, %v7927_v3  ;;  %v7929_v1 = vpop.eup %7928 }
0x10d1   : > { %7940 = vrcp.f32 %v5069_v12  ;;  %v7931_v47 = vpop.eup %7930 }
0x10d2   : > { %7942 = vrcp.f32 %v5081_v38  ;;  %v7933_v2 = vpop.eup %7932 }
0x10d3   : > { %v7935_v29 = vpop.eup %7934  ;;  %v5094_v26 = vadd.f32 1.0, %v7933_v2 }
0x10d4   : > { %v5095_v33 = vadd.f32 1.0, %v7935_v29 }
0x10d5   : > { %7944 = vrcp.f32 %v5094_v26 }
0x10d9   : > { %v7937_v48 = vpop.eup %7936 }
0x10da   : > { %v7939_v9 = vpop.eup %7938  ;;  %v5102_v51 = vmul.f32 %v7937_v48, %v7929_v1 }
0x10db   : > { %v7941_v22 = vpop.eup %7940  ;;  %v5100_v41 = vmul.f32 %v7939_v9, %v10229_v10 }
0x10dc   : > { %v7943_v25 = vpop.eup %7942  ;;  %v5103_v39 = vmul.f32 %v7941_v22, %v7931_v47 }
0x10dd   : > { %v10349_v27 = vadd.f32 %v5102_v51, %v5100_v41  ;;  %v5101_v57 = vmul.f32 %v7943_v25, %v10232_v13 }
0x10df   : > { %7946 = vtanh.f32 %v10349_v27  ;;  %v10353_v28 = vadd.f32 %v5103_v39, %v5101_v57  ;;  %v7945_v3 = vpop.eup %7944 }
0x10e0   : > { %7948 = vrcp.f32 %v5095_v33 }
0x10e1   : > { %7950 = vtanh.f32 %v10353_v28 }
0x10e9   : > { %v7947_v12 = vpop.eup %7946 }
0x10ea   : > { %v7949_v38 = vpop.eup %7948  ;;  %v5108_v10 = vmul.f32 %v7947_v12, %v7945_v3 }
0x10eb   : > { %v7951_v1 = vpop.eup %7950 }
0x10ec   : > { %v5109_v2 = vmul.f32 %v7951_v1, %v7949_v38 }
0x10ee   : > { %v5110_v29 = vpack.c.bf16 %v5109_v2, %v5108_v10 }
0x10f0   : > { %6872 = vmatmul.mubr.bf16.vlgmr.msra.gmra.mrb[72].mxu1 %v5110_v29  ;;  %5196 = vmatmul.mubr.bf16.vlgmr.msra.gmra.mrb[56].mxu0 %v5110_v29 }
0x10f1   : > { %5207 = vmatpush1.bf16.msra.mxu1 %v10135_v59  ;;  %5238 = vmatprep.mubr.bf16.mxu1 %v11033_v24 }
0x10f2   : > { %5208 = vmatprep.subr.bf16.mxu1 %v10139_v45  ;;  %6876 = vmatpush3.bf16.msra.mxu0 %v10242_v36 }
0x10f3   : > { %6877 = vmatprep.subr.bf16.mxu0 %v11182_v60  ;;  %6891 = vmatprep.mubr.msk.bf16.mxu0 %vm8356_vm0, %v11182_v60 }
0x10f5   : > { %5209 = vmatpush1.bf16.msra.mxu1 %v10146_v5 }
0x10f6   : > { %5210 = vmatprep.subr.bf16.mxu1 %v10149_v54  ;;  %6878 = vmatpush3.bf16.msra.mxu0 %v10254_v40 }
0x10f7   : > { %6879 = vmatprep.subr.bf16.mxu0 %v11182_v60 }
0x10f9   : > { %5211 = vmatpush1.bf16.msra.mxu1 %v10154_v23 }
0x10fa   : > { %5212 = vmatprep.subr.bf16.mxu1 %v10157_v20  ;;  %6880 = vmatpush3.bf16.msra.mxu0 %v10264_v63 }
0x10fb   : > { %6881 = vmatprep.subr.bf16.mxu0 %v11182_v60 }
0x10fd   : > { %5213 = vmatpush1.bf16.msra.mxu1 %v10162_v15 }
0x10fe   : > { %5214 = vmatprep.subr.bf16.mxu1 %v10165_v32  ;;  %6882 = vmatpush3.bf16.msra.mxu0 %v10274_v14 }
0x10ff   : > { %6883 = vmatprep.subr.bf16.mxu0 %v11182_v60 }
0x1101   : > { %5215 = vmatpush1.bf16.msra.mxu1 %v10170_v21 }
0x1102   : > { %5216 = vmatprep.subr.bf16.mxu1 %v10173_v58  ;;  %6884 = vmatpush3.bf16.msra.mxu0 %v10284_v30 }
0x1103   : > { %6885 = vmatprep.subr.bf16.mxu0 %v11182_v60 }
0x1105   : > { %5217 = vmatpush1.bf16.msra.mxu1 %v10178_v44 }
0x1106   : > { %5218 = vmatprep.subr.bf16.mxu1 %v10181_v7  ;;  %6886 = vmatpush3.bf16.msra.mxu0 %v10294_v46 }
0x1107   : > { %6887 = vmatprep.subr.bf16.mxu0 %v11182_v60 }
0x1109   : > { %5219 = vmatpush1.bf16.msra.mxu1 %v10186_v4 }
0x110a   : > { %5220 = vmatprep.subr.bf16.mxu1 %v10189_v8  ;;  %6888 = vmatpush3.bf16.msra.mxu0 %v10304_v42 }
0x110b   : > { %6889 = vmatprep.subr.bf16.mxu0 %v11182_v60 }
0x110d   : > { %5221 = vmatpush1.bf16.msra.mxu1 %v10194_v43 }
0x110e   : > { %5401 = vmatprep.subr.bf16.mxu1 %v10097_v53  ;;  %6890 = vmatpush3.bf16.msra.mxu0 %v10312_v16 }
0x110f   : > { %5358 = vmatprep.subr.bf16.mxu0 %v10093_v61 }
0x1110   : > { %5239 = vmatmul.mubr.bf16.vlgmr.msra.gmra.mrb[56].mxu1 %v5110_v29 }
0x1111   : > { %5402 = vmatpush1.bf16.msra.mxu1 %v10135_v59  ;;  %5433 = vmatprep.mubr.bf16.mxu1 %v11033_v24 }
0x1112   : > { %5403 = vmatprep.subr.bf16.mxu1 %v10139_v45 }
0x1115   : > { %5404 = vmatpush1.bf16.msra.mxu1 %v10146_v5 }
0x1116   : > { %5405 = vmatprep.subr.bf16.mxu1 %v10149_v54 }
0x1119   : > { %5406 = vmatpush1.bf16.msra.mxu1 %v10154_v23 }
0x111a   : > { %5407 = vmatprep.subr.bf16.mxu1 %v10157_v20 }
0x111d   : > { %5408 = vmatpush1.bf16.msra.mxu1 %v10162_v15 }
0x111e   : > { %5409 = vmatprep.subr.bf16.mxu1 %v10165_v32 }
0x1121   : > { %5410 = vmatpush1.bf16.msra.mxu1 %v10170_v21 }
0x1122   : > { %5411 = vmatprep.subr.bf16.mxu1 %v10173_v58 }
0x1125   : > { %5412 = vmatpush1.bf16.msra.mxu1 %v10178_v44 }
0x1126   : > { %5413 = vmatprep.subr.bf16.mxu1 %v10181_v7 }
0x1129   : > { %5414 = vmatpush1.bf16.msra.mxu1 %v10186_v4 }
0x112a   : > { %5415 = vmatprep.subr.bf16.mxu1 %v10189_v8 }
0x112d   : > { %5416 = vmatpush1.bf16.msra.mxu1 %v10194_v43 }
0x112e   : > { %6895 = vmatprep.subr.bf16.mxu1 %v11182_v60 }
0x11c3   : > { %v5145_v61 = vpop.f32.mrb[72].mxu1  ;;  %v5197_v53 = vpop.f32.mrb[56].mxu0 }
0x11c4   : > { %v5146_v59 = vadd.f32 %v10336_v6, %v5145_v61  ;;  %v6873_v45 = vpop.f32.mrb[73].mxu1  ;;  %v5199_v5 = vpop.f32.mrb[57].mxu0  ;;  %v7027_v21 = vadd.f32 %v5197_v53, %v9886_v52 }
0x11c5   : > { %v5148_v54 = vpop.f32.mrb[74].mxu1  ;;  %v5201_v23 = vpop.f32.mrb[58].mxu0  ;;  %v7028_v58 = vadd.f32 %v5199_v5, %v9890_v34 }
0x11c6   : > { %5153 = vst [vmem:[#allocation4 + $0x50] sm:$0xff] %v5146_v59  ;;  %v5149_v20 = vadd.f32 %v10336_v6, %v5148_v54  ;;  %v6874_v15 = vpop.f32.mrb[75].mxu1  ;;  %v5203_v32 = vpop.f32.mrb[59].mxu0  ;;  %v6650_v7 = vmul.f32 -1.442695, %v7027_v21  ;;  %v7029_v4 = vadd.f32 %v5201_v23, %v9886_v52 }
0x11c7   : > { %v7030_v44 = vadd.f32 %v5203_v32, %v9890_v34  ;;  %v6652_v8 = vmul.f32 -1.442695, %v7028_v58 }
0x11c8   : > { %5154 = vst [vmem:[#allocation4 + $0x58] sm:$0xff] %v5149_v20  ;;  %7952 = vpow2.f32 %v6650_v7  ;;  %v6651_v13 = vmul.f32 -1.442695, %v7029_v4 }
0x11c9   : > { %v6653_v43 = vmul.f32 -1.442695, %v7030_v44  ;;  %7954 = vpow2.f32 %v6652_v8 }
0x11cb   : > { %7956 = vpow2.f32 %v6653_v43 }
0x11cc   : > { %7958 = vpow2.f32 %v6651_v13 }
0x11d2   : > { %v7953_v39 = vpop.eup %7952 }
0x11d3   : > { %v7955_v47 = vpop.eup %7954  ;;  %v5263_v9 = vadd.f32 1.0, %v7953_v39 }
0x11d4   : > { %v5275_v51 = vadd.f32 1.0, %v7955_v47 }
0x11d5   : > { %v7957_v48 = vpop.eup %7956  ;;  %7960 = vrcp.f32 %v5263_v9 }
0x11d6   : > { %v7959_v26 = vpop.eup %7958  ;;  %v5276_v22 = vadd.f32 1.0, %v7957_v48  ;;  %7962 = vrcp.f32 %v5275_v51 }
0x11d7   : > { %v5264_v41 = vadd.f32 1.0, %v7959_v26 }
0x11d8   : > { %7964 = vrcp.f32 %v5276_v22 }
0x11df   : > { %v7961_v61 = vpop.eup %7960 }
0x11e0   : > { %v7963_v53 = vpop.eup %7962 }
0x11e1   : > { %v5295_v54 = vmul.f32 %v7963_v53, %v10349_v27 }
0x11e2   : > { %v7965_v59 = vpop.eup %7964 }
0x11e3   : > { %v5240_v25 = vpop.f32.mrb[56].mxu1  ;;  %v5296_v32 = vmul.f32 %v7965_v59, %v10353_v28 }
0x11e4   : > { %v7031_v33 = vadd.f32 %v5240_v25, %v9902_v35  ;;  %v5242_v57 = vpop.f32.mrb[57].mxu1 }
0x11e5   : > { %v7032_v3 = vadd.f32 %v5242_v57, %v9897_v17  ;;  %v5244_v12 = vpop.f32.mrb[58].mxu1 }
0x11e6   : > { %7966 = vtanh.f32 %v7031_v33  ;;  %v7033_v38 = vadd.f32 %v5244_v12, %v9902_v35  ;;  %v5246_v1 = vpop.f32.mrb[59].mxu1 }
0x11e7   : > { %7968 = vrcp.f32 %v5264_v41  ;;  %v6654_v10 = vmul.f32 -1.442695, %v7032_v3  ;;  %v7034_v2 = vadd.f32 %v5246_v1, %v9897_v17 }
0x11e8   : > { %7970 = vtanh.f32 %v7033_v38 }
0x11e9   : > { %7972 = vpow2.f32 %v6654_v10  ;;  %v6655_v29 = vmul.f32 -1.442695, %v7034_v2 }
0x11eb   : > { %7974 = vpow2.f32 %v6655_v29 }
0x11f0   : > { %v7967_v45 = vpop.eup %7966 }
0x11f1   : > { %v7969_v5 = vpop.eup %7968  ;;  %v5297_v23 = vmul.f32 %v7967_v45, %v7961_v61 }
0x11f2   : > { %v7971_v20 = vpop.eup %7970 }
0x11f3   : > { %v7973_v15 = vpop.eup %7972  ;;  %v10420_v21 = vadd.f32 %v5297_v23, %v5295_v54  ;;  %v5298_v58 = vmul.f32 %v7971_v20, %v7969_v5 }
0x11f4   : > { %v5289_v44 = vadd.f32 1.0, %v7973_v15 }
0x11f5   : > { %v7975_v7 = vpop.eup %7974  ;;  %7976 = vtanh.f32 %v10420_v21  ;;  %v10423_v4 = vadd.f32 %v5298_v58, %v5296_v32 }
0x11f6   : > { %7978 = vrcp.f32 %v5289_v44  ;;  %v5290_v8 = vadd.f32 1.0, %v7975_v7 }
0x11f7   : > { %7980 = vtanh.f32 %v10423_v4 }
0x11f8   : > { %7982 = vrcp.f32 %v5290_v8 }
0x11ff   : > { %v7977_v27 = vpop.eup %7976 }
0x1200   : > { %v7979_v43 = vpop.eup %7978 }
0x1201   : > { %v7981_v13 = vpop.eup %7980  ;;  %v5303_v47 = vmul.f32 %v7979_v43, %v7977_v27 }
0x1202   : > { %v7983_v39 = vpop.eup %7982 }
0x1203   : > { %v5304_v28 = vmul.f32 %v7983_v39, %v7981_v13 }
0x1205   : > { %v5305_v48 = vpack.c.bf16 %v5304_v28, %v5303_v47 }
0x1207   : > { %6892 = vmatmul.mubr.bf16.vlgmr.msra.gmra.mrb[76].mxu0 %v5305_v48  ;;  %5434 = vmatmul.mubr.bf16.vlgmr.msra.gmra.mrb[60].mxu1 %v5305_v48 }
0x1208   : > { %5359 = vmatpush1.bf16.msra.mxu0 %v10235_v19  ;;  %5390 = vmatprep.mubr.bf16.mxu0 %v11033_v24  ;;  %v11193_v24 = vld [vmem:[#allocation46_spill] sm:$0xff]  ;;  %v11194_v19 = vld [vmem:[#allocation47_spill] sm:$0xff] }
0x1209   : > { %5360 = vmatprep.subr.bf16.mxu0 %v10239_v49  ;;  %6896 = vmatpush3.bf16.msra.mxu1 %v10242_v36  ;;  %v11195_v49 = vld [vmem:[#allocation48_spill] sm:$0xff]  ;;  %v11196_v36 = vld [vmem:[#allocation49_spill] sm:$0xff] }
0x120a   : > { %6897 = vmatprep.subr.bf16.mxu1 %v11182_v60  ;;  %6911 = vmatprep.mubr.msk.bf16.mxu1 %vm8356_vm0, %v11182_v60 }
0x120c   : > { %5361 = vmatpush1.bf16.msra.mxu0 %v10248_v50 }
0x120d   : > { %5362 = vmatprep.subr.bf16.mxu0 %v10251_v62  ;;  %6898 = vmatpush3.bf16.msra.mxu1 %v10254_v40 }
0x120e   : > { %6899 = vmatprep.subr.bf16.mxu1 %v11182_v60 }
0x1210   : > { %5363 = vmatpush1.bf16.msra.mxu0 %v10258_v56 }
0x1211   : > { %5364 = vmatprep.subr.bf16.mxu0 %v10261_v55  ;;  %6900 = vmatpush3.bf16.msra.mxu1 %v10264_v63 }
0x1212   : > { %6901 = vmatprep.subr.bf16.mxu1 %v11182_v60 }
0x1214   : > { %5365 = vmatpush1.bf16.msra.mxu0 %v10268_v0 }
0x1215   : > { %5366 = vmatprep.subr.bf16.mxu0 %v10271_v37  ;;  %6902 = vmatpush3.bf16.msra.mxu1 %v10274_v14 }
0x1216   : > { %6903 = vmatprep.subr.bf16.mxu1 %v11182_v60 }
0x1218   : > { %5367 = vmatpush1.bf16.msra.mxu0 %v10278_v31 }
0x1219   : > { %5368 = vmatprep.subr.bf16.mxu0 %v10281_v11  ;;  %6904 = vmatpush3.bf16.msra.mxu1 %v10284_v30 }
0x121a   : > { %6905 = vmatprep.subr.bf16.mxu1 %v11182_v60 }
0x121c   : > { %5369 = vmatpush1.bf16.msra.mxu0 %v10288_v18 }
0x121d   : > { %5370 = vmatprep.subr.bf16.mxu0 %v11193_v24  ;;  %6906 = vmatpush3.bf16.msra.mxu1 %v10294_v46  ;;  %v5591_v24 = vld [vmem:[#allocation4 + $0x11] sm:$0x1] }
0x121e   : > { %6907 = vmatprep.subr.bf16.mxu1 %v11182_v60 }
0x1220   : > { %5371 = vmatpush1.bf16.msra.mxu0 %v11194_v19  ;;  %v5623_v19 = vld [vmem:[#allocation4 + $0x12] sm:$0x1] }
0x1221   : > { %5372 = vmatprep.subr.bf16.mxu0 %v11195_v49  ;;  %6908 = vmatpush3.bf16.msra.mxu1 %v10304_v42  ;;  %v5655_v49 = vld [vmem:[#allocation4 + $0x13] sm:$0x1] }
0x1222   : > { %6909 = vmatprep.subr.bf16.mxu1 %v11182_v60 }
0x1224   : > { %5373 = vmatpush1.bf16.msra.mxu0 %v11196_v36  ;;  %v5687_v36 = vld [vmem:[#allocation4 + $0x14] sm:$0x1] }
0x1225   : > { %6910 = vmatpush3.bf16.msra.mxu1 %v10312_v16 }
0x1227   : > { %5391 = vmatmul.mubr.bf16.vlgmr.msra.gmra.mrb[60].mxu0 %v5305_v48 }
0x12da   : > { %v5340_v50 = vpop.f32.mrb[76].mxu0  ;;  %v5435_v62 = vpop.f32.mrb[60].mxu1 }
0x12db   : > { %v5341_v40 = vadd.f32 %v10336_v6, %v5340_v50  ;;  %v6893_v56 = vpop.f32.mrb[77].mxu0  ;;  %v5437_v55 = vpop.f32.mrb[61].mxu1  ;;  %v7039_v33 = vadd.f32 %v5435_v62, %v9902_v35  ;;  %v5719_v50 = vld [vmem:[#allocation4 + $0x15] sm:$0x1]  ;;  %v5751_v62 = vld [vmem:[#allocation4 + $0x16] sm:$0x1] }
0x12dc   : > { %v5343_v63 = vpop.f32.mrb[78].mxu0  ;;  %v5439_v0 = vpop.f32.mrb[62].mxu1  ;;  %v7040_v41 = vadd.f32 %v5437_v55, %v9897_v17  ;;  %v10478_v56 = vld [vmem:[#allocation4 + $0x18] sm:$0x1]  ;;  %v10480_v55 = vld [vmem:[#allocation4 + $0x19] sm:$0x1] }
0x12dd   : > { %5348 = vst [vmem:[#allocation4 + $0x60] sm:$0xff] %v5341_v40  ;;  %v5344_v37 = vadd.f32 %v10336_v6, %v5343_v63  ;;  %v6894_v14 = vpop.f32.mrb[79].mxu0  ;;  %v5441_v31 = vpop.f32.mrb[63].mxu1  ;;  %v7041_v57 = vadd.f32 %v5439_v0, %v9902_v35  ;;  %v10476_v40 = vld [vmem:[#allocation4 + $0x17] sm:$0x1]  ;;  %v5606_v0 = vrot.slane %v5591_v24, 7 }
0x12de   : > { %v7042_v25 = vadd.f32 %v5441_v31, %v9897_v17  ;;  %v6660_v3 = vmul.f32 -1.442695, %v7040_v41  ;;  %v5670_v14 = vrot.slane %v5655_v49, 7  ;;  %v5702_v31 = vrot.slane %v5687_v36, 7  ;;  %v10497_v41 = vld [vmem:[#allocation4 + $0x21] sm:$0x1] }
0x12df   : > { %5349 = vst [vmem:[#allocation4 + $0x68] sm:$0xff] %v5344_v37  ;;  %v5638_v37 = vrot.slane %v5623_v19, 7  ;;  %v10524_v24 = vld [vmem:[#allocation4 + $0x2a] sm:$0x1]  ;;  %v10526_v19 = vld [vmem:[#allocation4 + $0x2b] sm:$0x1] }
0x12e0   : > { %v10528_v49 = vld [vmem:[#allocation4 + $0x2c] sm:$0x1] }
0x12fa   : > { %v5392_v60 = vpop.f32.mrb[60].mxu0 }
0x12fb   : > { %v7035_v11 = vadd.f32 %v5392_v60, %v9886_v52  ;;  %v5394_v30 = vpop.f32.mrb[61].mxu0  ;;  %v5734_v60 = vrot.slane %v5719_v50, 7 }
0x12fc   : > { %v7036_v18 = vadd.f32 %v5394_v30, %v9890_v34  ;;  %v5396_v46 = vpop.f32.mrb[62].mxu0  ;;  %v5798_v30 = vrot.slane %v10476_v40, 7 }
0x12fd   : > { %v6656_v42 = vmul.f32 -1.442695, %v7035_v11  ;;  %v7037_v16 = vadd.f32 %v5396_v46, %v9886_v52  ;;  %v5398_v9 = vpop.f32.mrb[63].mxu0  ;;  %v6661_v52 = vmul.f32 -1.442695, %v7042_v25  ;;  %v5766_v11 = vrot.slane %v5751_v62, 7 }
0x12fe   : > { %v6658_v26 = vmul.f32 -1.442695, %v7036_v18  ;;  %v7038_v51 = vadd.f32 %v5398_v9, %v9890_v34  ;;  %v5879_v18 = vld [vmem:[#allocation4 + $0x1a] sm:$0x1]  ;;  %v5830_v46 = vrot.slane %v10478_v56, 7 }
0x12ff   : > { %7984 = vpow2.f32 %v6656_v42  ;;  %v6657_v22 = vmul.f32 -1.442695, %v7037_v16  ;;  %v5862_v42 = vrot.slane %v10480_v55, 7  ;;  %v10485_v16 = vld [vmem:[#allocation4 + $0x1b] sm:$0x1] }
0x1300   : > { %7986 = vpow2.f32 %v6658_v26  ;;  %v6659_v6 = vmul.f32 -1.442695, %v7038_v51  ;;  %v10487_v9 = vld [vmem:[#allocation4 + $0x1c] sm:$0x1]  ;;  %v10489_v26 = vld [vmem:[#allocation4 + $0x1d] sm:$0x1] }
0x1301   : > { %7988 = vpow2.f32 %v6657_v22  ;;  %v10491_v51 = vld [vmem:[#allocation4 + $0x1e] sm:$0x1]  ;;  %v10493_v22 = vld [vmem:[#allocation4 + $0x1f] sm:$0x1]  ;;  %v10499_v25 = vld [vmem:[#allocation4 + $0x22] sm:$0x1] }
0x1302   : > { %7990 = vpow2.f32 %v6659_v6  ;;  %v10495_v6 = vld [vmem:[#allocation4 + $0x20] sm:$0x1]  ;;  %v10534_v56 = vld [vmem:[#allocation4 + $0x2d] sm:$0x1]  ;;  %v10536_v55 = vld [vmem:[#allocation4 + $0x2e] sm:$0x1] }
0x1303   : > { %7992 = vtanh.f32 %v7039_v33  ;;  %v5894_v33 = vrot.slane %v5879_v18, 7 }
0x1304   : > { %7994 = vtanh.f32 %v7041_v57  ;;  %v5926_v57 = vrot.slane %v10485_v16, 7 }
0x1305   : > { %7996 = vpow2.f32 %v6660_v3  ;;  %v10502_v3 = vld [vmem:[#allocation4 + $0x23] sm:$0x1] }
0x1306   : > { %7998 = vpow2.f32 %v6661_v52  ;;  %v10504_v52 = vld [vmem:[#allocation4 + $0x24] sm:$0x1] }
0x1309   : > { %v7985_v12 = vpop.eup %7984 }
0x130a   : > { %v7987_v34 = vpop.eup %7986  ;;  %v5458_v38 = vadd.f32 1.0, %v7985_v12  ;;  %v5551_v12 = vld [vmem:[#allocation4] sm:$0x1] }
0x130b   : > { %v7989_v1 = vpop.eup %7988  ;;  %v5470_v10 = vadd.f32 1.0, %v7987_v34  ;;  %v5590_v34 = vld [vmem:[#allocation4 + $0x1] sm:$0x1] }
0x130c   : > { %v7991_v2 = vpop.eup %7990  ;;  %8000 = vrcp.f32 %v5458_v38  ;;  %v5459_v29 = vadd.f32 1.0, %v7989_v1  ;;  %v5622_v38 = vld [vmem:[#allocation4 + $0x2] sm:$0x1]  ;;  %v5958_v1 = vrot.slane %v10487_v9, 7  ;;  %v6038_v9 = vld [vmem:[#allocation4 + $0xf] sm:$0x1] }
0x130d   : > { %8002 = vrcp.f32 %v5470_v10  ;;  %v5471_v17 = vadd.f32 1.0, %v7991_v2  ;;  %v7993_v61 = vpop.eup %7992  ;;  %v5990_v10 = vrot.slane %v10489_v26, 7  ;;  %v6022_v2 = vrot.slane %v10491_v51, 7 }
0x130e   : > { %8004 = vrcp.f32 %v5459_v29  ;;  %v7995_v35 = vpop.eup %7994  ;;  %v6054_v29 = vrot.slane %v10493_v22, 7  ;;  %v5928_v26 = vrot.slane %v10526_v19, 6  ;;  %v5960_v51 = vrot.slane %v10528_v49, 6  ;;  %v5785_v22 = vld [vmem:[#allocation4 + $0x37] sm:$0x1] }
0x130f   : > { %8006 = vrcp.f32 %v5471_v17  ;;  %v7997_v53 = vpop.eup %7996  ;;  %v5654_v17 = vld [vmem:[#allocation4 + $0x3] sm:$0x1] }
0x1310   : > { %v7999_v59 = vpop.eup %7998  ;;  %v5484_v54 = vadd.f32 1.0, %v7997_v53  ;;  %v5750_v53 = vld [vmem:[#allocation4 + $0x6] sm:$0x1] }
0x1311   : > { %v5485_v58 = vadd.f32 1.0, %v7999_v59  ;;  %v5570_v59 = vrot.slane %v10495_v6, 6  ;;  %v5992_v6 = vrot.slane %v10534_v56, 6 }
0x1312   : > { %8008 = vrcp.f32 %v5484_v54  ;;  %v5782_v54 = vld [vmem:[#allocation4 + $0x7] sm:$0x1] }
0x1313   : > { %v5799_v36 = vsel %vm5568_vm1, %v5798_v30, %v5782_v54 }
0x1316   : > { %v8001_v45 = vpop.eup %8000 }
0x1317   : > { %v8003_v5 = vpop.eup %8002  ;;  %v5492_v23 = vmul.f32 %v8001_v45, %v7993_v61  ;;  %v5686_v61 = vld [vmem:[#allocation4 + $0x4] sm:$0x1]  ;;  %v5608_v45 = vrot.slane %v10497_v41, 6  ;;  %v6024_v41 = vrot.slane %v10536_v55, 6 }
0x1318   : > { %v8005_v20 = vpop.eup %8004  ;;  %v5490_v15 = vmul.f32 %v8003_v5, %v10420_v21  ;;  %v5640_v5 = vrot.slane %v10499_v25, 6 }
0x1319   : > { %v8007_v32 = vpop.eup %8006  ;;  %v5493_v44 = vmul.f32 %v8005_v20, %v7995_v35  ;;  %v5718_v35 = vld [vmem:[#allocation4 + $0x5] sm:$0x1]  ;;  %v5846_v20 = vld [vmem:[#allocation4 + $0x9] sm:$0x1] }
0x131a   : > { %v5494_v7 = vadd.f32 %v5492_v23, %v5490_v15  ;;  %v5491_v8 = vmul.f32 %v8007_v32, %v10423_v4  ;;  %v5552_v4 = vld [vmem:[#allocation4 + $0x10] sm:$0x1]  ;;  %v5814_v23 = vld [vmem:[#allocation4 + $0x8] sm:$0x1]  ;;  %v5878_v15 = vld [vmem:[#allocation4 + $0xa] sm:$0x1]  ;;  %v5863_v62 = vsel %vm5568_vm1, %v5862_v42, %v5846_v20 }
0x131b   : > { %v5567_v63 = vrot.slane %v5552_v4, 7  ;;  %v5672_v32 = vrot.slane %v10502_v3, 6  ;;  %v5767_v4 = vsel %vm5568_vm1, %v5766_v11, %v5750_v53  ;;  %v5831_v50 = vsel %vm5568_vm1, %v5830_v46, %v5814_v23  ;;  %v5721_v23 = vld [vmem:[#allocation4 + $0x35] sm:$0x1] }
0x131c   : > { %8010 = vtanh.f32 %v5494_v7  ;;  %6664 = vst [vmem:[%s9724_s21 + $0x10] sm:$0xff] %v5494_v7  ;;  %v5495_v27 = vadd.f32 %v5493_v44, %v5491_v8  ;;  %v8009_v43 = vpop.eup %8008  ;;  %v5720_v44 = vld [vmem:[#allocation4 + $0x25] sm:$0x1]  ;;  %v5752_v7 = vld [vmem:[#allocation4 + $0x26] sm:$0x1]  ;;  %v5895_v40 = vsel %vm5568_vm1, %v5894_v33, %v5878_v15  ;;  %v5896_v42 = vrot.slane %v10524_v24, 6 }
0x131d   : > { %8012 = vrcp.f32 %v5485_v58  ;;  %v5704_v58 = vrot.slane %v10504_v52, 6  ;;  %v5569_v8 = vsel %vm5568_vm1, %v5567_v63, %v5551_v12  ;;  %v10538_v63 = vld [vmem:[#allocation4 + $0x2f] sm:$0x1]  ;;  %v5768_v11 = vrot.slane %v5752_v7, 6  ;;  %v5554_v33 = vld [vmem:[#allocation4 + $0x30] sm:$0x1] }
0x131e   : > { %8014 = vtanh.f32 %v5495_v27  ;;  %6665 = vst [vmem:[%s9724_s21 + $0x18] sm:$0xff] %v5495_v27  ;;  %v5607_v27 = vsel %vm5568_vm1, %v5606_v0, %v5590_v34  ;;  %v5910_v0 = vld [vmem:[#allocation4 + $0xb] sm:$0x1]  ;;  %v6056_v25 = vrot.slane %v10538_v63, 6  ;;  %v5572_v53 = vsel %vm5571_vm2, %v5570_v59, %v5569_v8  ;;  %v5881_v8 = vld [vmem:[#allocation4 + $0x3a] sm:$0x1] }
0x131f   : > { %v5927_v3 = vsel %vm5568_vm1, %v5926_v57, %v5910_v0  ;;  %v5609_v54 = vsel %vm5571_vm2, %v5608_v45, %v5607_v27  ;;  %v5689_v57 = vld [vmem:[#allocation4 + $0x34] sm:$0x1]  ;;  %v5769_v15 = vsel %vm5571_vm2, %v5768_v11, %v5767_v4  ;;  %v5573_v7 = vrot.slane %v5554_v33, 5  ;;  %v5913_v27 = vld [vmem:[#allocation4 + $0x3b] sm:$0x1] }
0x1320   : > { %v5897_v24 = vsel %vm5571_vm2, %v5896_v42, %v5895_v40  ;;  %v5898_v19 = vrot.slane %v5881_v8, 5  ;;  %v5930_v49 = vrot.slane %v5913_v27, 5  ;;  %v5929_v56 = vsel %vm5571_vm2, %v5928_v26, %v5927_v3  ;;  %v5978_v8 = vld [vmem:[#allocation4 + $0x4d] sm:$0x1]  ;;  %v6010_v27 = vld [vmem:[#allocation4 + $0x4e] sm:$0x1] }
0x1326   : > { %v8011_v13 = vpop.eup %8010 }
0x1327   : > { %v8013_v39 = vpop.eup %8012  ;;  %v5498_v21 = vmul.f32 %v8011_v13, %v8009_v43  ;;  %v5639_v43 = vsel %vm5568_vm1, %v5638_v37, %v5622_v38  ;;  %v5784_v13 = vld [vmem:[#allocation4 + $0x27] sm:$0x1]  ;;  %v5942_v37 = vld [vmem:[#allocation4 + $0xc] sm:$0x1]  ;;  %v5593_v38 = vld [vmem:[#allocation4 + $0x31] sm:$0x1] }
0x1328   : > { %v8015_v47 = vpop.eup %8014  ;;  %v5800_v18 = vrot.slane %v5784_v13, 6  ;;  %v5959_v52 = vsel %vm5568_vm1, %v5958_v1, %v5942_v37  ;;  %v5641_v16 = vsel %vm5571_vm2, %v5640_v5, %v5639_v43  ;;  %v5753_v1 = vld [vmem:[#allocation4 + $0x36] sm:$0x1]  ;;  %v5610_v5 = vrot.slane %v5593_v38, 5  ;;  %v6041_v37 = vld [vmem:[#allocation4 + $0x3f] sm:$0x1] }
0x1329   : > { %v5499_v28 = vmul.f32 %v8015_v47, %v8013_v39  ;;  %6662 = vst [vmem:[%s9730_s23 + $0x10] sm:$0xff] %v5498_v21  ;;  %v5816_v39 = vld [vmem:[#allocation4 + $0x28] sm:$0x1]  ;;  %v5671_v47 = vsel %vm5568_vm1, %v5670_v14, %v5654_v17  ;;  %v5974_v14 = vld [vmem:[#allocation4 + $0xd] sm:$0x1]  ;;  %v5961_v55 = vsel %vm5571_vm2, %v5960_v51, %v5959_v52  ;;  %v6058_v3 = vrot.slane %v6041_v37, 5 }
0x132a   : > { %v5832_v30 = vrot.slane %v5816_v39, 6  ;;  %v5991_v12 = vsel %vm5568_vm1, %v5990_v10, %v5974_v14  ;;  %v5625_v17 = vld [vmem:[#allocation4 + $0x32] sm:$0x1]  ;;  %v5673_v10 = vsel %vm5571_vm2, %v5672_v32, %v5671_v47  ;;  %v5801_v59 = vsel %vm5571_vm2, %v5800_v18, %v5799_v36  ;;  %v5977_v36 = vld [vmem:[#allocation4 + $0x3d] sm:$0x1] }
0x132b   : > { %v5500_v48 = vpack.c.bf16 %v5499_v28, %v5498_v21  ;;  %6663 = vst [vmem:[%s9730_s23 + $0x18] sm:$0xff] %v5499_v28  ;;  %v10518_v21 = vld [vmem:[#allocation4 + $0x29] sm:$0x1]  ;;  %v5703_v28 = vsel %vm5568_vm1, %v5702_v31, %v5686_v61  ;;  %v6006_v31 = vld [vmem:[#allocation4 + $0xe] sm:$0x1]  ;;  %v5642_v43 = vrot.slane %v5625_v17, 5  ;;  %v5993_v63 = vsel %vm5571_vm2, %v5992_v6, %v5991_v12 }
0x132c   : > { %v5864_v46 = vrot.slane %v10518_v21, 6  ;;  %v6023_v34 = vsel %vm5568_vm1, %v6022_v2, %v6006_v31  ;;  %v5657_v61 = vld [vmem:[#allocation4 + $0x33] sm:$0x1]  ;;  %v5705_v2 = vsel %vm5571_vm2, %v5704_v58, %v5703_v28  ;;  %v5833_v45 = vsel %vm5571_vm2, %v5832_v30, %v5831_v50  ;;  %v6009_v50 = vld [vmem:[#allocation4 + $0x3e] sm:$0x1] }
0x132d   : > { %6912 = vmatmul.mubr.bf16.vlgmr.msra.gmra.mrb[76].mxu1 %v5500_v48  ;;  %v5735_v48 = vsel %vm5568_vm1, %v5734_v60, %v5718_v35  ;;  %v5736_v60 = vrot.slane %v5720_v44, 6  ;;  %v6055_v35 = vsel %vm5568_vm1, %v6054_v29, %v6038_v9  ;;  %v5817_v44 = vld [vmem:[#allocation4 + $0x38] sm:$0x1]  ;;  %v5849_v29 = vld [vmem:[#allocation4 + $0x39] sm:$0x1]  ;;  %v5674_v13 = vrot.slane %v5657_v61, 5 }
0x132e   : > { %v5706_v32 = vrot.slane %v5689_v57, 5  ;;  %v5738_v39 = vrot.slane %v5721_v23, 5  ;;  %v5770_v58 = vrot.slane %v5753_v1, 5  ;;  %v5802_v21 = vrot.slane %v5785_v22, 5  ;;  %v5555_v14 = vld [vmem:[#allocation4 + $0x40] sm:$0x1] }
0x132f   : > { %v5737_v20 = vsel %vm5571_vm2, %v5736_v60, %v5735_v48  ;;  %v5834_v47 = vrot.slane %v5817_v44, 5  ;;  %v5866_v28 = vrot.slane %v5849_v29, 5  ;;  %v5945_v48 = vld [vmem:[#allocation4 + $0x3c] sm:$0x1]  ;;  %v5865_v4 = vsel %vm5571_vm2, %v5864_v46, %v5863_v62  ;;  %v5594_v31 = vld [vmem:[#allocation4 + $0x41] sm:$0x1] }
0x1330   : > { %v6025_v0 = vsel %vm5571_vm2, %v6024_v41, %v6023_v34  ;;  %v6057_v60 = vsel %vm5571_vm2, %v6056_v25, %v6055_v35  ;;  %v5575_v62 = vsel %vm5574_vm3, %v5573_v7, %v5572_v53  ;;  %v5611_v40 = vsel %vm5574_vm3, %v5610_v5, %v5609_v54  ;;  %v5626_v18 = vld [vmem:[#allocation4 + $0x42] sm:$0x1]  ;;  %v5658_v30 = vld [vmem:[#allocation4 + $0x43] sm:$0x1]  ;;  %v5690_v9 = vld [vmem:[#allocation4 + $0x44] sm:$0x1] }
0x1331   : > { %v5643_v11 = vsel %vm5574_vm3, %v5642_v43, %v5641_v16  ;;  %v5675_v46 = vsel %vm5574_vm3, %v5674_v13, %v5673_v10  ;;  %v5707_v42 = vsel %vm5574_vm3, %v5706_v32, %v5705_v2  ;;  %v5962_v26 = vrot.slane %v5945_v48, 5  ;;  %v5722_v6 = vld [vmem:[#allocation4 + $0x45] sm:$0x1]  ;;  %v5754_v41 = vld [vmem:[#allocation4 + $0x46] sm:$0x1] }
0x1332   : > { %v5994_v51 = vrot.slane %v5977_v36, 5  ;;  %v6026_v33 = vrot.slane %v6009_v50, 5  ;;  %v5576_v25 = vrot.slane %v5555_v14, 4  ;;  %v5612_v52 = vrot.slane %v5594_v31, 4  ;;  %v5786_v17 = vld [vmem:[#allocation4 + $0x47] sm:$0x1] }
0x1333   : > { %v5644_v12 = vrot.slane %v5626_v18, 4  ;;  %v5676_v34 = vrot.slane %v5658_v30, 4  ;;  %v5708_v38 = vrot.slane %v5690_v9, 4  ;;  %v5739_v61 = vsel %vm5574_vm3, %v5738_v39, %v5737_v20  ;;  %v5818_v16 = vld [vmem:[#allocation4 + $0x48] sm:$0x1] }
0x1334   : > { %v5771_v35 = vsel %vm5574_vm3, %v5770_v58, %v5769_v15  ;;  %v5740_v53 = vrot.slane %v5722_v6, 4  ;;  %v5772_v54 = vrot.slane %v5754_v41, 4  ;;  %v5850_v57 = vld [vmem:[#allocation4 + $0x49] sm:$0x1]  ;;  %v5803_v23 = vsel %vm5574_vm3, %v5802_v21, %v5801_v59  ;;  %v5882_v22 = vld [vmem:[#allocation4 + $0x4a] sm:$0x1] }
0x1335   : > { %v5835_v1 = vsel %vm5574_vm3, %v5834_v47, %v5833_v45  ;;  %v5867_v10 = vsel %vm5574_vm3, %v5866_v28, %v5865_v4  ;;  %v5899_v2 = vsel %vm5574_vm3, %v5898_v19, %v5897_v24  ;;  %v5914_v44 = vld [vmem:[#allocation4 + $0x4b] sm:$0x1]  ;;  %v5946_v29 = vld [vmem:[#allocation4 + $0x4c] sm:$0x1]  ;;  %v5931_v7 = vsel %vm5574_vm3, %v5930_v49, %v5929_v56  ;;  %v6042_v59 = vld [vmem:[#allocation4 + $0x4f] sm:$0x1] }
0x1336   : > { %v5963_v20 = vsel %vm5574_vm3, %v5962_v26, %v5961_v55  ;;  %v5995_v15 = vsel %vm5574_vm3, %v5994_v51, %v5993_v63  ;;  %v6027_v5 = vsel %vm5574_vm3, %v6026_v33, %v6025_v0  ;;  %v6059_v45 = vsel %vm5574_vm3, %v6058_v3, %v6057_v60  ;;  %v5556_v39 = vld [vmem:[#allocation4 + $0x50] sm:$0x1]  ;;  %v5595_v58 = vld [vmem:[#allocation4 + $0x51] sm:$0x1]  ;;  %v5627_v21 = vld [vmem:[#allocation4 + $0x52] sm:$0x1] }
0x1337   : > { %v5578_v43 = vsel %vm5577_vm4, %v5576_v25, %v5575_v62  ;;  %v5613_v13 = vsel %vm5577_vm4, %v5612_v52, %v5611_v40  ;;  %v5645_v32 = vsel %vm5577_vm4, %v5644_v12, %v5643_v11  ;;  %v5804_v47 = vrot.slane %v5786_v17, 4  ;;  %v5659_v0 = vld [vmem:[#allocation4 + $0x53] sm:$0x1]  ;;  %v5691_v62 = vld [vmem:[#allocation4 + $0x54] sm:$0x1] }
0x1338   : > { %v5836_v28 = vrot.slane %v5818_v16, 4  ;;  %v5868_v48 = vrot.slane %v5850_v57, 4  ;;  %v5900_v4 = vrot.slane %v5882_v22, 4  ;;  %v5932_v24 = vrot.slane %v5914_v44, 4  ;;  %v5723_v40 = vld [vmem:[#allocation4 + $0x55] sm:$0x1] }
0x1339   : > { %v5964_v19 = vrot.slane %v5946_v29, 4  ;;  %v5996_v49 = vrot.slane %v5978_v8, 4  ;;  %v6028_v36 = vrot.slane %v6010_v27, 4  ;;  %v6060_v50 = vrot.slane %v6042_v59, 4  ;;  %v5755_v11 = vld [vmem:[#allocation4 + $0x56] sm:$0x1] }
0x133a   : > { %v5579_v56 = vrot.slane %v5556_v39, 3  ;;  %v5614_v55 = vrot.slane %v5595_v58, 3  ;;  %v5646_v63 = vrot.slane %v5627_v21, 3  ;;  %v5677_v37 = vsel %vm5577_vm4, %v5676_v34, %v5675_v46  ;;  %v5787_v51 = vld [vmem:[#allocation4 + $0x57] sm:$0x1] }
0x133b   : > { %v5709_v14 = vsel %vm5577_vm4, %v5708_v38, %v5707_v42  ;;  %v5741_v31 = vsel %vm5577_vm4, %v5740_v53, %v5739_v61  ;;  %v5773_v60 = vsel %vm5577_vm4, %v5772_v54, %v5771_v35  ;;  %v5805_v18 = vsel %vm5577_vm4, %v5804_v47, %v5803_v23  ;;  %v5819_v46 = vld [vmem:[#allocation4 + $0x58] sm:$0x1]  ;;  %v5851_v6 = vld [vmem:[#allocation4 + $0x59] sm:$0x1]  ;;  %v5883_v25 = vld [vmem:[#allocation4 + $0x5a] sm:$0x1] }
0x133c   : > { %v5837_v30 = vsel %vm5577_vm4, %v5836_v28, %v5835_v1  ;;  %v5869_v9 = vsel %vm5577_vm4, %v5868_v48, %v5867_v10  ;;  %v10599_v26 = vsel %vm5577_vm4, %v5900_v4, %v5899_v2  ;;  %v5933_v42 = vsel %vm5577_vm4, %v5932_v24, %v5931_v7  ;;  %v5915_v52 = vld [vmem:[#allocation4 + $0x5b] sm:$0x1]  ;;  %v5947_v12 = vld [vmem:[#allocation4 + $0x5c] sm:$0x1]  ;;  %v5979_v61 = vld [vmem:[#allocation4 + $0x5d] sm:$0x1] }
0x133d   : > { %v10603_v41 = vsel %vm5577_vm4, %v5964_v19, %v5963_v20  ;;  %v10606_v33 = vsel %vm5577_vm4, %v5996_v49, %v5995_v15  ;;  %v10609_v3 = vsel %vm5577_vm4, %v6028_v36, %v6027_v5  ;;  %v10612_v34 = vsel %vm5577_vm4, %v6060_v50, %v6059_v45  ;;  %v6011_v57 = vld [vmem:[#allocation4 + $0x5e] sm:$0x1]  ;;  %v5557_v22 = vld [vmem:[#allocation4 + $0x60] sm:$0x1]  ;;  %v5596_v15 = vld [vmem:[#allocation4 + $0x61] sm:$0x1] }
0x133e   : > { %v5678_v38 = vrot.slane %v5659_v0, 3  ;;  %v5710_v17 = vrot.slane %v5691_v62, 3  ;;  %v5742_v35 = vrot.slane %v5723_v40, 3  ;;  %v5774_v53 = vrot.slane %v5755_v11, 3  ;;  %v5628_v5 = vld [vmem:[#allocation4 + $0x62] sm:$0x1] }
0x133f   : > { %v5806_v54 = vrot.slane %v5787_v51, 3  ;;  %v5838_v16 = vrot.slane %v5819_v46, 3  ;;  %v5870_v23 = vrot.slane %v5851_v6, 3  ;;  %v5902_v1 = vrot.slane %v5883_v25, 3  ;;  %v5660_v39 = vld [vmem:[#allocation4 + $0x63] sm:$0x1] }
0x1340   : > { %v5934_v10 = vrot.slane %v5915_v52, 3  ;;  %v5966_v2 = vrot.slane %v5947_v12, 3  ;;  %v5581_v44 = vsel %vm5580_vm5, %v5579_v56, %v5578_v43  ;;  %v5615_v29 = vsel %vm5580_vm5, %v5614_v55, %v5613_v13  ;;  %v5692_v58 = vld [vmem:[#allocation4 + $0x64] sm:$0x1]  ;;  %v8153_v21 = vld [vmem:[%s11184_s16] ss:$0 sm:$0xff] }
0x1341   : > { %v5647_v7 = vsel %vm5580_vm5, %v5646_v63, %v5645_v32  ;;  %v5998_v20 = vrot.slane %v5979_v61, 3  ;;  %v5679_v27 = vsel %vm5580_vm5, %v5678_v38, %v5677_v37  ;;  %v5711_v59 = vsel %vm5580_vm5, %v5710_v17, %v5709_v14  ;;  %v10625_v48 = vld [vmem:[#allocation4 + $0x5f] sm:$0x1]  ;;  %v5724_v24 = vld [vmem:[#allocation4 + $0x65] sm:$0x1] }
0x1342   : > { %v6030_v45 = vrot.slane %v6011_v57, 3  ;;  %v5743_v13 = vsel %vm5580_vm5, %v5742_v35, %v5741_v31  ;;  %v5775_v32 = vsel %vm5580_vm5, %v5774_v53, %v5773_v60  ;;  %v5807_v28 = vsel %vm5580_vm5, %v5806_v54, %v5805_v18  ;;  %v5756_v19 = vld [vmem:[#allocation4 + $0x66] sm:$0x1]  ;;  %v5788_v55 = vld [vmem:[#allocation4 + $0x67] sm:$0x1] }
0x1343   : > { %v5582_v4 = vrot.slane %v5557_v22, 2  ;;  %v5839_v36 = vsel %vm5580_vm5, %v5838_v16, %v5837_v30  ;;  %v5871_v50 = vsel %vm5580_vm5, %v5870_v23, %v5869_v9  ;;  %v5616_v56 = vrot.slane %v5596_v15, 2  ;;  %v5820_v63 = vld [vmem:[#allocation4 + $0x68] sm:$0x1]  ;;  %v5852_v30 = vld [vmem:[#allocation4 + $0x69] sm:$0x1] }
0x1344   : > { %v5648_v14 = vrot.slane %v5628_v5, 2  ;;  %v5680_v31 = vrot.slane %v5660_v39, 2  ;;  %v5712_v60 = vrot.slane %v5692_v58, 2  ;;  %v5903_v62 = vsel %vm5580_vm5, %v5902_v1, %v10599_v26  ;;  %v5884_v9 = vld [vmem:[#allocation4 + $0x6a] sm:$0x1] }
0x1345   : > { %v5935_v40 = vsel %vm5580_vm5, %v5934_v10, %v5933_v42  ;;  %v5744_v11 = vrot.slane %v5724_v24, 2  ;;  %v5776_v18 = vrot.slane %v5756_v19, 2  ;;  %v10635_v51 = vsel %vm5580_vm5, %v5966_v2, %v10603_v41  ;;  %v5916_v52 = vld [vmem:[#allocation4 + $0x6b] sm:$0x1]  ;;  %v10641_v12 = vld [vmem:[#allocation4 + $0x6c] sm:$0x1] }
0x1346   : > { %v10639_v46 = vsel %vm5580_vm5, %v5998_v20, %v10606_v33  ;;  %v5808_v6 = vrot.slane %v5788_v55, 2  ;;  %v5840_v25 = vrot.slane %v5820_v63, 2  ;;  %v10645_v26 = vsel %vm5580_vm5, %v6030_v45, %v10609_v3  ;;  %v10652_v53 = vld [vmem:[#allocation4 + $0x6d] sm:$0x1]  ;;  %v10656_v57 = vld [vmem:[#allocation4 + $0x6e] sm:$0x1] }
0x1347   : > { %v6062_v42 = vrot.slane %v10625_v48, 3  ;;  %v5584_v38 = vsel %vm5583_vm6, %v5582_v4, %v5581_v44  ;;  %v5617_v41 = vsel %vm5583_vm6, %v5616_v56, %v5615_v29  ;;  %v5649_v17 = vsel %vm5583_vm6, %v5648_v14, %v5647_v7  ;;  %v10662_v22 = vld [vmem:[#allocation4 + $0x6f] sm:$0x1] }
0x1348   : > { %v5681_v33 = vsel %vm5583_vm6, %v5680_v31, %v5679_v27  ;;  %v5872_v61 = vrot.slane %v5852_v30, 2  ;;  %v5904_v35 = vrot.slane %v5884_v9, 2  ;;  %v5713_v54 = vsel %vm5583_vm6, %v5712_v60, %v5711_v59 }
0x1349   : > { %v5936_v16 = vrot.slane %v5916_v52, 2  ;;  %v5968_v3 = vrot.slane %v10641_v12, 2  ;;  %v5745_v23 = vsel %vm5583_vm6, %v5744_v11, %v5743_v13  ;;  %v5777_v1 = vsel %vm5583_vm6, %v5776_v18, %v5775_v32 }
0x134a   : > { %v5809_v10 = vsel %vm5583_vm6, %v5808_v6, %v5807_v28  ;;  %v5841_v2 = vsel %vm5583_vm6, %v5840_v25, %v5839_v36  ;;  %v6000_v20 = vrot.slane %v10652_v53, 2  ;;  %v5873_v59 = vsel %vm5583_vm6, %v5872_v61, %v5871_v50 }
0x134b   : > { %v5905_v45 = vsel %vm5583_vm6, %v5904_v35, %v5903_v62  ;;  %v6032_v39 = vrot.slane %v10656_v57, 2  ;;  %v5937_v55 = vsel %vm5583_vm6, %v5936_v16, %v5935_v40  ;;  %v6064_v63 = vrot.slane %v10662_v22, 2 }
0x1400   : > { %v5535_v8 = vpop.f32.mrb[76].mxu1 }
0x1401   : > { %v5536_v43 = vadd.f32 %v8153_v21, %v5535_v8  ;;  %v6913_v47 = vpop.f32.mrb[77].mxu1 }
0x1402   : > { %v5538_v49 = vpop.f32.mrb[78].mxu1 }
0x1403   : > { %5543 = vst [vmem:[#allocation4 + $0x70] sm:$0xff] %v5536_v43  ;;  %v5539_v0 = vadd.f32 %v8153_v21, %v5538_v49  ;;  %v6914_v37 = vpop.f32.mrb[79].mxu1 }
0x1405   : > { %5544 = vst [vmem:[#allocation4 + $0x78] sm:$0xff] %v5539_v0 }
0x140a   : > { %v5558_v44 = vld [vmem:[#allocation4 + $0x70] sm:$0x1]  ;;  %v5597_v29 = vld [vmem:[#allocation4 + $0x71] sm:$0x1]  ;;  %v5629_v7 = vld [vmem:[#allocation4 + $0x72] sm:$0x1] }
0x140b   : > { %v5585_v15 = vrot.slane %v5558_v44, 1  ;;  %v5618_v5 = vrot.slane %v5597_v29, 1  ;;  %v5650_v8 = vrot.slane %v5629_v7, 1  ;;  %v5661_v27 = vld [vmem:[#allocation4 + $0x73] sm:$0x1] }
0x140c   : > { %v5682_v58 = vrot.slane %v5661_v27, 1  ;;  %v5693_v21 = vld [vmem:[#allocation4 + $0x74] sm:$0x1]  ;;  %v5725_v43 = vld [vmem:[#allocation4 + $0x75] sm:$0x1] }
0x140d   : > { %v5587_v47 = vsel %vm5586_vm7, %v5585_v15, %v5584_v38  ;;  %v5619_v13 = vsel %vm5586_vm7, %v5618_v5, %v5617_v41  ;;  %v5651_v32 = vsel %vm5586_vm7, %v5650_v8, %v5649_v17  ;;  %v5714_v28 = vrot.slane %v5693_v21, 1  ;;  %v5757_v4 = vld [vmem:[#allocation4 + $0x76] sm:$0x1]  ;;  %v5789_v24 = vld [vmem:[#allocation4 + $0x77] sm:$0x1] }
0x140e   : > { %5589 = vst [vmem:[%s10673_s15] sm:$0xff] %v5587_v47  ;;  %5621 = vst [vmem:[%s10673_s15 + $0x8] sm:$0xff] %v5619_v13  ;;  %v5683_v19 = vsel %vm5586_vm7, %v5682_v58, %v5681_v33  ;;  %v5746_v49 = vrot.slane %v5725_v43, 1  ;;  %v5778_v36 = vrot.slane %v5757_v4, 1  ;;  %v5810_v50 = vrot.slane %v5789_v24, 1  ;;  %v5821_v56 = vld [vmem:[#allocation4 + $0x78] sm:$0x1] }
0x140f   : > { %5653 = vst [vmem:[%s10673_s15 + $0x10] sm:$0xff] %v5651_v32  ;;  %5685 = vst [vmem:[%s10673_s15 + $0x18] sm:$0xff] %v5683_v19  ;;  %v5715_v0 = vsel %vm5586_vm7, %v5714_v28, %v5713_v54  ;;  %v5842_v37 = vrot.slane %v5821_v56, 1  ;;  %v5853_v14 = vld [vmem:[#allocation4 + $0x79] sm:$0x1]  ;;  %v5969_v38 = vsel %vm5583_vm6, %v5968_v3, %v10635_v51  ;;  %v6001_v41 = vsel %vm5583_vm6, %v6000_v20, %v10639_v46 }
0x1410   : > { %v5885_v31 = vld [vmem:[#allocation4 + $0x7a] sm:$0x1]  ;;  %5717 = vst [vmem:[%s10673_s15 + $0x20] sm:$0xff] %v5715_v0  ;;  %v5747_v60 = vsel %vm5586_vm7, %v5746_v49, %v5745_v23  ;;  %v5779_v62 = vsel %vm5586_vm7, %v5778_v36, %v5777_v1  ;;  %v5811_v11 = vsel %vm5586_vm7, %v5810_v50, %v5809_v10  ;;  %v5874_v40 = vrot.slane %v5853_v14, 1  ;;  %v5917_v18 = vld [vmem:[#allocation4 + $0x7b] sm:$0x1] }
0x1411   : > { %v5949_v30 = vld [vmem:[#allocation4 + $0x7c] sm:$0x1]  ;;  %5749 = vst [vmem:[%s10673_s15 + $0x28] sm:$0xff] %v5747_v60  ;;  %5781 = vst [vmem:[%s10673_s15 + $0x30] sm:$0xff] %v5779_v62  ;;  %v5843_v9 = vsel %vm5586_vm7, %v5842_v37, %v5841_v2  ;;  %v5906_v6 = vrot.slane %v5885_v31, 1  ;;  %v5938_v25 = vrot.slane %v5917_v18, 1  ;;  %v6063_v46 = vsel %vm5580_vm5, %v6062_v42, %v10612_v34 }
0x1412   : > { %5813 = vst [vmem:[%s10673_s15 + $0x38] sm:$0xff] %v5811_v11  ;;  %v5970_v52 = vrot.slane %v5949_v30, 1  ;;  %v5981_v12 = vld [vmem:[#allocation4 + $0x7d] sm:$0x1]  ;;  %5845 = vst [vmem:[%s10673_s15 + $0x40] sm:$0xff] %v5843_v9  ;;  %v5875_v17 = vsel %vm5586_vm7, %v5874_v40, %v5873_v59  ;;  %v6033_v3 = vsel %vm5583_vm6, %v6032_v39, %v10645_v26  ;;  %v6065_v34 = vsel %vm5583_vm6, %v6064_v63, %v6063_v46 }
0x1413   : > { %v6002_v33 = vrot.slane %v5981_v12, 1  ;;  %v6013_v61 = vld [vmem:[#allocation4 + $0x7e] sm:$0x1]  ;;  %v6045_v35 = vld [vmem:[#allocation4 + $0x7f] sm:$0x1]  ;;  %5877 = vst [vmem:[%s10673_s15 + $0x48] sm:$0xff] %v5875_v17  ;;  %v5907_v53 = vsel %vm5586_vm7, %v5906_v6, %v5905_v45  ;;  %v5939_v54 = vsel %vm5586_vm7, %v5938_v25, %v5937_v55 }
0x1414   : > { %v5971_v51 = vsel %vm5586_vm7, %v5970_v52, %v5969_v38  ;;  %v6034_v16 = vrot.slane %v6013_v61, 1  ;;  %5909 = vst [vmem:[%s10673_s15 + $0x50] sm:$0xff] %v5907_v53  ;;  %5941 = vst [vmem:[%s10673_s15 + $0x58] sm:$0xff] %v5939_v54  ;;  %v6066_v23 = vrot.slane %v6045_v35, 1 }
0x1415   : > { %5973 = vst [vmem:[%s10673_s15 + $0x60] sm:$0xff] %v5971_v51  ;;  %v6003_v57 = vsel %vm5586_vm7, %v6002_v33, %v6001_v41 }
0x1416   : > { %6005 = vst [vmem:[%s10673_s15 + $0x68] sm:$0xff] %v6003_v57  ;;  %v6035_v48 = vsel %vm5586_vm7, %v6034_v16, %v6033_v3  ;;  %v6067_v26 = vsel %vm5586_vm7, %v6066_v23, %v6065_v34 }
0x1417   : > { %6037 = vst [vmem:[%s10673_s15 + $0x70] sm:$0xff] %v6035_v48  ;;  %6069 = vst [vmem:[%s10673_s15 + $0x78] sm:$0xff] %v6067_v26 }
0x1418   : > { %8279 = shalt.err (!%p8276_p4)
}
0x1419   : > { %s8280_s15 = scalar_lea.hbm %s10718_s25, 2048  ;;  %s8284_s13 = scalar_lea.hbm %s11198_s14, 4096 }
0x141a   : > { %p8281_p7 = scmp.ne.s32.totalorder %s10718_s25, %s8280_s15  ;;  %p8285_p13 = scmp.lt.u32.totalorder %s10718_s25, %s11198_s14 }
0x141b   : > { %p8286_p1 = scmp.lt.u32.totalorder %s8284_s13, %s8280_s15  ;;  %p8288_p10 = scmp.lt.u32.totalorder %s8280_s15, %s10718_s25 }
0x141c   : > { %p8282_p8 = pnand %p8281_p7, %p11199_p6 }
0x141d   : > { %p8287_p3 = por %p8286_p1, %p8285_p13 }
0x141e   : > { %p8283_p9 = pneg %p8282_p8 }
0x141f   : > { %p8289_p2 = por %p8288_p10, %p8287_p3 }
0x1421   : > { %p8290_p0 = pnand %p8289_p2, %p8283_p9 }
0x1423   : > { %8293 = shalt.err (!%p8290_p0)
}
0x1424   : > { %s8358_s12 = smov 128   ;;  %s8359_s22 = smov 8  }
0x1425   : > { %7187 = dma.vmem_to_hbm [thread:$0]  (%p11199_p6), %s10720_s11, 2048, %s10718_s25, %s6071_s8, %s8358_s12, %s8358_s12, %s8359_s22  }
0x1426   : > { %s10754_s24 = scalar_lea.sflag [#allocation18], %s6075_s10 }
0x1427   : > { %s6681_s15 = sshll.u32 %s8465_s29, 8  ;;  %s6126_s17 = sshll.u32 %s9730_s23, 4  ;;  %s6127_s17 = int_to_ptr.vmem [resolvable:$true] %s6126_s17 }
0x1428   : > { %s11200_s20 = sld [smem:[#allocation64_spill]]  ;;  %s8360_s11 = smov 256  }
0x1429   : > { %7188 = sst [smem:[#allocation21]] (%p11199_p6), %s8360_s11  ;;  %s8361_s10 = smov 512  }
0x142a   : > { %7189 = sst [smem:[#allocation21 + $0x1]] (%p11199_p6), %s8361_s10  ;;  %s8362_s25 = smov 2  }
0x142b   : > { %7190 = sst [smem:[#allocation21 + $0x2]] (%p11199_p6), %s8362_s25  ;;  %s8363_s8 = smov 128  }
0x142c   : > { %7191 = sst [smem:[#allocation21 + $0x3]] (%p11199_p6), %s8363_s8  ;;  %s8364_s29 = smov 8  }
0x142d   : > { %7192 = sst [smem:[#allocation21 + $0x4]] (%p11199_p6), %s8363_s8  ;;  %s8365_s23 = smov [#allocation20]  }
0x142e   : > { %s6109_s18 = scalar_lea.hbm %s11200_s20, %s6681_s15  ;;  %7193 = sst [smem:[#allocation21 + $0x5]] (%p11199_p6), %s8364_s29 }
0x142f   : > { %s8366_s12 = smov 0  }
0x1430   : > { %7194 = dma.general (%p11199_p6), %s6127_s17, 512, %s6109_s18, %s10754_s24, %s8365_s23, [#allocation21], %s8366_s12, 0  }
0x1431   : > { %s11201_s19 = sld [smem:[#allocation65_spill]]  ;;  %s6171_s11 = sshll.u32 %s9724_s21, 4  ;;  %s6172_s11 = int_to_ptr.vmem [resolvable:$true] %s6171_s11 }
0x1432   : > { %s8367_s10 = smov 256   ;;  %s8368_s25 = smov 512  }
0x1433   : > { %7195 = sst [smem:[#allocation23]] (%p11199_p6), %s8367_s10  ;;  %s8369_s17 = smov 2  }
0x1434   : > { %7196 = sst [smem:[#allocation23 + $0x1]] (%p11199_p6), %s8368_s25  ;;  %s8370_s18 = smov 128  }
0x1435   : > { %7197 = sst [smem:[#allocation23 + $0x2]] (%p11199_p6), %s8369_s17  ;;  %s8371_s8 = smov 8  }
0x1436   : > { %7198 = sst [smem:[#allocation23 + $0x3]] (%p11199_p6), %s8370_s18  ;;  %s8373_s21 = smov 0  }
0x1437   : > { %s6154_s20 = scalar_lea.hbm %s11201_s19, %s6681_s15  ;;  %7199 = sst [smem:[#allocation23 + $0x4]] (%p11199_p6), %s8370_s18 }
0x1438   : > { %7200 = sst [smem:[#allocation23 + $0x5]] (%p11199_p6), %s8371_s8  ;;  %s8372_s15 = smov [#allocation22]  }
0x1439   : > { %7201 = dma.general (%p11199_p6), %s6172_s11, 512, %s6154_s20, %s10754_s24, %s8372_s15, [#allocation23], %s8373_s21, 0  }
0x143a PF: > { %s11202_s29 = sld [smem:[#allocation29_spill]]  ;;  %s11203_s23 = sld [smem:[#allocation33_spill]] }
0x1440   : > { %s6199_s12 = sand.u32 1, %s11202_s29   ;;  %p11204_p12 = scmp.ne.s32.totalorder %s11203_s23, 0 }
0x1441   : > { %s6200_s22 = scalar_lea.sflag [#allocation10], %s6199_s12 }
0x1442   : > { %p7219_p11 = pnand %p6396_p5, %p11204_p12 }
0x1444   : > { %8323 = dma.done.wait (!%p7219_p11), %s6200_s22, 2048  }
0x1445   : > { %8325 = vsyncadd (!%p7219_p11), %s6200_s22, 4294965248  ;;  %s11205_s13 = sadd.s32 4294967294, %s8344_s28  }
0x1446   : > { %s6208_s19 = sand.u32 1, %s11205_s13  }
0x1447   : > { %s6209_s10 = scalar_lea.sflag [#allocation18], %s6208_s19 }
0x1448   : > { %8327 = dma.done.wait (!%p7219_p11), %s6209_s10, 1024  }
0x1449   : > { %8329 = vsyncadd (!%p7219_p11), %s6209_s10, 4294966272  ;;  %s11206_s28 = sld [smem:[#allocation30_spill]]  ;;  %s11207_s30 = sld [smem:[#allocation31_spill]] }
0x144a   : > { %s11208_s25 = smov %s8336_s26  ;;  %s11209_s26 = smov %s8340_s27 }
0x144f   : > { %p30_p6 = scmp.ge.s32.totalorder %s11206_s28, 4   ;;  %s11210_s27 = smov %s11207_s30 }
0x1451   :  { %32 = sbr.rel (!%p30_p6) target bundleno = 14 (0xe), region = 321 }
0x1458   :  { %6223 = vsyncpa [#allocation9], 1 }
0x1459   :  { %6225 = vsyncpa [#allocation9 + $0x1], 1 }
0x145a   :  { %6226 = vsyncpa [#allocation12], 1 }
0x145b   :  { %6227 = vsyncpa [#allocation15], 1 }
0x145c   :  { %6228 = vsyncpa [#allocation10], 1 }
0x145d   :  { %6230 = vsyncpa [#allocation10 + $0x1], 1 }
0x145e   :  { %6231 = vsyncpa [#allocation18], 1 }
0x145f   :  { %6233 = vsyncpa [#allocation18 + $0x1], 1 }

</bundles_post_ra>
